<compile_context>
chip_gen: v7x
topology: tpu7x:2x2x1
jax: 0.10.0
libtpu: 0.0.40
codegen_flags: <defaults>
</compile_context>

<pallas_src>
import functools

import jax
import jax.numpy as jnp
from jax.experimental import pallas as pl
from jax.experimental.pallas import tpu as pltpu


def _resblock_kernel(x_ref, w1_ref, sb1_ref, w2_ref, sb2_ref, o_ref,
                     pad_ref, col_ref, *, H, W, C, Nb):
    """Processes Nb images per grid step.

    x_ref  : (Nb, H, W, C)      unpadded input block (NHWC, f32)
    w*_ref : (9*C, C)           im2col-folded conv weights (compute dtype)
    sb*_ref: (2, C)             row0 = folded BN scale, row1 = folded BN bias (f32)
    o_ref  : (Nb, H, W, C)      output block (f32)
    pad_ref: (Nb, H+2, W+2, C)  padded-activation VMEM scratch (f32)
    col_ref: (Nb*H*W, 9*C)      im2col patch-matrix VMEM scratch (f32)
    """
    M = Nb * H * W

    # Zero only the 1-pixel border strips; the interior is fully overwritten every
    # step, so the full-buffer re-zero of the old version is unnecessary.
    zrow = jnp.zeros((Nb, 1, W + 2, C), jnp.float32)
    pad_ref[:, 0:1, :, :] = zrow
    pad_ref[:, H + 1:H + 2, :, :] = zrow
    zcol = jnp.zeros((Nb, H + 2, 1, C), jnp.float32)
    pad_ref[:, :, 0:1, :] = zcol
    pad_ref[:, :, W + 1:W + 2, :] = zcol

    # Stage the unpadded input into the interior of the padded scratch
    # (replaces the host-side jnp.pad -> saves a full HBM round trip of the input).
    pad_ref[:, 1:1 + H, 1:1 + W, :] = x_ref[...]

    def conv_bn(w_ref, sb_ref):
        # im2col: write the 9 shifted taps into one (M, 9*C) patch matrix, then do a
        # single MXU matmul with K = 9*C -- tap accumulation happens inside the MXU.
        k = 0
        for dh in range(3):
            for dw in range(3):
                col_ref[:, k * C:(k + 1) * C] = (
                    pad_ref[:, dh:dh + H, dw:dw + W, :].reshape(M, C))
                k += 1
        acc = jnp.dot(col_ref[...].astype(w_ref.dtype), w_ref[...],
                      preferred_element_type=jnp.float32)
        return acc * sb_ref[0:1, :] + sb_ref[1:2, :]        # folded BN (scale, bias)

    # conv1 -> bn1 -> relu, written straight back into the padded scratch so the
    # same zero-bordered buffer feeds conv2 (no extra temporaries kept live).
    out1 = jnp.maximum(conv_bn(w1_ref, sb1_ref), 0.0)
    pad_ref[:, 1:1 + H, 1:1 + W, :] = out1.reshape(Nb, H, W, C)

    # conv2 -> bn2 -> +identity -> relu.
    out2 = conv_bn(w2_ref, sb2_ref)
    identity = x_ref[...].reshape(M, C)
    o_ref[...] = jnp.maximum(out2 + identity, 0.0).reshape(Nb, H, W, C)


def _pick_batch_block(N, H, W, C):
    """Images per grid step: enough matmul rows (Nb*H*W) to amortize the ~0.35us
    per-step pipeline overhead, capped by a conservative VMEM budget (v7x has only
    64 MiB/TC).  Returns a divisor of N so every block is full."""
    bytes_per_image = 4 * (2 * 2 * H * W * C          # double-buffered input + output
                           + (H + 2) * (W + 2) * C    # padded scratch
                           + 9 * H * W * C)           # im2col scratch
    vmem_cap = max(1, (24 * 1024 * 1024) // max(bytes_per_image, 1))
    want = max(1, -(-4096 // (H * W)))                # target ~4096 rows per step
    cap = max(1, min(N, vmem_cap, want))
    nb = 1
    for cand in range(1, cap + 1):
        if N % cand == 0:
            nb = cand
    return nb


def resblock_pallas(x_nhwc, w1_hwio, sb1, w2_hwio, sb2, *, compute_dtype=jnp.float32):
    N, H, W, C = x_nhwc.shape
    nb = _pick_batch_block(N, H, W, C)

    # Fold each (3,3,Cin,Cout) HWIO weight into the (9*C, C) im2col matrix; the row
    # order (dh*3 + dw)*C + ci matches the order the kernel writes taps.
    w1m = w1_hwio.reshape(9 * C, C).astype(compute_dtype)
    w2m = w2_hwio.reshape(9 * C, C).astype(compute_dtype)
    sb1 = sb1.astype(jnp.float32)
    sb2 = sb2.astype(jnp.float32)
    x_nhwc = x_nhwc.astype(jnp.float32)

    kernel = functools.partial(_resblock_kernel, H=H, W=W, C=C, Nb=nb)
    return pl.pallas_call(
        kernel,
        out_shape=jax.ShapeDtypeStruct((N, H, W, C), jnp.float32),
        grid_spec=pltpu.PrefetchScalarGridSpec(
            num_scalar_prefetch=0,
            grid=(N // nb,),
            in_specs=[
                pl.BlockSpec((nb, H, W, C), lambda n: (n, 0, 0, 0)),
                pl.BlockSpec((9 * C, C), lambda n: (0, 0)),
                pl.BlockSpec((2, C), lambda n: (0, 0)),
                pl.BlockSpec((9 * C, C), lambda n: (0, 0)),
                pl.BlockSpec((2, C), lambda n: (0, 0)),
            ],
            out_specs=pl.BlockSpec((nb, H, W, C), lambda n: (n, 0, 0, 0)),
            scratch_shapes=[
                pltpu.VMEM((nb, H + 2, W + 2, C), jnp.float32),   # padded activation
                pltpu.VMEM((nb * H * W, 9 * C), jnp.float32),     # im2col patches
            ],
        ),
        compiler_params=pltpu.CompilerParams(
            dimension_semantics=("parallel",),
            vmem_limit_bytes=64 * 1024 * 1024,   # fits v7x's 64 MiB physical VMEM
        ),
    )(x_nhwc, w1m, sb1, w2m, sb2)


# ------------------------- pure-JAX reference (for checking) -------------------------
def resblock_ref(x, w1, cb1, g1, be1, m1, v1, w2, cb2, g2, be2, m2, v2, eps=1e-5):
    def conv(x_, w_, b_):
        y = jax.lax.conv_general_dilated(
            x_, w_, window_strides=(1, 1), padding=((1, 1), (1, 1)),
            dimension_numbers=("NHWC", "HWIO", "NHWC"))
        return y + b_

    def bn(x_, g_, be_, m_, v_):
        return (x_ - m_) * (g_ / jnp.sqrt(v_ + eps)) + be_

    out = jax.nn.relu(bn(conv(x, w1, cb1), g1, be1, m1, v1))
    out = bn(conv(out, w2, cb2), g2, be2, m2, v2)
    return jax.nn.relu(out + x)


if __name__ == "__main__":
    N, C, H, W = 2, 4, 16, 16
    eps = 1e-5

    key = jax.random.PRNGKey(0)
    keys = jax.random.split(key, 13)

    # Input in PyTorch's NCHW convention, converted to NHWC for the kernel.
    x_nchw = jax.random.normal(keys[0], (N, C, H, W), jnp.float32)
    x = jnp.transpose(x_nchw, (0, 2, 3, 1))  # NHWC

    # conv1 / bn1 parameters
    w1 = 0.2 * jax.random.normal(keys[1], (3, 3, C, C), jnp.float32)   # HWIO
    cb1 = 0.1 * jax.random.normal(keys[2], (C,), jnp.float32)
    g1 = 1.0 + 0.1 * jax.random.normal(keys[3], (C,), jnp.float32)
    be1 = 0.1 * jax.random.normal(keys[4], (C,), jnp.float32)
    m1 = 0.1 * jax.random.normal(keys[5], (C,), jnp.float32)
    v1 = 0.5 + jnp.abs(jax.random.normal(keys[6], (C,), jnp.float32))

    # conv2 / bn2 parameters
    w2 = 0.2 * jax.random.normal(keys[7], (3, 3, C, C), jnp.float32)
    cb2 = 0.1 * jax.random.normal(keys[8], (C,), jnp.float32)
    g2 = 1.0 + 0.1 * jax.random.normal(keys[9], (C,), jnp.float32)
    be2 = 0.1 * jax.random.normal(keys[10], (C,), jnp.float32)
    m2 = 0.1 * jax.random.normal(keys[11], (C,), jnp.float32)
    v2 = 0.5 + jnp.abs(jax.random.normal(keys[12], (C,), jnp.float32))

    # Fold conv bias + eval-mode BatchNorm into per-channel scale / bias.
    s1 = g1 / jnp.sqrt(v1 + eps)
    sb1 = jnp.stack([s1, be1 + s1 * (cb1 - m1)])      # (2, C)
    s2 = g2 / jnp.sqrt(v2 + eps)
    sb2 = jnp.stack([s2, be2 + s2 * (cb2 - m2)])      # (2, C)

    ref = resblock_ref(x, w1, cb1, g1, be1, m1, v1, w2, cb2, g2, be2, m2, v2, eps)

    # Exact (f32) path: strict check against the reference.
    out = resblock_pallas(x, w1, sb1, w2, sb2, compute_dtype=jnp.float32)
    out = jax.block_until_ready(out)
    err = float(jnp.max(jnp.abs(out - ref)))
    assert err < 2e-4, f"f32 max abs err {err}"

    # bf16-matmul path (f32 MXU accumulation): looser tolerance for the cast error.
    out_bf16 = resblock_pallas(x, w1, sb1, w2, sb2, compute_dtype=jnp.bfloat16)
    out_bf16 = jax.block_until_ready(out_bf16)
    err_bf16 = float(jnp.max(jnp.abs(out_bf16 - ref)))
    assert err_bf16 < 0.25, f"bf16 max abs err {err_bf16}"

    print("KERNEL_OK")
</pallas_src>

<mosaic_0001>
module attributes {stable_mosaic.version = 11 : i64} {
  func.func @_resblock_kernel(%arg0: i32, %arg1: memref<2x16x16x4xf32, #tpu.memory_space<vmem>>, %arg2: memref<36x4xf32, #tpu.memory_space<vmem>>, %arg3: memref<2x4xf32, #tpu.memory_space<vmem>>, %arg4: memref<36x4xf32, #tpu.memory_space<vmem>>, %arg5: memref<2x4xf32, #tpu.memory_space<vmem>>, %arg6: memref<2x16x16x4xf32, #tpu.memory_space<vmem>>, %arg7: memref<2x18x18x4xf32, #tpu.memory_space<vmem>>, %arg8: memref<512x36xf32, #tpu.memory_space<vmem>>) attributes {dimension_semantics = [#tpu.dimension_semantics<parallel>], iteration_bounds = array<i64: 1>, scalar_prefetch = 0 : i64, scratch_operands = 2 : i64, tpu.core_type = #tpu.core_type<tc>, window_params = [{transform_indices = @transform_0, window_bounds = array<i64: 2, 16, 16, 4>}, {pipeline_mode = #tpu.pipeline_mode<synchronous>, transform_indices = @transform_1, window_bounds = array<i64: 36, 4>}, {pipeline_mode = #tpu.pipeline_mode<synchronous>, transform_indices = @transform_2, window_bounds = array<i64: 2, 4>}, {pipeline_mode = #tpu.pipeline_mode<synchronous>, transform_indices = @transform_3, window_bounds = array<i64: 36, 4>}, {pipeline_mode = #tpu.pipeline_mode<synchronous>, transform_indices = @transform_4, window_bounds = array<i64: 2, 4>}, {transform_indices = @transform_5, window_bounds = array<i64: 2, 16, 16, 4>}]} {
    %cst = arith.constant 0.000000e+00 : f32
    %0 = vector.broadcast %cst : f32 to vector<2x1x18x4xf32>
    %c0 = arith.constant 0 : index
    %c0_0 = arith.constant 0 : index
    %c0_1 = arith.constant 0 : index
    %c0_2 = arith.constant 0 : index
    %1 = vector.load %arg7[%c0, %c0_0, %c0_1, %c0_2] : memref<2x18x18x4xf32, #tpu.memory_space<vmem>>, vector<2x1x18x4xf32>
    tpu.vector_store %arg7[%c0, %c0_0, %c0_1, %c0_2], %0 {strides = array<i32>} : memref<2x18x18x4xf32, #tpu.memory_space<vmem>>, vector<2x1x18x4xf32>,
    %c0_3 = arith.constant 0 : index
    %c17 = arith.constant 17 : index
    %c0_4 = arith.constant 0 : index
    %c0_5 = arith.constant 0 : index
    %2 = vector.load %arg7[%c0_3, %c17, %c0_4, %c0_5] : memref<2x18x18x4xf32, #tpu.memory_space<vmem>>, vector<2x1x18x4xf32>
    tpu.vector_store %arg7[%c0_3, %c17, %c0_4, %c0_5], %0 {strides = array<i32>} : memref<2x18x18x4xf32, #tpu.memory_space<vmem>>, vector<2x1x18x4xf32>,
    %cst_6 = arith.constant 0.000000e+00 : f32
    %3 = vector.broadcast %cst_6 : f32 to vector<2x18x1x4xf32>
    %c0_7 = arith.constant 0 : index
    %c0_8 = arith.constant 0 : index
    %c0_9 = arith.constant 0 : index
    %c0_10 = arith.constant 0 : index
    %4 = vector.load %arg7[%c0_7, %c0_8, %c0_9, %c0_10] : memref<2x18x18x4xf32, #tpu.memory_space<vmem>>, vector<2x18x1x4xf32>
    tpu.vector_store %arg7[%c0_7, %c0_8, %c0_9, %c0_10], %3 {strides = array<i32>} : memref<2x18x18x4xf32, #tpu.memory_space<vmem>>, vector<2x18x1x4xf32>,
    %c0_11 = arith.constant 0 : index
    %c0_12 = arith.constant 0 : index
    %c17_13 = arith.constant 17 : index
    %c0_14 = arith.constant 0 : index
    %5 = vector.load %arg7[%c0_11, %c0_12, %c17_13, %c0_14] : memref<2x18x18x4xf32, #tpu.memory_space<vmem>>, vector<2x18x1x4xf32>
    tpu.vector_store %arg7[%c0_11, %c0_12, %c17_13, %c0_14], %3 {strides = array<i32>} : memref<2x18x18x4xf32, #tpu.memory_space<vmem>>, vector<2x18x1x4xf32>,
    %c0_15 = arith.constant 0 : index
    %c0_16 = arith.constant 0 : index
    %c0_17 = arith.constant 0 : index
    %c0_18 = arith.constant 0 : index
    %6 = vector.load %arg1[%c0_15, %c0_16, %c0_17, %c0_18] : memref<2x16x16x4xf32, #tpu.memory_space<vmem>>, vector<2x16x16x4xf32>
    %c0_19 = arith.constant 0 : index
    %c1 = arith.constant 1 : index
    %c1_20 = arith.constant 1 : index
    %c0_21 = arith.constant 0 : index
    %7 = vector.load %arg7[%c0_19, %c1, %c1_20, %c0_21] : memref<2x18x18x4xf32, #tpu.memory_space<vmem>>, vector<2x16x16x4xf32>
    tpu.vector_store %arg7[%c0_19, %c1, %c1_20, %c0_21], %6 {strides = array<i32>} : memref<2x18x18x4xf32, #tpu.memory_space<vmem>>, vector<2x16x16x4xf32>,
    %c0_22 = arith.constant 0 : index
    %c0_23 = arith.constant 0 : index
    %c0_24 = arith.constant 0 : index
    %c0_25 = arith.constant 0 : index
    %8 = vector.load %arg7[%c0_22, %c0_23, %c0_24, %c0_25] : memref<2x18x18x4xf32, #tpu.memory_space<vmem>>, vector<2x16x16x4xf32>
    %9 = vector.shape_cast %8 : vector<2x16x16x4xf32> to vector<512x4xf32>
    %c0_26 = arith.constant 0 : index
    %c0_27 = arith.constant 0 : index
    %10 = vector.load %arg8[%c0_26, %c0_27] : memref<512x36xf32, #tpu.memory_space<vmem>>, vector<512x4xf32>
    tpu.vector_store %arg8[%c0_26, %c0_27], %9 {strides = array<i32>} : memref<512x36xf32, #tpu.memory_space<vmem>>, vector<512x4xf32>,
    %c0_28 = arith.constant 0 : index
    %c0_29 = arith.constant 0 : index
    %c1_30 = arith.constant 1 : index
    %c0_31 = arith.constant 0 : index
    %11 = vector.load %arg7[%c0_28, %c0_29, %c1_30, %c0_31] : memref<2x18x18x4xf32, #tpu.memory_space<vmem>>, vector<2x16x16x4xf32>
    %12 = vector.shape_cast %11 : vector<2x16x16x4xf32> to vector<512x4xf32>
    %c0_32 = arith.constant 0 : index
    %c4 = arith.constant 4 : index
    %13 = vector.load %arg8[%c0_32, %c4] : memref<512x36xf32, #tpu.memory_space<vmem>>, vector<512x4xf32>
    tpu.vector_store %arg8[%c0_32, %c4], %12 {strides = array<i32>} : memref<512x36xf32, #tpu.memory_space<vmem>>, vector<512x4xf32>,
    %c0_33 = arith.constant 0 : index
    %c0_34 = arith.constant 0 : index
    %c2 = arith.constant 2 : index
    %c0_35 = arith.constant 0 : index
    %14 = vector.load %arg7[%c0_33, %c0_34, %c2, %c0_35] : memref<2x18x18x4xf32, #tpu.memory_space<vmem>>, vector<2x16x16x4xf32>
    %15 = vector.shape_cast %14 : vector<2x16x16x4xf32> to vector<512x4xf32>
    %c0_36 = arith.constant 0 : index
    %c8 = arith.constant 8 : index
    %16 = vector.load %arg8[%c0_36, %c8] : memref<512x36xf32, #tpu.memory_space<vmem>>, vector<512x4xf32>
    tpu.vector_store %arg8[%c0_36, %c8], %15 {strides = array<i32>} : memref<512x36xf32, #tpu.memory_space<vmem>>, vector<512x4xf32>,
    %c0_37 = arith.constant 0 : index
    %c1_38 = arith.constant 1 : index
    %c0_39 = arith.constant 0 : index
    %c0_40 = arith.constant 0 : index
    %17 = vector.load %arg7[%c0_37, %c1_38, %c0_39, %c0_40] : memref<2x18x18x4xf32, #tpu.memory_space<vmem>>, vector<2x16x16x4xf32>
    %18 = vector.shape_cast %17 : vector<2x16x16x4xf32> to vector<512x4xf32>
    %c0_41 = arith.constant 0 : index
    %c12 = arith.constant 12 : index
    %19 = vector.load %arg8[%c0_41, %c12] : memref<512x36xf32, #tpu.memory_space<vmem>>, vector<512x4xf32>
    tpu.vector_store %arg8[%c0_41, %c12], %18 {strides = array<i32>} : memref<512x36xf32, #tpu.memory_space<vmem>>, vector<512x4xf32>,
    %c0_42 = arith.constant 0 : index
    %c1_43 = arith.constant 1 : index
    %c1_44 = arith.constant 1 : index
    %c0_45 = arith.constant 0 : index
    %20 = vector.load %arg7[%c0_42, %c1_43, %c1_44, %c0_45] : memref<2x18x18x4xf32, #tpu.memory_space<vmem>>, vector<2x16x16x4xf32>
    %21 = vector.shape_cast %20 : vector<2x16x16x4xf32> to vector<512x4xf32>
    %c0_46 = arith.constant 0 : index
    %c16 = arith.constant 16 : index
    %22 = vector.load %arg8[%c0_46, %c16] : memref<512x36xf32, #tpu.memory_space<vmem>>, vector<512x4xf32>
    tpu.vector_store %arg8[%c0_46, %c16], %21 {strides = array<i32>} : memref<512x36xf32, #tpu.memory_space<vmem>>, vector<512x4xf32>,
    %c0_47 = arith.constant 0 : index
    %c1_48 = arith.constant 1 : index
    %c2_49 = arith.constant 2 : index
    %c0_50 = arith.constant 0 : index
    %23 = vector.load %arg7[%c0_47, %c1_48, %c2_49, %c0_50] : memref<2x18x18x4xf32, #tpu.memory_space<vmem>>, vector<2x16x16x4xf32>
    %24 = vector.shape_cast %23 : vector<2x16x16x4xf32> to vector<512x4xf32>
    %c0_51 = arith.constant 0 : index
    %c20 = arith.constant 20 : index
    %25 = vector.load %arg8[%c0_51, %c20] : memref<512x36xf32, #tpu.memory_space<vmem>>, vector<512x4xf32>
    tpu.vector_store %arg8[%c0_51, %c20], %24 {strides = array<i32>} : memref<512x36xf32, #tpu.memory_space<vmem>>, vector<512x4xf32>,
    %c0_52 = arith.constant 0 : index
    %c2_53 = arith.constant 2 : index
    %c0_54 = arith.constant 0 : index
    %c0_55 = arith.constant 0 : index
    %26 = vector.load %arg7[%c0_52, %c2_53, %c0_54, %c0_55] : memref<2x18x18x4xf32, #tpu.memory_space<vmem>>, vector<2x16x16x4xf32>
    %27 = vector.shape_cast %26 : vector<2x16x16x4xf32> to vector<512x4xf32>
    %c0_56 = arith.constant 0 : index
    %c24 = arith.constant 24 : index
    %28 = vector.load %arg8[%c0_56, %c24] : memref<512x36xf32, #tpu.memory_space<vmem>>, vector<512x4xf32>
    tpu.vector_store %arg8[%c0_56, %c24], %27 {strides = array<i32>} : memref<512x36xf32, #tpu.memory_space<vmem>>, vector<512x4xf32>,
    %c0_57 = arith.constant 0 : index
    %c2_58 = arith.constant 2 : index
    %c1_59 = arith.constant 1 : index
    %c0_60 = arith.constant 0 : index
    %29 = vector.load %arg7[%c0_57, %c2_58, %c1_59, %c0_60] : memref<2x18x18x4xf32, #tpu.memory_space<vmem>>, vector<2x16x16x4xf32>
    %30 = vector.shape_cast %29 : vector<2x16x16x4xf32> to vector<512x4xf32>
    %c0_61 = arith.constant 0 : index
    %c28 = arith.constant 28 : index
    %31 = vector.load %arg8[%c0_61, %c28] : memref<512x36xf32, #tpu.memory_space<vmem>>, vector<512x4xf32>
    tpu.vector_store %arg8[%c0_61, %c28], %30 {strides = array<i32>} : memref<512x36xf32, #tpu.memory_space<vmem>>, vector<512x4xf32>,
    %c0_62 = arith.constant 0 : index
    %c2_63 = arith.constant 2 : index
    %c2_64 = arith.constant 2 : index
    %c0_65 = arith.constant 0 : index
    %32 = vector.load %arg7[%c0_62, %c2_63, %c2_64, %c0_65] : memref<2x18x18x4xf32, #tpu.memory_space<vmem>>, vector<2x16x16x4xf32>
    %33 = vector.shape_cast %32 : vector<2x16x16x4xf32> to vector<512x4xf32>
    %c0_66 = arith.constant 0 : index
    %c32 = arith.constant 32 : index
    %34 = vector.load %arg8[%c0_66, %c32] : memref<512x36xf32, #tpu.memory_space<vmem>>, vector<512x4xf32>
    tpu.vector_store %arg8[%c0_66, %c32], %33 {strides = array<i32>} : memref<512x36xf32, #tpu.memory_space<vmem>>, vector<512x4xf32>,
    %c0_67 = arith.constant 0 : index
    %c0_68 = arith.constant 0 : index
    %35 = vector.load %arg8[%c0_67, %c0_68] : memref<512x36xf32, #tpu.memory_space<vmem>>, vector<512x36xf32>
    %c0_69 = arith.constant 0 : index
    %c0_70 = arith.constant 0 : index
    %36 = vector.load %arg2[%c0_69, %c0_70] : memref<36x4xf32, #tpu.memory_space<vmem>>, vector<36x4xf32>
    %cst_71 = arith.constant dense<0.000000e+00> : vector<512x4xf32>
    %37 = tpu.matmul %35, %36, %cst_71 {dimension_numbers = #tpu.dot_dimension_numbers<[1], [0], [0], [1], [0, 0, 1, 1], [], []>} : vector<512x36xf32>, vector<36x4xf32>, vector<512x4xf32> -> vector<512x4xf32>
    %c0_72 = arith.constant 0 : index
    %c0_73 = arith.constant 0 : index
    %38 = vector.load %arg3[%c0_72, %c0_73] : memref<2x4xf32, #tpu.memory_space<vmem>>, vector<1x4xf32>
    %39 = vector.broadcast %38 : vector<1x4xf32> to vector<512x4xf32>
    %40 = arith.mulf %37, %39 : vector<512x4xf32>
    %c1_74 = arith.constant 1 : index
    %c0_75 = arith.constant 0 : index
    %41 = vector.load %arg3[%c1_74, %c0_75] : memref<2x4xf32, #tpu.memory_space<vmem>>, vector<1x4xf32>
    %42 = vector.broadcast %41 : vector<1x4xf32> to vector<512x4xf32>
    %43 = arith.addf %40, %42 : vector<512x4xf32>
    %cst_76 = arith.constant 0.000000e+00 : f32
    %44 = vector.broadcast %cst_76 : f32 to vector<512x4xf32>
    %45 = arith.maximumf %43, %44 : vector<512x4xf32>
    %46 = vector.shape_cast %45 : vector<512x4xf32> to vector<2x16x16x4xf32>
    %c0_77 = arith.constant 0 : index
    %c1_78 = arith.constant 1 : index
    %c1_79 = arith.constant 1 : index
    %c0_80 = arith.constant 0 : index
    %47 = vector.load %arg7[%c0_77, %c1_78, %c1_79, %c0_80] : memref<2x18x18x4xf32, #tpu.memory_space<vmem>>, vector<2x16x16x4xf32>
    tpu.vector_store %arg7[%c0_77, %c1_78, %c1_79, %c0_80], %46 {strides = array<i32>} : memref<2x18x18x4xf32, #tpu.memory_space<vmem>>, vector<2x16x16x4xf32>,
    %c0_81 = arith.constant 0 : index
    %c0_82 = arith.constant 0 : index
    %c0_83 = arith.constant 0 : index
    %c0_84 = arith.constant 0 : index
    %48 = vector.load %arg7[%c0_81, %c0_82, %c0_83, %c0_84] : memref<2x18x18x4xf32, #tpu.memory_space<vmem>>, vector<2x16x16x4xf32>
    %49 = vector.shape_cast %48 : vector<2x16x16x4xf32> to vector<512x4xf32>
    %c0_85 = arith.constant 0 : index
    %c0_86 = arith.constant 0 : index
    %50 = vector.load %arg8[%c0_85, %c0_86] : memref<512x36xf32, #tpu.memory_space<vmem>>, vector<512x4xf32>
    tpu.vector_store %arg8[%c0_85, %c0_86], %49 {strides = array<i32>} : memref<512x36xf32, #tpu.memory_space<vmem>>, vector<512x4xf32>,
    %c0_87 = arith.constant 0 : index
    %c0_88 = arith.constant 0 : index
    %c1_89 = arith.constant 1 : index
    %c0_90 = arith.constant 0 : index
    %51 = vector.load %arg7[%c0_87, %c0_88, %c1_89, %c0_90] : memref<2x18x18x4xf32, #tpu.memory_space<vmem>>, vector<2x16x16x4xf32>
    %52 = vector.shape_cast %51 : vector<2x16x16x4xf32> to vector<512x4xf32>
    %c0_91 = arith.constant 0 : index
    %c4_92 = arith.constant 4 : index
    %53 = vector.load %arg8[%c0_91, %c4_92] : memref<512x36xf32, #tpu.memory_space<vmem>>, vector<512x4xf32>
    tpu.vector_store %arg8[%c0_91, %c4_92], %52 {strides = array<i32>} : memref<512x36xf32, #tpu.memory_space<vmem>>, vector<512x4xf32>,
    %c0_93 = arith.constant 0 : index
    %c0_94 = arith.constant 0 : index
    %c2_95 = arith.constant 2 : index
    %c0_96 = arith.constant 0 : index
    %54 = vector.load %arg7[%c0_93, %c0_94, %c2_95, %c0_96] : memref<2x18x18x4xf32, #tpu.memory_space<vmem>>, vector<2x16x16x4xf32>
    %55 = vector.shape_cast %54 : vector<2x16x16x4xf32> to vector<512x4xf32>
    %c0_97 = arith.constant 0 : index
    %c8_98 = arith.constant 8 : index
    %56 = vector.load %arg8[%c0_97, %c8_98] : memref<512x36xf32, #tpu.memory_space<vmem>>, vector<512x4xf32>
    tpu.vector_store %arg8[%c0_97, %c8_98], %55 {strides = array<i32>} : memref<512x36xf32, #tpu.memory_space<vmem>>, vector<512x4xf32>,
    %c0_99 = arith.constant 0 : index
    %c1_100 = arith.constant 1 : index
    %c0_101 = arith.constant 0 : index
    %c0_102 = arith.constant 0 : index
    %57 = vector.load %arg7[%c0_99, %c1_100, %c0_101, %c0_102] : memref<2x18x18x4xf32, #tpu.memory_space<vmem>>, vector<2x16x16x4xf32>
    %58 = vector.shape_cast %57 : vector<2x16x16x4xf32> to vector<512x4xf32>
    %c0_103 = arith.constant 0 : index
    %c12_104 = arith.constant 12 : index
    %59 = vector.load %arg8[%c0_103, %c12_104] : memref<512x36xf32, #tpu.memory_space<vmem>>, vector<512x4xf32>
    tpu.vector_store %arg8[%c0_103, %c12_104], %58 {strides = array<i32>} : memref<512x36xf32, #tpu.memory_space<vmem>>, vector<512x4xf32>,
    %c0_105 = arith.constant 0 : index
    %c1_106 = arith.constant 1 : index
    %c1_107 = arith.constant 1 : index
    %c0_108 = arith.constant 0 : index
    %60 = vector.load %arg7[%c0_105, %c1_106, %c1_107, %c0_108] : memref<2x18x18x4xf32, #tpu.memory_space<vmem>>, vector<2x16x16x4xf32>
    %61 = vector.shape_cast %60 : vector<2x16x16x4xf32> to vector<512x4xf32>
    %c0_109 = arith.constant 0 : index
    %c16_110 = arith.constant 16 : index
    %62 = vector.load %arg8[%c0_109, %c16_110] : memref<512x36xf32, #tpu.memory_space<vmem>>, vector<512x4xf32>
    tpu.vector_store %arg8[%c0_109, %c16_110], %61 {strides = array<i32>} : memref<512x36xf32, #tpu.memory_space<vmem>>, vector<512x4xf32>,
    %c0_111 = arith.constant 0 : index
    %c1_112 = arith.constant 1 : index
    %c2_113 = arith.constant 2 : index
    %c0_114 = arith.constant 0 : index
    %63 = vector.load %arg7[%c0_111, %c1_112, %c2_113, %c0_114] : memref<2x18x18x4xf32, #tpu.memory_space<vmem>>, vector<2x16x16x4xf32>
    %64 = vector.shape_cast %63 : vector<2x16x16x4xf32> to vector<512x4xf32>
    %c0_115 = arith.constant 0 : index
    %c20_116 = arith.constant 20 : index
    %65 = vector.load %arg8[%c0_115, %c20_116] : memref<512x36xf32, #tpu.memory_space<vmem>>, vector<512x4xf32>
    tpu.vector_store %arg8[%c0_115, %c20_116], %64 {strides = array<i32>} : memref<512x36xf32, #tpu.memory_space<vmem>>, vector<512x4xf32>,
    %c0_117 = arith.constant 0 : index
    %c2_118 = arith.constant 2 : index
    %c0_119 = arith.constant 0 : index
    %c0_120 = arith.constant 0 : index
    %66 = vector.load %arg7[%c0_117, %c2_118, %c0_119, %c0_120] : memref<2x18x18x4xf32, #tpu.memory_space<vmem>>, vector<2x16x16x4xf32>
    %67 = vector.shape_cast %66 : vector<2x16x16x4xf32> to vector<512x4xf32>
    %c0_121 = arith.constant 0 : index
    %c24_122 = arith.constant 24 : index
    %68 = vector.load %arg8[%c0_121, %c24_122] : memref<512x36xf32, #tpu.memory_space<vmem>>, vector<512x4xf32>
    tpu.vector_store %arg8[%c0_121, %c24_122], %67 {strides = array<i32>} : memref<512x36xf32, #tpu.memory_space<vmem>>, vector<512x4xf32>,
    %c0_123 = arith.constant 0 : index
    %c2_124 = arith.constant 2 : index
    %c1_125 = arith.constant 1 : index
    %c0_126 = arith.constant 0 : index
    %69 = vector.load %arg7[%c0_123, %c2_124, %c1_125, %c0_126] : memref<2x18x18x4xf32, #tpu.memory_space<vmem>>, vector<2x16x16x4xf32>
    %70 = vector.shape_cast %69 : vector<2x16x16x4xf32> to vector<512x4xf32>
    %c0_127 = arith.constant 0 : index
    %c28_128 = arith.constant 28 : index
    %71 = vector.load %arg8[%c0_127, %c28_128] : memref<512x36xf32, #tpu.memory_space<vmem>>, vector<512x4xf32>
    tpu.vector_store %arg8[%c0_127, %c28_128], %70 {strides = array<i32>} : memref<512x36xf32, #tpu.memory_space<vmem>>, vector<512x4xf32>,
    %c0_129 = arith.constant 0 : index
    %c2_130 = arith.constant 2 : index
    %c2_131 = arith.constant 2 : index
    %c0_132 = arith.constant 0 : index
    %72 = vector.load %arg7[%c0_129, %c2_130, %c2_131, %c0_132] : memref<2x18x18x4xf32, #tpu.memory_space<vmem>>, vector<2x16x16x4xf32>
    %73 = vector.shape_cast %72 : vector<2x16x16x4xf32> to vector<512x4xf32>
    %c0_133 = arith.constant 0 : index
    %c32_134 = arith.constant 32 : index
    %74 = vector.load %arg8[%c0_133, %c32_134] : memref<512x36xf32, #tpu.memory_space<vmem>>, vector<512x4xf32>
    tpu.vector_store %arg8[%c0_133, %c32_134], %73 {strides = array<i32>} : memref<512x36xf32, #tpu.memory_space<vmem>>, vector<512x4xf32>,
    %c0_135 = arith.constant 0 : index
    %c0_136 = arith.constant 0 : index
    %75 = vector.load %arg8[%c0_135, %c0_136] : memref<512x36xf32, #tpu.memory_space<vmem>>, vector<512x36xf32>
    %c0_137 = arith.constant 0 : index
    %c0_138 = arith.constant 0 : index
    %76 = vector.load %arg4[%c0_137, %c0_138] : memref<36x4xf32, #tpu.memory_space<vmem>>, vector<36x4xf32>
    %cst_139 = arith.constant dense<0.000000e+00> : vector<512x4xf32>
    %77 = tpu.matmul %75, %76, %cst_139 {dimension_numbers = #tpu.dot_dimension_numbers<[1], [0], [0], [1], [0, 0, 1, 1], [], []>} : vector<512x36xf32>, vector<36x4xf32>, vector<512x4xf32> -> vector<512x4xf32>
    %c0_140 = arith.constant 0 : index
    %c0_141 = arith.constant 0 : index
    %78 = vector.load %arg5[%c0_140, %c0_141] : memref<2x4xf32, #tpu.memory_space<vmem>>, vector<1x4xf32>
    %79 = vector.broadcast %78 : vector<1x4xf32> to vector<512x4xf32>
    %80 = arith.mulf %77, %79 : vector<512x4xf32>
    %c1_142 = arith.constant 1 : index
    %c0_143 = arith.constant 0 : index
    %81 = vector.load %arg5[%c1_142, %c0_143] : memref<2x4xf32, #tpu.memory_space<vmem>>, vector<1x4xf32>
    %82 = vector.broadcast %81 : vector<1x4xf32> to vector<512x4xf32>
    %83 = arith.addf %80, %82 : vector<512x4xf32>
    %c0_144 = arith.constant 0 : index
    %c0_145 = arith.constant 0 : index
    %c0_146 = arith.constant 0 : index
    %c0_147 = arith.constant 0 : index
    %84 = vector.load %arg1[%c0_144, %c0_145, %c0_146, %c0_147] : memref<2x16x16x4xf32, #tpu.memory_space<vmem>>, vector<2x16x16x4xf32>
    %85 = vector.shape_cast %84 : vector<2x16x16x4xf32> to vector<512x4xf32>
    %86 = arith.addf %83, %85 : vector<512x4xf32>
    %cst_148 = arith.constant 0.000000e+00 : f32
    %87 = vector.broadcast %cst_148 : f32 to vector<512x4xf32>
    %88 = arith.maximumf %86, %87 : vector<512x4xf32>
    %89 = vector.shape_cast %88 : vector<512x4xf32> to vector<2x16x16x4xf32>
    %c0_149 = arith.constant 0 : index
    %c0_150 = arith.constant 0 : index
    %c0_151 = arith.constant 0 : index
    %c0_152 = arith.constant 0 : index
    %90 = vector.load %arg6[%c0_149, %c0_150, %c0_151, %c0_152] : memref<2x16x16x4xf32, #tpu.memory_space<vmem>>, vector<2x16x16x4xf32>
    tpu.vector_store %arg6[%c0_149, %c0_150, %c0_151, %c0_152], %89 {strides = array<i32>} : memref<2x16x16x4xf32, #tpu.memory_space<vmem>>, vector<2x16x16x4xf32>,
    return
  }
  func.func @transform_0(%arg0: i32) -> (i32, i32, i32, i32) {
    %c0_i32 = arith.constant 0 : i32
    %c0_i32_0 = arith.constant 0 : i32
    %c0_i32_1 = arith.constant 0 : i32
    %c0_i32_2 = arith.constant 0 : i32
    return %arg0, %c0_i32, %c0_i32_0, %c0_i32_1 : i32, i32, i32, i32
  }
  func.func @transform_1(%arg0: i32) -> (i32, i32) {
    %c0_i32 = arith.constant 0 : i32
    %c0_i32_0 = arith.constant 0 : i32
    %c0_i32_1 = arith.constant 0 : i32
    return %c0_i32, %c0_i32_0 : i32, i32
  }
  func.func @transform_2(%arg0: i32) -> (i32, i32) {
    %c0_i32 = arith.constant 0 : i32
    %c0_i32_0 = arith.constant 0 : i32
    %c0_i32_1 = arith.constant 0 : i32
    return %c0_i32, %c0_i32_0 : i32, i32
  }
  func.func @transform_3(%arg0: i32) -> (i32, i32) {
    %c0_i32 = arith.constant 0 : i32
    %c0_i32_0 = arith.constant 0 : i32
    %c0_i32_1 = arith.constant 0 : i32
    return %c0_i32, %c0_i32_0 : i32, i32
  }
  func.func @transform_4(%arg0: i32) -> (i32, i32) {
    %c0_i32 = arith.constant 0 : i32
    %c0_i32_0 = arith.constant 0 : i32
    %c0_i32_1 = arith.constant 0 : i32
    return %c0_i32, %c0_i32_0 : i32, i32
  }
  func.func @transform_5(%arg0: i32) -> (i32, i32, i32, i32) {
    %c0_i32 = arith.constant 0 : i32
    %c0_i32_0 = arith.constant 0 : i32
    %c0_i32_1 = arith.constant 0 : i32
    %c0_i32_2 = arith.constant 0 : i32
    return %arg0, %c0_i32, %c0_i32_0, %c0_i32_1 : i32, i32, i32, i32
  }
}

</mosaic_0001>

<bundles_post_ra>
// kernel: tpu_custom_call.1
= control target key start
LH: loop header
LB: loop body
LE: loop exit
PB: predicated region body
PF: predicated region fallthrough
CT: control target
= control target key end

     0   :  { %10 = vsyncpa [#allocation5], 0  ;;  %s13071_s0 = inlined_call_operand.hbm [shape: f32[2,16,16,4], index: 0, kind: input, shape index: {}]   ;;  %s13072_s1 = inlined_call_operand.hbm [shape: f32[36,4], index: 1, kind: input, shape index: {}]   ;;  %s13073_s2 = inlined_call_operand.hbm [shape: f32[2,4], index: 2, kind: input, shape index: {}]   ;;  %s13074_s3 = inlined_call_operand.hbm [shape: f32[36,4], index: 3, kind: input, shape index: {}]   ;;  %s13075_s4 = inlined_call_operand.hbm [shape: f32[2,4], index: 4, kind: input, shape index: {}]   ;;  %s13076_s5 = inlined_call_operand.hbm [shape: f32[2,16,16,4], index: 5, kind: output, shape index: {}]  }
   0x1   :  { %11 = vsyncpa [#allocation8], 0 }
   0x2   :  { %12 = vsyncpa [#allocation11], 0 }
   0x3   :  { %13 = vsyncpa [#allocation6], 0  ;;  %s9350_s18 = smov [#allocation7]   ;;  %s9351_s20 = smov [#allocation10]  }
   0x4   :  { %s31_s19 = sshll.u32 %s9350_s18, 4  ;;  %s53_s21 = sshll.u32 %s9351_s20, 4  ;;  %s32_s19 = int_to_ptr.vmem [resolvable:$true] %s31_s19  ;;  %s9396_s21 = int_to_ptr.vmem [resolvable:$true] %s53_s21 }
   0x5   :  { %s9210_s24 = scalar_lea.hbm %s13072_s1, 640 }
   0x6   :  { %p9211_p0 = scmp.ne.s32.totalorder %s13072_s1, %s9210_s24  ;;  %p9214_p1 = scmp.lt.u32.totalorder %s9210_s24, %s13072_s1 }
   0x8   :  { %p9216_p2 = pnand %p9214_p1, %p9211_p0 }
   0xa   :  { %9219 = shalt.err (!%p9216_p2)
}
   0xb   :  { %s9220_s29 = scalar_lea.vmem %s32_s19, 640  ;;  %p9225_p4 = scmp.lt.s32.totalorder %s32_s19, %s32_s19 }
   0xc   :  { %p9221_p3 = scmp.ne.s32.totalorder %s32_s19, %s9220_s29  ;;  %p9226_p5 = scmp.lt.s32.totalorder %s9220_s29, %s9220_s29 }
   0xe   :  { %p9227_p6 = por %p9226_p5, %p9225_p4 }
  0x10   :  { %p9228_p7 = pnand %p9227_p6, %p9221_p3 }
  0x12   :  { %9231 = shalt.err (!%p9228_p7)
}
  0x13   :  { %s9352_s30 = smov 128   ;;  %s9353_s6 = smov 8  }
  0x14   :  { %37 = dma.hbm_to_vmem [thread:$0]  %s13072_s1, 640, %s32_s19, [#allocation8], %s9352_s30, %s9352_s30, %s9353_s6  }
  0x15   :  { %s9232_s11 = scalar_lea.hbm %s13074_s3, 640 }
  0x16   :  { %p9233_p8 = scmp.ne.s32.totalorder %s13074_s3, %s9232_s11  ;;  %p9236_p9 = scmp.lt.u32.totalorder %s9232_s11, %s13074_s3 }
  0x18   :  { %p9238_p10 = pnand %p9236_p9, %p9233_p8 }
  0x1a   :  { %9241 = shalt.err (!%p9238_p10)
}
  0x1b   :  { %s9242_s16 = scalar_lea.vmem %s9396_s21, 640  ;;  %p9247_p12 = scmp.lt.s32.totalorder %s9396_s21, %s9396_s21 }
  0x1c   :  { %p9243_p11 = scmp.ne.s32.totalorder %s9396_s21, %s9242_s16  ;;  %p9248_p13 = scmp.lt.s32.totalorder %s9242_s16, %s9242_s16 }
  0x1e   :  { %p9249_p0 = por %p9248_p13, %p9247_p12 }
  0x20   :  { %p9250_p1 = pnand %p9249_p0, %p9243_p11 }
  0x22   :  { %9253 = shalt.err (!%p9250_p1)
}
  0x23   :  { %59 = dma.hbm_to_vmem [thread:$0]  %s13074_s3, 640, %s9396_s21, [#allocation11], %s9352_s30, %s9352_s30, %s9353_s6  }
  0x24   :  { %s9354_s18 = smov [#allocation4]   ;;  %s9355_s20 = smov [#allocation9]  }
  0x25   :  { %s19_s19 = sshll.u32 %s9354_s18, 4  ;;  %s44_s22 = sshll.u32 %s9355_s20, 4  ;;  %s20_s19 = int_to_ptr.vmem [resolvable:$true] %s19_s19  ;;  %s45_s22 = int_to_ptr.vmem [resolvable:$true] %s44_s22 }
  0x26   :  { %s9254_s25 = scalar_lea.hbm %s13071_s0, 8192 }
  0x27   :  { %p9255_p2 = scmp.ne.s32.totalorder %s13071_s0, %s9254_s25  ;;  %p9258_p3 = scmp.lt.u32.totalorder %s9254_s25, %s13071_s0 }
  0x29   :  { %p9260_p4 = pnand %p9258_p3, %p9255_p2 }
  0x2b   :  { %9263 = shalt.err (!%p9260_p4)
}
  0x2c   :  { %s9264_s3 = scalar_lea.vmem %s20_s19, 8192  ;;  %p9269_p6 = scmp.lt.s32.totalorder %s20_s19, %s20_s19 }
  0x2d   :  { %p9265_p5 = scmp.ne.s32.totalorder %s20_s19, %s9264_s3  ;;  %p9270_p7 = scmp.lt.s32.totalorder %s9264_s3, %s9264_s3 }
  0x2f   :  { %p9271_p8 = por %p9270_p7, %p9269_p6 }
  0x31   :  { %p9272_p9 = pnand %p9271_p8, %p9265_p5 }
  0x33   :  { %9275 = shalt.err (!%p9272_p9)
}
  0x34   :  { %25 = dma.hbm_to_vmem [thread:$0]  %s13071_s0, 8192, %s20_s19, [#allocation5], %s9352_s30, %s9352_s30, %s9353_s6  }
  0x35   :  { %s9276_s10 = scalar_lea.hbm %s13073_s2, 32 }
  0x36   :  { %p9277_p10 = scmp.ne.s32.totalorder %s13073_s2, %s9276_s10  ;;  %p9280_p11 = scmp.lt.u32.totalorder %s9276_s10, %s13073_s2 }
  0x38   :  { %p9282_p12 = pnand %p9280_p11, %p9277_p10 }
  0x3a   :  { %9285 = shalt.err (!%p9282_p12)
}
  0x3b   :  { %s9286_s15 = scalar_lea.vmem %s45_s22, 32  ;;  %p9291_p0 = scmp.lt.s32.totalorder %s45_s22, %s45_s22 }
  0x3c   :  { %p9287_p13 = scmp.ne.s32.totalorder %s45_s22, %s9286_s15  ;;  %p9292_p1 = scmp.lt.s32.totalorder %s9286_s15, %s9286_s15 }
  0x3e   :  { %p9293_p2 = por %p9292_p1, %p9291_p0 }
  0x40   :  { %p9294_p3 = pnand %p9293_p2, %p9287_p13 }
  0x42   :  { %9297 = shalt.err (!%p9294_p3)
}
  0x43   :  { %47 = dma.hbm_to_vmem [thread:$0]  %s13073_s2, 32, %s45_s22, [#allocation8]  }
  0x44   :  { %s9356_s1 = smov [#allocation12]   ;;  %s9298_s20 = scalar_lea.hbm %s13075_s4, 32 }
  0x45   :  { %s66_s17 = sshll.u32 %s9356_s1, 4  ;;  %p9299_p4 = scmp.ne.s32.totalorder %s13075_s4, %s9298_s20  ;;  %s67_s17 = int_to_ptr.vmem [resolvable:$true] %s66_s17 }
  0x46   :  { %p9302_p5 = scmp.lt.u32.totalorder %s9298_s20, %s13075_s4 }
  0x48   :  { %p9304_p6 = pnand %p9302_p5, %p9299_p4 }
  0x4a   :  { %9307 = shalt.err (!%p9304_p6)
}
  0x4b   :  { %s9308_s27 = scalar_lea.vmem %s67_s17, 32  ;;  %p9313_p8 = scmp.lt.s32.totalorder %s67_s17, %s67_s17 }
  0x4c   :  { %p9309_p7 = scmp.ne.s32.totalorder %s67_s17, %s9308_s27  ;;  %p9314_p9 = scmp.lt.s32.totalorder %s9308_s27, %s9308_s27 }
  0x4e   :  { %p9315_p10 = por %p9314_p9, %p9313_p8 }
  0x50   :  { %p9316_p11 = pnand %p9315_p10, %p9309_p7 }
  0x52   :  { %9319 = shalt.err (!%p9316_p11)
}
  0x53   :  { %69 = dma.hbm_to_vmem [thread:$0]  %s13075_s4, 32, %s67_s17, [#allocation11]  }
  0x54   :  { %9342 = dma.done.wait [#allocation5], 8192  }
  0x55   :  { %9343 = vsyncadd [#allocation5], 4294959104 }
  0x56   :  { %9344 = dma.done.wait [#allocation8], 672  }
  0x57   :  { %9345 = vsyncadd [#allocation8], 4294966624 }
  0x58   :  { %9346 = dma.done.wait [#allocation11], 672  }
  0x59   :  { %9347 = vsyncadd [#allocation11], 4294966624  ;;  %vm85_vm0 = vcmask 31744   ;;  %vm88_vm1 = vcmask 25600   ;;  %v9357_v0 = vmov 0.0   ;;  %vm100_vm2 = vcmask 24576  }
  0x5a   :  { %86 = vst.msk [vmem:[#allocation2] sm:$0xff] %vm85_vm0, %v9357_v0  ;;  %87 = vst.msk [vmem:[#allocation2 + $0x8] sm:$0xff] %vm85_vm0, %v9357_v0  ;;  %v173_v1 = vld [vmem:[#allocation4] sm:$0xff]  ;;  %v174_v2 = vld [vmem:[#allocation4 + $0x8] sm:$0xff]  ;;  %s9358_s4 = smov 4   ;;  %vm750_vm3 = vcmask 64544  }
  0x5b   :  { %90 = vst.msk [vmem:[#allocation2 + $0x1b0] sm:$0xff] %vm85_vm0, %v9357_v0  ;;  %91 = vst.msk [vmem:[#allocation2 + $0x1b8] sm:$0xff] %vm85_vm0, %v9357_v0  ;;  %v175_v3 = vld [vmem:[#allocation4 + $0x10] sm:$0xff]  ;;  %v176_v6 = vld [vmem:[#allocation4 + $0x18] sm:$0xff]  ;;  %vm1135_vm4 = vcmask 97344   ;;  %s9359_s28 = smov 12  }
  0x5c   :  { %94 = vst.msk [vmem:[#allocation2 + $0x198] sm:$0xff] %vm85_vm0, %v9357_v0  ;;  %95 = vst.msk [vmem:[#allocation2 + $0x1a0] sm:$0xff] %vm85_vm0, %v9357_v0  ;;  %v177_v7 = vld [vmem:[#allocation4 + $0x20] sm:$0xff]  ;;  %v178_v8 = vld [vmem:[#allocation4 + $0x28] sm:$0xff]  ;;  %vm1520_vm5 = vcmask 130144   ;;  %s9360_s29 = smov 16  }
  0x5d   :  { %97 = vst.msk [vmem:[#allocation2 + $0x348] sm:$0xff] %vm85_vm0, %v9357_v0  ;;  %98 = vst.msk [vmem:[#allocation2 + $0x350] sm:$0xff] %vm85_vm0, %v9357_v0  ;;  %v179_v9 = vld [vmem:[#allocation4 + $0x30] sm:$0xff]  ;;  %v180_v10 = vld [vmem:[#allocation4 + $0x38] sm:$0xff]  ;;  %vm1905_vm6 = vcmask 162944   ;;  %s9361_s3 = smov 20  }
  0x5e   :  { %89 = vst.msk [vmem:[#allocation2 + $0x10] sm:$0x3] %vm88_vm1, %v9357_v0  ;;  %92 = vst.msk [vmem:[#allocation2 + $0x1c0] sm:$0x3] %vm88_vm1, %v9357_v0  ;;  %v181_v11 = vld [vmem:[#allocation4 + $0x40] sm:$0xff]  ;;  %v182_v12 = vld [vmem:[#allocation4 + $0x48] sm:$0xff] }
  0x5f   :  { %96 = vst.msk [vmem:[#allocation2 + $0x1a8] sm:$0x3] %vm88_vm1, %v9357_v0  ;;  %99 = vst.msk [vmem:[#allocation2 + $0x358] sm:$0x3] %vm88_vm1, %v9357_v0  ;;  %v183_v13 = vld [vmem:[#allocation4 + $0x50] sm:$0xff]  ;;  %v184_v14 = vld [vmem:[#allocation4 + $0x58] sm:$0xff] }
  0x60   :  { %101 = vst.msk [vmem:[#allocation2] sm:$0x1] %vm100_vm2, %v9357_v0  ;;  %102 = vst.msk [vmem:[#allocation2 + $0x18] sm:$0x1] %vm100_vm2, %v9357_v0  ;;  %v185_v15 = vld [vmem:[#allocation4 + $0x60] sm:$0xff]  ;;  %v186_v16 = vld [vmem:[#allocation4 + $0x68] sm:$0xff] }
  0x61   :  { %103 = vst.msk [vmem:[#allocation2 + $0x30] sm:$0x1] %vm100_vm2, %v9357_v0  ;;  %104 = vst.msk [vmem:[#allocation2 + $0x48] sm:$0x1] %vm100_vm2, %v9357_v0  ;;  %v430_v4 = vld [vmem:[#allocation2 + $0x1] sm:$0xff]  ;;  %v187_v17 = vld [vmem:[#allocation4 + $0x70] sm:$0xff] }
  0x62   :  { %105 = vst.msk [vmem:[#allocation2 + $0x60] sm:$0x1] %vm100_vm2, %v9357_v0  ;;  %106 = vst.msk [vmem:[#allocation2 + $0x78] sm:$0x1] %vm100_vm2, %v9357_v0  ;;  %558 = vrot.lane.b32.xlu0 %v430_v4, %s9358_s4  ;;  %v188_v18 = vld [vmem:[#allocation4 + $0x78] sm:$0xff]  ;;  %v189_v19 = vld [vmem:[#allocation4 + $0x80] sm:$0xff] }
  0x63   :  { %107 = vst.msk [vmem:[#allocation2 + $0x90] sm:$0x1] %vm100_vm2, %v9357_v0  ;;  %108 = vst.msk [vmem:[#allocation2 + $0xa8] sm:$0x1] %vm100_vm2, %v9357_v0  ;;  %v190_v20 = vld [vmem:[#allocation4 + $0x88] sm:$0xff]  ;;  %v191_v21 = vld [vmem:[#allocation4 + $0x90] sm:$0xff] }
  0x64   :  { %109 = vst.msk [vmem:[#allocation2 + $0xc0] sm:$0x1] %vm100_vm2, %v9357_v0  ;;  %110 = vst.msk [vmem:[#allocation2 + $0xd8] sm:$0x1] %vm100_vm2, %v9357_v0  ;;  %v192_v22 = vld [vmem:[#allocation4 + $0x98] sm:$0xff]  ;;  %v193_v23 = vld [vmem:[#allocation4 + $0xa0] sm:$0xff] }
  0x65   :  { %111 = vst.msk [vmem:[#allocation2 + $0xf0] sm:$0x1] %vm100_vm2, %v9357_v0  ;;  %112 = vst.msk [vmem:[#allocation2 + $0x108] sm:$0x1] %vm100_vm2, %v9357_v0  ;;  %v431_v5 = vld [vmem:[#allocation2 + $0x9] sm:$0xff]  ;;  %v196_v28 = vld [vmem:[#allocation4 + $0xb8] sm:$0xff] }
  0x66   :  { %113 = vst.msk [vmem:[#allocation2 + $0x120] sm:$0x1] %vm100_vm2, %v9357_v0  ;;  %114 = vst.msk [vmem:[#allocation2 + $0x138] sm:$0x1] %vm100_vm2, %v9357_v0  ;;  %560 = vrot.lane.b32.xlu0 %v431_v5, %s9358_s4  ;;  %v194_v24 = vld [vmem:[#allocation4 + $0xa8] sm:$0xff]  ;;  %v195_v27 = vld [vmem:[#allocation4 + $0xb0] sm:$0xff] }
  0x67   :  { %115 = vst.msk [vmem:[#allocation2 + $0x150] sm:$0x1] %vm100_vm2, %v9357_v0  ;;  %116 = vst.msk [vmem:[#allocation2 + $0x168] sm:$0x1] %vm100_vm2, %v9357_v0  ;;  %v197_v33 = vld [vmem:[#allocation4 + $0xc0] sm:$0xff]  ;;  %v198_v34 = vld [vmem:[#allocation4 + $0xc8] sm:$0xff] }
  0x68   :  { %117 = vst.msk [vmem:[#allocation2 + $0x180] sm:$0x1] %vm100_vm2, %v9357_v0  ;;  %118 = vst.msk [vmem:[#allocation2 + $0x198] sm:$0x1] %vm100_vm2, %v9357_v0  ;;  %v199_v35 = vld [vmem:[#allocation4 + $0xd0] sm:$0xff]  ;;  %v200_v36 = vld [vmem:[#allocation4 + $0xd8] sm:$0xff] }
  0x69   :  { %119 = vst.msk [vmem:[#allocation2 + $0x1b0] sm:$0x1] %vm100_vm2, %v9357_v0  ;;  %120 = vst.msk [vmem:[#allocation2 + $0x1c8] sm:$0x1] %vm100_vm2, %v9357_v0  ;;  %v201_v38 = vld [vmem:[#allocation4 + $0xe0] sm:$0xff]  ;;  %v202_v39 = vld [vmem:[#allocation4 + $0xe8] sm:$0xff] }
  0x6a   :  { %121 = vst.msk [vmem:[#allocation2 + $0x1e0] sm:$0x1] %vm100_vm2, %v9357_v0  ;;  %122 = vst.msk [vmem:[#allocation2 + $0x1f8] sm:$0x1] %vm100_vm2, %v9357_v0  ;;  %v205_v41 = vld [vmem:[#allocation4 + $0x100] sm:$0xff]  ;;  %v206_v42 = vld [vmem:[#allocation4 + $0x108] sm:$0xff] }
  0x6b   :  { %123 = vst.msk [vmem:[#allocation2 + $0x210] sm:$0x1] %vm100_vm2, %v9357_v0  ;;  %124 = vst.msk [vmem:[#allocation2 + $0x228] sm:$0x1] %vm100_vm2, %v9357_v0  ;;  %v207_v44 = vld [vmem:[#allocation4 + $0x110] sm:$0xff]  ;;  %v208_v45 = vld [vmem:[#allocation4 + $0x118] sm:$0xff] }
  0x6c   :  { %125 = vst.msk [vmem:[#allocation2 + $0x240] sm:$0x1] %vm100_vm2, %v9357_v0  ;;  %126 = vst.msk [vmem:[#allocation2 + $0x258] sm:$0x1] %vm100_vm2, %v9357_v0  ;;  %v209_v46 = vld [vmem:[#allocation4 + $0x120] sm:$0xff]  ;;  %v210_v48 = vld [vmem:[#allocation4 + $0x128] sm:$0xff] }
  0x6d   :  { %127 = vst.msk [vmem:[#allocation2 + $0x270] sm:$0x1] %vm100_vm2, %v9357_v0  ;;  %128 = vst.msk [vmem:[#allocation2 + $0x288] sm:$0x1] %vm100_vm2, %v9357_v0  ;;  %v211_v49 = vld [vmem:[#allocation4 + $0x130] sm:$0xff]  ;;  %v212_v50 = vld [vmem:[#allocation4 + $0x138] sm:$0xff] }
  0x6e   :  { %129 = vst.msk [vmem:[#allocation2 + $0x2a0] sm:$0x1] %vm100_vm2, %v9357_v0  ;;  %130 = vst.msk [vmem:[#allocation2 + $0x2b8] sm:$0x1] %vm100_vm2, %v9357_v0  ;;  %v213_v51 = vld [vmem:[#allocation4 + $0x140] sm:$0xff]  ;;  %v214_v52 = vld [vmem:[#allocation4 + $0x148] sm:$0xff] }
  0x6f   :  { %131 = vst.msk [vmem:[#allocation2 + $0x2d0] sm:$0x1] %vm100_vm2, %v9357_v0  ;;  %132 = vst.msk [vmem:[#allocation2 + $0x2e8] sm:$0x1] %vm100_vm2, %v9357_v0  ;;  %v215_v53 = vld [vmem:[#allocation4 + $0x150] sm:$0xff]  ;;  %v216_v54 = vld [vmem:[#allocation4 + $0x158] sm:$0xff] }
  0x70   :  { %133 = vst.msk [vmem:[#allocation2 + $0x300] sm:$0x1] %vm100_vm2, %v9357_v0  ;;  %134 = vst.msk [vmem:[#allocation2 + $0x318] sm:$0x1] %vm100_vm2, %v9357_v0  ;;  %v217_v55 = vld [vmem:[#allocation4 + $0x160] sm:$0xff]  ;;  %v218_v56 = vld [vmem:[#allocation4 + $0x168] sm:$0xff] }
  0x71   :  { %135 = vst.msk [vmem:[#allocation2 + $0x330] sm:$0x1] %vm100_vm2, %v9357_v0  ;;  %136 = vst.msk [vmem:[#allocation2 + $0x348] sm:$0x1] %vm100_vm2, %v9357_v0  ;;  %v219_v57 = vld [vmem:[#allocation4 + $0x170] sm:$0xff]  ;;  %v220_v58 = vld [vmem:[#allocation4 + $0x178] sm:$0xff] }
  0x72   :  { %137 = vst.msk [vmem:[#allocation2 + $0x11] sm:$0x1] %vm100_vm2, %v9357_v0  ;;  %138 = vst.msk [vmem:[#allocation2 + $0x29] sm:$0x1] %vm100_vm2, %v9357_v0  ;;  %v221_v60 = vld [vmem:[#allocation4 + $0x180] sm:$0xff]  ;;  %v222_v62 = vld [vmem:[#allocation4 + $0x188] sm:$0xff] }
  0x73   :  { %139 = vst.msk [vmem:[#allocation2 + $0x41] sm:$0x1] %vm100_vm2, %v9357_v0  ;;  %140 = vst.msk [vmem:[#allocation2 + $0x59] sm:$0x1] %vm100_vm2, %v9357_v0  ;;  %v226_v4 = vld [vmem:[#allocation4 + $0x1a8] sm:$0xff]  ;;  %vm2290_vm7 = vcmask 195744  }
  0x74   :  { %141 = vst.msk [vmem:[#allocation2 + $0x71] sm:$0x1] %vm100_vm2, %v9357_v0  ;;  %142 = vst.msk [vmem:[#allocation2 + $0x89] sm:$0x1] %vm100_vm2, %v9357_v0  ;;  %s9362_s21 = smov 24   ;;  %vm2676_vm8 = vcmask 228544  }
  0x75   :  { %143 = vst.msk [vmem:[#allocation2 + $0xa1] sm:$0x1] %vm100_vm2, %v9357_v0  ;;  %144 = vst.msk [vmem:[#allocation2 + $0xb9] sm:$0x1] %vm100_vm2, %v9357_v0  ;;  %s9363_s7 = smov 28   ;;  %vm3061_vm9 = vcmask 261344  }
  0x76   :  { %145 = vst.msk [vmem:[#allocation2 + $0xd1] sm:$0x1] %vm100_vm2, %v9357_v0  ;;  %146 = vst.msk [vmem:[#allocation2 + $0xe9] sm:$0x1] %vm100_vm2, %v9357_v0  ;;  %vm3773_vm10 = vcmask 1043456   ;;  %s9364_s8 = smov 32  }
  0x77   :  { %147 = vst.msk [vmem:[#allocation2 + $0x101] sm:$0x1] %vm100_vm2, %v9357_v0  ;;  %148 = vst.msk [vmem:[#allocation2 + $0x119] sm:$0x1] %vm100_vm2, %v9357_v0  ;;  %vm3446_vm11 = vcmask 294144   ;;  %vm3580_vm12 = vcmask 293888  }
  0x78   :  { %149 = vst.msk [vmem:[#allocation2 + $0x131] sm:$0x1] %vm100_vm2, %v9357_v0  ;;  %150 = vst.msk [vmem:[#allocation2 + $0x149] sm:$0x1] %vm100_vm2, %v9357_v0  ;;  %s9365_s9 = smov [#allocation13]  }
  0x79   :  { %151 = vst.msk [vmem:[#allocation2 + $0x161] sm:$0x1] %vm100_vm2, %v9357_v0  ;;  %152 = vst.msk [vmem:[#allocation2 + $0x179] sm:$0x1] %vm100_vm2, %v9357_v0  ;;  %s8676_s10 = sshll.u32 %s9365_s9, 4  ;;  %s8677_s10 = int_to_ptr.vmem [resolvable:$true] %s8676_s10 }
  0x7a   :  { %153 = vst.msk [vmem:[#allocation2 + $0x191] sm:$0x1] %vm100_vm2, %v9357_v0  ;;  %154 = vst.msk [vmem:[#allocation2 + $0x1a9] sm:$0x1] %vm100_vm2, %v9357_v0  ;;  %s9320_s11 = scalar_lea.vmem %s8677_s10, 8192  ;;  %p9325_p13 = scmp.lt.s32.totalorder %s8677_s10, %s8677_s10 }
  0x7b   :  { %155 = vst.msk [vmem:[#allocation2 + $0x1c1] sm:$0x1] %vm100_vm2, %v9357_v0  ;;  %156 = vst.msk [vmem:[#allocation2 + $0x1d9] sm:$0x1] %vm100_vm2, %v9357_v0  ;;  %p9321_p12 = scmp.ne.s32.totalorder %s8677_s10, %s9320_s11  ;;  %p9326_p0 = scmp.lt.s32.totalorder %s9320_s11, %s9320_s11 }
  0x7c   :  { %157 = vst.msk [vmem:[#allocation2 + $0x1f1] sm:$0x1] %vm100_vm2, %v9357_v0  ;;  %158 = vst.msk [vmem:[#allocation2 + $0x209] sm:$0x1] %vm100_vm2, %v9357_v0 }
  0x7d   :  { %159 = vst.msk [vmem:[#allocation2 + $0x221] sm:$0x1] %vm100_vm2, %v9357_v0  ;;  %160 = vst.msk [vmem:[#allocation2 + $0x239] sm:$0x1] %vm100_vm2, %v9357_v0  ;;  %p9327_p1 = por %p9326_p0, %p9325_p13 }
  0x7e   :  { %161 = vst.msk [vmem:[#allocation2 + $0x251] sm:$0x1] %vm100_vm2, %v9357_v0  ;;  %162 = vst.msk [vmem:[#allocation2 + $0x269] sm:$0x1] %vm100_vm2, %v9357_v0 }
  0x7f   :  { %163 = vst.msk [vmem:[#allocation2 + $0x281] sm:$0x1] %vm100_vm2, %v9357_v0  ;;  %164 = vst.msk [vmem:[#allocation2 + $0x299] sm:$0x1] %vm100_vm2, %v9357_v0  ;;  %p9328_p2 = pnand %p9327_p1, %p9321_p12 }
  0x80   :  { %165 = vst.msk [vmem:[#allocation2 + $0x2b1] sm:$0x1] %vm100_vm2, %v9357_v0  ;;  %166 = vst.msk [vmem:[#allocation2 + $0x2c9] sm:$0x1] %vm100_vm2, %v9357_v0 }
  0x81   :  { %167 = vst.msk [vmem:[#allocation2 + $0x2e1] sm:$0x1] %vm100_vm2, %v9357_v0  ;;  %168 = vst.msk [vmem:[#allocation2 + $0x2f9] sm:$0x1] %vm100_vm2, %v9357_v0 }
  0x82   :  { %169 = vst.msk [vmem:[#allocation2 + $0x311] sm:$0x1] %vm100_vm2, %v9357_v0  ;;  %170 = vst.msk [vmem:[#allocation2 + $0x329] sm:$0x1] %vm100_vm2, %v9357_v0 }
  0x83   :  { %171 = vst.msk [vmem:[#allocation2 + $0x341] sm:$0x1] %vm100_vm2, %v9357_v0  ;;  %172 = vst.msk [vmem:[#allocation2 + $0x359] sm:$0x1] %vm100_vm2, %v9357_v0 }
  0x84   :  { %238 = vst.msk [vmem:[#allocation2 + $0x19] sm:$0xff] %vm85_vm0, %v173_v1  ;;  %239 = vst.msk [vmem:[#allocation2 + $0x21] sm:$0xff] %vm85_vm0, %v174_v2  ;;  %v223_v1 = vld [vmem:[#allocation4 + $0x190] sm:$0xff]  ;;  %v224_v2 = vld [vmem:[#allocation4 + $0x198] sm:$0xff] }
  0x85   :  { %240 = vst.msk [vmem:[#allocation2 + $0x31] sm:$0xff] %vm85_vm0, %v175_v3  ;;  %241 = vst.msk [vmem:[#allocation2 + $0x39] sm:$0xff] %vm85_vm0, %v176_v6  ;;  %v225_v3 = vld [vmem:[#allocation4 + $0x1a0] sm:$0xff]  ;;  %v227_v6 = vld [vmem:[#allocation4 + $0x1b0] sm:$0xff] }
  0x86   :  { %242 = vst.msk [vmem:[#allocation2 + $0x49] sm:$0xff] %vm85_vm0, %v177_v7  ;;  %243 = vst.msk [vmem:[#allocation2 + $0x51] sm:$0xff] %vm85_vm0, %v178_v8  ;;  %v228_v7 = vld [vmem:[#allocation4 + $0x1b8] sm:$0xff] }
  0x87   :  { %244 = vst.msk [vmem:[#allocation2 + $0x61] sm:$0xff] %vm85_vm0, %v179_v9  ;;  %245 = vst.msk [vmem:[#allocation2 + $0x69] sm:$0xff] %vm85_vm0, %v180_v10  ;;  %v302_v9 = vld [vmem:[#allocation2] sm:$0xff] }
  0x88   :  { %246 = vst.msk [vmem:[#allocation2 + $0x79] sm:$0xff] %vm85_vm0, %v181_v11  ;;  %247 = vst.msk [vmem:[#allocation2 + $0x81] sm:$0xff] %vm85_vm0, %v182_v12  ;;  %v229_v12 = vld [vmem:[#allocation4 + $0x1c0] sm:$0xff] }
  0x89   :  { %248 = vst.msk [vmem:[#allocation2 + $0x91] sm:$0xff] %vm85_vm0, %v183_v13  ;;  %249 = vst.msk [vmem:[#allocation2 + $0x99] sm:$0xff] %vm85_vm0, %v184_v14  ;;  %v230_v13 = vld [vmem:[#allocation4 + $0x1c8] sm:$0xff] }
  0x8a   :  { %250 = vst.msk [vmem:[#allocation2 + $0xa9] sm:$0xff] %vm85_vm0, %v185_v15  ;;  %251 = vst.msk [vmem:[#allocation2 + $0xb1] sm:$0xff] %vm85_vm0, %v186_v16  ;;  %v303_v14 = vld [vmem:[#allocation2 + $0x8] sm:$0xff] }
  0x8b   :  { %252 = vst.msk [vmem:[#allocation2 + $0xc1] sm:$0xff] %vm85_vm0, %v187_v17  ;;  %253 = vst.msk [vmem:[#allocation2 + $0xc9] sm:$0xff] %vm85_vm0, %v188_v18  ;;  %v432_v25 = vld [vmem:[#allocation2 + $0x19] sm:$0xff]  ;;  %v433_v29 = vld [vmem:[#allocation2 + $0x21] sm:$0xff] }
  0x8c   :  { %254 = vst.msk [vmem:[#allocation2 + $0xd9] sm:$0xff] %vm85_vm0, %v189_v19  ;;  %255 = vst.msk [vmem:[#allocation2 + $0xe1] sm:$0xff] %vm85_vm0, %v190_v20  ;;  %v434_v26 = vld [vmem:[#allocation2 + $0x31] sm:$0xff]  ;;  %562 = vrot.lane.b32.xlu1 %v432_v25, %s9358_s4  ;;  %v435_v31 = vld [vmem:[#allocation2 + $0x39] sm:$0xff] }
  0x8d   :  { %256 = vst.msk [vmem:[#allocation2 + $0xf1] sm:$0xff] %vm85_vm0, %v191_v21  ;;  %257 = vst.msk [vmem:[#allocation2 + $0xf9] sm:$0xff] %vm85_vm0, %v192_v22  ;;  %566 = vrot.lane.b32.xlu0 %v434_v26, %s9358_s4  ;;  %v436_v30 = vld [vmem:[#allocation2 + $0x49] sm:$0xff]  ;;  %v437_v37 = vld [vmem:[#allocation2 + $0x51] sm:$0xff] }
  0x8e   :  { %258 = vst.msk [vmem:[#allocation2 + $0x109] sm:$0xff] %vm85_vm0, %v193_v23  ;;  %259 = vst.msk [vmem:[#allocation2 + $0x111] sm:$0xff] %vm85_vm0, %v194_v24  ;;  %v438_v32 = vld [vmem:[#allocation2 + $0x61] sm:$0xff]  ;;  %v439_v43 = vld [vmem:[#allocation2 + $0x69] sm:$0xff] }
  0x8f   :  { %260 = vst.msk [vmem:[#allocation2 + $0x121] sm:$0xff] %vm85_vm0, %v195_v27  ;;  %261 = vst.msk [vmem:[#allocation2 + $0x129] sm:$0xff] %vm85_vm0, %v196_v28  ;;  %v440_v40 = vld [vmem:[#allocation2 + $0x79] sm:$0xff]  ;;  %v441_v59 = vld [vmem:[#allocation2 + $0x81] sm:$0xff] }
  0x90   :  { %564 = vrot.lane.b32.xlu1 %v433_v29, %s9358_s4  ;;  %262 = vst.msk [vmem:[#allocation2 + $0x139] sm:$0xff] %vm85_vm0, %v197_v33  ;;  %263 = vst.msk [vmem:[#allocation2 + $0x141] sm:$0xff] %vm85_vm0, %v198_v34  ;;  %v442_v47 = vld [vmem:[#allocation2 + $0x91] sm:$0xff]  ;;  %v443_v63 = vld [vmem:[#allocation2 + $0x99] sm:$0xff] }
  0x91   :  { %570 = vrot.lane.b32.xlu0 %v436_v30, %s9358_s4  ;;  %264 = vst.msk [vmem:[#allocation2 + $0x151] sm:$0xff] %vm85_vm0, %v199_v35  ;;  %265 = vst.msk [vmem:[#allocation2 + $0x159] sm:$0xff] %vm85_vm0, %v200_v36  ;;  %v444_v61 = vld [vmem:[#allocation2 + $0xa9] sm:$0xff]  ;;  %v445_v5 = vld [vmem:[#allocation2 + $0xb1] sm:$0xff] }
  0x92   :  { %266 = vst.msk [vmem:[#allocation2 + $0x169] sm:$0xff] %vm85_vm0, %v201_v38  ;;  %267 = vst.msk [vmem:[#allocation2 + $0x171] sm:$0xff] %vm85_vm0, %v202_v39  ;;  %v446_v0 = vld [vmem:[#allocation2 + $0xc1] sm:$0xff]  ;;  %v9706_v10 = vld [vmem:[#allocation2 + $0x18] sm:$0xff] }
  0x93   :  { %270 = vst.msk [vmem:[#allocation2 + $0x1c9] sm:$0xff] %vm85_vm0, %v205_v41  ;;  %271 = vst.msk [vmem:[#allocation2 + $0x1d1] sm:$0xff] %vm85_vm0, %v206_v42  ;;  %v448_v8 = vld [vmem:[#allocation2 + $0xd9] sm:$0xff]  ;;  %v447_v11 = vld [vmem:[#allocation2 + $0xc9] sm:$0xff] }
  0x94   :  { %568 = vrot.lane.b32.xlu1 %v435_v31, %s9358_s4  ;;  %272 = vst.msk [vmem:[#allocation2 + $0x1e1] sm:$0xff] %vm85_vm0, %v207_v44  ;;  %273 = vst.msk [vmem:[#allocation2 + $0x1e9] sm:$0xff] %vm85_vm0, %v208_v45  ;;  %v450_v15 = vld [vmem:[#allocation2 + $0xf1] sm:$0xff]  ;;  %v9715_v16 = vld [vmem:[#allocation2 + $0x20] sm:$0xff] }
  0x95   :  { %574 = vrot.lane.b32.xlu0 %v438_v32, %s9358_s4  ;;  %274 = vst.msk [vmem:[#allocation2 + $0x1f9] sm:$0xff] %vm85_vm0, %v209_v46  ;;  %275 = vst.msk [vmem:[#allocation2 + $0x201] sm:$0xff] %vm85_vm0, %v210_v48  ;;  %v231_v17 = vld [vmem:[#allocation4 + $0x1d0] sm:$0xff]  ;;  %v232_v18 = vld [vmem:[#allocation4 + $0x1d8] sm:$0xff] }
  0x96   :  { %276 = vst.msk [vmem:[#allocation2 + $0x211] sm:$0xff] %vm85_vm0, %v211_v49  ;;  %277 = vst.msk [vmem:[#allocation2 + $0x219] sm:$0xff] %vm85_vm0, %v212_v50  ;;  %v9722_v19 = vld [vmem:[#allocation2 + $0x30] sm:$0xff]  ;;  %v9724_v20 = vld [vmem:[#allocation2 + $0x38] sm:$0xff] }
  0x97   :  { %278 = vst.msk [vmem:[#allocation2 + $0x229] sm:$0xff] %vm85_vm0, %v213_v51  ;;  %279 = vst.msk [vmem:[#allocation2 + $0x231] sm:$0xff] %vm85_vm0, %v214_v52  ;;  %v233_v21 = vld [vmem:[#allocation4 + $0x1e0] sm:$0xff]  ;;  %v234_v22 = vld [vmem:[#allocation4 + $0x1e8] sm:$0xff] }
  0x98   :  { %572 = vrot.lane.b32.xlu1 %v437_v37, %s9358_s4  ;;  %280 = vst.msk [vmem:[#allocation2 + $0x241] sm:$0xff] %vm85_vm0, %v215_v53  ;;  %281 = vst.msk [vmem:[#allocation2 + $0x249] sm:$0xff] %vm85_vm0, %v216_v54  ;;  %v9731_v23 = vld [vmem:[#allocation2 + $0x48] sm:$0xff]  ;;  %v9733_v24 = vld [vmem:[#allocation2 + $0x50] sm:$0xff] }
  0x99   :  { %578 = vrot.lane.b32.xlu0 %v440_v40, %s9358_s4  ;;  %282 = vst.msk [vmem:[#allocation2 + $0x259] sm:$0xff] %vm85_vm0, %v217_v55  ;;  %283 = vst.msk [vmem:[#allocation2 + $0x261] sm:$0xff] %vm85_vm0, %v218_v56  ;;  %v449_v25 = vld [vmem:[#allocation2 + $0xe1] sm:$0xff]  ;;  %v452_v27 = vld [vmem:[#allocation2 + $0x109] sm:$0xff] }
  0x9a   :  { %284 = vst.msk [vmem:[#allocation2 + $0x271] sm:$0xff] %vm85_vm0, %v219_v57  ;;  %285 = vst.msk [vmem:[#allocation2 + $0x279] sm:$0xff] %vm85_vm0, %v220_v58  ;;  %v9742_v26 = vld [vmem:[#allocation2 + $0x60] sm:$0xff]  ;;  %v9746_v28 = vld [vmem:[#allocation2 + $0x68] sm:$0xff] }
  0x9b   :  { %286 = vst.msk [vmem:[#allocation2 + $0x289] sm:$0xff] %vm85_vm0, %v221_v60  ;;  %287 = vst.msk [vmem:[#allocation2 + $0x291] sm:$0xff] %vm85_vm0, %v222_v62  ;;  %v9750_v29 = vld [vmem:[#allocation2 + $0x78] sm:$0xff]  ;;  %v9755_v30 = vld [vmem:[#allocation2 + $0x80] sm:$0xff] }
  0x9c   :  { %576 = vrot.lane.b32.xlu1 %v439_v43, %s9358_s4  ;;  %288 = vst.msk [vmem:[#allocation2 + $0x2a1] sm:$0xff] %vm85_vm0, %v223_v1  ;;  %289 = vst.msk [vmem:[#allocation2 + $0x2a9] sm:$0xff] %vm85_vm0, %v224_v2  ;;  %v451_v31 = vld [vmem:[#allocation2 + $0xf9] sm:$0xff]  ;;  %v454_v32 = vld [vmem:[#allocation2 + $0x121] sm:$0xff] }
  0x9d   :  { %582 = vrot.lane.b32.xlu0 %v442_v47, %s9358_s4  ;;  %290 = vst.msk [vmem:[#allocation2 + $0x2b9] sm:$0xff] %vm85_vm0, %v225_v3  ;;  %291 = vst.msk [vmem:[#allocation2 + $0x2c1] sm:$0xff] %vm85_vm0, %v226_v4  ;;  %v9760_v33 = vld [vmem:[#allocation2 + $0x90] sm:$0xff]  ;;  %v9762_v34 = vld [vmem:[#allocation2 + $0x98] sm:$0xff] }
  0x9e   :  { %292 = vst.msk [vmem:[#allocation2 + $0x2d1] sm:$0xff] %vm85_vm0, %v227_v6  ;;  %293 = vst.msk [vmem:[#allocation2 + $0x2d9] sm:$0xff] %vm85_vm0, %v228_v7  ;;  %v9768_v35 = vld [vmem:[#allocation2 + $0xa8] sm:$0xff]  ;;  %v9773_v36 = vld [vmem:[#allocation2 + $0xb0] sm:$0xff] }
  0x9f   :  { %366 = vst.msk [vmem:[#allocation3] sm:$0xff] %vm85_vm0, %v302_v9  ;;  %368 = vst.msk [vmem:[#allocation3 + $0x10] sm:$0xff] %vm85_vm0, %v9706_v10  ;;  %v453_v37 = vld [vmem:[#allocation2 + $0x111] sm:$0xff]  ;;  %v9778_v38 = vld [vmem:[#allocation2 + $0xc0] sm:$0xff] }
  0xa0   :  { %580 = vrot.lane.b32.xlu1 %v441_v59, %s9358_s4  ;;  %294 = vst.msk [vmem:[#allocation2 + $0x2e9] sm:$0xff] %vm85_vm0, %v229_v12  ;;  %295 = vst.msk [vmem:[#allocation2 + $0x2f1] sm:$0xff] %vm85_vm0, %v230_v13  ;;  %v9780_v39 = vld [vmem:[#allocation2 + $0xc8] sm:$0xff]  ;;  %v456_v40 = vld [vmem:[#allocation2 + $0x139] sm:$0xff] }
  0xa1   :  { %586 = vrot.lane.b32.xlu0 %v444_v61, %s9358_s4  ;;  %367 = vst.msk [vmem:[#allocation3 + $0x8] sm:$0xff] %vm85_vm0, %v303_v14  ;;  %369 = vst.msk [vmem:[#allocation3 + $0x18] sm:$0xff] %vm85_vm0, %v9715_v16  ;;  %v9786_v41 = vld [vmem:[#allocation2 + $0xd8] sm:$0xff]  ;;  %v9788_v42 = vld [vmem:[#allocation2 + $0xe0] sm:$0xff] }
  0xa2   :  { %296 = vst.msk [vmem:[#allocation2 + $0x301] sm:$0xff] %vm85_vm0, %v231_v17  ;;  %297 = vst.msk [vmem:[#allocation2 + $0x309] sm:$0xff] %vm85_vm0, %v232_v18  ;;  %v9794_v43 = vld [vmem:[#allocation2 + $0xf0] sm:$0xff]  ;;  %v9799_v44 = vld [vmem:[#allocation2 + $0xf8] sm:$0xff] }
  0xa3   :  { %370 = vst.msk [vmem:[#allocation3 + $0x20] sm:$0xff] %vm85_vm0, %v9722_v19  ;;  %371 = vst.msk [vmem:[#allocation3 + $0x28] sm:$0xff] %vm85_vm0, %v9724_v20  ;;  %v455_v45 = vld [vmem:[#allocation2 + $0x129] sm:$0xff]  ;;  %v458_v48 = vld [vmem:[#allocation2 + $0x151] sm:$0xff] }
  0xa4   :  { %584 = vrot.lane.b32.xlu1 %v443_v63, %s9358_s4  ;;  %298 = vst.msk [vmem:[#allocation2 + $0x319] sm:$0xff] %vm85_vm0, %v233_v21  ;;  %299 = vst.msk [vmem:[#allocation2 + $0x321] sm:$0xff] %vm85_vm0, %v234_v22  ;;  %v9804_v46 = vld [vmem:[#allocation2 + $0x108] sm:$0xff]  ;;  %v9806_v47 = vld [vmem:[#allocation2 + $0x110] sm:$0xff] }
  0xa5   :  { %590 = vrot.lane.b32.xlu0 %v446_v0, %s9358_s4  ;;  %372 = vst.msk [vmem:[#allocation3 + $0x30] sm:$0xff] %vm85_vm0, %v9731_v23  ;;  %373 = vst.msk [vmem:[#allocation3 + $0x38] sm:$0xff] %vm85_vm0, %v9733_v24  ;;  %v9812_v49 = vld [vmem:[#allocation2 + $0x120] sm:$0xff]  ;;  %v9814_v50 = vld [vmem:[#allocation2 + $0x128] sm:$0xff] }
  0xa6   :  { %374 = vst.msk [vmem:[#allocation3 + $0x40] sm:$0xff] %vm85_vm0, %v9742_v26  ;;  %375 = vst.msk [vmem:[#allocation3 + $0x48] sm:$0xff] %vm85_vm0, %v9746_v28  ;;  %v9820_v51 = vld [vmem:[#allocation2 + $0x138] sm:$0xff]  ;;  %v9825_v52 = vld [vmem:[#allocation2 + $0x140] sm:$0xff] }
  0xa7   :  { %376 = vst.msk [vmem:[#allocation3 + $0x50] sm:$0xff] %vm85_vm0, %v9750_v29  ;;  %377 = vst.msk [vmem:[#allocation3 + $0x58] sm:$0xff] %vm85_vm0, %v9755_v30  ;;  %v457_v53 = vld [vmem:[#allocation2 + $0x141] sm:$0xff]  ;;  %v9830_v54 = vld [vmem:[#allocation2 + $0x150] sm:$0xff] }
  0xa8   :  { %588 = vrot.lane.b32.xlu1 %v445_v5, %s9358_s4  ;;  %378 = vst.msk [vmem:[#allocation3 + $0x60] sm:$0xff] %vm85_vm0, %v9760_v33  ;;  %379 = vst.msk [vmem:[#allocation3 + $0x68] sm:$0xff] %vm85_vm0, %v9762_v34  ;;  %v9832_v55 = vld [vmem:[#allocation2 + $0x158] sm:$0xff]  ;;  %v460_v56 = vld [vmem:[#allocation2 + $0x169] sm:$0xff] }
  0xa9   :  { %594 = vrot.lane.b32.xlu0 %v448_v8, %s9358_s4  ;;  %380 = vst.msk [vmem:[#allocation3 + $0x70] sm:$0xff] %vm85_vm0, %v9768_v35  ;;  %381 = vst.msk [vmem:[#allocation3 + $0x78] sm:$0xff] %vm85_vm0, %v9773_v36  ;;  %v9838_v57 = vld [vmem:[#allocation2 + $0x168] sm:$0xff]  ;;  %v9840_v58 = vld [vmem:[#allocation2 + $0x170] sm:$0xff] }
  0xaa   :  { %382 = vst.msk [vmem:[#allocation3 + $0x80] sm:$0xff] %vm85_vm0, %v9778_v38  ;;  %383 = vst.msk [vmem:[#allocation3 + $0x88] sm:$0xff] %vm85_vm0, %v9780_v39  ;;  %v334_v59 = vld [vmem:[#allocation2 + $0x1b0] sm:$0xff]  ;;  %v335_v60 = vld [vmem:[#allocation2 + $0x1b8] sm:$0xff] }
  0xab   :  { %384 = vst.msk [vmem:[#allocation3 + $0x90] sm:$0xff] %vm85_vm0, %v9786_v41  ;;  %385 = vst.msk [vmem:[#allocation3 + $0x98] sm:$0xff] %vm85_vm0, %v9788_v42  ;;  %v459_v61 = vld [vmem:[#allocation2 + $0x159] sm:$0xff]  ;;  %v9850_v62 = vld [vmem:[#allocation2 + $0x1c8] sm:$0xff] }
  0xac   :  { %592 = vrot.lane.b32.xlu1 %v447_v11, %s9358_s4  ;;  %386 = vst.msk [vmem:[#allocation3 + $0xa0] sm:$0xff] %vm85_vm0, %v9794_v43  ;;  %387 = vst.msk [vmem:[#allocation3 + $0xa8] sm:$0xff] %vm85_vm0, %v9799_v44  ;;  %v9852_v63 = vld [vmem:[#allocation2 + $0x1d0] sm:$0xff]  ;;  %v9859_v1 = vld [vmem:[#allocation2 + $0x1e0] sm:$0xff] }
  0xad   :  { %598 = vrot.lane.b32.xlu0 %v450_v15, %s9358_s4  ;;  %388 = vst.msk [vmem:[#allocation3 + $0xb0] sm:$0xff] %vm85_vm0, %v9804_v46  ;;  %389 = vst.msk [vmem:[#allocation3 + $0xb8] sm:$0xff] %vm85_vm0, %v9806_v47  ;;  %v462_v0 = vld [vmem:[#allocation2 + $0x1b1] sm:$0xff]  ;;  %v9861_v2 = vld [vmem:[#allocation2 + $0x1e8] sm:$0xff] }
  0xae   :  { %390 = vst.msk [vmem:[#allocation3 + $0xc0] sm:$0xff] %vm85_vm0, %v9812_v49  ;;  %391 = vst.msk [vmem:[#allocation3 + $0xc8] sm:$0xff] %vm85_vm0, %v9814_v50  ;;  %v461_v3 = vld [vmem:[#allocation2 + $0x171] sm:$0xff]  ;;  %v464_v4 = vld [vmem:[#allocation2 + $0x1c9] sm:$0xff] }
  0xaf   :  { %392 = vst.msk [vmem:[#allocation3 + $0xd0] sm:$0xff] %vm85_vm0, %v9820_v51  ;;  %393 = vst.msk [vmem:[#allocation3 + $0xd8] sm:$0xff] %vm85_vm0, %v9825_v52  ;;  %v9869_v5 = vld [vmem:[#allocation2 + $0x1f8] sm:$0xff]  ;;  %v9871_v6 = vld [vmem:[#allocation2 + $0x200] sm:$0xff] }
  0xb0   :  { %596 = vrot.lane.b32.xlu1 %v449_v25, %s9358_s4  ;;  %394 = vst.msk [vmem:[#allocation3 + $0xe0] sm:$0xff] %vm85_vm0, %v9830_v54  ;;  %395 = vst.msk [vmem:[#allocation3 + $0xe8] sm:$0xff] %vm85_vm0, %v9832_v55  ;;  %v463_v7 = vld [vmem:[#allocation2 + $0x1b9] sm:$0xff]  ;;  %v466_v8 = vld [vmem:[#allocation2 + $0x1e1] sm:$0xff] }
  0xb1   :  { %602 = vrot.lane.b32.xlu0 %v452_v27, %s9358_s4  ;;  %396 = vst.msk [vmem:[#allocation3 + $0xf0] sm:$0xff] %vm85_vm0, %v9838_v57  ;;  %397 = vst.msk [vmem:[#allocation3 + $0xf8] sm:$0xff] %vm85_vm0, %v9840_v58  ;;  %v9879_v9 = vld [vmem:[#allocation2 + $0x210] sm:$0xff]  ;;  %v9881_v11 = vld [vmem:[#allocation2 + $0x218] sm:$0xff] }
  0xb2   :  { %398 = vst.msk [vmem:[#allocation3 + $0x100] sm:$0xff] %vm85_vm0, %v334_v59  ;;  %399 = vst.msk [vmem:[#allocation3 + $0x108] sm:$0xff] %vm85_vm0, %v335_v60  ;;  %v465_v12 = vld [vmem:[#allocation2 + $0x1d1] sm:$0xff]  ;;  %v468_v13 = vld [vmem:[#allocation2 + $0x1f9] sm:$0xff] }
  0xb3   :  { %400 = vst.msk [vmem:[#allocation3 + $0x110] sm:$0xff] %vm85_vm0, %v9850_v62  ;;  %401 = vst.msk [vmem:[#allocation3 + $0x118] sm:$0xff] %vm85_vm0, %v9852_v63  ;;  %v9889_v14 = vld [vmem:[#allocation2 + $0x228] sm:$0xff]  ;;  %v9891_v15 = vld [vmem:[#allocation2 + $0x230] sm:$0xff] }
  0xb4   :  { %600 = vrot.lane.b32.xlu1 %v451_v31, %s9358_s4  ;;  %402 = vst.msk [vmem:[#allocation3 + $0x120] sm:$0xff] %vm85_vm0, %v9859_v1  ;;  %403 = vst.msk [vmem:[#allocation3 + $0x128] sm:$0xff] %vm85_vm0, %v9861_v2  ;;  %v467_v17 = vld [vmem:[#allocation2 + $0x1e9] sm:$0xff]  ;;  %v470_v18 = vld [vmem:[#allocation2 + $0x211] sm:$0xff] }
  0xb5   :  { %606 = vrot.lane.b32.xlu0 %v454_v32, %s9358_s4  ;;  %404 = vst.msk [vmem:[#allocation3 + $0x130] sm:$0xff] %vm85_vm0, %v9869_v5  ;;  %405 = vst.msk [vmem:[#allocation3 + $0x138] sm:$0xff] %vm85_vm0, %v9871_v6  ;;  %v9899_v21 = vld [vmem:[#allocation2 + $0x240] sm:$0xff]  ;;  %v9901_v22 = vld [vmem:[#allocation2 + $0x248] sm:$0xff] }
  0xb6   :  { %406 = vst.msk [vmem:[#allocation3 + $0x140] sm:$0xff] %vm85_vm0, %v9879_v9  ;;  %407 = vst.msk [vmem:[#allocation3 + $0x148] sm:$0xff] %vm85_vm0, %v9881_v11  ;;  %v469_v25 = vld [vmem:[#allocation2 + $0x201] sm:$0xff]  ;;  %v472_v27 = vld [vmem:[#allocation2 + $0x229] sm:$0xff] }
  0xb7   :  { %408 = vst.msk [vmem:[#allocation3 + $0x150] sm:$0xff] %vm85_vm0, %v9889_v14  ;;  %409 = vst.msk [vmem:[#allocation3 + $0x158] sm:$0xff] %vm85_vm0, %v9891_v15  ;;  %v9909_v31 = vld [vmem:[#allocation2 + $0x258] sm:$0xff]  ;;  %v9911_v32 = vld [vmem:[#allocation2 + $0x260] sm:$0xff] }
  0xb8   :  { %604 = vrot.lane.b32.xlu1 %v453_v37, %s9358_s4  ;;  %410 = vst.msk [vmem:[#allocation3 + $0x160] sm:$0xff] %vm85_vm0, %v9899_v21  ;;  %411 = vst.msk [vmem:[#allocation3 + $0x168] sm:$0xff] %vm85_vm0, %v9901_v22  ;;  %v471_v37 = vld [vmem:[#allocation2 + $0x219] sm:$0xff]  ;;  %v9929_v59 = vld [vmem:[#allocation2 + $0x288] sm:$0xff] }
  0xb9   :  { %610 = vrot.lane.b32.xlu0 %v456_v40, %s9358_s4  ;;  %412 = vst.msk [vmem:[#allocation3 + $0x170] sm:$0xff] %vm85_vm0, %v9909_v31  ;;  %413 = vst.msk [vmem:[#allocation3 + $0x178] sm:$0xff] %vm85_vm0, %v9911_v32  ;;  %v474_v40 = vld [vmem:[#allocation2 + $0x241] sm:$0xff]  ;;  %v9931_v60 = vld [vmem:[#allocation2 + $0x290] sm:$0xff] }
  0xba   :  { %416 = vst.msk [vmem:[#allocation3 + $0x190] sm:$0xff] %vm85_vm0, %v9929_v59  ;;  %417 = vst.msk [vmem:[#allocation3 + $0x198] sm:$0xff] %vm85_vm0, %v9931_v60 }
  0xbc   :  { %608 = vrot.lane.b32.xlu1 %v455_v45, %s9358_s4  ;;  %v9919_v45 = vld [vmem:[#allocation2 + $0x270] sm:$0xff] }
  0xbd   :  { %614 = vrot.lane.b32.xlu0 %v458_v48, %s9358_s4  ;;  %v9921_v48 = vld [vmem:[#allocation2 + $0x278] sm:$0xff]  ;;  %414 = vst.msk [vmem:[#allocation3 + $0x180] sm:$0xff] %vm85_vm0, %v9919_v45 }
  0xbe   :  { %415 = vst.msk [vmem:[#allocation3 + $0x188] sm:$0xff] %vm85_vm0, %v9921_v48 }
  0xc0   :  { %612 = vrot.lane.b32.xlu1 %v457_v53, %s9358_s4  ;;  %v473_v53 = vld [vmem:[#allocation2 + $0x231] sm:$0xff] }
  0xc1   :  { %618 = vrot.lane.b32.xlu0 %v460_v56, %s9358_s4  ;;  %v476_v56 = vld [vmem:[#allocation2 + $0x259] sm:$0xff] }
  0xc4   :  { %616 = vrot.lane.b32.xlu1 %v459_v61, %s9358_s4  ;;  %v475_v61 = vld [vmem:[#allocation2 + $0x249] sm:$0xff] }
  0xc5   :  { %622 = vrot.lane.b32.xlu0 %v462_v0, %s9358_s4  ;;  %v478_v0 = vld [vmem:[#allocation2 + $0x271] sm:$0xff] }
  0xc8   :  { %620 = vrot.lane.b32.xlu1 %v461_v3, %s9358_s4  ;;  %v9939_v3 = vld [vmem:[#allocation2 + $0x2a0] sm:$0xff] }
  0xc9   :  { %626 = vrot.lane.b32.xlu0 %v464_v4, %s9358_s4  ;;  %v9941_v4 = vld [vmem:[#allocation2 + $0x2a8] sm:$0xff]  ;;  %418 = vst.msk [vmem:[#allocation3 + $0x1a0] sm:$0xff] %vm85_vm0, %v9939_v3 }
  0xca   :  { %419 = vst.msk [vmem:[#allocation3 + $0x1a8] sm:$0xff] %vm85_vm0, %v9941_v4 }
  0xcc   :  { %624 = vrot.lane.b32.xlu1 %v463_v7, %s9358_s4  ;;  %v477_v7 = vld [vmem:[#allocation2 + $0x261] sm:$0xff] }
  0xcd   :  { %630 = vrot.lane.b32.xlu0 %v466_v8, %s9358_s4  ;;  %v480_v8 = vld [vmem:[#allocation2 + $0x289] sm:$0xff] }
  0xd0   :  { %628 = vrot.lane.b32.xlu1 %v465_v12, %s9358_s4  ;;  %v9949_v12 = vld [vmem:[#allocation2 + $0x2b8] sm:$0xff] }
  0xd1   :  { %634 = vrot.lane.b32.xlu0 %v468_v13, %s9358_s4  ;;  %v9951_v13 = vld [vmem:[#allocation2 + $0x2c0] sm:$0xff]  ;;  %420 = vst.msk [vmem:[#allocation3 + $0x1b0] sm:$0xff] %vm85_vm0, %v9949_v12 }
  0xd2   :  { %421 = vst.msk [vmem:[#allocation3 + $0x1b8] sm:$0xff] %vm85_vm0, %v9951_v13 }
  0xd4   :  { %632 = vrot.lane.b32.xlu1 %v467_v17, %s9358_s4  ;;  %v479_v17 = vld [vmem:[#allocation2 + $0x279] sm:$0xff] }
  0xd5   :  { %638 = vrot.lane.b32.xlu0 %v470_v18, %s9358_s4  ;;  %v482_v18 = vld [vmem:[#allocation2 + $0x2a1] sm:$0xff] }
  0xd8   :  { %636 = vrot.lane.b32.xlu1 %v469_v25, %s9358_s4  ;;  %v9959_v25 = vld [vmem:[#allocation2 + $0x2d0] sm:$0xff] }
  0xd9   :  { %642 = vrot.lane.b32.xlu0 %v472_v27, %s9358_s4  ;;  %v9961_v27 = vld [vmem:[#allocation2 + $0x2d8] sm:$0xff]  ;;  %422 = vst.msk [vmem:[#allocation3 + $0x1c0] sm:$0xff] %vm85_vm0, %v9959_v25 }
  0xda   :  { %13093 = vst [vmem:[#allocation18_spill] sm:$0xff] %v9961_v27  ;;  %423 = vst.msk [vmem:[#allocation3 + $0x1c8] sm:$0xff] %vm85_vm0, %v9961_v27  ;;  %v815_v27 = vld [vmem:[#allocation2 + $0x2] sm:$0xff] }
  0xdc   :  { %640 = vrot.lane.b32.xlu1 %v471_v37, %s9358_s4  ;;  %v481_v37 = vld [vmem:[#allocation2 + $0x291] sm:$0xff] }
  0xdd   :  { %646 = vrot.lane.b32.xlu0 %v474_v40, %s9358_s4  ;;  %v484_v40 = vld [vmem:[#allocation2 + $0x2b9] sm:$0xff] }
  0xe0   :  { %644 = vrot.lane.b32.xlu1 %v473_v53, %s9358_s4  ;;  %v9969_v53 = vld [vmem:[#allocation2 + $0x2e8] sm:$0xff] }
  0xe1   :  { %650 = vrot.lane.b32.xlu0 %v476_v56, %s9358_s4  ;;  %v9971_v56 = vld [vmem:[#allocation2 + $0x2f0] sm:$0xff]  ;;  %424 = vst.msk [vmem:[#allocation3 + $0x1d0] sm:$0xff] %vm85_vm0, %v9969_v53 }
  0xe2   :  { %13094 = vst [vmem:[#allocation19_spill] sm:$0xff] %v9971_v56  ;;  %425 = vst.msk [vmem:[#allocation3 + $0x1d8] sm:$0xff] %vm85_vm0, %v9971_v56  ;;  %v487_v56 = vld [vmem:[#allocation2 + $0x2d9] sm:$0xff] }
  0xe4   :  { %648 = vrot.lane.b32.xlu1 %v475_v61, %s9358_s4  ;;  %v483_v61 = vld [vmem:[#allocation2 + $0x2a9] sm:$0xff] }
  0xe5   :  { %654 = vrot.lane.b32.xlu0 %v478_v0, %s9358_s4  ;;  %v486_v0 = vld [vmem:[#allocation2 + $0x2d1] sm:$0xff] }
  0xe8   :  { %652 = vrot.lane.b32.xlu1 %v477_v7, %s9358_s4  ;;  %v9979_v7 = vld [vmem:[#allocation2 + $0x300] sm:$0xff] }
  0xe9   :  { %658 = vrot.lane.b32.xlu0 %v480_v8, %s9358_s4  ;;  %13095 = vst [vmem:[#allocation20_spill] sm:$0xff] %v9979_v7  ;;  %v9981_v8 = vld [vmem:[#allocation2 + $0x308] sm:$0xff]  ;;  %426 = vst.msk [vmem:[#allocation3 + $0x1e0] sm:$0xff] %vm85_vm0, %v9979_v7  ;;  %v492_v7 = vld [vmem:[#allocation2 + $0x319] sm:$0xff] }
  0xea   :  { %13096 = vst [vmem:[#allocation21_spill] sm:$0xff] %v9981_v8  ;;  %427 = vst.msk [vmem:[#allocation3 + $0x1e8] sm:$0xff] %vm85_vm0, %v9981_v8 }
  0xec   :  { %656 = vrot.lane.b32.xlu1 %v479_v17, %s9358_s4  ;;  %v485_v17 = vld [vmem:[#allocation2 + $0x2c1] sm:$0xff] }
  0xed   :  { %662 = vrot.lane.b32.xlu0 %v482_v18, %s9358_s4  ;;  %v488_v18 = vld [vmem:[#allocation2 + $0x2e9] sm:$0xff] }
  0xf0   :  { %660 = vrot.lane.b32.xlu1 %v481_v37, %s9358_s4  ;;  %v559_v37 = vpop.permute.xlu0 %558 }
  0xf1   :  { %666 = vrot.lane.b32.xlu0 %v484_v40, %s9358_s4  ;;  %751 = vst.msk [vmem:[#allocation3] sm:$0xff] %vm750_vm3, %v559_v37  ;;  %v9990_v40 = vld [vmem:[#allocation2 + $0x318] sm:$0xff] }
  0xf2   :  { %13097 = vst [vmem:[#allocation22_spill] sm:$0xff] %v9990_v40  ;;  %428 = vst.msk [vmem:[#allocation3 + $0x1f0] sm:$0xff] %vm85_vm0, %v9990_v40  ;;  %v491_v40 = vld [vmem:[#allocation2 + $0x309] sm:$0xff] }
  0xf4   :  { %664 = vrot.lane.b32.xlu1 %v483_v61, %s9358_s4  ;;  %v9992_v61 = vld [vmem:[#allocation2 + $0x320] sm:$0xff]  ;;  %v561_v8 = vpop.permute.xlu0 %560 }
  0xf5   :  { %670 = vrot.lane.b32.xlu0 %v486_v0, %s9358_s4  ;;  %13098 = vst [vmem:[#allocation23_spill] sm:$0xff] %v9992_v61  ;;  %429 = vst.msk [vmem:[#allocation3 + $0x1f8] sm:$0xff] %vm85_vm0, %v9992_v61  ;;  %v490_v0 = vld [vmem:[#allocation2 + $0x301] sm:$0xff] }
  0xf6   :  { %752 = vst.msk [vmem:[#allocation3 + $0x8] sm:$0xff] %vm750_vm3, %v561_v8  ;;  %v493_v8 = vld [vmem:[#allocation2 + $0x321] sm:$0xff] }
  0xf8   :  { %668 = vrot.lane.b32.xlu1 %v485_v17, %s9358_s4  ;;  %v489_v17 = vld [vmem:[#allocation2 + $0x2f1] sm:$0xff] }
  0xf9   :  { %674 = vrot.lane.b32.xlu0 %v488_v18, %s9358_s4 }
  0xfc   :  { %672 = vrot.lane.b32.xlu1 %v487_v56, %s9358_s4 }
  0xfd   :  { %678 = vrot.lane.b32.xlu0 %v490_v0, %s9358_s4 }
  0xfe   :  { %v563_v37 = vpop.permute.xlu1 %562 }
  0xff   :  { %753 = vst.msk [vmem:[#allocation3 + $0x10] sm:$0xff] %vm750_vm3, %v563_v37  ;;  %v567_v18 = vpop.permute.xlu0 %566  ;;  %v817_v37 = vld [vmem:[#allocation2 + $0x1a] sm:$0xff] }
 0x100   :  { %676 = vrot.lane.b32.xlu1 %v489_v17, %s9358_s4  ;;  %755 = vst.msk [vmem:[#allocation3 + $0x20] sm:$0xff] %vm750_vm3, %v567_v18  ;;  %v819_v18 = vld [vmem:[#allocation2 + $0x32] sm:$0xff] }
 0x101   :  { %682 = vrot.lane.b32.xlu0 %v492_v7, %s9358_s4  ;;  %v816_v7 = vld [vmem:[#allocation2 + $0xa] sm:$0xff] }
 0x102   :  { %v565_v61 = vpop.permute.xlu1 %564 }
 0x103   :  { %754 = vst.msk [vmem:[#allocation3 + $0x18] sm:$0xff] %vm750_vm3, %v565_v61  ;;  %v571_v56 = vpop.permute.xlu0 %570 }
 0x104   :  { %680 = vrot.lane.b32.xlu1 %v491_v40, %s9358_s4  ;;  %757 = vst.msk [vmem:[#allocation3 + $0x30] sm:$0xff] %vm750_vm3, %v571_v56 }
 0x105   :  { %943 = vrot.lane.b32.xlu0 %v815_v27, %s9353_s6  ;;  %v818_v27 = vld [vmem:[#allocation2 + $0x22] sm:$0xff] }
 0x106   :  { %v569_v0 = vpop.permute.xlu1 %568 }
 0x107   :  { %756 = vst.msk [vmem:[#allocation3 + $0x28] sm:$0xff] %vm750_vm3, %v569_v0  ;;  %v575_v17 = vpop.permute.xlu0 %574  ;;  %v821_v0 = vld [vmem:[#allocation2 + $0x4a] sm:$0xff] }
 0x108   :  { %684 = vrot.lane.b32.xlu1 %v493_v8, %s9358_s4  ;;  %759 = vst.msk [vmem:[#allocation3 + $0x40] sm:$0xff] %vm750_vm3, %v575_v17 }
 0x109   :  { %947 = vrot.lane.b32.xlu0 %v817_v37, %s9353_s6  ;;  %v820_v37 = vld [vmem:[#allocation2 + $0x3a] sm:$0xff] }
 0x10a   :  { %v573_v61 = vpop.permute.xlu1 %572 }
 0x10b   :  { %758 = vst.msk [vmem:[#allocation3 + $0x38] sm:$0xff] %vm750_vm3, %v573_v61  ;;  %v579_v40 = vpop.permute.xlu0 %578  ;;  %v823_v61 = vld [vmem:[#allocation2 + $0x62] sm:$0xff] }
 0x10c   :  { %945 = vrot.lane.b32.xlu1 %v816_v7, %s9353_s6  ;;  %761 = vst.msk [vmem:[#allocation3 + $0x50] sm:$0xff] %vm750_vm3, %v579_v40 }
 0x10d   :  { %951 = vrot.lane.b32.xlu0 %v819_v18, %s9353_s6  ;;  %v822_v18 = vld [vmem:[#allocation2 + $0x52] sm:$0xff] }
 0x10e   :  { %v577_v56 = vpop.permute.xlu1 %576 }
 0x10f   :  { %760 = vst.msk [vmem:[#allocation3 + $0x48] sm:$0xff] %vm750_vm3, %v577_v56  ;;  %v583_v8 = vpop.permute.xlu0 %582  ;;  %v825_v56 = vld [vmem:[#allocation2 + $0x7a] sm:$0xff] }
 0x110   :  { %949 = vrot.lane.b32.xlu1 %v818_v27, %s9353_s6  ;;  %763 = vst.msk [vmem:[#allocation3 + $0x60] sm:$0xff] %vm750_vm3, %v583_v8 }
 0x111   :  { %955 = vrot.lane.b32.xlu0 %v821_v0, %s9353_s6  ;;  %v824_v0 = vld [vmem:[#allocation2 + $0x6a] sm:$0xff] }
 0x112   :  { %v581_v17 = vpop.permute.xlu1 %580 }
 0x113   :  { %762 = vst.msk [vmem:[#allocation3 + $0x58] sm:$0xff] %vm750_vm3, %v581_v17  ;;  %v587_v7 = vpop.permute.xlu0 %586  ;;  %v827_v17 = vld [vmem:[#allocation2 + $0x92] sm:$0xff] }
 0x114   :  { %953 = vrot.lane.b32.xlu1 %v820_v37, %s9353_s6  ;;  %765 = vst.msk [vmem:[#allocation3 + $0x70] sm:$0xff] %vm750_vm3, %v587_v7 }
 0x115   :  { %959 = vrot.lane.b32.xlu0 %v823_v61, %s9353_s6  ;;  %v826_v61 = vld [vmem:[#allocation2 + $0x82] sm:$0xff] }
 0x116   :  { %v585_v40 = vpop.permute.xlu1 %584 }
 0x117   :  { %764 = vst.msk [vmem:[#allocation3 + $0x68] sm:$0xff] %vm750_vm3, %v585_v40  ;;  %v591_v27 = vpop.permute.xlu0 %590  ;;  %v829_v40 = vld [vmem:[#allocation2 + $0xaa] sm:$0xff] }
 0x118   :  { %957 = vrot.lane.b32.xlu1 %v822_v18, %s9353_s6  ;;  %767 = vst.msk [vmem:[#allocation3 + $0x80] sm:$0xff] %vm750_vm3, %v591_v27 }
 0x119   :  { %963 = vrot.lane.b32.xlu0 %v825_v56, %s9353_s6  ;;  %v828_v56 = vld [vmem:[#allocation2 + $0x9a] sm:$0xff] }
 0x11a   :  { %v589_v8 = vpop.permute.xlu1 %588 }
 0x11b   :  { %766 = vst.msk [vmem:[#allocation3 + $0x78] sm:$0xff] %vm750_vm3, %v589_v8  ;;  %v595_v37 = vpop.permute.xlu0 %594  ;;  %v831_v8 = vld [vmem:[#allocation2 + $0xc2] sm:$0xff] }
 0x11c   :  { %961 = vrot.lane.b32.xlu1 %v824_v0, %s9353_s6  ;;  %769 = vst.msk [vmem:[#allocation3 + $0x90] sm:$0xff] %vm750_vm3, %v595_v37 }
 0x11d   :  { %967 = vrot.lane.b32.xlu0 %v827_v17, %s9353_s6  ;;  %v830_v17 = vld [vmem:[#allocation2 + $0xb2] sm:$0xff] }
 0x11e   :  { %v593_v7 = vpop.permute.xlu1 %592 }
 0x11f   :  { %768 = vst.msk [vmem:[#allocation3 + $0x88] sm:$0xff] %vm750_vm3, %v593_v7  ;;  %v599_v18 = vpop.permute.xlu0 %598  ;;  %v833_v7 = vld [vmem:[#allocation2 + $0xda] sm:$0xff] }
 0x120   :  { %965 = vrot.lane.b32.xlu1 %v826_v61, %s9353_s6  ;;  %771 = vst.msk [vmem:[#allocation3 + $0xa0] sm:$0xff] %vm750_vm3, %v599_v18 }
 0x121   :  { %971 = vrot.lane.b32.xlu0 %v829_v40, %s9353_s6  ;;  %v832_v40 = vld [vmem:[#allocation2 + $0xca] sm:$0xff] }
 0x122   :  { %v597_v27 = vpop.permute.xlu1 %596 }
 0x123   :  { %770 = vst.msk [vmem:[#allocation3 + $0x98] sm:$0xff] %vm750_vm3, %v597_v27  ;;  %v603_v0 = vpop.permute.xlu0 %602  ;;  %v835_v27 = vld [vmem:[#allocation2 + $0xf2] sm:$0xff] }
 0x124   :  { %969 = vrot.lane.b32.xlu1 %v828_v56, %s9353_s6  ;;  %773 = vst.msk [vmem:[#allocation3 + $0xb0] sm:$0xff] %vm750_vm3, %v603_v0 }
 0x125   :  { %975 = vrot.lane.b32.xlu0 %v831_v8, %s9353_s6  ;;  %v834_v8 = vld [vmem:[#allocation2 + $0xe2] sm:$0xff] }
 0x126   :  { %v601_v37 = vpop.permute.xlu1 %600 }
 0x127   :  { %772 = vst.msk [vmem:[#allocation3 + $0xa8] sm:$0xff] %vm750_vm3, %v601_v37  ;;  %v607_v61 = vpop.permute.xlu0 %606  ;;  %v837_v37 = vld [vmem:[#allocation2 + $0x10a] sm:$0xff] }
 0x128   :  { %973 = vrot.lane.b32.xlu1 %v830_v17, %s9353_s6  ;;  %775 = vst.msk [vmem:[#allocation3 + $0xc0] sm:$0xff] %vm750_vm3, %v607_v61 }
 0x129   :  { %979 = vrot.lane.b32.xlu0 %v833_v7, %s9353_s6  ;;  %v836_v7 = vld [vmem:[#allocation2 + $0xfa] sm:$0xff] }
 0x12a   :  { %v605_v18 = vpop.permute.xlu1 %604 }
 0x12b   :  { %774 = vst.msk [vmem:[#allocation3 + $0xb8] sm:$0xff] %vm750_vm3, %v605_v18  ;;  %v611_v56 = vpop.permute.xlu0 %610  ;;  %v839_v18 = vld [vmem:[#allocation2 + $0x122] sm:$0xff] }
 0x12c   :  { %977 = vrot.lane.b32.xlu1 %v832_v40, %s9353_s6  ;;  %777 = vst.msk [vmem:[#allocation3 + $0xd0] sm:$0xff] %vm750_vm3, %v611_v56 }
 0x12d   :  { %983 = vrot.lane.b32.xlu0 %v835_v27, %s9353_s6  ;;  %v838_v27 = vld [vmem:[#allocation2 + $0x112] sm:$0xff] }
 0x12e   :  { %v609_v0 = vpop.permute.xlu1 %608 }
 0x12f   :  { %776 = vst.msk [vmem:[#allocation3 + $0xc8] sm:$0xff] %vm750_vm3, %v609_v0  ;;  %v615_v17 = vpop.permute.xlu0 %614  ;;  %v841_v0 = vld [vmem:[#allocation2 + $0x13a] sm:$0xff] }
 0x130   :  { %981 = vrot.lane.b32.xlu1 %v834_v8, %s9353_s6  ;;  %779 = vst.msk [vmem:[#allocation3 + $0xe0] sm:$0xff] %vm750_vm3, %v615_v17 }
 0x131   :  { %987 = vrot.lane.b32.xlu0 %v837_v37, %s9353_s6  ;;  %v840_v37 = vld [vmem:[#allocation2 + $0x12a] sm:$0xff] }
 0x132   :  { %v613_v61 = vpop.permute.xlu1 %612 }
 0x133   :  { %778 = vst.msk [vmem:[#allocation3 + $0xd8] sm:$0xff] %vm750_vm3, %v613_v61  ;;  %v619_v40 = vpop.permute.xlu0 %618  ;;  %v843_v61 = vld [vmem:[#allocation2 + $0x152] sm:$0xff] }
 0x134   :  { %985 = vrot.lane.b32.xlu1 %v836_v7, %s9353_s6  ;;  %781 = vst.msk [vmem:[#allocation3 + $0xf0] sm:$0xff] %vm750_vm3, %v619_v40 }
 0x135   :  { %991 = vrot.lane.b32.xlu0 %v839_v18, %s9353_s6  ;;  %v842_v18 = vld [vmem:[#allocation2 + $0x142] sm:$0xff] }
 0x136   :  { %v617_v56 = vpop.permute.xlu1 %616 }
 0x137   :  { %780 = vst.msk [vmem:[#allocation3 + $0xe8] sm:$0xff] %vm750_vm3, %v617_v56  ;;  %v623_v8 = vpop.permute.xlu0 %622  ;;  %v845_v56 = vld [vmem:[#allocation2 + $0x16a] sm:$0xff] }
 0x138   :  { %989 = vrot.lane.b32.xlu1 %v838_v27, %s9353_s6  ;;  %783 = vst.msk [vmem:[#allocation3 + $0x100] sm:$0xff] %vm750_vm3, %v623_v8  ;;  %v203_v27 = vld [vmem:[#allocation4 + $0xf0] sm:$0xff] }
 0x139   :  { %995 = vrot.lane.b32.xlu0 %v841_v0, %s9353_s6  ;;  %268 = vst.msk [vmem:[#allocation2 + $0x181] sm:$0xff] %vm85_vm0, %v203_v27  ;;  %v204_v0 = vld [vmem:[#allocation4 + $0xf8] sm:$0xff]  ;;  %v849_v27 = vld [vmem:[#allocation2 + $0x1ca] sm:$0xff] }
 0x13a   :  { %v621_v17 = vpop.permute.xlu1 %620  ;;  %269 = vst.msk [vmem:[#allocation2 + $0x189] sm:$0xff] %vm85_vm0, %v204_v0 }
 0x13b   :  { %782 = vst.msk [vmem:[#allocation3 + $0xf8] sm:$0xff] %vm750_vm3, %v621_v17  ;;  %v627_v7 = vpop.permute.xlu0 %626 }
 0x13c   :  { %993 = vrot.lane.b32.xlu1 %v840_v37, %s9353_s6  ;;  %785 = vst.msk [vmem:[#allocation3 + $0x110] sm:$0xff] %vm750_vm3, %v627_v7  ;;  %v844_v37 = vld [vmem:[#allocation2 + $0x15a] sm:$0xff] }
 0x13d   :  { %999 = vrot.lane.b32.xlu0 %v843_v61, %s9353_s6  ;;  %v847_v61 = vld [vmem:[#allocation2 + $0x1b2] sm:$0xff] }
 0x13e   :  { %v625_v40 = vpop.permute.xlu1 %624 }
 0x13f   :  { %784 = vst.msk [vmem:[#allocation3 + $0x108] sm:$0xff] %vm750_vm3, %v625_v40  ;;  %v631_v8 = vpop.permute.xlu0 %630  ;;  %v846_v40 = vld [vmem:[#allocation2 + $0x172] sm:$0xff] }
 0x140   :  { %997 = vrot.lane.b32.xlu1 %v842_v18, %s9353_s6  ;;  %787 = vst.msk [vmem:[#allocation3 + $0x120] sm:$0xff] %vm750_vm3, %v631_v8 }
 0x141   :  { %1003 = vrot.lane.b32.xlu0 %v845_v56, %s9353_s6  ;;  %v848_v56 = vld [vmem:[#allocation2 + $0x1ba] sm:$0xff] }
 0x142   :  { %v629_v17 = vpop.permute.xlu1 %628 }
 0x143   :  { %786 = vst.msk [vmem:[#allocation3 + $0x118] sm:$0xff] %vm750_vm3, %v629_v17  ;;  %v635_v7 = vpop.permute.xlu0 %634  ;;  %v851_v17 = vld [vmem:[#allocation2 + $0x1e2] sm:$0xff] }
 0x144   :  { %1001 = vrot.lane.b32.xlu1 %v844_v37, %s9353_s6  ;;  %789 = vst.msk [vmem:[#allocation3 + $0x130] sm:$0xff] %vm750_vm3, %v635_v7 }
 0x145   :  { %1007 = vrot.lane.b32.xlu0 %v847_v61, %s9353_s6  ;;  %v850_v61 = vld [vmem:[#allocation2 + $0x1d2] sm:$0xff] }
 0x146   :  { %v633_v18 = vpop.permute.xlu1 %632 }
 0x147   :  { %788 = vst.msk [vmem:[#allocation3 + $0x128] sm:$0xff] %vm750_vm3, %v633_v18  ;;  %v639_v8 = vpop.permute.xlu0 %638  ;;  %v853_v18 = vld [vmem:[#allocation2 + $0x1fa] sm:$0xff] }
 0x148   :  { %1005 = vrot.lane.b32.xlu1 %v846_v40, %s9353_s6  ;;  %791 = vst.msk [vmem:[#allocation3 + $0x140] sm:$0xff] %vm750_vm3, %v639_v8 }
 0x149   :  { %1011 = vrot.lane.b32.xlu0 %v849_v27, %s9353_s6  ;;  %v852_v27 = vld [vmem:[#allocation2 + $0x1ea] sm:$0xff] }
 0x14a   :  { %v637_v0 = vpop.permute.xlu1 %636 }
 0x14b   :  { %790 = vst.msk [vmem:[#allocation3 + $0x138] sm:$0xff] %vm750_vm3, %v637_v0  ;;  %v643_v37 = vpop.permute.xlu0 %642  ;;  %v855_v0 = vld [vmem:[#allocation2 + $0x212] sm:$0xff] }
 0x14c   :  { %1009 = vrot.lane.b32.xlu1 %v848_v56, %s9353_s6  ;;  %793 = vst.msk [vmem:[#allocation3 + $0x150] sm:$0xff] %vm750_vm3, %v643_v37 }
 0x14d   :  { %1015 = vrot.lane.b32.xlu0 %v851_v17, %s9353_s6  ;;  %v854_v17 = vld [vmem:[#allocation2 + $0x202] sm:$0xff] }
 0x14e   :  { %v641_v7 = vpop.permute.xlu1 %640 }
 0x14f   :  { %792 = vst.msk [vmem:[#allocation3 + $0x148] sm:$0xff] %vm750_vm3, %v641_v7  ;;  %v647_v40 = vpop.permute.xlu0 %646  ;;  %v857_v7 = vld [vmem:[#allocation2 + $0x22a] sm:$0xff] }
 0x150   :  { %1013 = vrot.lane.b32.xlu1 %v850_v61, %s9353_s6  ;;  %795 = vst.msk [vmem:[#allocation3 + $0x160] sm:$0xff] %vm750_vm3, %v647_v40 }
 0x151   :  { %1019 = vrot.lane.b32.xlu0 %v853_v18, %s9353_s6  ;;  %v856_v18 = vld [vmem:[#allocation2 + $0x21a] sm:$0xff] }
 0x152   :  { %v645_v8 = vpop.permute.xlu1 %644 }
 0x153   :  { %794 = vst.msk [vmem:[#allocation3 + $0x158] sm:$0xff] %vm750_vm3, %v645_v8  ;;  %v651_v56 = vpop.permute.xlu0 %650  ;;  %v859_v8 = vld [vmem:[#allocation2 + $0x242] sm:$0xff] }
 0x154   :  { %1017 = vrot.lane.b32.xlu1 %v852_v27, %s9353_s6  ;;  %797 = vst.msk [vmem:[#allocation3 + $0x170] sm:$0xff] %vm750_vm3, %v651_v56 }
 0x155   :  { %1023 = vrot.lane.b32.xlu0 %v855_v0, %s9353_s6  ;;  %v858_v0 = vld [vmem:[#allocation2 + $0x232] sm:$0xff] }
 0x156   :  { %v649_v37 = vpop.permute.xlu1 %648 }
 0x157   :  { %796 = vst.msk [vmem:[#allocation3 + $0x168] sm:$0xff] %vm750_vm3, %v649_v37  ;;  %v655_v61 = vpop.permute.xlu0 %654  ;;  %v861_v37 = vld [vmem:[#allocation2 + $0x25a] sm:$0xff] }
 0x158   :  { %1021 = vrot.lane.b32.xlu1 %v854_v17, %s9353_s6  ;;  %799 = vst.msk [vmem:[#allocation3 + $0x180] sm:$0xff] %vm750_vm3, %v655_v61 }
 0x159   :  { %1027 = vrot.lane.b32.xlu0 %v857_v7, %s9353_s6  ;;  %v860_v7 = vld [vmem:[#allocation2 + $0x24a] sm:$0xff] }
 0x15a   :  { %v653_v40 = vpop.permute.xlu1 %652 }
 0x15b   :  { %798 = vst.msk [vmem:[#allocation3 + $0x178] sm:$0xff] %vm750_vm3, %v653_v40  ;;  %v659_v27 = vpop.permute.xlu0 %658  ;;  %v863_v40 = vld [vmem:[#allocation2 + $0x272] sm:$0xff] }
 0x15c   :  { %1025 = vrot.lane.b32.xlu1 %v856_v18, %s9353_s6  ;;  %801 = vst.msk [vmem:[#allocation3 + $0x190] sm:$0xff] %vm750_vm3, %v659_v27 }
 0x15d   :  { %1031 = vrot.lane.b32.xlu0 %v859_v8, %s9353_s6  ;;  %v862_v8 = vld [vmem:[#allocation2 + $0x262] sm:$0xff] }
 0x15e   :  { %v657_v56 = vpop.permute.xlu1 %656 }
 0x15f   :  { %800 = vst.msk [vmem:[#allocation3 + $0x188] sm:$0xff] %vm750_vm3, %v657_v56  ;;  %v663_v17 = vpop.permute.xlu0 %662  ;;  %v865_v56 = vld [vmem:[#allocation2 + $0x28a] sm:$0xff] }
 0x160   :  { %1029 = vrot.lane.b32.xlu1 %v858_v0, %s9353_s6  ;;  %803 = vst.msk [vmem:[#allocation3 + $0x1a0] sm:$0xff] %vm750_vm3, %v663_v17 }
 0x161   :  { %1035 = vrot.lane.b32.xlu0 %v861_v37, %s9353_s6  ;;  %v864_v37 = vld [vmem:[#allocation2 + $0x27a] sm:$0xff] }
 0x162   :  { %v661_v61 = vpop.permute.xlu1 %660 }
 0x163   :  { %802 = vst.msk [vmem:[#allocation3 + $0x198] sm:$0xff] %vm750_vm3, %v661_v61  ;;  %v667_v18 = vpop.permute.xlu0 %666  ;;  %v867_v61 = vld [vmem:[#allocation2 + $0x2a2] sm:$0xff] }
 0x164   :  { %1033 = vrot.lane.b32.xlu1 %v860_v7, %s9353_s6  ;;  %805 = vst.msk [vmem:[#allocation3 + $0x1b0] sm:$0xff] %vm750_vm3, %v667_v18 }
 0x165   :  { %1039 = vrot.lane.b32.xlu0 %v863_v40, %s9353_s6  ;;  %v866_v40 = vld [vmem:[#allocation2 + $0x292] sm:$0xff] }
 0x166   :  { %v665_v27 = vpop.permute.xlu1 %664 }
 0x167   :  { %804 = vst.msk [vmem:[#allocation3 + $0x1a8] sm:$0xff] %vm750_vm3, %v665_v27  ;;  %v671_v0 = vpop.permute.xlu0 %670  ;;  %v869_v27 = vld [vmem:[#allocation2 + $0x2ba] sm:$0xff] }
 0x168   :  { %1037 = vrot.lane.b32.xlu1 %v862_v8, %s9353_s6  ;;  %807 = vst.msk [vmem:[#allocation3 + $0x1c0] sm:$0xff] %vm750_vm3, %v671_v0 }
 0x169   :  { %1043 = vrot.lane.b32.xlu0 %v865_v56, %s9353_s6  ;;  %v868_v56 = vld [vmem:[#allocation2 + $0x2aa] sm:$0xff] }
 0x16a   :  { %v669_v17 = vpop.permute.xlu1 %668 }
 0x16b   :  { %806 = vst.msk [vmem:[#allocation3 + $0x1b8] sm:$0xff] %vm750_vm3, %v669_v17  ;;  %v675_v7 = vpop.permute.xlu0 %674  ;;  %v871_v17 = vld [vmem:[#allocation2 + $0x2d2] sm:$0xff] }
 0x16c   :  { %1041 = vrot.lane.b32.xlu1 %v864_v37, %s9353_s6  ;;  %809 = vst.msk [vmem:[#allocation3 + $0x1d0] sm:$0xff] %vm750_vm3, %v675_v7 }
 0x16d   :  { %1047 = vrot.lane.b32.xlu0 %v867_v61, %s9353_s6  ;;  %v870_v61 = vld [vmem:[#allocation2 + $0x2c2] sm:$0xff] }
 0x16e   :  { %v673_v18 = vpop.permute.xlu1 %672 }
 0x16f   :  { %808 = vst.msk [vmem:[#allocation3 + $0x1c8] sm:$0xff] %vm750_vm3, %v673_v18  ;;  %v679_v8 = vpop.permute.xlu0 %678 }
 0x170   :  { %1045 = vrot.lane.b32.xlu1 %v866_v40, %s9353_s6  ;;  %811 = vst.msk [vmem:[#allocation3 + $0x1e0] sm:$0xff] %vm750_vm3, %v679_v8  ;;  %v873_v40 = vld [vmem:[#allocation2 + $0x2ea] sm:$0xff] }
 0x171   :  { %1051 = vrot.lane.b32.xlu0 %v869_v27, %s9353_s6  ;;  %v872_v27 = vld [vmem:[#allocation2 + $0x2da] sm:$0xff] }
 0x172   :  { %v677_v0 = vpop.permute.xlu1 %676 }
 0x173   :  { %810 = vst.msk [vmem:[#allocation3 + $0x1d8] sm:$0xff] %vm750_vm3, %v677_v0  ;;  %v683_v37 = vpop.permute.xlu0 %682 }
 0x174   :  { %1049 = vrot.lane.b32.xlu1 %v868_v56, %s9353_s6  ;;  %813 = vst.msk [vmem:[#allocation3 + $0x1f0] sm:$0xff] %vm750_vm3, %v683_v37  ;;  %v875_v56 = vld [vmem:[#allocation2 + $0x302] sm:$0xff] }
 0x175   :  { %1055 = vrot.lane.b32.xlu0 %v871_v17, %s9353_s6  ;;  %v874_v17 = vld [vmem:[#allocation2 + $0x2f2] sm:$0xff] }
 0x176   :  { %v681_v7 = vpop.permute.xlu1 %680 }
 0x177   :  { %812 = vst.msk [vmem:[#allocation3 + $0x1e8] sm:$0xff] %vm750_vm3, %v681_v7  ;;  %v944_v18 = vpop.permute.xlu0 %943  ;;  %v877_v7 = vld [vmem:[#allocation2 + $0x31a] sm:$0xff] }
 0x178   :  { %1053 = vrot.lane.b32.xlu1 %v870_v61, %s9353_s6  ;;  %1136 = vst.msk [vmem:[#allocation3] sm:$0xff] %vm1135_vm4, %v944_v18  ;;  %v235_v61 = vld [vmem:[#allocation4 + $0x1f0] sm:$0xff] }
 0x179   :  { %1059 = vrot.lane.b32.xlu0 %v873_v40, %s9353_s6  ;;  %300 = vst.msk [vmem:[#allocation2 + $0x331] sm:$0xff] %vm85_vm0, %v235_v61  ;;  %v236_v40 = vld [vmem:[#allocation4 + $0x1f8] sm:$0xff] }
 0x17a   :  { %v685_v8 = vpop.permute.xlu1 %684  ;;  %301 = vst.msk [vmem:[#allocation2 + $0x339] sm:$0xff] %vm85_vm0, %v236_v40  ;;  %v1230_v40 = vld [vmem:[#allocation2 + $0x180] sm:$0xff] }
 0x17b   :  { %814 = vst.msk [vmem:[#allocation3 + $0x1f8] sm:$0xff] %vm750_vm3, %v685_v8  ;;  %v948_v0 = vpop.permute.xlu0 %947 }
 0x17c   :  { %1057 = vrot.lane.b32.xlu1 %v872_v27, %s9353_s6  ;;  %1138 = vst.msk [vmem:[#allocation3 + $0x10] sm:$0xff] %vm1135_vm4, %v948_v0  ;;  %v876_v27 = vld [vmem:[#allocation2 + $0x30a] sm:$0xff]  ;;  %v878_v0 = vld [vmem:[#allocation2 + $0x322] sm:$0xff] }
 0x17d   :  { %1063 = vrot.lane.b32.xlu0 %v875_v56, %s9353_s6 }
 0x17e   :  { %v946_v37 = vpop.permute.xlu1 %945 }
 0x17f   :  { %1137 = vst.msk [vmem:[#allocation3 + $0x8] sm:$0xff] %vm1135_vm4, %v946_v37  ;;  %v952_v18 = vpop.permute.xlu0 %951 }
 0x180   :  { %1061 = vrot.lane.b32.xlu1 %v874_v17, %s9353_s6  ;;  %1140 = vst.msk [vmem:[#allocation3 + $0x20] sm:$0xff] %vm1135_vm4, %v952_v18 }
 0x181   :  { %1067 = vrot.lane.b32.xlu0 %v877_v7, %s9353_s6 }
 0x182   :  { %v950_v8 = vpop.permute.xlu1 %949 }
 0x183   :  { %1139 = vst.msk [vmem:[#allocation3 + $0x18] sm:$0xff] %vm1135_vm4, %v950_v8  ;;  %v956_v56 = vpop.permute.xlu0 %955 }
 0x184   :  { %1065 = vrot.lane.b32.xlu1 %v876_v27, %s9353_s6  ;;  %1142 = vst.msk [vmem:[#allocation3 + $0x30] sm:$0xff] %vm1135_vm4, %v956_v56 }
 0x185   :  { %1328 = vrot.lane.b32.xlu0 %v9706_v10, %s9359_s28 }
 0x186   :  { %v954_v17 = vpop.permute.xlu1 %953 }
 0x187   :  { %1141 = vst.msk [vmem:[#allocation3 + $0x28] sm:$0xff] %vm1135_vm4, %v954_v17  ;;  %v960_v37 = vpop.permute.xlu0 %959 }
 0x188   :  { %1069 = vrot.lane.b32.xlu1 %v878_v0, %s9353_s6  ;;  %1144 = vst.msk [vmem:[#allocation3 + $0x40] sm:$0xff] %vm1135_vm4, %v960_v37  ;;  %v13099_v0 = vld [vmem:[#allocation18_spill] sm:$0xff]  ;;  %v13101_v37 = vld [vmem:[#allocation19_spill] sm:$0xff] }
 0x189   :  { %1332 = vrot.lane.b32.xlu0 %v9722_v19, %s9359_s28 }
 0x18a   :  { %v958_v7 = vpop.permute.xlu1 %957 }
 0x18b   :  { %1143 = vst.msk [vmem:[#allocation3 + $0x38] sm:$0xff] %vm1135_vm4, %v958_v7  ;;  %v964_v61 = vpop.permute.xlu0 %963 }
 0x18c   :  { %1330 = vrot.lane.b32.xlu1 %v9715_v16, %s9359_s28  ;;  %1146 = vst.msk [vmem:[#allocation3 + $0x50] sm:$0xff] %vm1135_vm4, %v964_v61  ;;  %v1262_v61 = vld [vmem:[#allocation2 + $0x330] sm:$0xff] }
 0x18d   :  { %1336 = vrot.lane.b32.xlu0 %v9731_v23, %s9359_s28 }
 0x18e   :  { %v962_v10 = vpop.permute.xlu1 %961 }
 0x18f   :  { %1145 = vst.msk [vmem:[#allocation3 + $0x48] sm:$0xff] %vm1135_vm4, %v962_v10  ;;  %v968_v18 = vpop.permute.xlu0 %967 }
 0x190   :  { %1334 = vrot.lane.b32.xlu1 %v9724_v20, %s9359_s28  ;;  %1148 = vst.msk [vmem:[#allocation3 + $0x60] sm:$0xff] %vm1135_vm4, %v968_v18  ;;  %v13103_v18 = vld [vmem:[#allocation21_spill] sm:$0xff] }
 0x191   :  { %1340 = vrot.lane.b32.xlu0 %v9742_v26, %s9359_s28 }
 0x192   :  { %v966_v19 = vpop.permute.xlu1 %965 }
 0x193   :  { %1147 = vst.msk [vmem:[#allocation3 + $0x58] sm:$0xff] %vm1135_vm4, %v966_v19  ;;  %v972_v16 = vpop.permute.xlu0 %971 }
 0x194   :  { %1338 = vrot.lane.b32.xlu1 %v9733_v24, %s9359_s28  ;;  %1150 = vst.msk [vmem:[#allocation3 + $0x70] sm:$0xff] %vm1135_vm4, %v972_v16  ;;  %v1585_v16 = vld [vmem:[#allocation2 + $0x19] sm:$0xff] }
 0x195   :  { %1344 = vrot.lane.b32.xlu0 %v9750_v29, %s9359_s28 }
 0x196   :  { %v970_v23 = vpop.permute.xlu1 %969 }
 0x197   :  { %1149 = vst.msk [vmem:[#allocation3 + $0x68] sm:$0xff] %vm1135_vm4, %v970_v23  ;;  %v976_v20 = vpop.permute.xlu0 %975 }
 0x198   :  { %1342 = vrot.lane.b32.xlu1 %v9746_v28, %s9359_s28  ;;  %1152 = vst.msk [vmem:[#allocation3 + $0x80] sm:$0xff] %vm1135_vm4, %v976_v20  ;;  %v13104_v20 = vld [vmem:[#allocation23_spill] sm:$0xff] }
 0x199   :  { %1348 = vrot.lane.b32.xlu0 %v9760_v33, %s9359_s28 }
 0x19a   :  { %v974_v26 = vpop.permute.xlu1 %973 }
 0x19b   :  { %1151 = vst.msk [vmem:[#allocation3 + $0x78] sm:$0xff] %vm1135_vm4, %v974_v26  ;;  %v980_v24 = vpop.permute.xlu0 %979  ;;  %v1263_v26 = vld [vmem:[#allocation2 + $0x338] sm:$0xff] }
 0x19c   :  { %1346 = vrot.lane.b32.xlu1 %v9755_v30, %s9359_s28  ;;  %1154 = vst.msk [vmem:[#allocation3 + $0x90] sm:$0xff] %vm1135_vm4, %v980_v24 }
 0x19d   :  { %1352 = vrot.lane.b32.xlu0 %v9768_v35, %s9359_s28 }
 0x19e   :  { %v978_v29 = vpop.permute.xlu1 %977 }
 0x19f   :  { %1153 = vst.msk [vmem:[#allocation3 + $0x88] sm:$0xff] %vm1135_vm4, %v978_v29  ;;  %v984_v28 = vpop.permute.xlu0 %983  ;;  %v1587_v29 = vld [vmem:[#allocation2 + $0x31] sm:$0xff] }
 0x1a0   :  { %1350 = vrot.lane.b32.xlu1 %v9762_v34, %s9359_s28  ;;  %1156 = vst.msk [vmem:[#allocation3 + $0xa0] sm:$0xff] %vm1135_vm4, %v984_v28 }
 0x1a1   :  { %1356 = vrot.lane.b32.xlu0 %v9778_v38, %s9359_s28 }
 0x1a2   :  { %v982_v33 = vpop.permute.xlu1 %981 }
 0x1a3   :  { %1155 = vst.msk [vmem:[#allocation3 + $0x98] sm:$0xff] %vm1135_vm4, %v982_v33  ;;  %v988_v30 = vpop.permute.xlu0 %987  ;;  %v1586_v33 = vld [vmem:[#allocation2 + $0x21] sm:$0xff] }
 0x1a4   :  { %1354 = vrot.lane.b32.xlu1 %v9773_v36, %s9359_s28  ;;  %1158 = vst.msk [vmem:[#allocation3 + $0xb0] sm:$0xff] %vm1135_vm4, %v988_v30 }
 0x1a5   :  { %1360 = vrot.lane.b32.xlu0 %v9786_v41, %s9359_s28 }
 0x1a6   :  { %v986_v35 = vpop.permute.xlu1 %985 }
 0x1a7   :  { %1157 = vst.msk [vmem:[#allocation3 + $0xa8] sm:$0xff] %vm1135_vm4, %v986_v35  ;;  %v992_v34 = vpop.permute.xlu0 %991  ;;  %v1589_v35 = vld [vmem:[#allocation2 + $0x49] sm:$0xff] }
 0x1a8   :  { %1358 = vrot.lane.b32.xlu1 %v9780_v39, %s9359_s28  ;;  %1160 = vst.msk [vmem:[#allocation3 + $0xc0] sm:$0xff] %vm1135_vm4, %v992_v34 }
 0x1a9   :  { %1364 = vrot.lane.b32.xlu0 %v9794_v43, %s9359_s28 }
 0x1aa   :  { %v990_v38 = vpop.permute.xlu1 %989 }
 0x1ab   :  { %1159 = vst.msk [vmem:[#allocation3 + $0xb8] sm:$0xff] %vm1135_vm4, %v990_v38  ;;  %v996_v36 = vpop.permute.xlu0 %995  ;;  %v1588_v38 = vld [vmem:[#allocation2 + $0x39] sm:$0xff] }
 0x1ac   :  { %1362 = vrot.lane.b32.xlu1 %v9788_v42, %s9359_s28  ;;  %1162 = vst.msk [vmem:[#allocation3 + $0xd0] sm:$0xff] %vm1135_vm4, %v996_v36 }
 0x1ad   :  { %1368 = vrot.lane.b32.xlu0 %v9804_v46, %s9359_s28 }
 0x1ae   :  { %v994_v41 = vpop.permute.xlu1 %993 }
 0x1af   :  { %1161 = vst.msk [vmem:[#allocation3 + $0xc8] sm:$0xff] %vm1135_vm4, %v994_v41  ;;  %v1000_v39 = vpop.permute.xlu0 %999  ;;  %v1591_v41 = vld [vmem:[#allocation2 + $0x61] sm:$0xff] }
 0x1b0   :  { %1366 = vrot.lane.b32.xlu1 %v9799_v44, %s9359_s28  ;;  %1164 = vst.msk [vmem:[#allocation3 + $0xe0] sm:$0xff] %vm1135_vm4, %v1000_v39 }
 0x1b1   :  { %1372 = vrot.lane.b32.xlu0 %v9812_v49, %s9359_s28 }
 0x1b2   :  { %v998_v43 = vpop.permute.xlu1 %997 }
 0x1b3   :  { %1163 = vst.msk [vmem:[#allocation3 + $0xd8] sm:$0xff] %vm1135_vm4, %v998_v43  ;;  %v1004_v42 = vpop.permute.xlu0 %1003  ;;  %v1590_v43 = vld [vmem:[#allocation2 + $0x51] sm:$0xff] }
 0x1b4   :  { %1370 = vrot.lane.b32.xlu1 %v9806_v47, %s9359_s28  ;;  %1166 = vst.msk [vmem:[#allocation3 + $0xf0] sm:$0xff] %vm1135_vm4, %v1004_v42 }
 0x1b5   :  { %1376 = vrot.lane.b32.xlu0 %v9820_v51, %s9359_s28 }
 0x1b6   :  { %v1002_v46 = vpop.permute.xlu1 %1001 }
 0x1b7   :  { %1165 = vst.msk [vmem:[#allocation3 + $0xe8] sm:$0xff] %vm1135_vm4, %v1002_v46  ;;  %v1008_v44 = vpop.permute.xlu0 %1007  ;;  %v1593_v46 = vld [vmem:[#allocation2 + $0x79] sm:$0xff] }
 0x1b8   :  { %1374 = vrot.lane.b32.xlu1 %v9814_v50, %s9359_s28  ;;  %1168 = vst.msk [vmem:[#allocation3 + $0x100] sm:$0xff] %vm1135_vm4, %v1008_v44 }
 0x1b9   :  { %1380 = vrot.lane.b32.xlu0 %v9830_v54, %s9359_s28 }
 0x1ba   :  { %v1006_v49 = vpop.permute.xlu1 %1005 }
 0x1bb   :  { %1167 = vst.msk [vmem:[#allocation3 + $0xf8] sm:$0xff] %vm1135_vm4, %v1006_v49  ;;  %v1012_v47 = vpop.permute.xlu0 %1011  ;;  %v1592_v49 = vld [vmem:[#allocation2 + $0x69] sm:$0xff] }
 0x1bc   :  { %1378 = vrot.lane.b32.xlu1 %v9825_v52, %s9359_s28  ;;  %1170 = vst.msk [vmem:[#allocation3 + $0x110] sm:$0xff] %vm1135_vm4, %v1012_v47 }
 0x1bd   :  { %1384 = vrot.lane.b32.xlu0 %v9838_v57, %s9359_s28  ;;  %v1231_v57 = vld [vmem:[#allocation2 + $0x188] sm:$0xff] }
 0x1be   :  { %v1010_v51 = vpop.permute.xlu1 %1009 }
 0x1bf   :  { %1169 = vst.msk [vmem:[#allocation3 + $0x108] sm:$0xff] %vm1135_vm4, %v1010_v51  ;;  %v1016_v50 = vpop.permute.xlu0 %1015  ;;  %v1595_v51 = vld [vmem:[#allocation2 + $0x91] sm:$0xff] }
 0x1c0   :  { %1382 = vrot.lane.b32.xlu1 %v9832_v55, %s9359_s28  ;;  %1172 = vst.msk [vmem:[#allocation3 + $0x120] sm:$0xff] %vm1135_vm4, %v1016_v50  ;;  %v1594_v50 = vld [vmem:[#allocation2 + $0x81] sm:$0xff] }
 0x1c1   :  { %1388 = vrot.lane.b32.xlu0 %v1230_v40, %s9359_s28 }
 0x1c2   :  { %v1014_v54 = vpop.permute.xlu1 %1013 }
 0x1c3   :  { %1171 = vst.msk [vmem:[#allocation3 + $0x118] sm:$0xff] %vm1135_vm4, %v1014_v54  ;;  %v1020_v52 = vpop.permute.xlu0 %1019 }
 0x1c4   :  { %1386 = vrot.lane.b32.xlu1 %v9840_v58, %s9359_s28  ;;  %1174 = vst.msk [vmem:[#allocation3 + $0x130] sm:$0xff] %vm1135_vm4, %v1020_v52  ;;  %v1597_v52 = vld [vmem:[#allocation2 + $0xa9] sm:$0xff] }
 0x1c5   :  { %1392 = vrot.lane.b32.xlu0 %v9850_v62, %s9359_s28 }
 0x1c6   :  { %v1018_v27 = vpop.permute.xlu1 %1017 }
 0x1c7   :  { %1173 = vst.msk [vmem:[#allocation3 + $0x128] sm:$0xff] %vm1135_vm4, %v1018_v27  ;;  %v1024_v55 = vpop.permute.xlu0 %1023  ;;  %v1596_v27 = vld [vmem:[#allocation2 + $0x99] sm:$0xff] }
 0x1c8   :  { %1390 = vrot.lane.b32.xlu1 %v1231_v57, %s9359_s28  ;;  %1176 = vst.msk [vmem:[#allocation3 + $0x140] sm:$0xff] %vm1135_vm4, %v1024_v55 }
 0x1c9   :  { %1396 = vrot.lane.b32.xlu0 %v9859_v1, %s9359_s28 }
 0x1ca   :  { %v1022_v8 = vpop.permute.xlu1 %1021 }
 0x1cb   :  { %1175 = vst.msk [vmem:[#allocation3 + $0x138] sm:$0xff] %vm1135_vm4, %v1022_v8  ;;  %v1028_v58 = vpop.permute.xlu0 %1027  ;;  %v1599_v8 = vld [vmem:[#allocation2 + $0xc1] sm:$0xff] }
 0x1cc   :  { %1394 = vrot.lane.b32.xlu1 %v9852_v63, %s9359_s28  ;;  %1178 = vst.msk [vmem:[#allocation3 + $0x150] sm:$0xff] %vm1135_vm4, %v1028_v58 }
 0x1cd   :  { %1400 = vrot.lane.b32.xlu0 %v9869_v5, %s9359_s28 }
 0x1ce   :  { %v1026_v62 = vpop.permute.xlu1 %1025 }
 0x1cf   :  { %1177 = vst.msk [vmem:[#allocation3 + $0x148] sm:$0xff] %vm1135_vm4, %v1026_v62  ;;  %v1032_v56 = vpop.permute.xlu0 %1031  ;;  %v1598_v62 = vld [vmem:[#allocation2 + $0xb1] sm:$0xff] }
 0x1d0   :  { %1398 = vrot.lane.b32.xlu1 %v9861_v2, %s9359_s28  ;;  %1180 = vst.msk [vmem:[#allocation3 + $0x160] sm:$0xff] %vm1135_vm4, %v1032_v56 }
 0x1d1   :  { %1404 = vrot.lane.b32.xlu0 %v9879_v9, %s9359_s28 }
 0x1d2   :  { %v1030_v1 = vpop.permute.xlu1 %1029 }
 0x1d3   :  { %1179 = vst.msk [vmem:[#allocation3 + $0x158] sm:$0xff] %vm1135_vm4, %v1030_v1  ;;  %v1036_v63 = vpop.permute.xlu0 %1035  ;;  %v1601_v1 = vld [vmem:[#allocation2 + $0xd9] sm:$0xff] }
 0x1d4   :  { %1402 = vrot.lane.b32.xlu1 %v9871_v6, %s9359_s28  ;;  %1182 = vst.msk [vmem:[#allocation3 + $0x170] sm:$0xff] %vm1135_vm4, %v1036_v63 }
 0x1d5   :  { %1408 = vrot.lane.b32.xlu0 %v9889_v14, %s9359_s28 }
 0x1d6   :  { %v1034_v5 = vpop.permute.xlu1 %1033 }
 0x1d7   :  { %1181 = vst.msk [vmem:[#allocation3 + $0x168] sm:$0xff] %vm1135_vm4, %v1034_v5  ;;  %v1040_v2 = vpop.permute.xlu0 %1039  ;;  %v1600_v5 = vld [vmem:[#allocation2 + $0xc9] sm:$0xff] }
 0x1d8   :  { %1406 = vrot.lane.b32.xlu1 %v9881_v11, %s9359_s28  ;;  %1184 = vst.msk [vmem:[#allocation3 + $0x180] sm:$0xff] %vm1135_vm4, %v1040_v2 }
 0x1d9   :  { %1412 = vrot.lane.b32.xlu0 %v9899_v21, %s9359_s28 }
 0x1da   :  { %v1038_v9 = vpop.permute.xlu1 %1037 }
 0x1db   :  { %1183 = vst.msk [vmem:[#allocation3 + $0x178] sm:$0xff] %vm1135_vm4, %v1038_v9  ;;  %v1044_v6 = vpop.permute.xlu0 %1043  ;;  %v1603_v9 = vld [vmem:[#allocation2 + $0xf1] sm:$0xff] }
 0x1dc   :  { %1410 = vrot.lane.b32.xlu1 %v9891_v15, %s9359_s28  ;;  %1186 = vst.msk [vmem:[#allocation3 + $0x190] sm:$0xff] %vm1135_vm4, %v1044_v6 }
 0x1dd   :  { %1416 = vrot.lane.b32.xlu0 %v9909_v31, %s9359_s28 }
 0x1de   :  { %v1042_v14 = vpop.permute.xlu1 %1041 }
 0x1df   :  { %1185 = vst.msk [vmem:[#allocation3 + $0x188] sm:$0xff] %vm1135_vm4, %v1042_v14  ;;  %v1048_v11 = vpop.permute.xlu0 %1047  ;;  %v1602_v14 = vld [vmem:[#allocation2 + $0xe1] sm:$0xff] }
 0x1e0   :  { %1414 = vrot.lane.b32.xlu1 %v9901_v22, %s9359_s28  ;;  %1188 = vst.msk [vmem:[#allocation3 + $0x1a0] sm:$0xff] %vm1135_vm4, %v1048_v11 }
 0x1e1   :  { %1420 = vrot.lane.b32.xlu0 %v9919_v45, %s9359_s28 }
 0x1e2   :  { %v1046_v21 = vpop.permute.xlu1 %1045 }
 0x1e3   :  { %1187 = vst.msk [vmem:[#allocation3 + $0x198] sm:$0xff] %vm1135_vm4, %v1046_v21  ;;  %v1052_v15 = vpop.permute.xlu0 %1051  ;;  %v1605_v21 = vld [vmem:[#allocation2 + $0x109] sm:$0xff] }
 0x1e4   :  { %1418 = vrot.lane.b32.xlu1 %v9911_v32, %s9359_s28  ;;  %1190 = vst.msk [vmem:[#allocation3 + $0x1b0] sm:$0xff] %vm1135_vm4, %v1052_v15 }
 0x1e5   :  { %1424 = vrot.lane.b32.xlu0 %v9929_v59, %s9359_s28 }
 0x1e6   :  { %v1050_v31 = vpop.permute.xlu1 %1049 }
 0x1e7   :  { %1189 = vst.msk [vmem:[#allocation3 + $0x1a8] sm:$0xff] %vm1135_vm4, %v1050_v31  ;;  %v1056_v22 = vpop.permute.xlu0 %1055  ;;  %v1604_v31 = vld [vmem:[#allocation2 + $0xf9] sm:$0xff] }
 0x1e8   :  { %1422 = vrot.lane.b32.xlu1 %v9921_v48, %s9359_s28  ;;  %1192 = vst.msk [vmem:[#allocation3 + $0x1c0] sm:$0xff] %vm1135_vm4, %v1056_v22 }
 0x1e9   :  { %1428 = vrot.lane.b32.xlu0 %v9939_v3, %s9359_s28 }
 0x1ea   :  { %v1054_v45 = vpop.permute.xlu1 %1053 }
 0x1eb   :  { %1191 = vst.msk [vmem:[#allocation3 + $0x1b8] sm:$0xff] %vm1135_vm4, %v1054_v45  ;;  %v1060_v32 = vpop.permute.xlu0 %1059  ;;  %v1607_v45 = vld [vmem:[#allocation2 + $0x121] sm:$0xff] }
 0x1ec   :  { %1426 = vrot.lane.b32.xlu1 %v9931_v60, %s9359_s28  ;;  %1194 = vst.msk [vmem:[#allocation3 + $0x1d0] sm:$0xff] %vm1135_vm4, %v1060_v32 }
 0x1ed   :  { %1432 = vrot.lane.b32.xlu0 %v9949_v12, %s9359_s28 }
 0x1ee   :  { %v1058_v59 = vpop.permute.xlu1 %1057 }
 0x1ef   :  { %1193 = vst.msk [vmem:[#allocation3 + $0x1c8] sm:$0xff] %vm1135_vm4, %v1058_v59  ;;  %v1064_v48 = vpop.permute.xlu0 %1063  ;;  %v1606_v59 = vld [vmem:[#allocation2 + $0x111] sm:$0xff] }
 0x1f0   :  { %1430 = vrot.lane.b32.xlu1 %v9941_v4, %s9359_s28  ;;  %1196 = vst.msk [vmem:[#allocation3 + $0x1e0] sm:$0xff] %vm1135_vm4, %v1064_v48 }
 0x1f1   :  { %1436 = vrot.lane.b32.xlu0 %v9959_v25, %s9359_s28  ;;  %v13100_v25 = vld [vmem:[#allocation20_spill] sm:$0xff] }
 0x1f2   :  { %v1062_v3 = vpop.permute.xlu1 %1061 }
 0x1f3   :  { %1195 = vst.msk [vmem:[#allocation3 + $0x1d8] sm:$0xff] %vm1135_vm4, %v1062_v3  ;;  %v1068_v60 = vpop.permute.xlu0 %1067  ;;  %v1609_v3 = vld [vmem:[#allocation2 + $0x139] sm:$0xff] }
 0x1f4   :  { %1434 = vrot.lane.b32.xlu1 %v9951_v13, %s9359_s28  ;;  %1198 = vst.msk [vmem:[#allocation3 + $0x1f0] sm:$0xff] %vm1135_vm4, %v1068_v60 }
 0x1f5   :  { %1440 = vrot.lane.b32.xlu0 %v9969_v53, %s9359_s28  ;;  %v13102_v53 = vld [vmem:[#allocation22_spill] sm:$0xff] }
 0x1f6   :  { %v1066_v12 = vpop.permute.xlu1 %1065 }
 0x1f7   :  { %1197 = vst.msk [vmem:[#allocation3 + $0x1e8] sm:$0xff] %vm1135_vm4, %v1066_v12  ;;  %v1329_v4 = vpop.permute.xlu0 %1328  ;;  %v1608_v12 = vld [vmem:[#allocation2 + $0x129] sm:$0xff] }
 0x1f8   :  { %1438 = vrot.lane.b32.xlu1 %v13099_v0, %s9359_s28  ;;  %1521 = vst.msk [vmem:[#allocation3] sm:$0xff] %vm1520_vm5, %v1329_v4  ;;  %v1611_v0 = vld [vmem:[#allocation2 + $0x151] sm:$0xff] }
 0x1f9   :  { %1444 = vrot.lane.b32.xlu0 %v13100_v25, %s9359_s28 }
 0x1fa   :  { %v1070_v17 = vpop.permute.xlu1 %1069 }
 0x1fb   :  { %1199 = vst.msk [vmem:[#allocation3 + $0x1f8] sm:$0xff] %vm1135_vm4, %v1070_v17  ;;  %v1333_v13 = vpop.permute.xlu0 %1332  ;;  %v1610_v17 = vld [vmem:[#allocation2 + $0x141] sm:$0xff] }
 0x1fc   :  { %1442 = vrot.lane.b32.xlu1 %v13101_v37, %s9359_s28  ;;  %1523 = vst.msk [vmem:[#allocation3 + $0x10] sm:$0xff] %vm1520_vm5, %v1333_v13  ;;  %v1613_v37 = vld [vmem:[#allocation2 + $0x169] sm:$0xff] }
 0x1fd   :  { %1448 = vrot.lane.b32.xlu0 %v13102_v53, %s9359_s28 }
 0x1fe   :  { %v1331_v7 = vpop.permute.xlu1 %1330 }
 0x1ff   :  { %1522 = vst.msk [vmem:[#allocation3 + $0x8] sm:$0xff] %vm1520_vm5, %v1331_v7  ;;  %v1337_v10 = vpop.permute.xlu0 %1336  ;;  %v1612_v7 = vld [vmem:[#allocation2 + $0x159] sm:$0xff] }
 0x200   :  { %1446 = vrot.lane.b32.xlu1 %v13103_v18, %s9359_s28  ;;  %1525 = vst.msk [vmem:[#allocation3 + $0x20] sm:$0xff] %vm1520_vm5, %v1337_v10  ;;  %v1615_v10 = vld [vmem:[#allocation2 + $0x181] sm:$0xff] }
 0x201   :  { %1452 = vrot.lane.b32.xlu0 %v1262_v61, %s9359_s28 }
 0x202   :  { %v1335_v19 = vpop.permute.xlu1 %1334 }
 0x203   :  { %1524 = vst.msk [vmem:[#allocation3 + $0x18] sm:$0xff] %vm1520_vm5, %v1335_v19  ;;  %v1341_v23 = vpop.permute.xlu0 %1340  ;;  %v1614_v19 = vld [vmem:[#allocation2 + $0x171] sm:$0xff] }
 0x204   :  { %1450 = vrot.lane.b32.xlu1 %v13104_v20, %s9359_s28  ;;  %1527 = vst.msk [vmem:[#allocation3 + $0x30] sm:$0xff] %vm1520_vm5, %v1341_v23  ;;  %v1617_v23 = vld [vmem:[#allocation2 + $0x1c9] sm:$0xff] }
 0x205   :  { %1713 = vrot.lane.b32.xlu0 %v1585_v16, %s9360_s29 }
 0x206   :  { %v1339_v24 = vpop.permute.xlu1 %1338 }
 0x207   :  { %1526 = vst.msk [vmem:[#allocation3 + $0x28] sm:$0xff] %vm1520_vm5, %v1339_v24  ;;  %v1345_v28 = vpop.permute.xlu0 %1344 }
 0x208   :  { %1454 = vrot.lane.b32.xlu1 %v1263_v26, %s9359_s28  ;;  %1529 = vst.msk [vmem:[#allocation3 + $0x40] sm:$0xff] %vm1520_vm5, %v1345_v28  ;;  %v1616_v26 = vld [vmem:[#allocation2 + $0x189] sm:$0xff] }
 0x209   :  { %1717 = vrot.lane.b32.xlu0 %v1587_v29, %s9360_s29  ;;  %v1619_v29 = vld [vmem:[#allocation2 + $0x1e1] sm:$0xff] }
 0x20a   :  { %v1343_v30 = vpop.permute.xlu1 %1342 }
 0x20b   :  { %1528 = vst.msk [vmem:[#allocation3 + $0x38] sm:$0xff] %vm1520_vm5, %v1343_v30  ;;  %v1349_v34 = vpop.permute.xlu0 %1348 }
 0x20c   :  { %1715 = vrot.lane.b32.xlu1 %v1586_v33, %s9360_s29  ;;  %1531 = vst.msk [vmem:[#allocation3 + $0x50] sm:$0xff] %vm1520_vm5, %v1349_v34  ;;  %v1618_v33 = vld [vmem:[#allocation2 + $0x1d1] sm:$0xff] }
 0x20d   :  { %1721 = vrot.lane.b32.xlu0 %v1589_v35, %s9360_s29  ;;  %v1621_v35 = vld [vmem:[#allocation2 + $0x1f9] sm:$0xff] }
 0x20e   :  { %v1347_v36 = vpop.permute.xlu1 %1346 }
 0x20f   :  { %1530 = vst.msk [vmem:[#allocation3 + $0x48] sm:$0xff] %vm1520_vm5, %v1347_v36  ;;  %v1353_v39 = vpop.permute.xlu0 %1352 }
 0x210   :  { %1719 = vrot.lane.b32.xlu1 %v1588_v38, %s9360_s29  ;;  %1533 = vst.msk [vmem:[#allocation3 + $0x60] sm:$0xff] %vm1520_vm5, %v1353_v39  ;;  %v1620_v38 = vld [vmem:[#allocation2 + $0x1e9] sm:$0xff] }
 0x211   :  { %1725 = vrot.lane.b32.xlu0 %v1591_v41, %s9360_s29  ;;  %v1623_v41 = vld [vmem:[#allocation2 + $0x211] sm:$0xff] }
 0x212   :  { %v1351_v42 = vpop.permute.xlu1 %1350 }
 0x213   :  { %1532 = vst.msk [vmem:[#allocation3 + $0x58] sm:$0xff] %vm1520_vm5, %v1351_v42  ;;  %v1357_v44 = vpop.permute.xlu0 %1356 }
 0x214   :  { %1723 = vrot.lane.b32.xlu1 %v1590_v43, %s9360_s29  ;;  %1535 = vst.msk [vmem:[#allocation3 + $0x70] sm:$0xff] %vm1520_vm5, %v1357_v44  ;;  %v1622_v43 = vld [vmem:[#allocation2 + $0x201] sm:$0xff] }
 0x215   :  { %1729 = vrot.lane.b32.xlu0 %v1593_v46, %s9360_s29  ;;  %v1625_v46 = vld [vmem:[#allocation2 + $0x229] sm:$0xff] }
 0x216   :  { %v1355_v47 = vpop.permute.xlu1 %1354 }
 0x217   :  { %1534 = vst.msk [vmem:[#allocation3 + $0x68] sm:$0xff] %vm1520_vm5, %v1355_v47  ;;  %v1361_v40 = vpop.permute.xlu0 %1360 }
 0x218   :  { %1727 = vrot.lane.b32.xlu1 %v1592_v49, %s9360_s29  ;;  %1537 = vst.msk [vmem:[#allocation3 + $0x80] sm:$0xff] %vm1520_vm5, %v1361_v40  ;;  %v1624_v49 = vld [vmem:[#allocation2 + $0x219] sm:$0xff] }
 0x219   :  { %1733 = vrot.lane.b32.xlu0 %v1595_v51, %s9360_s29  ;;  %v1627_v51 = vld [vmem:[#allocation2 + $0x241] sm:$0xff] }
 0x21a   :  { %v1359_v54 = vpop.permute.xlu1 %1358 }
 0x21b   :  { %1536 = vst.msk [vmem:[#allocation3 + $0x78] sm:$0xff] %vm1520_vm5, %v1359_v54  ;;  %v1365_v57 = vpop.permute.xlu0 %1364 }
 0x21c   :  { %1731 = vrot.lane.b32.xlu1 %v1594_v50, %s9360_s29  ;;  %1539 = vst.msk [vmem:[#allocation3 + $0x90] sm:$0xff] %vm1520_vm5, %v1365_v57  ;;  %v1626_v50 = vld [vmem:[#allocation2 + $0x231] sm:$0xff] }
 0x21d   :  { %1737 = vrot.lane.b32.xlu0 %v1597_v52, %s9360_s29  ;;  %v1629_v52 = vld [vmem:[#allocation2 + $0x259] sm:$0xff] }
 0x21e   :  { %v1363_v55 = vpop.permute.xlu1 %1362 }
 0x21f   :  { %1538 = vst.msk [vmem:[#allocation3 + $0x88] sm:$0xff] %vm1520_vm5, %v1363_v55  ;;  %v1369_v58 = vpop.permute.xlu0 %1368 }
 0x220   :  { %1735 = vrot.lane.b32.xlu1 %v1596_v27, %s9360_s29  ;;  %1541 = vst.msk [vmem:[#allocation3 + $0xa0] sm:$0xff] %vm1520_vm5, %v1369_v58  ;;  %v1628_v27 = vld [vmem:[#allocation2 + $0x249] sm:$0xff] }
 0x221   :  { %1741 = vrot.lane.b32.xlu0 %v1599_v8, %s9360_s29  ;;  %v1631_v8 = vld [vmem:[#allocation2 + $0x271] sm:$0xff] }
 0x222   :  { %v1367_v56 = vpop.permute.xlu1 %1366 }
 0x223   :  { %1540 = vst.msk [vmem:[#allocation3 + $0x98] sm:$0xff] %vm1520_vm5, %v1367_v56  ;;  %v1373_v63 = vpop.permute.xlu0 %1372 }
 0x224   :  { %1739 = vrot.lane.b32.xlu1 %v1598_v62, %s9360_s29  ;;  %1543 = vst.msk [vmem:[#allocation3 + $0xb0] sm:$0xff] %vm1520_vm5, %v1373_v63  ;;  %v1630_v62 = vld [vmem:[#allocation2 + $0x261] sm:$0xff] }
 0x225   :  { %1745 = vrot.lane.b32.xlu0 %v1601_v1, %s9360_s29  ;;  %v1633_v1 = vld [vmem:[#allocation2 + $0x289] sm:$0xff] }
 0x226   :  { %v1371_v2 = vpop.permute.xlu1 %1370 }
 0x227   :  { %1542 = vst.msk [vmem:[#allocation3 + $0xa8] sm:$0xff] %vm1520_vm5, %v1371_v2  ;;  %v1377_v6 = vpop.permute.xlu0 %1376 }
 0x228   :  { %1743 = vrot.lane.b32.xlu1 %v1600_v5, %s9360_s29  ;;  %1545 = vst.msk [vmem:[#allocation3 + $0xc0] sm:$0xff] %vm1520_vm5, %v1377_v6  ;;  %v1632_v5 = vld [vmem:[#allocation2 + $0x279] sm:$0xff] }
 0x229   :  { %1749 = vrot.lane.b32.xlu0 %v1603_v9, %s9360_s29  ;;  %v1635_v9 = vld [vmem:[#allocation2 + $0x2a1] sm:$0xff] }
 0x22a   :  { %v1375_v11 = vpop.permute.xlu1 %1374 }
 0x22b   :  { %1544 = vst.msk [vmem:[#allocation3 + $0xb8] sm:$0xff] %vm1520_vm5, %v1375_v11  ;;  %v1381_v15 = vpop.permute.xlu0 %1380 }
 0x22c   :  { %1747 = vrot.lane.b32.xlu1 %v1602_v14, %s9360_s29  ;;  %1547 = vst.msk [vmem:[#allocation3 + $0xd0] sm:$0xff] %vm1520_vm5, %v1381_v15  ;;  %v1634_v14 = vld [vmem:[#allocation2 + $0x291] sm:$0xff] }
 0x22d   :  { %1753 = vrot.lane.b32.xlu0 %v1605_v21, %s9360_s29  ;;  %v1637_v21 = vld [vmem:[#allocation2 + $0x2b9] sm:$0xff] }
 0x22e   :  { %v1379_v22 = vpop.permute.xlu1 %1378 }
 0x22f   :  { %1546 = vst.msk [vmem:[#allocation3 + $0xc8] sm:$0xff] %vm1520_vm5, %v1379_v22  ;;  %v1385_v32 = vpop.permute.xlu0 %1384 }
 0x230   :  { %1751 = vrot.lane.b32.xlu1 %v1604_v31, %s9360_s29  ;;  %1549 = vst.msk [vmem:[#allocation3 + $0xe0] sm:$0xff] %vm1520_vm5, %v1385_v32  ;;  %v1636_v31 = vld [vmem:[#allocation2 + $0x2a9] sm:$0xff] }
 0x231   :  { %1757 = vrot.lane.b32.xlu0 %v1607_v45, %s9360_s29  ;;  %v1639_v45 = vld [vmem:[#allocation2 + $0x2d1] sm:$0xff] }
 0x232   :  { %v1383_v48 = vpop.permute.xlu1 %1382 }
 0x233   :  { %1548 = vst.msk [vmem:[#allocation3 + $0xd8] sm:$0xff] %vm1520_vm5, %v1383_v48  ;;  %v1389_v60 = vpop.permute.xlu0 %1388 }
 0x234   :  { %1755 = vrot.lane.b32.xlu1 %v1606_v59, %s9360_s29  ;;  %1551 = vst.msk [vmem:[#allocation3 + $0xf0] sm:$0xff] %vm1520_vm5, %v1389_v60  ;;  %v1638_v59 = vld [vmem:[#allocation2 + $0x2c1] sm:$0xff] }
 0x235   :  { %1761 = vrot.lane.b32.xlu0 %v1609_v3, %s9360_s29  ;;  %v1641_v3 = vld [vmem:[#allocation2 + $0x2e9] sm:$0xff] }
 0x236   :  { %v1387_v4 = vpop.permute.xlu1 %1386 }
 0x237   :  { %1550 = vst.msk [vmem:[#allocation3 + $0xe8] sm:$0xff] %vm1520_vm5, %v1387_v4  ;;  %v1393_v25 = vpop.permute.xlu0 %1392 }
 0x238   :  { %1759 = vrot.lane.b32.xlu1 %v1608_v12, %s9360_s29  ;;  %1553 = vst.msk [vmem:[#allocation3 + $0x100] sm:$0xff] %vm1520_vm5, %v1393_v25  ;;  %v1640_v12 = vld [vmem:[#allocation2 + $0x2d9] sm:$0xff] }
 0x239   :  { %1765 = vrot.lane.b32.xlu0 %v1611_v0, %s9360_s29  ;;  %v1643_v0 = vld [vmem:[#allocation2 + $0x301] sm:$0xff] }
 0x23a   :  { %v1391_v13 = vpop.permute.xlu1 %1390 }
 0x23b   :  { %1552 = vst.msk [vmem:[#allocation3 + $0xf8] sm:$0xff] %vm1520_vm5, %v1391_v13  ;;  %v1397_v53 = vpop.permute.xlu0 %1396 }
 0x23c   :  { %1763 = vrot.lane.b32.xlu1 %v1610_v17, %s9360_s29  ;;  %1555 = vst.msk [vmem:[#allocation3 + $0x110] sm:$0xff] %vm1520_vm5, %v1397_v53  ;;  %v1642_v17 = vld [vmem:[#allocation2 + $0x2f1] sm:$0xff] }
 0x23d   :  { %1769 = vrot.lane.b32.xlu0 %v1613_v37, %s9360_s29  ;;  %v1645_v37 = vld [vmem:[#allocation2 + $0x319] sm:$0xff] }
 0x23e   :  { %v1395_v61 = vpop.permute.xlu1 %1394 }
 0x23f   :  { %1554 = vst.msk [vmem:[#allocation3 + $0x108] sm:$0xff] %vm1520_vm5, %v1395_v61  ;;  %v1401_v18 = vpop.permute.xlu0 %1400 }
 0x240   :  { %1767 = vrot.lane.b32.xlu1 %v1612_v7, %s9360_s29  ;;  %1557 = vst.msk [vmem:[#allocation3 + $0x120] sm:$0xff] %vm1520_vm5, %v1401_v18  ;;  %v1644_v7 = vld [vmem:[#allocation2 + $0x309] sm:$0xff] }
 0x241   :  { %1773 = vrot.lane.b32.xlu0 %v1615_v10, %s9360_s29  ;;  %v1647_v10 = vld [vmem:[#allocation2 + $0x331] sm:$0xff] }
 0x242   :  { %v1399_v16 = vpop.permute.xlu1 %1398 }
 0x243   :  { %1556 = vst.msk [vmem:[#allocation3 + $0x118] sm:$0xff] %vm1520_vm5, %v1399_v16  ;;  %v1405_v20 = vpop.permute.xlu0 %1404 }
 0x244   :  { %1771 = vrot.lane.b32.xlu1 %v1614_v19, %s9360_s29  ;;  %1559 = vst.msk [vmem:[#allocation3 + $0x130] sm:$0xff] %vm1520_vm5, %v1405_v20  ;;  %v1646_v19 = vld [vmem:[#allocation2 + $0x321] sm:$0xff] }
 0x245   :  { %1777 = vrot.lane.b32.xlu0 %v1617_v23, %s9360_s29  ;;  %v1970_v23 = vld [vmem:[#allocation2 + $0x1a] sm:$0xff] }
 0x246   :  { %v1403_v24 = vpop.permute.xlu1 %1402 }
 0x247   :  { %1558 = vst.msk [vmem:[#allocation3 + $0x128] sm:$0xff] %vm1520_vm5, %v1403_v24  ;;  %v1409_v28 = vpop.permute.xlu0 %1408 }
 0x248   :  { %1775 = vrot.lane.b32.xlu1 %v1616_v26, %s9360_s29  ;;  %1561 = vst.msk [vmem:[#allocation3 + $0x140] sm:$0xff] %vm1520_vm5, %v1409_v28  ;;  %v1648_v26 = vld [vmem:[#allocation2 + $0x339] sm:$0xff] }
 0x249   :  { %1781 = vrot.lane.b32.xlu0 %v1619_v29, %s9360_s29  ;;  %v1972_v29 = vld [vmem:[#allocation2 + $0x32] sm:$0xff] }
 0x24a   :  { %v1407_v30 = vpop.permute.xlu1 %1406 }
 0x24b   :  { %1560 = vst.msk [vmem:[#allocation3 + $0x138] sm:$0xff] %vm1520_vm5, %v1407_v30  ;;  %v1413_v34 = vpop.permute.xlu0 %1412 }
 0x24c   :  { %1779 = vrot.lane.b32.xlu1 %v1618_v33, %s9360_s29  ;;  %1563 = vst.msk [vmem:[#allocation3 + $0x150] sm:$0xff] %vm1520_vm5, %v1413_v34  ;;  %v1971_v33 = vld [vmem:[#allocation2 + $0x22] sm:$0xff] }
 0x24d   :  { %1785 = vrot.lane.b32.xlu0 %v1621_v35, %s9360_s29  ;;  %v1974_v35 = vld [vmem:[#allocation2 + $0x4a] sm:$0xff] }
 0x24e   :  { %v1411_v36 = vpop.permute.xlu1 %1410 }
 0x24f   :  { %1562 = vst.msk [vmem:[#allocation3 + $0x148] sm:$0xff] %vm1520_vm5, %v1411_v36  ;;  %v1417_v39 = vpop.permute.xlu0 %1416 }
 0x250   :  { %1783 = vrot.lane.b32.xlu1 %v1620_v38, %s9360_s29  ;;  %1565 = vst.msk [vmem:[#allocation3 + $0x160] sm:$0xff] %vm1520_vm5, %v1417_v39  ;;  %v1973_v38 = vld [vmem:[#allocation2 + $0x3a] sm:$0xff] }
 0x251   :  { %1789 = vrot.lane.b32.xlu0 %v1623_v41, %s9360_s29  ;;  %v1976_v41 = vld [vmem:[#allocation2 + $0x62] sm:$0xff] }
 0x252   :  { %v1415_v42 = vpop.permute.xlu1 %1414 }
 0x253   :  { %1564 = vst.msk [vmem:[#allocation3 + $0x158] sm:$0xff] %vm1520_vm5, %v1415_v42  ;;  %v1421_v44 = vpop.permute.xlu0 %1420 }
 0x254   :  { %1787 = vrot.lane.b32.xlu1 %v1622_v43, %s9360_s29  ;;  %1567 = vst.msk [vmem:[#allocation3 + $0x170] sm:$0xff] %vm1520_vm5, %v1421_v44  ;;  %v1975_v43 = vld [vmem:[#allocation2 + $0x52] sm:$0xff] }
 0x255   :  { %1793 = vrot.lane.b32.xlu0 %v1625_v46, %s9360_s29  ;;  %v1978_v46 = vld [vmem:[#allocation2 + $0x7a] sm:$0xff] }
 0x256   :  { %v1419_v47 = vpop.permute.xlu1 %1418 }
 0x257   :  { %1566 = vst.msk [vmem:[#allocation3 + $0x168] sm:$0xff] %vm1520_vm5, %v1419_v47  ;;  %v1425_v40 = vpop.permute.xlu0 %1424 }
 0x258   :  { %1791 = vrot.lane.b32.xlu1 %v1624_v49, %s9360_s29  ;;  %1569 = vst.msk [vmem:[#allocation3 + $0x180] sm:$0xff] %vm1520_vm5, %v1425_v40  ;;  %v1977_v49 = vld [vmem:[#allocation2 + $0x6a] sm:$0xff] }
 0x259   :  { %1797 = vrot.lane.b32.xlu0 %v1627_v51, %s9360_s29  ;;  %v1980_v51 = vld [vmem:[#allocation2 + $0x92] sm:$0xff] }
 0x25a   :  { %v1423_v54 = vpop.permute.xlu1 %1422 }
 0x25b   :  { %1568 = vst.msk [vmem:[#allocation3 + $0x178] sm:$0xff] %vm1520_vm5, %v1423_v54  ;;  %v1429_v57 = vpop.permute.xlu0 %1428 }
 0x25c   :  { %1795 = vrot.lane.b32.xlu1 %v1626_v50, %s9360_s29  ;;  %1571 = vst.msk [vmem:[#allocation3 + $0x190] sm:$0xff] %vm1520_vm5, %v1429_v57  ;;  %v1979_v50 = vld [vmem:[#allocation2 + $0x82] sm:$0xff] }
 0x25d   :  { %1801 = vrot.lane.b32.xlu0 %v1629_v52, %s9360_s29  ;;  %v1982_v52 = vld [vmem:[#allocation2 + $0xaa] sm:$0xff] }
 0x25e   :  { %v1427_v55 = vpop.permute.xlu1 %1426 }
 0x25f   :  { %1570 = vst.msk [vmem:[#allocation3 + $0x188] sm:$0xff] %vm1520_vm5, %v1427_v55  ;;  %v1433_v58 = vpop.permute.xlu0 %1432 }
 0x260   :  { %1799 = vrot.lane.b32.xlu1 %v1628_v27, %s9360_s29  ;;  %1573 = vst.msk [vmem:[#allocation3 + $0x1a0] sm:$0xff] %vm1520_vm5, %v1433_v58  ;;  %v1981_v27 = vld [vmem:[#allocation2 + $0x9a] sm:$0xff] }
 0x261   :  { %1805 = vrot.lane.b32.xlu0 %v1631_v8, %s9360_s29  ;;  %v1984_v8 = vld [vmem:[#allocation2 + $0xc2] sm:$0xff] }
 0x262   :  { %v1431_v56 = vpop.permute.xlu1 %1430 }
 0x263   :  { %1572 = vst.msk [vmem:[#allocation3 + $0x198] sm:$0xff] %vm1520_vm5, %v1431_v56  ;;  %v1437_v63 = vpop.permute.xlu0 %1436 }
 0x264   :  { %1803 = vrot.lane.b32.xlu1 %v1630_v62, %s9360_s29  ;;  %1575 = vst.msk [vmem:[#allocation3 + $0x1b0] sm:$0xff] %vm1520_vm5, %v1437_v63  ;;  %v1983_v62 = vld [vmem:[#allocation2 + $0xb2] sm:$0xff] }
 0x265   :  { %1809 = vrot.lane.b32.xlu0 %v1633_v1, %s9360_s29  ;;  %v1986_v1 = vld [vmem:[#allocation2 + $0xda] sm:$0xff] }
 0x266   :  { %v1435_v2 = vpop.permute.xlu1 %1434 }
 0x267   :  { %1574 = vst.msk [vmem:[#allocation3 + $0x1a8] sm:$0xff] %vm1520_vm5, %v1435_v2  ;;  %v1441_v6 = vpop.permute.xlu0 %1440 }
 0x268   :  { %1807 = vrot.lane.b32.xlu1 %v1632_v5, %s9360_s29  ;;  %1577 = vst.msk [vmem:[#allocation3 + $0x1c0] sm:$0xff] %vm1520_vm5, %v1441_v6  ;;  %v1985_v5 = vld [vmem:[#allocation2 + $0xca] sm:$0xff] }
 0x269   :  { %1813 = vrot.lane.b32.xlu0 %v1635_v9, %s9360_s29  ;;  %v1988_v9 = vld [vmem:[#allocation2 + $0xf2] sm:$0xff] }
 0x26a   :  { %v1439_v11 = vpop.permute.xlu1 %1438 }
 0x26b   :  { %1576 = vst.msk [vmem:[#allocation3 + $0x1b8] sm:$0xff] %vm1520_vm5, %v1439_v11  ;;  %v1445_v15 = vpop.permute.xlu0 %1444 }
 0x26c   :  { %1811 = vrot.lane.b32.xlu1 %v1634_v14, %s9360_s29  ;;  %1579 = vst.msk [vmem:[#allocation3 + $0x1d0] sm:$0xff] %vm1520_vm5, %v1445_v15  ;;  %v1987_v14 = vld [vmem:[#allocation2 + $0xe2] sm:$0xff] }
 0x26d   :  { %1817 = vrot.lane.b32.xlu0 %v1637_v21, %s9360_s29  ;;  %v1990_v21 = vld [vmem:[#allocation2 + $0x10a] sm:$0xff] }
 0x26e   :  { %v1443_v22 = vpop.permute.xlu1 %1442 }
 0x26f   :  { %1578 = vst.msk [vmem:[#allocation3 + $0x1c8] sm:$0xff] %vm1520_vm5, %v1443_v22  ;;  %v1449_v32 = vpop.permute.xlu0 %1448 }
 0x270   :  { %1815 = vrot.lane.b32.xlu1 %v1636_v31, %s9360_s29  ;;  %1581 = vst.msk [vmem:[#allocation3 + $0x1e0] sm:$0xff] %vm1520_vm5, %v1449_v32  ;;  %v1989_v31 = vld [vmem:[#allocation2 + $0xfa] sm:$0xff] }
 0x271   :  { %1821 = vrot.lane.b32.xlu0 %v1639_v45, %s9360_s29  ;;  %v1992_v45 = vld [vmem:[#allocation2 + $0x122] sm:$0xff] }
 0x272   :  { %v1447_v48 = vpop.permute.xlu1 %1446 }
 0x273   :  { %1580 = vst.msk [vmem:[#allocation3 + $0x1d8] sm:$0xff] %vm1520_vm5, %v1447_v48  ;;  %v1453_v60 = vpop.permute.xlu0 %1452 }
 0x274   :  { %1819 = vrot.lane.b32.xlu1 %v1638_v59, %s9360_s29  ;;  %1583 = vst.msk [vmem:[#allocation3 + $0x1f0] sm:$0xff] %vm1520_vm5, %v1453_v60  ;;  %v1991_v59 = vld [vmem:[#allocation2 + $0x112] sm:$0xff] }
 0x275   :  { %1825 = vrot.lane.b32.xlu0 %v1641_v3, %s9360_s29  ;;  %v1994_v3 = vld [vmem:[#allocation2 + $0x13a] sm:$0xff] }
 0x276   :  { %v1451_v4 = vpop.permute.xlu1 %1450 }
 0x277   :  { %1582 = vst.msk [vmem:[#allocation3 + $0x1e8] sm:$0xff] %vm1520_vm5, %v1451_v4  ;;  %v1714_v25 = vpop.permute.xlu0 %1713 }
 0x278   :  { %1823 = vrot.lane.b32.xlu1 %v1640_v12, %s9360_s29  ;;  %1906 = vst.msk [vmem:[#allocation3] sm:$0xff] %vm1905_vm6, %v1714_v25  ;;  %v1993_v12 = vld [vmem:[#allocation2 + $0x12a] sm:$0xff] }
 0x279   :  { %1829 = vrot.lane.b32.xlu0 %v1643_v0, %s9360_s29  ;;  %v1996_v0 = vld [vmem:[#allocation2 + $0x152] sm:$0xff] }
 0x27a   :  { %v1455_v13 = vpop.permute.xlu1 %1454 }
 0x27b   :  { %1584 = vst.msk [vmem:[#allocation3 + $0x1f8] sm:$0xff] %vm1520_vm5, %v1455_v13  ;;  %v1718_v53 = vpop.permute.xlu0 %1717 }
 0x27c   :  { %1827 = vrot.lane.b32.xlu1 %v1642_v17, %s9360_s29  ;;  %1908 = vst.msk [vmem:[#allocation3 + $0x10] sm:$0xff] %vm1905_vm6, %v1718_v53  ;;  %v1995_v17 = vld [vmem:[#allocation2 + $0x142] sm:$0xff] }
 0x27d   :  { %1833 = vrot.lane.b32.xlu0 %v1645_v37, %s9360_s29  ;;  %v1998_v37 = vld [vmem:[#allocation2 + $0x16a] sm:$0xff] }
 0x27e   :  { %v1716_v61 = vpop.permute.xlu1 %1715 }
 0x27f   :  { %1907 = vst.msk [vmem:[#allocation3 + $0x8] sm:$0xff] %vm1905_vm6, %v1716_v61  ;;  %v1722_v18 = vpop.permute.xlu0 %1721 }
 0x280   :  { %1831 = vrot.lane.b32.xlu1 %v1644_v7, %s9360_s29  ;;  %1910 = vst.msk [vmem:[#allocation3 + $0x20] sm:$0xff] %vm1905_vm6, %v1722_v18  ;;  %v1997_v7 = vld [vmem:[#allocation2 + $0x15a] sm:$0xff] }
 0x281   :  { %1837 = vrot.lane.b32.xlu0 %v1647_v10, %s9360_s29  ;;  %v2000_v10 = vld [vmem:[#allocation2 + $0x182] sm:$0xff] }
 0x282   :  { %v1720_v16 = vpop.permute.xlu1 %1719 }
 0x283   :  { %1909 = vst.msk [vmem:[#allocation3 + $0x18] sm:$0xff] %vm1905_vm6, %v1720_v16  ;;  %v1726_v20 = vpop.permute.xlu0 %1725 }
 0x284   :  { %1835 = vrot.lane.b32.xlu1 %v1646_v19, %s9360_s29  ;;  %1912 = vst.msk [vmem:[#allocation3 + $0x30] sm:$0xff] %vm1905_vm6, %v1726_v20  ;;  %v1999_v19 = vld [vmem:[#allocation2 + $0x172] sm:$0xff] }
 0x285   :  { %2098 = vrot.lane.b32.xlu0 %v1970_v23, %s9361_s3  ;;  %v2002_v23 = vld [vmem:[#allocation2 + $0x1ca] sm:$0xff] }
 0x286   :  { %v1724_v24 = vpop.permute.xlu1 %1723 }
 0x287   :  { %1911 = vst.msk [vmem:[#allocation3 + $0x28] sm:$0xff] %vm1905_vm6, %v1724_v24  ;;  %v1730_v28 = vpop.permute.xlu0 %1729 }
 0x288   :  { %1839 = vrot.lane.b32.xlu1 %v1648_v26, %s9360_s29  ;;  %1914 = vst.msk [vmem:[#allocation3 + $0x40] sm:$0xff] %vm1905_vm6, %v1730_v28  ;;  %v2001_v26 = vld [vmem:[#allocation2 + $0x18a] sm:$0xff] }
 0x289   :  { %2102 = vrot.lane.b32.xlu0 %v1972_v29, %s9361_s3  ;;  %v2004_v29 = vld [vmem:[#allocation2 + $0x1e2] sm:$0xff] }
 0x28a   :  { %v1728_v30 = vpop.permute.xlu1 %1727 }
 0x28b   :  { %1913 = vst.msk [vmem:[#allocation3 + $0x38] sm:$0xff] %vm1905_vm6, %v1728_v30  ;;  %v1734_v34 = vpop.permute.xlu0 %1733 }
 0x28c   :  { %2100 = vrot.lane.b32.xlu1 %v1971_v33, %s9361_s3  ;;  %1916 = vst.msk [vmem:[#allocation3 + $0x50] sm:$0xff] %vm1905_vm6, %v1734_v34  ;;  %v2003_v33 = vld [vmem:[#allocation2 + $0x1d2] sm:$0xff] }
 0x28d   :  { %2106 = vrot.lane.b32.xlu0 %v1974_v35, %s9361_s3  ;;  %v2006_v35 = vld [vmem:[#allocation2 + $0x1fa] sm:$0xff] }
 0x28e   :  { %v1732_v36 = vpop.permute.xlu1 %1731 }
 0x28f   :  { %1915 = vst.msk [vmem:[#allocation3 + $0x48] sm:$0xff] %vm1905_vm6, %v1732_v36  ;;  %v1738_v39 = vpop.permute.xlu0 %1737 }
 0x290   :  { %2104 = vrot.lane.b32.xlu1 %v1973_v38, %s9361_s3  ;;  %1918 = vst.msk [vmem:[#allocation3 + $0x60] sm:$0xff] %vm1905_vm6, %v1738_v39  ;;  %v2005_v38 = vld [vmem:[#allocation2 + $0x1ea] sm:$0xff] }
 0x291   :  { %2110 = vrot.lane.b32.xlu0 %v1976_v41, %s9361_s3  ;;  %v2008_v41 = vld [vmem:[#allocation2 + $0x212] sm:$0xff] }
 0x292   :  { %v1736_v42 = vpop.permute.xlu1 %1735 }
 0x293   :  { %1917 = vst.msk [vmem:[#allocation3 + $0x58] sm:$0xff] %vm1905_vm6, %v1736_v42  ;;  %v1742_v44 = vpop.permute.xlu0 %1741 }
 0x294   :  { %2108 = vrot.lane.b32.xlu1 %v1975_v43, %s9361_s3  ;;  %1920 = vst.msk [vmem:[#allocation3 + $0x70] sm:$0xff] %vm1905_vm6, %v1742_v44  ;;  %v2007_v43 = vld [vmem:[#allocation2 + $0x202] sm:$0xff] }
 0x295   :  { %2114 = vrot.lane.b32.xlu0 %v1978_v46, %s9361_s3  ;;  %v2010_v46 = vld [vmem:[#allocation2 + $0x22a] sm:$0xff] }
 0x296   :  { %v1740_v47 = vpop.permute.xlu1 %1739 }
 0x297   :  { %1919 = vst.msk [vmem:[#allocation3 + $0x68] sm:$0xff] %vm1905_vm6, %v1740_v47  ;;  %v1746_v40 = vpop.permute.xlu0 %1745 }
 0x298   :  { %2112 = vrot.lane.b32.xlu1 %v1977_v49, %s9361_s3  ;;  %1922 = vst.msk [vmem:[#allocation3 + $0x80] sm:$0xff] %vm1905_vm6, %v1746_v40  ;;  %v2009_v49 = vld [vmem:[#allocation2 + $0x21a] sm:$0xff] }
 0x299   :  { %2118 = vrot.lane.b32.xlu0 %v1980_v51, %s9361_s3  ;;  %v2012_v51 = vld [vmem:[#allocation2 + $0x242] sm:$0xff] }
 0x29a   :  { %v1744_v54 = vpop.permute.xlu1 %1743 }
 0x29b   :  { %1921 = vst.msk [vmem:[#allocation3 + $0x78] sm:$0xff] %vm1905_vm6, %v1744_v54  ;;  %v1750_v57 = vpop.permute.xlu0 %1749 }
 0x29c   :  { %2116 = vrot.lane.b32.xlu1 %v1979_v50, %s9361_s3  ;;  %1924 = vst.msk [vmem:[#allocation3 + $0x90] sm:$0xff] %vm1905_vm6, %v1750_v57  ;;  %v2011_v50 = vld [vmem:[#allocation2 + $0x232] sm:$0xff] }
 0x29d   :  { %2122 = vrot.lane.b32.xlu0 %v1982_v52, %s9361_s3  ;;  %v2014_v52 = vld [vmem:[#allocation2 + $0x25a] sm:$0xff] }
 0x29e   :  { %v1748_v55 = vpop.permute.xlu1 %1747 }
 0x29f   :  { %1923 = vst.msk [vmem:[#allocation3 + $0x88] sm:$0xff] %vm1905_vm6, %v1748_v55  ;;  %v1754_v58 = vpop.permute.xlu0 %1753 }
 0x2a0   :  { %2120 = vrot.lane.b32.xlu1 %v1981_v27, %s9361_s3  ;;  %1926 = vst.msk [vmem:[#allocation3 + $0xa0] sm:$0xff] %vm1905_vm6, %v1754_v58  ;;  %v2013_v27 = vld [vmem:[#allocation2 + $0x24a] sm:$0xff] }
 0x2a1   :  { %2126 = vrot.lane.b32.xlu0 %v1984_v8, %s9361_s3  ;;  %v2016_v8 = vld [vmem:[#allocation2 + $0x272] sm:$0xff] }
 0x2a2   :  { %v1752_v56 = vpop.permute.xlu1 %1751 }
 0x2a3   :  { %1925 = vst.msk [vmem:[#allocation3 + $0x98] sm:$0xff] %vm1905_vm6, %v1752_v56  ;;  %v1758_v63 = vpop.permute.xlu0 %1757 }
 0x2a4   :  { %2124 = vrot.lane.b32.xlu1 %v1983_v62, %s9361_s3  ;;  %1928 = vst.msk [vmem:[#allocation3 + $0xb0] sm:$0xff] %vm1905_vm6, %v1758_v63  ;;  %v2015_v62 = vld [vmem:[#allocation2 + $0x262] sm:$0xff] }
 0x2a5   :  { %2130 = vrot.lane.b32.xlu0 %v1986_v1, %s9361_s3  ;;  %v2018_v1 = vld [vmem:[#allocation2 + $0x28a] sm:$0xff] }
 0x2a6   :  { %v1756_v2 = vpop.permute.xlu1 %1755 }
 0x2a7   :  { %1927 = vst.msk [vmem:[#allocation3 + $0xa8] sm:$0xff] %vm1905_vm6, %v1756_v2  ;;  %v1762_v6 = vpop.permute.xlu0 %1761 }
 0x2a8   :  { %2128 = vrot.lane.b32.xlu1 %v1985_v5, %s9361_s3  ;;  %1930 = vst.msk [vmem:[#allocation3 + $0xc0] sm:$0xff] %vm1905_vm6, %v1762_v6  ;;  %v2017_v5 = vld [vmem:[#allocation2 + $0x27a] sm:$0xff] }
 0x2a9   :  { %2134 = vrot.lane.b32.xlu0 %v1988_v9, %s9361_s3  ;;  %v2020_v9 = vld [vmem:[#allocation2 + $0x2a2] sm:$0xff] }
 0x2aa   :  { %v1760_v11 = vpop.permute.xlu1 %1759 }
 0x2ab   :  { %1929 = vst.msk [vmem:[#allocation3 + $0xb8] sm:$0xff] %vm1905_vm6, %v1760_v11  ;;  %v1766_v15 = vpop.permute.xlu0 %1765 }
 0x2ac   :  { %2132 = vrot.lane.b32.xlu1 %v1987_v14, %s9361_s3  ;;  %1932 = vst.msk [vmem:[#allocation3 + $0xd0] sm:$0xff] %vm1905_vm6, %v1766_v15  ;;  %v2019_v14 = vld [vmem:[#allocation2 + $0x292] sm:$0xff] }
 0x2ad   :  { %2138 = vrot.lane.b32.xlu0 %v1990_v21, %s9361_s3  ;;  %v2022_v21 = vld [vmem:[#allocation2 + $0x2ba] sm:$0xff] }
 0x2ae   :  { %v1764_v22 = vpop.permute.xlu1 %1763 }
 0x2af   :  { %1931 = vst.msk [vmem:[#allocation3 + $0xc8] sm:$0xff] %vm1905_vm6, %v1764_v22  ;;  %v1770_v32 = vpop.permute.xlu0 %1769 }
 0x2b0   :  { %2136 = vrot.lane.b32.xlu1 %v1989_v31, %s9361_s3  ;;  %1934 = vst.msk [vmem:[#allocation3 + $0xe0] sm:$0xff] %vm1905_vm6, %v1770_v32  ;;  %v2021_v31 = vld [vmem:[#allocation2 + $0x2aa] sm:$0xff] }
 0x2b1   :  { %2142 = vrot.lane.b32.xlu0 %v1992_v45, %s9361_s3  ;;  %v2024_v45 = vld [vmem:[#allocation2 + $0x2d2] sm:$0xff] }
 0x2b2   :  { %v1768_v48 = vpop.permute.xlu1 %1767 }
 0x2b3   :  { %1933 = vst.msk [vmem:[#allocation3 + $0xd8] sm:$0xff] %vm1905_vm6, %v1768_v48  ;;  %v1774_v60 = vpop.permute.xlu0 %1773 }
 0x2b4   :  { %2140 = vrot.lane.b32.xlu1 %v1991_v59, %s9361_s3  ;;  %1936 = vst.msk [vmem:[#allocation3 + $0xf0] sm:$0xff] %vm1905_vm6, %v1774_v60  ;;  %v2023_v59 = vld [vmem:[#allocation2 + $0x2c2] sm:$0xff] }
 0x2b5   :  { %2146 = vrot.lane.b32.xlu0 %v1994_v3, %s9361_s3  ;;  %v2026_v3 = vld [vmem:[#allocation2 + $0x2ea] sm:$0xff] }
 0x2b6   :  { %v1772_v4 = vpop.permute.xlu1 %1771 }
 0x2b7   :  { %1935 = vst.msk [vmem:[#allocation3 + $0xe8] sm:$0xff] %vm1905_vm6, %v1772_v4  ;;  %v1778_v25 = vpop.permute.xlu0 %1777 }
 0x2b8   :  { %2144 = vrot.lane.b32.xlu1 %v1993_v12, %s9361_s3  ;;  %1938 = vst.msk [vmem:[#allocation3 + $0x100] sm:$0xff] %vm1905_vm6, %v1778_v25  ;;  %v2025_v12 = vld [vmem:[#allocation2 + $0x2da] sm:$0xff] }
 0x2b9   :  { %2150 = vrot.lane.b32.xlu0 %v1996_v0, %s9361_s3  ;;  %v2028_v0 = vld [vmem:[#allocation2 + $0x302] sm:$0xff] }
 0x2ba   :  { %v1776_v13 = vpop.permute.xlu1 %1775 }
 0x2bb   :  { %1937 = vst.msk [vmem:[#allocation3 + $0xf8] sm:$0xff] %vm1905_vm6, %v1776_v13  ;;  %v1782_v53 = vpop.permute.xlu0 %1781 }
 0x2bc   :  { %2148 = vrot.lane.b32.xlu1 %v1995_v17, %s9361_s3  ;;  %1940 = vst.msk [vmem:[#allocation3 + $0x110] sm:$0xff] %vm1905_vm6, %v1782_v53  ;;  %v2027_v17 = vld [vmem:[#allocation2 + $0x2f2] sm:$0xff] }
 0x2bd   :  { %2154 = vrot.lane.b32.xlu0 %v1998_v37, %s9361_s3  ;;  %v2030_v37 = vld [vmem:[#allocation2 + $0x31a] sm:$0xff] }
 0x2be   :  { %v1780_v61 = vpop.permute.xlu1 %1779 }
 0x2bf   :  { %1939 = vst.msk [vmem:[#allocation3 + $0x108] sm:$0xff] %vm1905_vm6, %v1780_v61  ;;  %v1786_v18 = vpop.permute.xlu0 %1785 }
 0x2c0   :  { %2152 = vrot.lane.b32.xlu1 %v1997_v7, %s9361_s3  ;;  %1942 = vst.msk [vmem:[#allocation3 + $0x120] sm:$0xff] %vm1905_vm6, %v1786_v18  ;;  %v2029_v7 = vld [vmem:[#allocation2 + $0x30a] sm:$0xff] }
 0x2c1   :  { %2158 = vrot.lane.b32.xlu0 %v2000_v10, %s9361_s3  ;;  %v2032_v10 = vld [vmem:[#allocation2 + $0x332] sm:$0xff] }
 0x2c2   :  { %v1784_v16 = vpop.permute.xlu1 %1783 }
 0x2c3   :  { %1941 = vst.msk [vmem:[#allocation3 + $0x118] sm:$0xff] %vm1905_vm6, %v1784_v16  ;;  %v1790_v20 = vpop.permute.xlu0 %1789 }
 0x2c4   :  { %2156 = vrot.lane.b32.xlu1 %v1999_v19, %s9361_s3  ;;  %1944 = vst.msk [vmem:[#allocation3 + $0x130] sm:$0xff] %vm1905_vm6, %v1790_v20  ;;  %v2031_v19 = vld [vmem:[#allocation2 + $0x322] sm:$0xff] }
 0x2c5   :  { %2162 = vrot.lane.b32.xlu0 %v2002_v23, %s9361_s3  ;;  %v2356_v23 = vld [vmem:[#allocation2 + $0x30] sm:$0xff] }
 0x2c6   :  { %v1788_v24 = vpop.permute.xlu1 %1787 }
 0x2c7   :  { %1943 = vst.msk [vmem:[#allocation3 + $0x128] sm:$0xff] %vm1905_vm6, %v1788_v24  ;;  %v1794_v28 = vpop.permute.xlu0 %1793 }
 0x2c8   :  { %2160 = vrot.lane.b32.xlu1 %v2001_v26, %s9361_s3  ;;  %1946 = vst.msk [vmem:[#allocation3 + $0x140] sm:$0xff] %vm1905_vm6, %v1794_v28  ;;  %v2033_v26 = vld [vmem:[#allocation2 + $0x33a] sm:$0xff] }
 0x2c9   :  { %2166 = vrot.lane.b32.xlu0 %v2004_v29, %s9361_s3  ;;  %v2358_v29 = vld [vmem:[#allocation2 + $0x48] sm:$0xff] }
 0x2ca   :  { %v1792_v30 = vpop.permute.xlu1 %1791 }
 0x2cb   :  { %1945 = vst.msk [vmem:[#allocation3 + $0x138] sm:$0xff] %vm1905_vm6, %v1792_v30  ;;  %v1798_v34 = vpop.permute.xlu0 %1797 }
 0x2cc   :  { %2164 = vrot.lane.b32.xlu1 %v2003_v33, %s9361_s3  ;;  %1948 = vst.msk [vmem:[#allocation3 + $0x150] sm:$0xff] %vm1905_vm6, %v1798_v34  ;;  %v2357_v33 = vld [vmem:[#allocation2 + $0x38] sm:$0xff] }
 0x2cd   :  { %2170 = vrot.lane.b32.xlu0 %v2006_v35, %s9361_s3  ;;  %v2360_v35 = vld [vmem:[#allocation2 + $0x60] sm:$0xff] }
 0x2ce   :  { %v1796_v36 = vpop.permute.xlu1 %1795 }
 0x2cf   :  { %1947 = vst.msk [vmem:[#allocation3 + $0x148] sm:$0xff] %vm1905_vm6, %v1796_v36  ;;  %v1802_v39 = vpop.permute.xlu0 %1801 }
 0x2d0   :  { %2168 = vrot.lane.b32.xlu1 %v2005_v38, %s9361_s3  ;;  %1950 = vst.msk [vmem:[#allocation3 + $0x160] sm:$0xff] %vm1905_vm6, %v1802_v39  ;;  %v2359_v38 = vld [vmem:[#allocation2 + $0x50] sm:$0xff] }
 0x2d1   :  { %2174 = vrot.lane.b32.xlu0 %v2008_v41, %s9361_s3  ;;  %v2362_v41 = vld [vmem:[#allocation2 + $0x78] sm:$0xff] }
 0x2d2   :  { %v1800_v42 = vpop.permute.xlu1 %1799 }
 0x2d3   :  { %1949 = vst.msk [vmem:[#allocation3 + $0x158] sm:$0xff] %vm1905_vm6, %v1800_v42  ;;  %v1806_v44 = vpop.permute.xlu0 %1805 }
 0x2d4   :  { %2172 = vrot.lane.b32.xlu1 %v2007_v43, %s9361_s3  ;;  %1952 = vst.msk [vmem:[#allocation3 + $0x170] sm:$0xff] %vm1905_vm6, %v1806_v44  ;;  %v2361_v43 = vld [vmem:[#allocation2 + $0x68] sm:$0xff] }
 0x2d5   :  { %2178 = vrot.lane.b32.xlu0 %v2010_v46, %s9361_s3  ;;  %v2364_v46 = vld [vmem:[#allocation2 + $0x90] sm:$0xff] }
 0x2d6   :  { %v1804_v47 = vpop.permute.xlu1 %1803 }
 0x2d7   :  { %1951 = vst.msk [vmem:[#allocation3 + $0x168] sm:$0xff] %vm1905_vm6, %v1804_v47  ;;  %v1810_v40 = vpop.permute.xlu0 %1809 }
 0x2d8   :  { %2176 = vrot.lane.b32.xlu1 %v2009_v49, %s9361_s3  ;;  %1954 = vst.msk [vmem:[#allocation3 + $0x180] sm:$0xff] %vm1905_vm6, %v1810_v40  ;;  %v2363_v49 = vld [vmem:[#allocation2 + $0x80] sm:$0xff] }
 0x2d9   :  { %2182 = vrot.lane.b32.xlu0 %v2012_v51, %s9361_s3  ;;  %v2366_v51 = vld [vmem:[#allocation2 + $0xa8] sm:$0xff] }
 0x2da   :  { %v1808_v54 = vpop.permute.xlu1 %1807 }
 0x2db   :  { %1953 = vst.msk [vmem:[#allocation3 + $0x178] sm:$0xff] %vm1905_vm6, %v1808_v54  ;;  %v1814_v57 = vpop.permute.xlu0 %1813 }
 0x2dc   :  { %2180 = vrot.lane.b32.xlu1 %v2011_v50, %s9361_s3  ;;  %1956 = vst.msk [vmem:[#allocation3 + $0x190] sm:$0xff] %vm1905_vm6, %v1814_v57  ;;  %v2365_v50 = vld [vmem:[#allocation2 + $0x98] sm:$0xff] }
 0x2dd   :  { %2186 = vrot.lane.b32.xlu0 %v2014_v52, %s9361_s3  ;;  %v2368_v52 = vld [vmem:[#allocation2 + $0xc0] sm:$0xff] }
 0x2de   :  { %v1812_v55 = vpop.permute.xlu1 %1811 }
 0x2df   :  { %1955 = vst.msk [vmem:[#allocation3 + $0x188] sm:$0xff] %vm1905_vm6, %v1812_v55  ;;  %v1818_v58 = vpop.permute.xlu0 %1817 }
 0x2e0   :  { %2184 = vrot.lane.b32.xlu1 %v2013_v27, %s9361_s3  ;;  %1958 = vst.msk [vmem:[#allocation3 + $0x1a0] sm:$0xff] %vm1905_vm6, %v1818_v58  ;;  %v2367_v27 = vld [vmem:[#allocation2 + $0xb0] sm:$0xff] }
 0x2e1   :  { %2190 = vrot.lane.b32.xlu0 %v2016_v8, %s9361_s3  ;;  %v2370_v8 = vld [vmem:[#allocation2 + $0xd8] sm:$0xff] }
 0x2e2   :  { %v1816_v56 = vpop.permute.xlu1 %1815 }
 0x2e3   :  { %1957 = vst.msk [vmem:[#allocation3 + $0x198] sm:$0xff] %vm1905_vm6, %v1816_v56  ;;  %v1822_v63 = vpop.permute.xlu0 %1821 }
 0x2e4   :  { %2188 = vrot.lane.b32.xlu1 %v2015_v62, %s9361_s3  ;;  %1960 = vst.msk [vmem:[#allocation3 + $0x1b0] sm:$0xff] %vm1905_vm6, %v1822_v63  ;;  %v2369_v62 = vld [vmem:[#allocation2 + $0xc8] sm:$0xff] }
 0x2e5   :  { %2194 = vrot.lane.b32.xlu0 %v2018_v1, %s9361_s3  ;;  %v2372_v1 = vld [vmem:[#allocation2 + $0xf0] sm:$0xff] }
 0x2e6   :  { %v1820_v2 = vpop.permute.xlu1 %1819 }
 0x2e7   :  { %1959 = vst.msk [vmem:[#allocation3 + $0x1a8] sm:$0xff] %vm1905_vm6, %v1820_v2  ;;  %v1826_v6 = vpop.permute.xlu0 %1825 }
 0x2e8   :  { %2192 = vrot.lane.b32.xlu1 %v2017_v5, %s9361_s3  ;;  %1962 = vst.msk [vmem:[#allocation3 + $0x1c0] sm:$0xff] %vm1905_vm6, %v1826_v6  ;;  %v2371_v5 = vld [vmem:[#allocation2 + $0xe0] sm:$0xff] }
 0x2e9   :  { %2198 = vrot.lane.b32.xlu0 %v2020_v9, %s9361_s3  ;;  %v2374_v9 = vld [vmem:[#allocation2 + $0x108] sm:$0xff] }
 0x2ea   :  { %v1824_v11 = vpop.permute.xlu1 %1823 }
 0x2eb   :  { %1961 = vst.msk [vmem:[#allocation3 + $0x1b8] sm:$0xff] %vm1905_vm6, %v1824_v11  ;;  %v1830_v15 = vpop.permute.xlu0 %1829 }
 0x2ec   :  { %2196 = vrot.lane.b32.xlu1 %v2019_v14, %s9361_s3  ;;  %1964 = vst.msk [vmem:[#allocation3 + $0x1d0] sm:$0xff] %vm1905_vm6, %v1830_v15  ;;  %v2373_v14 = vld [vmem:[#allocation2 + $0xf8] sm:$0xff] }
 0x2ed   :  { %2202 = vrot.lane.b32.xlu0 %v2022_v21, %s9361_s3  ;;  %v2376_v21 = vld [vmem:[#allocation2 + $0x120] sm:$0xff] }
 0x2ee   :  { %v1828_v22 = vpop.permute.xlu1 %1827 }
 0x2ef   :  { %1963 = vst.msk [vmem:[#allocation3 + $0x1c8] sm:$0xff] %vm1905_vm6, %v1828_v22  ;;  %v1834_v32 = vpop.permute.xlu0 %1833 }
 0x2f0   :  { %2200 = vrot.lane.b32.xlu1 %v2021_v31, %s9361_s3  ;;  %1966 = vst.msk [vmem:[#allocation3 + $0x1e0] sm:$0xff] %vm1905_vm6, %v1834_v32  ;;  %v2375_v31 = vld [vmem:[#allocation2 + $0x110] sm:$0xff] }
 0x2f1   :  { %2206 = vrot.lane.b32.xlu0 %v2024_v45, %s9361_s3  ;;  %v2378_v45 = vld [vmem:[#allocation2 + $0x138] sm:$0xff] }
 0x2f2   :  { %v1832_v48 = vpop.permute.xlu1 %1831 }
 0x2f3   :  { %1965 = vst.msk [vmem:[#allocation3 + $0x1d8] sm:$0xff] %vm1905_vm6, %v1832_v48  ;;  %v1838_v60 = vpop.permute.xlu0 %1837 }
 0x2f4   :  { %2204 = vrot.lane.b32.xlu1 %v2023_v59, %s9361_s3  ;;  %1968 = vst.msk [vmem:[#allocation3 + $0x1f0] sm:$0xff] %vm1905_vm6, %v1838_v60  ;;  %v2377_v59 = vld [vmem:[#allocation2 + $0x128] sm:$0xff] }
 0x2f5   :  { %2210 = vrot.lane.b32.xlu0 %v2026_v3, %s9361_s3  ;;  %v2380_v3 = vld [vmem:[#allocation2 + $0x150] sm:$0xff] }
 0x2f6   :  { %v1836_v4 = vpop.permute.xlu1 %1835 }
 0x2f7   :  { %1967 = vst.msk [vmem:[#allocation3 + $0x1e8] sm:$0xff] %vm1905_vm6, %v1836_v4  ;;  %v2099_v25 = vpop.permute.xlu0 %2098 }
 0x2f8   :  { %2208 = vrot.lane.b32.xlu1 %v2025_v12, %s9361_s3  ;;  %2291 = vst.msk [vmem:[#allocation3] sm:$0xff] %vm2290_vm7, %v2099_v25  ;;  %v2379_v12 = vld [vmem:[#allocation2 + $0x140] sm:$0xff] }
 0x2f9   :  { %2214 = vrot.lane.b32.xlu0 %v2028_v0, %s9361_s3  ;;  %v2382_v0 = vld [vmem:[#allocation2 + $0x168] sm:$0xff] }
 0x2fa   :  { %v1840_v13 = vpop.permute.xlu1 %1839 }
 0x2fb   :  { %1969 = vst.msk [vmem:[#allocation3 + $0x1f8] sm:$0xff] %vm1905_vm6, %v1840_v13  ;;  %v2103_v53 = vpop.permute.xlu0 %2102 }
 0x2fc   :  { %2212 = vrot.lane.b32.xlu1 %v2027_v17, %s9361_s3  ;;  %2293 = vst.msk [vmem:[#allocation3 + $0x10] sm:$0xff] %vm2290_vm7, %v2103_v53  ;;  %v2381_v17 = vld [vmem:[#allocation2 + $0x158] sm:$0xff] }
 0x2fd   :  { %2218 = vrot.lane.b32.xlu0 %v2030_v37, %s9361_s3  ;;  %v2384_v37 = vld [vmem:[#allocation2 + $0x180] sm:$0xff] }
 0x2fe   :  { %v2101_v61 = vpop.permute.xlu1 %2100 }
 0x2ff   :  { %2292 = vst.msk [vmem:[#allocation3 + $0x8] sm:$0xff] %vm2290_vm7, %v2101_v61  ;;  %v2107_v18 = vpop.permute.xlu0 %2106 }
 0x300   :  { %2216 = vrot.lane.b32.xlu1 %v2029_v7, %s9361_s3  ;;  %2295 = vst.msk [vmem:[#allocation3 + $0x20] sm:$0xff] %vm2290_vm7, %v2107_v18  ;;  %v2383_v7 = vld [vmem:[#allocation2 + $0x170] sm:$0xff] }
 0x301   :  { %2222 = vrot.lane.b32.xlu0 %v2032_v10, %s9361_s3  ;;  %v2386_v10 = vld [vmem:[#allocation2 + $0x198] sm:$0xff] }
 0x302   :  { %v2105_v16 = vpop.permute.xlu1 %2104 }
 0x303   :  { %2294 = vst.msk [vmem:[#allocation3 + $0x18] sm:$0xff] %vm2290_vm7, %v2105_v16  ;;  %v2111_v20 = vpop.permute.xlu0 %2110 }
 0x304   :  { %2220 = vrot.lane.b32.xlu1 %v2031_v19, %s9361_s3  ;;  %2297 = vst.msk [vmem:[#allocation3 + $0x30] sm:$0xff] %vm2290_vm7, %v2111_v20  ;;  %v2385_v19 = vld [vmem:[#allocation2 + $0x188] sm:$0xff] }
 0x305   :  { %2484 = vrot.lane.b32.xlu0 %v2356_v23, %s9362_s21  ;;  %v2388_v23 = vld [vmem:[#allocation2 + $0x1e0] sm:$0xff] }
 0x306   :  { %v2109_v24 = vpop.permute.xlu1 %2108 }
 0x307   :  { %2296 = vst.msk [vmem:[#allocation3 + $0x28] sm:$0xff] %vm2290_vm7, %v2109_v24  ;;  %v2115_v28 = vpop.permute.xlu0 %2114 }
 0x308   :  { %2224 = vrot.lane.b32.xlu1 %v2033_v26, %s9361_s3  ;;  %2299 = vst.msk [vmem:[#allocation3 + $0x40] sm:$0xff] %vm2290_vm7, %v2115_v28  ;;  %v2387_v26 = vld [vmem:[#allocation2 + $0x1a0] sm:$0xff] }
 0x309   :  { %2488 = vrot.lane.b32.xlu0 %v2358_v29, %s9362_s21  ;;  %v2390_v29 = vld [vmem:[#allocation2 + $0x1f8] sm:$0xff] }
 0x30a   :  { %v2113_v30 = vpop.permute.xlu1 %2112 }
 0x30b   :  { %2298 = vst.msk [vmem:[#allocation3 + $0x38] sm:$0xff] %vm2290_vm7, %v2113_v30  ;;  %v2119_v34 = vpop.permute.xlu0 %2118 }
 0x30c   :  { %2486 = vrot.lane.b32.xlu1 %v2357_v33, %s9362_s21  ;;  %2301 = vst.msk [vmem:[#allocation3 + $0x50] sm:$0xff] %vm2290_vm7, %v2119_v34  ;;  %v2389_v33 = vld [vmem:[#allocation2 + $0x1e8] sm:$0xff] }
 0x30d   :  { %2492 = vrot.lane.b32.xlu0 %v2360_v35, %s9362_s21  ;;  %v2392_v35 = vld [vmem:[#allocation2 + $0x210] sm:$0xff] }
 0x30e   :  { %v2117_v36 = vpop.permute.xlu1 %2116 }
 0x30f   :  { %2300 = vst.msk [vmem:[#allocation3 + $0x48] sm:$0xff] %vm2290_vm7, %v2117_v36  ;;  %v2123_v39 = vpop.permute.xlu0 %2122 }
 0x310   :  { %2490 = vrot.lane.b32.xlu1 %v2359_v38, %s9362_s21  ;;  %2303 = vst.msk [vmem:[#allocation3 + $0x60] sm:$0xff] %vm2290_vm7, %v2123_v39  ;;  %v2391_v38 = vld [vmem:[#allocation2 + $0x200] sm:$0xff] }
 0x311   :  { %2496 = vrot.lane.b32.xlu0 %v2362_v41, %s9362_s21  ;;  %v2394_v41 = vld [vmem:[#allocation2 + $0x228] sm:$0xff] }
 0x312   :  { %v2121_v42 = vpop.permute.xlu1 %2120 }
 0x313   :  { %2302 = vst.msk [vmem:[#allocation3 + $0x58] sm:$0xff] %vm2290_vm7, %v2121_v42  ;;  %v2127_v44 = vpop.permute.xlu0 %2126 }
 0x314   :  { %2494 = vrot.lane.b32.xlu1 %v2361_v43, %s9362_s21  ;;  %2305 = vst.msk [vmem:[#allocation3 + $0x70] sm:$0xff] %vm2290_vm7, %v2127_v44  ;;  %v2393_v43 = vld [vmem:[#allocation2 + $0x218] sm:$0xff] }
 0x315   :  { %2500 = vrot.lane.b32.xlu0 %v2364_v46, %s9362_s21  ;;  %v2396_v46 = vld [vmem:[#allocation2 + $0x240] sm:$0xff] }
 0x316   :  { %v2125_v47 = vpop.permute.xlu1 %2124 }
 0x317   :  { %2304 = vst.msk [vmem:[#allocation3 + $0x68] sm:$0xff] %vm2290_vm7, %v2125_v47  ;;  %v2131_v40 = vpop.permute.xlu0 %2130 }
 0x318   :  { %2498 = vrot.lane.b32.xlu1 %v2363_v49, %s9362_s21  ;;  %2307 = vst.msk [vmem:[#allocation3 + $0x80] sm:$0xff] %vm2290_vm7, %v2131_v40  ;;  %v2395_v49 = vld [vmem:[#allocation2 + $0x230] sm:$0xff] }
 0x319   :  { %2504 = vrot.lane.b32.xlu0 %v2366_v51, %s9362_s21  ;;  %v2398_v51 = vld [vmem:[#allocation2 + $0x258] sm:$0xff] }
 0x31a   :  { %v2129_v54 = vpop.permute.xlu1 %2128 }
 0x31b   :  { %2306 = vst.msk [vmem:[#allocation3 + $0x78] sm:$0xff] %vm2290_vm7, %v2129_v54  ;;  %v2135_v57 = vpop.permute.xlu0 %2134 }
 0x31c   :  { %2502 = vrot.lane.b32.xlu1 %v2365_v50, %s9362_s21  ;;  %2309 = vst.msk [vmem:[#allocation3 + $0x90] sm:$0xff] %vm2290_vm7, %v2135_v57  ;;  %v2397_v50 = vld [vmem:[#allocation2 + $0x248] sm:$0xff] }
 0x31d   :  { %2508 = vrot.lane.b32.xlu0 %v2368_v52, %s9362_s21  ;;  %v2400_v52 = vld [vmem:[#allocation2 + $0x270] sm:$0xff] }
 0x31e   :  { %v2133_v55 = vpop.permute.xlu1 %2132 }
 0x31f   :  { %2308 = vst.msk [vmem:[#allocation3 + $0x88] sm:$0xff] %vm2290_vm7, %v2133_v55  ;;  %v2139_v58 = vpop.permute.xlu0 %2138 }
 0x320   :  { %2506 = vrot.lane.b32.xlu1 %v2367_v27, %s9362_s21  ;;  %2311 = vst.msk [vmem:[#allocation3 + $0xa0] sm:$0xff] %vm2290_vm7, %v2139_v58  ;;  %v2399_v27 = vld [vmem:[#allocation2 + $0x260] sm:$0xff] }
 0x321   :  { %2512 = vrot.lane.b32.xlu0 %v2370_v8, %s9362_s21  ;;  %v2402_v8 = vld [vmem:[#allocation2 + $0x288] sm:$0xff] }
 0x322   :  { %v2137_v56 = vpop.permute.xlu1 %2136 }
 0x323   :  { %2310 = vst.msk [vmem:[#allocation3 + $0x98] sm:$0xff] %vm2290_vm7, %v2137_v56  ;;  %v2143_v63 = vpop.permute.xlu0 %2142 }
 0x324   :  { %2510 = vrot.lane.b32.xlu1 %v2369_v62, %s9362_s21  ;;  %2313 = vst.msk [vmem:[#allocation3 + $0xb0] sm:$0xff] %vm2290_vm7, %v2143_v63  ;;  %v2401_v62 = vld [vmem:[#allocation2 + $0x278] sm:$0xff] }
 0x325   :  { %2516 = vrot.lane.b32.xlu0 %v2372_v1, %s9362_s21  ;;  %v2404_v1 = vld [vmem:[#allocation2 + $0x2a0] sm:$0xff] }
 0x326   :  { %v2141_v2 = vpop.permute.xlu1 %2140 }
 0x327   :  { %2312 = vst.msk [vmem:[#allocation3 + $0xa8] sm:$0xff] %vm2290_vm7, %v2141_v2  ;;  %v2147_v6 = vpop.permute.xlu0 %2146 }
 0x328   :  { %2514 = vrot.lane.b32.xlu1 %v2371_v5, %s9362_s21  ;;  %2315 = vst.msk [vmem:[#allocation3 + $0xc0] sm:$0xff] %vm2290_vm7, %v2147_v6  ;;  %v2403_v5 = vld [vmem:[#allocation2 + $0x290] sm:$0xff] }
 0x329   :  { %2520 = vrot.lane.b32.xlu0 %v2374_v9, %s9362_s21  ;;  %v2406_v9 = vld [vmem:[#allocation2 + $0x2b8] sm:$0xff] }
 0x32a   :  { %v2145_v11 = vpop.permute.xlu1 %2144 }
 0x32b   :  { %2314 = vst.msk [vmem:[#allocation3 + $0xb8] sm:$0xff] %vm2290_vm7, %v2145_v11  ;;  %v2151_v15 = vpop.permute.xlu0 %2150 }
 0x32c   :  { %2518 = vrot.lane.b32.xlu1 %v2373_v14, %s9362_s21  ;;  %2317 = vst.msk [vmem:[#allocation3 + $0xd0] sm:$0xff] %vm2290_vm7, %v2151_v15  ;;  %v2405_v14 = vld [vmem:[#allocation2 + $0x2a8] sm:$0xff] }
 0x32d   :  { %2524 = vrot.lane.b32.xlu0 %v2376_v21, %s9362_s21  ;;  %v2408_v21 = vld [vmem:[#allocation2 + $0x2d0] sm:$0xff] }
 0x32e   :  { %v2149_v22 = vpop.permute.xlu1 %2148 }
 0x32f   :  { %2316 = vst.msk [vmem:[#allocation3 + $0xc8] sm:$0xff] %vm2290_vm7, %v2149_v22  ;;  %v2155_v32 = vpop.permute.xlu0 %2154 }
 0x330   :  { %2522 = vrot.lane.b32.xlu1 %v2375_v31, %s9362_s21  ;;  %2319 = vst.msk [vmem:[#allocation3 + $0xe0] sm:$0xff] %vm2290_vm7, %v2155_v32  ;;  %v2407_v31 = vld [vmem:[#allocation2 + $0x2c0] sm:$0xff] }
 0x331   :  { %2528 = vrot.lane.b32.xlu0 %v2378_v45, %s9362_s21  ;;  %v2410_v45 = vld [vmem:[#allocation2 + $0x2e8] sm:$0xff] }
 0x332   :  { %v2153_v48 = vpop.permute.xlu1 %2152 }
 0x333   :  { %2318 = vst.msk [vmem:[#allocation3 + $0xd8] sm:$0xff] %vm2290_vm7, %v2153_v48  ;;  %v2159_v60 = vpop.permute.xlu0 %2158 }
 0x334   :  { %2526 = vrot.lane.b32.xlu1 %v2377_v59, %s9362_s21  ;;  %2321 = vst.msk [vmem:[#allocation3 + $0xf0] sm:$0xff] %vm2290_vm7, %v2159_v60  ;;  %v2409_v59 = vld [vmem:[#allocation2 + $0x2d8] sm:$0xff] }
 0x335   :  { %2532 = vrot.lane.b32.xlu0 %v2380_v3, %s9362_s21  ;;  %v2412_v3 = vld [vmem:[#allocation2 + $0x300] sm:$0xff] }
 0x336   :  { %v2157_v4 = vpop.permute.xlu1 %2156 }
 0x337   :  { %2320 = vst.msk [vmem:[#allocation3 + $0xe8] sm:$0xff] %vm2290_vm7, %v2157_v4  ;;  %v2163_v25 = vpop.permute.xlu0 %2162 }
 0x338   :  { %2530 = vrot.lane.b32.xlu1 %v2379_v12, %s9362_s21  ;;  %2323 = vst.msk [vmem:[#allocation3 + $0x100] sm:$0xff] %vm2290_vm7, %v2163_v25  ;;  %v2411_v12 = vld [vmem:[#allocation2 + $0x2f0] sm:$0xff] }
 0x339   :  { %2536 = vrot.lane.b32.xlu0 %v2382_v0, %s9362_s21  ;;  %v2414_v0 = vld [vmem:[#allocation2 + $0x318] sm:$0xff] }
 0x33a   :  { %v2161_v13 = vpop.permute.xlu1 %2160 }
 0x33b   :  { %2322 = vst.msk [vmem:[#allocation3 + $0xf8] sm:$0xff] %vm2290_vm7, %v2161_v13  ;;  %v2167_v53 = vpop.permute.xlu0 %2166 }
 0x33c   :  { %2534 = vrot.lane.b32.xlu1 %v2381_v17, %s9362_s21  ;;  %2325 = vst.msk [vmem:[#allocation3 + $0x110] sm:$0xff] %vm2290_vm7, %v2167_v53  ;;  %v2413_v17 = vld [vmem:[#allocation2 + $0x308] sm:$0xff] }
 0x33d   :  { %2540 = vrot.lane.b32.xlu0 %v2384_v37, %s9362_s21  ;;  %v2416_v37 = vld [vmem:[#allocation2 + $0x330] sm:$0xff] }
 0x33e   :  { %v2165_v61 = vpop.permute.xlu1 %2164 }
 0x33f   :  { %2324 = vst.msk [vmem:[#allocation3 + $0x108] sm:$0xff] %vm2290_vm7, %v2165_v61  ;;  %v2171_v18 = vpop.permute.xlu0 %2170 }
 0x340   :  { %2538 = vrot.lane.b32.xlu1 %v2383_v7, %s9362_s21  ;;  %2327 = vst.msk [vmem:[#allocation3 + $0x120] sm:$0xff] %vm2290_vm7, %v2171_v18  ;;  %v2415_v7 = vld [vmem:[#allocation2 + $0x320] sm:$0xff] }
 0x341   :  { %2544 = vrot.lane.b32.xlu0 %v2386_v10, %s9362_s21  ;;  %v2418_v10 = vld [vmem:[#allocation2 + $0x348] sm:$0xff] }
 0x342   :  { %v2169_v16 = vpop.permute.xlu1 %2168 }
 0x343   :  { %2326 = vst.msk [vmem:[#allocation3 + $0x118] sm:$0xff] %vm2290_vm7, %v2169_v16  ;;  %v2175_v20 = vpop.permute.xlu0 %2174 }
 0x344   :  { %2542 = vrot.lane.b32.xlu1 %v2385_v19, %s9362_s21  ;;  %2329 = vst.msk [vmem:[#allocation3 + $0x130] sm:$0xff] %vm2290_vm7, %v2175_v20  ;;  %v2417_v19 = vld [vmem:[#allocation2 + $0x338] sm:$0xff] }
 0x345   :  { %2548 = vrot.lane.b32.xlu0 %v2388_v23, %s9362_s21  ;;  %v2741_v23 = vld [vmem:[#allocation2 + $0x31] sm:$0xff] }
 0x346   :  { %v2173_v24 = vpop.permute.xlu1 %2172 }
 0x347   :  { %2328 = vst.msk [vmem:[#allocation3 + $0x128] sm:$0xff] %vm2290_vm7, %v2173_v24  ;;  %v2179_v28 = vpop.permute.xlu0 %2178 }
 0x348   :  { %2546 = vrot.lane.b32.xlu1 %v2387_v26, %s9362_s21  ;;  %2331 = vst.msk [vmem:[#allocation3 + $0x140] sm:$0xff] %vm2290_vm7, %v2179_v28  ;;  %v2419_v26 = vld [vmem:[#allocation2 + $0x350] sm:$0xff] }
 0x349   :  { %2552 = vrot.lane.b32.xlu0 %v2390_v29, %s9362_s21  ;;  %v2743_v29 = vld [vmem:[#allocation2 + $0x49] sm:$0xff] }
 0x34a   :  { %v2177_v30 = vpop.permute.xlu1 %2176 }
 0x34b   :  { %2330 = vst.msk [vmem:[#allocation3 + $0x138] sm:$0xff] %vm2290_vm7, %v2177_v30  ;;  %v2183_v34 = vpop.permute.xlu0 %2182 }
 0x34c   :  { %2550 = vrot.lane.b32.xlu1 %v2389_v33, %s9362_s21  ;;  %2333 = vst.msk [vmem:[#allocation3 + $0x150] sm:$0xff] %vm2290_vm7, %v2183_v34  ;;  %v2742_v33 = vld [vmem:[#allocation2 + $0x39] sm:$0xff] }
 0x34d   :  { %2556 = vrot.lane.b32.xlu0 %v2392_v35, %s9362_s21  ;;  %v2745_v35 = vld [vmem:[#allocation2 + $0x61] sm:$0xff] }
 0x34e   :  { %v2181_v36 = vpop.permute.xlu1 %2180 }
 0x34f   :  { %2332 = vst.msk [vmem:[#allocation3 + $0x148] sm:$0xff] %vm2290_vm7, %v2181_v36  ;;  %v2187_v39 = vpop.permute.xlu0 %2186 }
 0x350   :  { %2554 = vrot.lane.b32.xlu1 %v2391_v38, %s9362_s21  ;;  %2335 = vst.msk [vmem:[#allocation3 + $0x160] sm:$0xff] %vm2290_vm7, %v2187_v39  ;;  %v2744_v38 = vld [vmem:[#allocation2 + $0x51] sm:$0xff] }
 0x351   :  { %2560 = vrot.lane.b32.xlu0 %v2394_v41, %s9362_s21  ;;  %v2747_v41 = vld [vmem:[#allocation2 + $0x79] sm:$0xff] }
 0x352   :  { %v2185_v42 = vpop.permute.xlu1 %2184 }
 0x353   :  { %2334 = vst.msk [vmem:[#allocation3 + $0x158] sm:$0xff] %vm2290_vm7, %v2185_v42  ;;  %v2191_v44 = vpop.permute.xlu0 %2190 }
 0x354   :  { %2558 = vrot.lane.b32.xlu1 %v2393_v43, %s9362_s21  ;;  %2337 = vst.msk [vmem:[#allocation3 + $0x170] sm:$0xff] %vm2290_vm7, %v2191_v44  ;;  %v2746_v43 = vld [vmem:[#allocation2 + $0x69] sm:$0xff] }
 0x355   :  { %2564 = vrot.lane.b32.xlu0 %v2396_v46, %s9362_s21  ;;  %v2749_v46 = vld [vmem:[#allocation2 + $0x91] sm:$0xff] }
 0x356   :  { %v2189_v47 = vpop.permute.xlu1 %2188 }
 0x357   :  { %2336 = vst.msk [vmem:[#allocation3 + $0x168] sm:$0xff] %vm2290_vm7, %v2189_v47  ;;  %v2195_v40 = vpop.permute.xlu0 %2194 }
 0x358   :  { %2562 = vrot.lane.b32.xlu1 %v2395_v49, %s9362_s21  ;;  %2339 = vst.msk [vmem:[#allocation3 + $0x180] sm:$0xff] %vm2290_vm7, %v2195_v40  ;;  %v2748_v49 = vld [vmem:[#allocation2 + $0x81] sm:$0xff] }
 0x359   :  { %2568 = vrot.lane.b32.xlu0 %v2398_v51, %s9362_s21  ;;  %v2751_v51 = vld [vmem:[#allocation2 + $0xa9] sm:$0xff] }
 0x35a   :  { %v2193_v54 = vpop.permute.xlu1 %2192 }
 0x35b   :  { %2338 = vst.msk [vmem:[#allocation3 + $0x178] sm:$0xff] %vm2290_vm7, %v2193_v54  ;;  %v2199_v57 = vpop.permute.xlu0 %2198 }
 0x35c   :  { %2566 = vrot.lane.b32.xlu1 %v2397_v50, %s9362_s21  ;;  %2341 = vst.msk [vmem:[#allocation3 + $0x190] sm:$0xff] %vm2290_vm7, %v2199_v57  ;;  %v2750_v50 = vld [vmem:[#allocation2 + $0x99] sm:$0xff] }
 0x35d   :  { %2572 = vrot.lane.b32.xlu0 %v2400_v52, %s9362_s21  ;;  %v2753_v52 = vld [vmem:[#allocation2 + $0xc1] sm:$0xff] }
 0x35e   :  { %v2197_v55 = vpop.permute.xlu1 %2196 }
 0x35f   :  { %2340 = vst.msk [vmem:[#allocation3 + $0x188] sm:$0xff] %vm2290_vm7, %v2197_v55  ;;  %v2203_v58 = vpop.permute.xlu0 %2202 }
 0x360   :  { %2570 = vrot.lane.b32.xlu1 %v2399_v27, %s9362_s21  ;;  %2343 = vst.msk [vmem:[#allocation3 + $0x1a0] sm:$0xff] %vm2290_vm7, %v2203_v58  ;;  %v2752_v27 = vld [vmem:[#allocation2 + $0xb1] sm:$0xff] }
 0x361   :  { %2576 = vrot.lane.b32.xlu0 %v2402_v8, %s9362_s21  ;;  %v2755_v8 = vld [vmem:[#allocation2 + $0xd9] sm:$0xff] }
 0x362   :  { %v2201_v56 = vpop.permute.xlu1 %2200 }
 0x363   :  { %2342 = vst.msk [vmem:[#allocation3 + $0x198] sm:$0xff] %vm2290_vm7, %v2201_v56  ;;  %v2207_v63 = vpop.permute.xlu0 %2206 }
 0x364   :  { %2574 = vrot.lane.b32.xlu1 %v2401_v62, %s9362_s21  ;;  %2345 = vst.msk [vmem:[#allocation3 + $0x1b0] sm:$0xff] %vm2290_vm7, %v2207_v63  ;;  %v2754_v62 = vld [vmem:[#allocation2 + $0xc9] sm:$0xff] }
 0x365   :  { %2580 = vrot.lane.b32.xlu0 %v2404_v1, %s9362_s21  ;;  %v2757_v1 = vld [vmem:[#allocation2 + $0xf1] sm:$0xff] }
 0x366   :  { %v2205_v2 = vpop.permute.xlu1 %2204 }
 0x367   :  { %2344 = vst.msk [vmem:[#allocation3 + $0x1a8] sm:$0xff] %vm2290_vm7, %v2205_v2  ;;  %v2211_v6 = vpop.permute.xlu0 %2210 }
 0x368   :  { %2578 = vrot.lane.b32.xlu1 %v2403_v5, %s9362_s21  ;;  %2347 = vst.msk [vmem:[#allocation3 + $0x1c0] sm:$0xff] %vm2290_vm7, %v2211_v6  ;;  %v2756_v5 = vld [vmem:[#allocation2 + $0xe1] sm:$0xff] }
 0x369   :  { %2584 = vrot.lane.b32.xlu0 %v2406_v9, %s9362_s21  ;;  %v2759_v9 = vld [vmem:[#allocation2 + $0x109] sm:$0xff] }
 0x36a   :  { %v2209_v11 = vpop.permute.xlu1 %2208 }
 0x36b   :  { %2346 = vst.msk [vmem:[#allocation3 + $0x1b8] sm:$0xff] %vm2290_vm7, %v2209_v11  ;;  %v2215_v15 = vpop.permute.xlu0 %2214 }
 0x36c   :  { %2582 = vrot.lane.b32.xlu1 %v2405_v14, %s9362_s21  ;;  %2349 = vst.msk [vmem:[#allocation3 + $0x1d0] sm:$0xff] %vm2290_vm7, %v2215_v15  ;;  %v2758_v14 = vld [vmem:[#allocation2 + $0xf9] sm:$0xff] }
 0x36d   :  { %2588 = vrot.lane.b32.xlu0 %v2408_v21, %s9362_s21  ;;  %v2761_v21 = vld [vmem:[#allocation2 + $0x121] sm:$0xff] }
 0x36e   :  { %v2213_v22 = vpop.permute.xlu1 %2212 }
 0x36f   :  { %2348 = vst.msk [vmem:[#allocation3 + $0x1c8] sm:$0xff] %vm2290_vm7, %v2213_v22  ;;  %v2219_v32 = vpop.permute.xlu0 %2218 }
 0x370   :  { %2586 = vrot.lane.b32.xlu1 %v2407_v31, %s9362_s21  ;;  %2351 = vst.msk [vmem:[#allocation3 + $0x1e0] sm:$0xff] %vm2290_vm7, %v2219_v32  ;;  %v2760_v31 = vld [vmem:[#allocation2 + $0x111] sm:$0xff] }
 0x371   :  { %2592 = vrot.lane.b32.xlu0 %v2410_v45, %s9362_s21  ;;  %v2763_v45 = vld [vmem:[#allocation2 + $0x139] sm:$0xff] }
 0x372   :  { %v2217_v48 = vpop.permute.xlu1 %2216 }
 0x373   :  { %2350 = vst.msk [vmem:[#allocation3 + $0x1d8] sm:$0xff] %vm2290_vm7, %v2217_v48  ;;  %v2223_v60 = vpop.permute.xlu0 %2222 }
 0x374   :  { %2590 = vrot.lane.b32.xlu1 %v2409_v59, %s9362_s21  ;;  %2353 = vst.msk [vmem:[#allocation3 + $0x1f0] sm:$0xff] %vm2290_vm7, %v2223_v60  ;;  %v2762_v59 = vld [vmem:[#allocation2 + $0x129] sm:$0xff] }
 0x375   :  { %2596 = vrot.lane.b32.xlu0 %v2412_v3, %s9362_s21  ;;  %v2765_v3 = vld [vmem:[#allocation2 + $0x151] sm:$0xff] }
 0x376   :  { %v2221_v4 = vpop.permute.xlu1 %2220 }
 0x377   :  { %2352 = vst.msk [vmem:[#allocation3 + $0x1e8] sm:$0xff] %vm2290_vm7, %v2221_v4  ;;  %v2485_v25 = vpop.permute.xlu0 %2484 }
 0x378   :  { %2594 = vrot.lane.b32.xlu1 %v2411_v12, %s9362_s21  ;;  %2677 = vst.msk [vmem:[#allocation3] sm:$0xff] %vm2676_vm8, %v2485_v25  ;;  %v2764_v12 = vld [vmem:[#allocation2 + $0x141] sm:$0xff] }
 0x379   :  { %2600 = vrot.lane.b32.xlu0 %v2414_v0, %s9362_s21  ;;  %v2767_v0 = vld [vmem:[#allocation2 + $0x169] sm:$0xff] }
 0x37a   :  { %v2225_v13 = vpop.permute.xlu1 %2224 }
 0x37b   :  { %2354 = vst.msk [vmem:[#allocation3 + $0x1f8] sm:$0xff] %vm2290_vm7, %v2225_v13  ;;  %v2489_v53 = vpop.permute.xlu0 %2488 }
 0x37c   :  { %2598 = vrot.lane.b32.xlu1 %v2413_v17, %s9362_s21  ;;  %2679 = vst.msk [vmem:[#allocation3 + $0x10] sm:$0xff] %vm2676_vm8, %v2489_v53  ;;  %v2766_v17 = vld [vmem:[#allocation2 + $0x159] sm:$0xff] }
 0x37d   :  { %2604 = vrot.lane.b32.xlu0 %v2416_v37, %s9362_s21  ;;  %v2769_v37 = vld [vmem:[#allocation2 + $0x181] sm:$0xff] }
 0x37e   :  { %v2487_v61 = vpop.permute.xlu1 %2486 }
 0x37f   :  { %2678 = vst.msk [vmem:[#allocation3 + $0x8] sm:$0xff] %vm2676_vm8, %v2487_v61  ;;  %v2493_v18 = vpop.permute.xlu0 %2492 }
 0x380   :  { %2602 = vrot.lane.b32.xlu1 %v2415_v7, %s9362_s21  ;;  %2681 = vst.msk [vmem:[#allocation3 + $0x20] sm:$0xff] %vm2676_vm8, %v2493_v18  ;;  %v2768_v7 = vld [vmem:[#allocation2 + $0x171] sm:$0xff] }
 0x381   :  { %2608 = vrot.lane.b32.xlu0 %v2418_v10, %s9362_s21  ;;  %v2771_v10 = vld [vmem:[#allocation2 + $0x199] sm:$0xff] }
 0x382   :  { %v2491_v16 = vpop.permute.xlu1 %2490 }
 0x383   :  { %2680 = vst.msk [vmem:[#allocation3 + $0x18] sm:$0xff] %vm2676_vm8, %v2491_v16  ;;  %v2497_v20 = vpop.permute.xlu0 %2496 }
 0x384   :  { %2606 = vrot.lane.b32.xlu1 %v2417_v19, %s9362_s21  ;;  %2683 = vst.msk [vmem:[#allocation3 + $0x30] sm:$0xff] %vm2676_vm8, %v2497_v20  ;;  %v2770_v19 = vld [vmem:[#allocation2 + $0x189] sm:$0xff] }
 0x385   :  { %2869 = vrot.lane.b32.xlu0 %v2741_v23, %s9363_s7  ;;  %v2773_v23 = vld [vmem:[#allocation2 + $0x1e1] sm:$0xff] }
 0x386   :  { %v2495_v24 = vpop.permute.xlu1 %2494 }
 0x387   :  { %2682 = vst.msk [vmem:[#allocation3 + $0x28] sm:$0xff] %vm2676_vm8, %v2495_v24  ;;  %v2501_v28 = vpop.permute.xlu0 %2500 }
 0x388   :  { %2610 = vrot.lane.b32.xlu1 %v2419_v26, %s9362_s21  ;;  %2685 = vst.msk [vmem:[#allocation3 + $0x40] sm:$0xff] %vm2676_vm8, %v2501_v28  ;;  %v2772_v26 = vld [vmem:[#allocation2 + $0x1a1] sm:$0xff] }
 0x389   :  { %2873 = vrot.lane.b32.xlu0 %v2743_v29, %s9363_s7  ;;  %v2775_v29 = vld [vmem:[#allocation2 + $0x1f9] sm:$0xff] }
 0x38a   :  { %v2499_v30 = vpop.permute.xlu1 %2498 }
 0x38b   :  { %2684 = vst.msk [vmem:[#allocation3 + $0x38] sm:$0xff] %vm2676_vm8, %v2499_v30  ;;  %v2505_v34 = vpop.permute.xlu0 %2504 }
 0x38c   :  { %2871 = vrot.lane.b32.xlu1 %v2742_v33, %s9363_s7  ;;  %2687 = vst.msk [vmem:[#allocation3 + $0x50] sm:$0xff] %vm2676_vm8, %v2505_v34  ;;  %v2774_v33 = vld [vmem:[#allocation2 + $0x1e9] sm:$0xff] }
 0x38d   :  { %2877 = vrot.lane.b32.xlu0 %v2745_v35, %s9363_s7  ;;  %v2777_v35 = vld [vmem:[#allocation2 + $0x211] sm:$0xff] }
 0x38e   :  { %v2503_v36 = vpop.permute.xlu1 %2502 }
 0x38f   :  { %2686 = vst.msk [vmem:[#allocation3 + $0x48] sm:$0xff] %vm2676_vm8, %v2503_v36  ;;  %v2509_v39 = vpop.permute.xlu0 %2508 }
 0x390   :  { %2875 = vrot.lane.b32.xlu1 %v2744_v38, %s9363_s7  ;;  %2689 = vst.msk [vmem:[#allocation3 + $0x60] sm:$0xff] %vm2676_vm8, %v2509_v39  ;;  %v2776_v38 = vld [vmem:[#allocation2 + $0x201] sm:$0xff] }
 0x391   :  { %2881 = vrot.lane.b32.xlu0 %v2747_v41, %s9363_s7  ;;  %v2779_v41 = vld [vmem:[#allocation2 + $0x229] sm:$0xff] }
 0x392   :  { %v2507_v42 = vpop.permute.xlu1 %2506 }
 0x393   :  { %2688 = vst.msk [vmem:[#allocation3 + $0x58] sm:$0xff] %vm2676_vm8, %v2507_v42  ;;  %v2513_v44 = vpop.permute.xlu0 %2512 }
 0x394   :  { %2879 = vrot.lane.b32.xlu1 %v2746_v43, %s9363_s7  ;;  %2691 = vst.msk [vmem:[#allocation3 + $0x70] sm:$0xff] %vm2676_vm8, %v2513_v44  ;;  %v2778_v43 = vld [vmem:[#allocation2 + $0x219] sm:$0xff] }
 0x395   :  { %2885 = vrot.lane.b32.xlu0 %v2749_v46, %s9363_s7  ;;  %v2781_v46 = vld [vmem:[#allocation2 + $0x241] sm:$0xff] }
 0x396   :  { %v2511_v47 = vpop.permute.xlu1 %2510 }
 0x397   :  { %2690 = vst.msk [vmem:[#allocation3 + $0x68] sm:$0xff] %vm2676_vm8, %v2511_v47  ;;  %v2517_v40 = vpop.permute.xlu0 %2516 }
 0x398   :  { %2883 = vrot.lane.b32.xlu1 %v2748_v49, %s9363_s7  ;;  %2693 = vst.msk [vmem:[#allocation3 + $0x80] sm:$0xff] %vm2676_vm8, %v2517_v40  ;;  %v2780_v49 = vld [vmem:[#allocation2 + $0x231] sm:$0xff] }
 0x399   :  { %2889 = vrot.lane.b32.xlu0 %v2751_v51, %s9363_s7  ;;  %v2783_v51 = vld [vmem:[#allocation2 + $0x259] sm:$0xff] }
 0x39a   :  { %v2515_v54 = vpop.permute.xlu1 %2514 }
 0x39b   :  { %2692 = vst.msk [vmem:[#allocation3 + $0x78] sm:$0xff] %vm2676_vm8, %v2515_v54  ;;  %v2521_v57 = vpop.permute.xlu0 %2520 }
 0x39c   :  { %2887 = vrot.lane.b32.xlu1 %v2750_v50, %s9363_s7  ;;  %2695 = vst.msk [vmem:[#allocation3 + $0x90] sm:$0xff] %vm2676_vm8, %v2521_v57  ;;  %v2782_v50 = vld [vmem:[#allocation2 + $0x249] sm:$0xff] }
 0x39d   :  { %2893 = vrot.lane.b32.xlu0 %v2753_v52, %s9363_s7  ;;  %v2785_v52 = vld [vmem:[#allocation2 + $0x271] sm:$0xff] }
 0x39e   :  { %v2519_v55 = vpop.permute.xlu1 %2518 }
 0x39f   :  { %2694 = vst.msk [vmem:[#allocation3 + $0x88] sm:$0xff] %vm2676_vm8, %v2519_v55  ;;  %v2525_v58 = vpop.permute.xlu0 %2524 }
 0x3a0   :  { %2891 = vrot.lane.b32.xlu1 %v2752_v27, %s9363_s7  ;;  %2697 = vst.msk [vmem:[#allocation3 + $0xa0] sm:$0xff] %vm2676_vm8, %v2525_v58  ;;  %v2784_v27 = vld [vmem:[#allocation2 + $0x261] sm:$0xff] }
 0x3a1   :  { %2897 = vrot.lane.b32.xlu0 %v2755_v8, %s9363_s7  ;;  %v2787_v8 = vld [vmem:[#allocation2 + $0x289] sm:$0xff] }
 0x3a2   :  { %v2523_v56 = vpop.permute.xlu1 %2522 }
 0x3a3   :  { %2696 = vst.msk [vmem:[#allocation3 + $0x98] sm:$0xff] %vm2676_vm8, %v2523_v56  ;;  %v2529_v63 = vpop.permute.xlu0 %2528 }
 0x3a4   :  { %2895 = vrot.lane.b32.xlu1 %v2754_v62, %s9363_s7  ;;  %2699 = vst.msk [vmem:[#allocation3 + $0xb0] sm:$0xff] %vm2676_vm8, %v2529_v63  ;;  %v2786_v62 = vld [vmem:[#allocation2 + $0x279] sm:$0xff] }
 0x3a5   :  { %2901 = vrot.lane.b32.xlu0 %v2757_v1, %s9363_s7  ;;  %v2789_v1 = vld [vmem:[#allocation2 + $0x2a1] sm:$0xff] }
 0x3a6   :  { %v2527_v2 = vpop.permute.xlu1 %2526 }
 0x3a7   :  { %2698 = vst.msk [vmem:[#allocation3 + $0xa8] sm:$0xff] %vm2676_vm8, %v2527_v2  ;;  %v2533_v6 = vpop.permute.xlu0 %2532 }
 0x3a8   :  { %2899 = vrot.lane.b32.xlu1 %v2756_v5, %s9363_s7  ;;  %2701 = vst.msk [vmem:[#allocation3 + $0xc0] sm:$0xff] %vm2676_vm8, %v2533_v6  ;;  %v2788_v5 = vld [vmem:[#allocation2 + $0x291] sm:$0xff] }
 0x3a9   :  { %2905 = vrot.lane.b32.xlu0 %v2759_v9, %s9363_s7  ;;  %v2791_v9 = vld [vmem:[#allocation2 + $0x2b9] sm:$0xff] }
 0x3aa   :  { %v2531_v11 = vpop.permute.xlu1 %2530 }
 0x3ab   :  { %2700 = vst.msk [vmem:[#allocation3 + $0xb8] sm:$0xff] %vm2676_vm8, %v2531_v11  ;;  %v2537_v15 = vpop.permute.xlu0 %2536 }
 0x3ac   :  { %2903 = vrot.lane.b32.xlu1 %v2758_v14, %s9363_s7  ;;  %2703 = vst.msk [vmem:[#allocation3 + $0xd0] sm:$0xff] %vm2676_vm8, %v2537_v15  ;;  %v2790_v14 = vld [vmem:[#allocation2 + $0x2a9] sm:$0xff] }
 0x3ad   :  { %2909 = vrot.lane.b32.xlu0 %v2761_v21, %s9363_s7  ;;  %v2793_v21 = vld [vmem:[#allocation2 + $0x2d1] sm:$0xff] }
 0x3ae   :  { %v2535_v22 = vpop.permute.xlu1 %2534 }
 0x3af   :  { %2702 = vst.msk [vmem:[#allocation3 + $0xc8] sm:$0xff] %vm2676_vm8, %v2535_v22  ;;  %v2541_v32 = vpop.permute.xlu0 %2540 }
 0x3b0   :  { %2907 = vrot.lane.b32.xlu1 %v2760_v31, %s9363_s7  ;;  %2705 = vst.msk [vmem:[#allocation3 + $0xe0] sm:$0xff] %vm2676_vm8, %v2541_v32  ;;  %v2792_v31 = vld [vmem:[#allocation2 + $0x2c1] sm:$0xff] }
 0x3b1   :  { %2913 = vrot.lane.b32.xlu0 %v2763_v45, %s9363_s7  ;;  %v2795_v45 = vld [vmem:[#allocation2 + $0x2e9] sm:$0xff] }
 0x3b2   :  { %v2539_v48 = vpop.permute.xlu1 %2538 }
 0x3b3   :  { %2704 = vst.msk [vmem:[#allocation3 + $0xd8] sm:$0xff] %vm2676_vm8, %v2539_v48  ;;  %v2545_v60 = vpop.permute.xlu0 %2544 }
 0x3b4   :  { %2911 = vrot.lane.b32.xlu1 %v2762_v59, %s9363_s7  ;;  %2707 = vst.msk [vmem:[#allocation3 + $0xf0] sm:$0xff] %vm2676_vm8, %v2545_v60  ;;  %v2794_v59 = vld [vmem:[#allocation2 + $0x2d9] sm:$0xff] }
 0x3b5   :  { %2917 = vrot.lane.b32.xlu0 %v2765_v3, %s9363_s7  ;;  %v2797_v3 = vld [vmem:[#allocation2 + $0x301] sm:$0xff] }
 0x3b6   :  { %v2543_v4 = vpop.permute.xlu1 %2542 }
 0x3b7   :  { %2706 = vst.msk [vmem:[#allocation3 + $0xe8] sm:$0xff] %vm2676_vm8, %v2543_v4  ;;  %v2549_v25 = vpop.permute.xlu0 %2548 }
 0x3b8   :  { %2915 = vrot.lane.b32.xlu1 %v2764_v12, %s9363_s7  ;;  %2709 = vst.msk [vmem:[#allocation3 + $0x100] sm:$0xff] %vm2676_vm8, %v2549_v25  ;;  %v2796_v12 = vld [vmem:[#allocation2 + $0x2f1] sm:$0xff] }
 0x3b9   :  { %2921 = vrot.lane.b32.xlu0 %v2767_v0, %s9363_s7  ;;  %v2799_v0 = vld [vmem:[#allocation2 + $0x319] sm:$0xff] }
 0x3ba   :  { %v2547_v13 = vpop.permute.xlu1 %2546 }
 0x3bb   :  { %2708 = vst.msk [vmem:[#allocation3 + $0xf8] sm:$0xff] %vm2676_vm8, %v2547_v13  ;;  %v2553_v53 = vpop.permute.xlu0 %2552 }
 0x3bc   :  { %2919 = vrot.lane.b32.xlu1 %v2766_v17, %s9363_s7  ;;  %2711 = vst.msk [vmem:[#allocation3 + $0x110] sm:$0xff] %vm2676_vm8, %v2553_v53  ;;  %v2798_v17 = vld [vmem:[#allocation2 + $0x309] sm:$0xff]  ;;  %v3575_v53 = vld [vmem:[#allocation7] sm:$0xff] }
 0x3bd   :  { %2925 = vrot.lane.b32.xlu0 %v2769_v37, %s9363_s7  ;;  %v2801_v37 = vld [vmem:[#allocation2 + $0x331] sm:$0xff] }
 0x3be   :  { %v2551_v61 = vpop.permute.xlu1 %2550 }
 0x3bf   :  { %2710 = vst.msk [vmem:[#allocation3 + $0x108] sm:$0xff] %vm2676_vm8, %v2551_v61  ;;  %v2557_v18 = vpop.permute.xlu0 %2556 }
 0x3c0   :  { %2923 = vrot.lane.b32.xlu1 %v2768_v7, %s9363_s7  ;;  %2713 = vst.msk [vmem:[#allocation3 + $0x120] sm:$0xff] %vm2676_vm8, %v2557_v18  ;;  %v3576_v7 = vld [vmem:[#allocation7 + $0x8] sm:$0xff] }
 0x3c1   :  { %2929 = vrot.lane.b32.xlu0 %v2771_v10, %s9363_s7  ;;  %v9174_v10 = vpack.c.bf16 %v3576_v7, %v3575_v53  ;;  %v2800_v18 = vld [vmem:[#allocation2 + $0x321] sm:$0xff] }
 0x3c2   :  { %v2555_v16 = vpop.permute.xlu1 %2554  ;;  %v3149_v53 = vld [vmem:[#allocation2 + $0x142] sm:$0xff] }
 0x3c3   :  { %2712 = vst.msk [vmem:[#allocation3 + $0x118] sm:$0xff] %vm2676_vm8, %v2555_v16  ;;  %v2561_v20 = vpop.permute.xlu0 %2560  ;;  %9175 = vmatprep.subr.bf16.mxu0 %v9174_v10  ;;  %v2803_v16 = vld [vmem:[#allocation2 + $0x349] sm:$0xff] }
 0x3c4   :  { %2927 = vrot.lane.b32.xlu1 %v2770_v19, %s9363_s7  ;;  %2715 = vst.msk [vmem:[#allocation3 + $0x130] sm:$0xff] %vm2676_vm8, %v2561_v20  ;;  %9177 = vmatpush3.bf16.msra.mxu0 %v9174_v10  ;;  %v3578_v20 = vld [vmem:[#allocation7 + $0x18] sm:$0xff] }
 0x3c5   :  { %2933 = vrot.lane.b32.xlu0 %v2773_v23, %s9363_s7  ;;  %v3577_v23 = vld [vmem:[#allocation7 + $0x10] sm:$0xff] }
 0x3c6   :  { %v2559_v24 = vpop.permute.xlu1 %2558 }
 0x3c7   :  { %2714 = vst.msk [vmem:[#allocation3 + $0x128] sm:$0xff] %vm2676_vm8, %v2559_v24  ;;  %v2565_v28 = vpop.permute.xlu0 %2564  ;;  %v9178_v24 = vpack.c.bf16 %v3578_v20, %v3577_v23  ;;  %v3153_v20 = vld [vmem:[#allocation2 + $0x172] sm:$0xff] }
 0x3c8   :  { %2931 = vrot.lane.b32.xlu1 %v2772_v26, %s9363_s7  ;;  %2717 = vst.msk [vmem:[#allocation3 + $0x140] sm:$0xff] %vm2676_vm8, %v2565_v28 }
 0x3c9   :  { %2937 = vrot.lane.b32.xlu0 %v2775_v29, %s9363_s7  ;;  %v2802_v29 = vld [vmem:[#allocation2 + $0x339] sm:$0xff]  ;;  %9179 = vmatprep.subr.bf16.mxu0 %v9178_v24 }
 0x3ca   :  { %v2563_v30 = vpop.permute.xlu1 %2562  ;;  %9181 = vmatpush3.bf16.msra.mxu0 %v9178_v24  ;;  %v3156_v24 = vld [vmem:[#allocation2 + $0x19a] sm:$0xff] }
 0x3cb   :  { %2716 = vst.msk [vmem:[#allocation3 + $0x138] sm:$0xff] %vm2676_vm8, %v2563_v30  ;;  %v2569_v34 = vpop.permute.xlu0 %2568 }
 0x3cc   :  { %2935 = vrot.lane.b32.xlu1 %v2774_v33, %s9363_s7  ;;  %2719 = vst.msk [vmem:[#allocation3 + $0x150] sm:$0xff] %vm2676_vm8, %v2569_v34  ;;  %v3126_v33 = vld [vmem:[#allocation2 + $0x32] sm:$0xff] }
 0x3cd   :  { %2941 = vrot.lane.b32.xlu0 %v2777_v35, %s9363_s7  ;;  %v3579_v35 = vld [vmem:[#allocation7 + $0x20] sm:$0xf]  ;;  %v2804_v34 = vld [vmem:[#allocation2 + $0x351] sm:$0xff] }
 0x3ce   :  { %v2567_v36 = vpop.permute.xlu1 %2566  ;;  %8970 = vmatprep.subr.msk.mxu0 %vm3773_vm10, %v3579_v35 }
 0x3cf   :  { %2718 = vst.msk [vmem:[#allocation3 + $0x148] sm:$0xff] %vm2676_vm8, %v2567_v36  ;;  %v2573_v39 = vpop.permute.xlu0 %2572  ;;  %v3128_v36 = vld [vmem:[#allocation2 + $0x4a] sm:$0xff]  ;;  %8971 = vmatpush3.msk.msra.mxu0 %vm3773_vm10, %v3579_v35 }
 0x3d0   :  { %2939 = vrot.lane.b32.xlu1 %v2776_v38, %s9363_s7  ;;  %2721 = vst.msk [vmem:[#allocation3 + $0x160] sm:$0xff] %vm2676_vm8, %v2573_v39  ;;  %v3127_v39 = vld [vmem:[#allocation2 + $0x3a] sm:$0xff] }
 0x3d1   :  { %2945 = vrot.lane.b32.xlu0 %v2779_v41, %s9363_s7 }
 0x3d2   :  { %v2571_v42 = vpop.permute.xlu1 %2570 }
 0x3d3   :  { %2720 = vst.msk [vmem:[#allocation3 + $0x158] sm:$0xff] %vm2676_vm8, %v2571_v42  ;;  %v2577_v44 = vpop.permute.xlu0 %2576  ;;  %v3130_v42 = vld [vmem:[#allocation2 + $0x62] sm:$0xff] }
 0x3d4   :  { %2943 = vrot.lane.b32.xlu1 %v2778_v43, %s9363_s7  ;;  %2723 = vst.msk [vmem:[#allocation3 + $0x170] sm:$0xff] %vm2676_vm8, %v2577_v44  ;;  %v3129_v44 = vld [vmem:[#allocation2 + $0x52] sm:$0xff] }
 0x3d5   :  { %2949 = vrot.lane.b32.xlu0 %v2781_v46, %s9363_s7 }
 0x3d6   :  { %v2575_v47 = vpop.permute.xlu1 %2574 }
 0x3d7   :  { %2722 = vst.msk [vmem:[#allocation3 + $0x168] sm:$0xff] %vm2676_vm8, %v2575_v47  ;;  %v2581_v40 = vpop.permute.xlu0 %2580  ;;  %v3132_v47 = vld [vmem:[#allocation2 + $0x7a] sm:$0xff] }
 0x3d8   :  { %2947 = vrot.lane.b32.xlu1 %v2780_v49, %s9363_s7  ;;  %2725 = vst.msk [vmem:[#allocation3 + $0x180] sm:$0xff] %vm2676_vm8, %v2581_v40  ;;  %v3131_v40 = vld [vmem:[#allocation2 + $0x6a] sm:$0xff] }
 0x3d9   :  { %2953 = vrot.lane.b32.xlu0 %v2783_v51, %s9363_s7 }
 0x3da   :  { %v2579_v54 = vpop.permute.xlu1 %2578 }
 0x3db   :  { %2724 = vst.msk [vmem:[#allocation3 + $0x178] sm:$0xff] %vm2676_vm8, %v2579_v54  ;;  %v2585_v57 = vpop.permute.xlu0 %2584  ;;  %v3134_v54 = vld [vmem:[#allocation2 + $0x92] sm:$0xff] }
 0x3dc   :  { %2951 = vrot.lane.b32.xlu1 %v2782_v50, %s9363_s7  ;;  %2727 = vst.msk [vmem:[#allocation3 + $0x190] sm:$0xff] %vm2676_vm8, %v2585_v57  ;;  %v3133_v57 = vld [vmem:[#allocation2 + $0x82] sm:$0xff] }
 0x3dd   :  { %2957 = vrot.lane.b32.xlu0 %v2785_v52, %s9363_s7 }
 0x3de   :  { %v2583_v55 = vpop.permute.xlu1 %2582 }
 0x3df   :  { %2726 = vst.msk [vmem:[#allocation3 + $0x188] sm:$0xff] %vm2676_vm8, %v2583_v55  ;;  %v2589_v58 = vpop.permute.xlu0 %2588  ;;  %v3136_v55 = vld [vmem:[#allocation2 + $0xaa] sm:$0xff] }
 0x3e0   :  { %2955 = vrot.lane.b32.xlu1 %v2784_v27, %s9363_s7  ;;  %2729 = vst.msk [vmem:[#allocation3 + $0x1a0] sm:$0xff] %vm2676_vm8, %v2589_v58  ;;  %v3135_v58 = vld [vmem:[#allocation2 + $0x9a] sm:$0xff] }
 0x3e1   :  { %2961 = vrot.lane.b32.xlu0 %v2787_v8, %s9363_s7 }
 0x3e2   :  { %v2587_v56 = vpop.permute.xlu1 %2586 }
 0x3e3   :  { %2728 = vst.msk [vmem:[#allocation3 + $0x198] sm:$0xff] %vm2676_vm8, %v2587_v56  ;;  %v2593_v63 = vpop.permute.xlu0 %2592  ;;  %v3138_v56 = vld [vmem:[#allocation2 + $0xc2] sm:$0xff] }
 0x3e4   :  { %2959 = vrot.lane.b32.xlu1 %v2786_v62, %s9363_s7  ;;  %2731 = vst.msk [vmem:[#allocation3 + $0x1b0] sm:$0xff] %vm2676_vm8, %v2593_v63  ;;  %v3137_v63 = vld [vmem:[#allocation2 + $0xb2] sm:$0xff] }
 0x3e5   :  { %2965 = vrot.lane.b32.xlu0 %v2789_v1, %s9363_s7 }
 0x3e6   :  { %v2591_v2 = vpop.permute.xlu1 %2590 }
 0x3e7   :  { %2730 = vst.msk [vmem:[#allocation3 + $0x1a8] sm:$0xff] %vm2676_vm8, %v2591_v2  ;;  %v2597_v6 = vpop.permute.xlu0 %2596  ;;  %v3140_v2 = vld [vmem:[#allocation2 + $0xda] sm:$0xff] }
 0x3e8   :  { %2963 = vrot.lane.b32.xlu1 %v2788_v5, %s9363_s7  ;;  %2733 = vst.msk [vmem:[#allocation3 + $0x1c0] sm:$0xff] %vm2676_vm8, %v2597_v6  ;;  %v3139_v6 = vld [vmem:[#allocation2 + $0xca] sm:$0xff] }
 0x3e9   :  { %2969 = vrot.lane.b32.xlu0 %v2791_v9, %s9363_s7 }
 0x3ea   :  { %v2595_v11 = vpop.permute.xlu1 %2594 }
 0x3eb   :  { %2732 = vst.msk [vmem:[#allocation3 + $0x1b8] sm:$0xff] %vm2676_vm8, %v2595_v11  ;;  %v2601_v15 = vpop.permute.xlu0 %2600  ;;  %v3142_v11 = vld [vmem:[#allocation2 + $0xf2] sm:$0xff] }
 0x3ec   :  { %2967 = vrot.lane.b32.xlu1 %v2790_v14, %s9363_s7  ;;  %2735 = vst.msk [vmem:[#allocation3 + $0x1d0] sm:$0xff] %vm2676_vm8, %v2601_v15  ;;  %v3141_v15 = vld [vmem:[#allocation2 + $0xe2] sm:$0xff] }
 0x3ed   :  { %2973 = vrot.lane.b32.xlu0 %v2793_v21, %s9363_s7 }
 0x3ee   :  { %v2599_v22 = vpop.permute.xlu1 %2598 }
 0x3ef   :  { %2734 = vst.msk [vmem:[#allocation3 + $0x1c8] sm:$0xff] %vm2676_vm8, %v2599_v22  ;;  %v2605_v32 = vpop.permute.xlu0 %2604  ;;  %v3144_v22 = vld [vmem:[#allocation2 + $0x10a] sm:$0xff] }
 0x3f0   :  { %2971 = vrot.lane.b32.xlu1 %v2792_v31, %s9363_s7  ;;  %2737 = vst.msk [vmem:[#allocation3 + $0x1e0] sm:$0xff] %vm2676_vm8, %v2605_v32  ;;  %v3143_v32 = vld [vmem:[#allocation2 + $0xfa] sm:$0xff] }
 0x3f1   :  { %2977 = vrot.lane.b32.xlu0 %v2795_v45, %s9363_s7 }
 0x3f2   :  { %v2603_v48 = vpop.permute.xlu1 %2602 }
 0x3f3   :  { %2736 = vst.msk [vmem:[#allocation3 + $0x1d8] sm:$0xff] %vm2676_vm8, %v2603_v48  ;;  %v2609_v60 = vpop.permute.xlu0 %2608  ;;  %v3146_v48 = vld [vmem:[#allocation2 + $0x122] sm:$0xff] }
 0x3f4   :  { %2975 = vrot.lane.b32.xlu1 %v2794_v59, %s9363_s7  ;;  %2739 = vst.msk [vmem:[#allocation3 + $0x1f0] sm:$0xff] %vm2676_vm8, %v2609_v60  ;;  %v3145_v60 = vld [vmem:[#allocation2 + $0x112] sm:$0xff] }
 0x3f5   :  { %2981 = vrot.lane.b32.xlu0 %v2797_v3, %s9363_s7 }
 0x3f6   :  { %v2607_v4 = vpop.permute.xlu1 %2606 }
 0x3f7   :  { %2738 = vst.msk [vmem:[#allocation3 + $0x1e8] sm:$0xff] %vm2676_vm8, %v2607_v4  ;;  %v2870_v25 = vpop.permute.xlu0 %2869  ;;  %v3148_v4 = vld [vmem:[#allocation2 + $0x13a] sm:$0xff] }
 0x3f8   :  { %2979 = vrot.lane.b32.xlu1 %v2796_v12, %s9363_s7  ;;  %3062 = vst.msk [vmem:[#allocation3] sm:$0xff] %vm3061_vm9, %v2870_v25  ;;  %v3147_v25 = vld [vmem:[#allocation2 + $0x12a] sm:$0xff] }
 0x3f9   :  { %2985 = vrot.lane.b32.xlu0 %v2799_v0, %s9363_s7 }
 0x3fa   :  { %v2611_v13 = vpop.permute.xlu1 %2610 }
 0x3fb   :  { %2740 = vst.msk [vmem:[#allocation3 + $0x1f8] sm:$0xff] %vm2676_vm8, %v2611_v13  ;;  %v2874_v61 = vpop.permute.xlu0 %2873  ;;  %v3150_v13 = vld [vmem:[#allocation2 + $0x152] sm:$0xff] }
 0x3fc   :  { %2983 = vrot.lane.b32.xlu1 %v2798_v17, %s9363_s7  ;;  %3064 = vst.msk [vmem:[#allocation3 + $0x10] sm:$0xff] %vm3061_vm9, %v2874_v61  ;;  %v3152_v61 = vld [vmem:[#allocation2 + $0x16a] sm:$0xff] }
 0x3fd   :  { %2989 = vrot.lane.b32.xlu0 %v2801_v37, %s9363_s7 }
 0x3fe   :  { %v2872_v19 = vpop.permute.xlu1 %2871 }
 0x3ff   :  { %3063 = vst.msk [vmem:[#allocation3 + $0x8] sm:$0xff] %vm3061_vm9, %v2872_v19  ;;  %v2878_v26 = vpop.permute.xlu0 %2877 }
 0x400   :  { %2987 = vrot.lane.b32.xlu1 %v2800_v18, %s9363_s7  ;;  %3066 = vst.msk [vmem:[#allocation3 + $0x20] sm:$0xff] %vm3061_vm9, %v2878_v26  ;;  %v3151_v18 = vld [vmem:[#allocation2 + $0x15a] sm:$0xff] }
 0x401   :  { %2993 = vrot.lane.b32.xlu0 %v2803_v16, %s9363_s7  ;;  %v3154_v16 = vld [vmem:[#allocation2 + $0x182] sm:$0xff] }
 0x402   :  { %v2876_v28 = vpop.permute.xlu1 %2875 }
 0x403   :  { %3065 = vst.msk [vmem:[#allocation3 + $0x18] sm:$0xff] %vm3061_vm9, %v2876_v28  ;;  %v2882_v30 = vpop.permute.xlu0 %2881  ;;  %v3155_v28 = vld [vmem:[#allocation2 + $0x18a] sm:$0xff] }
 0x404   :  { %2991 = vrot.lane.b32.xlu1 %v2802_v29, %s9363_s7  ;;  %3068 = vst.msk [vmem:[#allocation3 + $0x30] sm:$0xff] %vm3061_vm9, %v2882_v30  ;;  %v3158_v30 = vld [vmem:[#allocation2 + $0x1e2] sm:$0xff] }
 0x405   :  { %3254 = vrot.lane.b32.xlu0 %v3126_v33, %s9364_s8 }
 0x406   :  { %v2880_v38 = vpop.permute.xlu1 %2879 }
 0x407   :  { %3067 = vst.msk [vmem:[#allocation3 + $0x28] sm:$0xff] %vm3061_vm9, %v2880_v38  ;;  %v2886_v41 = vpop.permute.xlu0 %2885 }
 0x408   :  { %2995 = vrot.lane.b32.xlu1 %v2804_v34, %s9363_s7  ;;  %3070 = vst.msk [vmem:[#allocation3 + $0x40] sm:$0xff] %vm3061_vm9, %v2886_v41  ;;  %v3157_v34 = vld [vmem:[#allocation2 + $0x1a2] sm:$0xff] }
 0x409   :  { %3258 = vrot.lane.b32.xlu0 %v3128_v36, %s9364_s8  ;;  %v3160_v36 = vld [vmem:[#allocation2 + $0x1fa] sm:$0xff] }
 0x40a   :  { %v2884_v43 = vpop.permute.xlu1 %2883 }
 0x40b   :  { %3069 = vst.msk [vmem:[#allocation3 + $0x38] sm:$0xff] %vm3061_vm9, %v2884_v43  ;;  %v2890_v46 = vpop.permute.xlu0 %2889 }
 0x40c   :  { %3256 = vrot.lane.b32.xlu1 %v3127_v39, %s9364_s8  ;;  %3072 = vst.msk [vmem:[#allocation3 + $0x50] sm:$0xff] %vm3061_vm9, %v2890_v46  ;;  %v3159_v39 = vld [vmem:[#allocation2 + $0x1ea] sm:$0xff] }
 0x40d   :  { %3262 = vrot.lane.b32.xlu0 %v3130_v42, %s9364_s8  ;;  %v3162_v42 = vld [vmem:[#allocation2 + $0x212] sm:$0xff] }
 0x40e   :  { %v2888_v49 = vpop.permute.xlu1 %2887 }
 0x40f   :  { %3071 = vst.msk [vmem:[#allocation3 + $0x48] sm:$0xff] %vm3061_vm9, %v2888_v49  ;;  %v2894_v51 = vpop.permute.xlu0 %2893 }
 0x410   :  { %3260 = vrot.lane.b32.xlu1 %v3129_v44, %s9364_s8  ;;  %3074 = vst.msk [vmem:[#allocation3 + $0x60] sm:$0xff] %vm3061_vm9, %v2894_v51  ;;  %v3161_v44 = vld [vmem:[#allocation2 + $0x202] sm:$0xff] }
 0x411   :  { %3266 = vrot.lane.b32.xlu0 %v3132_v47, %s9364_s8  ;;  %v3164_v47 = vld [vmem:[#allocation2 + $0x22a] sm:$0xff] }
 0x412   :  { %v2892_v50 = vpop.permute.xlu1 %2891 }
 0x413   :  { %3073 = vst.msk [vmem:[#allocation3 + $0x58] sm:$0xff] %vm3061_vm9, %v2892_v50  ;;  %v2898_v52 = vpop.permute.xlu0 %2897 }
 0x414   :  { %3264 = vrot.lane.b32.xlu1 %v3131_v40, %s9364_s8  ;;  %3076 = vst.msk [vmem:[#allocation3 + $0x70] sm:$0xff] %vm3061_vm9, %v2898_v52  ;;  %v3163_v40 = vld [vmem:[#allocation2 + $0x21a] sm:$0xff] }
 0x415   :  { %3270 = vrot.lane.b32.xlu0 %v3134_v54, %s9364_s8  ;;  %v3166_v54 = vld [vmem:[#allocation2 + $0x242] sm:$0xff] }
 0x416   :  { %v2896_v27 = vpop.permute.xlu1 %2895 }
 0x417   :  { %3075 = vst.msk [vmem:[#allocation3 + $0x68] sm:$0xff] %vm3061_vm9, %v2896_v27  ;;  %v2902_v8 = vpop.permute.xlu0 %2901 }
 0x418   :  { %3268 = vrot.lane.b32.xlu1 %v3133_v57, %s9364_s8  ;;  %3078 = vst.msk [vmem:[#allocation3 + $0x80] sm:$0xff] %vm3061_vm9, %v2902_v8  ;;  %v3165_v57 = vld [vmem:[#allocation2 + $0x232] sm:$0xff] }
 0x419   :  { %3274 = vrot.lane.b32.xlu0 %v3136_v55, %s9364_s8  ;;  %v3168_v55 = vld [vmem:[#allocation2 + $0x25a] sm:$0xff] }
 0x41a   :  { %v2900_v62 = vpop.permute.xlu1 %2899 }
 0x41b   :  { %3077 = vst.msk [vmem:[#allocation3 + $0x78] sm:$0xff] %vm3061_vm9, %v2900_v62  ;;  %v2906_v1 = vpop.permute.xlu0 %2905 }
 0x41c   :  { %3272 = vrot.lane.b32.xlu1 %v3135_v58, %s9364_s8  ;;  %3080 = vst.msk [vmem:[#allocation3 + $0x90] sm:$0xff] %vm3061_vm9, %v2906_v1  ;;  %v3167_v58 = vld [vmem:[#allocation2 + $0x24a] sm:$0xff] }
 0x41d   :  { %3278 = vrot.lane.b32.xlu0 %v3138_v56, %s9364_s8  ;;  %v3170_v56 = vld [vmem:[#allocation2 + $0x272] sm:$0xff] }
 0x41e   :  { %v2904_v5 = vpop.permute.xlu1 %2903 }
 0x41f   :  { %3079 = vst.msk [vmem:[#allocation3 + $0x88] sm:$0xff] %vm3061_vm9, %v2904_v5  ;;  %v2910_v9 = vpop.permute.xlu0 %2909 }
 0x420   :  { %3276 = vrot.lane.b32.xlu1 %v3137_v63, %s9364_s8  ;;  %3082 = vst.msk [vmem:[#allocation3 + $0xa0] sm:$0xff] %vm3061_vm9, %v2910_v9  ;;  %v3169_v63 = vld [vmem:[#allocation2 + $0x262] sm:$0xff] }
 0x421   :  { %3282 = vrot.lane.b32.xlu0 %v3140_v2, %s9364_s8  ;;  %v3172_v2 = vld [vmem:[#allocation2 + $0x28a] sm:$0xff] }
 0x422   :  { %v2908_v14 = vpop.permute.xlu1 %2907 }
 0x423   :  { %3081 = vst.msk [vmem:[#allocation3 + $0x98] sm:$0xff] %vm3061_vm9, %v2908_v14  ;;  %v2914_v21 = vpop.permute.xlu0 %2913 }
 0x424   :  { %3280 = vrot.lane.b32.xlu1 %v3139_v6, %s9364_s8  ;;  %3084 = vst.msk [vmem:[#allocation3 + $0xb0] sm:$0xff] %vm3061_vm9, %v2914_v21  ;;  %v3171_v6 = vld [vmem:[#allocation2 + $0x27a] sm:$0xff] }
 0x425   :  { %3286 = vrot.lane.b32.xlu0 %v3142_v11, %s9364_s8  ;;  %v3174_v11 = vld [vmem:[#allocation2 + $0x2a2] sm:$0xff] }
 0x426   :  { %v2912_v31 = vpop.permute.xlu1 %2911 }
 0x427   :  { %3083 = vst.msk [vmem:[#allocation3 + $0xa8] sm:$0xff] %vm3061_vm9, %v2912_v31  ;;  %v2918_v45 = vpop.permute.xlu0 %2917 }
 0x428   :  { %3284 = vrot.lane.b32.xlu1 %v3141_v15, %s9364_s8  ;;  %3086 = vst.msk [vmem:[#allocation3 + $0xc0] sm:$0xff] %vm3061_vm9, %v2918_v45  ;;  %v3173_v15 = vld [vmem:[#allocation2 + $0x292] sm:$0xff] }
 0x429   :  { %3290 = vrot.lane.b32.xlu0 %v3144_v22, %s9364_s8  ;;  %v3176_v22 = vld [vmem:[#allocation2 + $0x2ba] sm:$0xff] }
 0x42a   :  { %v2916_v59 = vpop.permute.xlu1 %2915 }
 0x42b   :  { %3085 = vst.msk [vmem:[#allocation3 + $0xb8] sm:$0xff] %vm3061_vm9, %v2916_v59  ;;  %v2922_v3 = vpop.permute.xlu0 %2921 }
 0x42c   :  { %3288 = vrot.lane.b32.xlu1 %v3143_v32, %s9364_s8  ;;  %3088 = vst.msk [vmem:[#allocation3 + $0xd0] sm:$0xff] %vm3061_vm9, %v2922_v3  ;;  %v3175_v32 = vld [vmem:[#allocation2 + $0x2aa] sm:$0xff] }
 0x42d   :  { %3294 = vrot.lane.b32.xlu0 %v3146_v48, %s9364_s8  ;;  %v3178_v48 = vld [vmem:[#allocation2 + $0x2d2] sm:$0xff] }
 0x42e   :  { %v2920_v12 = vpop.permute.xlu1 %2919 }
 0x42f   :  { %3087 = vst.msk [vmem:[#allocation3 + $0xc8] sm:$0xff] %vm3061_vm9, %v2920_v12  ;;  %v2926_v0 = vpop.permute.xlu0 %2925 }
 0x430   :  { %3292 = vrot.lane.b32.xlu1 %v3145_v60, %s9364_s8  ;;  %3090 = vst.msk [vmem:[#allocation3 + $0xe0] sm:$0xff] %vm3061_vm9, %v2926_v0  ;;  %v3177_v60 = vld [vmem:[#allocation2 + $0x2c2] sm:$0xff] }
 0x431   :  { %3298 = vrot.lane.b32.xlu0 %v3148_v4, %s9364_s8  ;;  %v3180_v4 = vld [vmem:[#allocation2 + $0x2ea] sm:$0xff] }
 0x432   :  { %v2924_v17 = vpop.permute.xlu1 %2923 }
 0x433   :  { %3089 = vst.msk [vmem:[#allocation3 + $0xd8] sm:$0xff] %vm3061_vm9, %v2924_v17  ;;  %v2930_v37 = vpop.permute.xlu0 %2929 }
 0x434   :  { %3296 = vrot.lane.b32.xlu1 %v3147_v25, %s9364_s8  ;;  %3092 = vst.msk [vmem:[#allocation3 + $0xf0] sm:$0xff] %vm3061_vm9, %v2930_v37  ;;  %v3179_v25 = vld [vmem:[#allocation2 + $0x2da] sm:$0xff] }
 0x435   :  { %3302 = vrot.lane.b32.xlu0 %v3150_v13, %s9364_s8  ;;  %v3182_v13 = vld [vmem:[#allocation2 + $0x302] sm:$0xff] }
 0x436   :  { %v2928_v7 = vpop.permute.xlu1 %2927 }
 0x437   :  { %3091 = vst.msk [vmem:[#allocation3 + $0xe8] sm:$0xff] %vm3061_vm9, %v2928_v7  ;;  %v2934_v10 = vpop.permute.xlu0 %2933 }
 0x438   :  { %3300 = vrot.lane.b32.xlu1 %v3149_v53, %s9364_s8  ;;  %3094 = vst.msk [vmem:[#allocation3 + $0x100] sm:$0xff] %vm3061_vm9, %v2934_v10  ;;  %v3181_v53 = vld [vmem:[#allocation2 + $0x2f2] sm:$0xff] }
 0x439   :  { %3306 = vrot.lane.b32.xlu0 %v3152_v61, %s9364_s8  ;;  %v3184_v61 = vld [vmem:[#allocation2 + $0x31a] sm:$0xff] }
 0x43a   :  { %v2932_v19 = vpop.permute.xlu1 %2931 }
 0x43b   :  { %3093 = vst.msk [vmem:[#allocation3 + $0xf8] sm:$0xff] %vm3061_vm9, %v2932_v19  ;;  %v2938_v23 = vpop.permute.xlu0 %2937 }
 0x43c   :  { %3304 = vrot.lane.b32.xlu1 %v3151_v18, %s9364_s8  ;;  %3096 = vst.msk [vmem:[#allocation3 + $0x110] sm:$0xff] %vm3061_vm9, %v2938_v23  ;;  %v3183_v18 = vld [vmem:[#allocation2 + $0x30a] sm:$0xff] }
 0x43d   :  { %3310 = vrot.lane.b32.xlu0 %v3154_v16, %s9364_s8  ;;  %v3186_v16 = vld [vmem:[#allocation2 + $0x332] sm:$0xff] }
 0x43e   :  { %v2936_v26 = vpop.permute.xlu1 %2935 }
 0x43f   :  { %3095 = vst.msk [vmem:[#allocation3 + $0x108] sm:$0xff] %vm3061_vm9, %v2936_v26  ;;  %v2942_v29 = vpop.permute.xlu0 %2941  ;;  %v4428_v26 = vld [vmem:[#allocation2] sm:$0xff] }
 0x440   :  { %3308 = vrot.lane.b32.xlu1 %v3153_v20, %s9364_s8  ;;  %3098 = vst.msk [vmem:[#allocation3 + $0x120] sm:$0xff] %vm3061_vm9, %v2942_v29  ;;  %v3185_v20 = vld [vmem:[#allocation2 + $0x322] sm:$0xff] }
 0x441   :  { %3314 = vrot.lane.b32.xlu0 %v3156_v24, %s9364_s8 }
 0x442   :  { %v2940_v33 = vpop.permute.xlu1 %2939 }
 0x443   :  { %3097 = vst.msk [vmem:[#allocation3 + $0x118] sm:$0xff] %vm3061_vm9, %v2940_v33  ;;  %v2946_v35 = vpop.permute.xlu0 %2945  ;;  %v3187_v33 = vld [vmem:[#allocation2 + $0x33a] sm:$0xff] }
 0x444   :  { %3312 = vrot.lane.b32.xlu1 %v3155_v28, %s9364_s8  ;;  %3100 = vst.msk [vmem:[#allocation3 + $0x130] sm:$0xff] %vm3061_vm9, %v2946_v35 }
 0x445   :  { %3318 = vrot.lane.b32.xlu0 %v3158_v30, %s9364_s8 }
 0x446   :  { %v2944_v38 = vpop.permute.xlu1 %2943 }
 0x447   :  { %3099 = vst.msk [vmem:[#allocation3 + $0x128] sm:$0xff] %vm3061_vm9, %v2944_v38  ;;  %v2950_v41 = vpop.permute.xlu0 %2949 }
 0x448   :  { %3316 = vrot.lane.b32.xlu1 %v3157_v34, %s9364_s8  ;;  %3102 = vst.msk [vmem:[#allocation3 + $0x140] sm:$0xff] %vm3061_vm9, %v2950_v41 }
 0x449   :  { %3322 = vrot.lane.b32.xlu0 %v3160_v36, %s9364_s8 }
 0x44a   :  { %v2948_v43 = vpop.permute.xlu1 %2947 }
 0x44b   :  { %3101 = vst.msk [vmem:[#allocation3 + $0x138] sm:$0xff] %vm3061_vm9, %v2948_v43  ;;  %v2954_v46 = vpop.permute.xlu0 %2953 }
 0x44c   :  { %3320 = vrot.lane.b32.xlu1 %v3159_v39, %s9364_s8  ;;  %3104 = vst.msk [vmem:[#allocation3 + $0x150] sm:$0xff] %vm3061_vm9, %v2954_v46 }
 0x44d   :  { %3326 = vrot.lane.b32.xlu0 %v3162_v42, %s9364_s8 }
 0x44e   :  { %v2952_v49 = vpop.permute.xlu1 %2951 }
 0x44f   :  { %3103 = vst.msk [vmem:[#allocation3 + $0x148] sm:$0xff] %vm3061_vm9, %v2952_v49  ;;  %v2958_v51 = vpop.permute.xlu0 %2957 }
 0x450   :  { %3324 = vrot.lane.b32.xlu1 %v3161_v44, %s9364_s8  ;;  %3106 = vst.msk [vmem:[#allocation3 + $0x160] sm:$0xff] %vm3061_vm9, %v2958_v51 }
 0x451   :  { %3330 = vrot.lane.b32.xlu0 %v3164_v47, %s9364_s8 }
 0x452   :  { %v2956_v50 = vpop.permute.xlu1 %2955 }
 0x453   :  { %3105 = vst.msk [vmem:[#allocation3 + $0x158] sm:$0xff] %vm3061_vm9, %v2956_v50  ;;  %v2962_v52 = vpop.permute.xlu0 %2961 }
 0x454   :  { %3328 = vrot.lane.b32.xlu1 %v3163_v40, %s9364_s8  ;;  %3108 = vst.msk [vmem:[#allocation3 + $0x170] sm:$0xff] %vm3061_vm9, %v2962_v52 }
 0x455   :  { %3334 = vrot.lane.b32.xlu0 %v3166_v54, %s9364_s8 }
 0x456   :  { %v2960_v27 = vpop.permute.xlu1 %2959 }
 0x457   :  { %3107 = vst.msk [vmem:[#allocation3 + $0x168] sm:$0xff] %vm3061_vm9, %v2960_v27  ;;  %v2966_v8 = vpop.permute.xlu0 %2965 }
 0x458   :  { %3332 = vrot.lane.b32.xlu1 %v3165_v57, %s9364_s8  ;;  %3110 = vst.msk [vmem:[#allocation3 + $0x180] sm:$0xff] %vm3061_vm9, %v2966_v8 }
 0x459   :  { %3338 = vrot.lane.b32.xlu0 %v3168_v55, %s9364_s8 }
 0x45a   :  { %v2964_v62 = vpop.permute.xlu1 %2963 }
 0x45b   :  { %3109 = vst.msk [vmem:[#allocation3 + $0x178] sm:$0xff] %vm3061_vm9, %v2964_v62  ;;  %v2970_v1 = vpop.permute.xlu0 %2969 }
 0x45c   :  { %3336 = vrot.lane.b32.xlu1 %v3167_v58, %s9364_s8  ;;  %3112 = vst.msk [vmem:[#allocation3 + $0x190] sm:$0xff] %vm3061_vm9, %v2970_v1 }
 0x45d   :  { %3342 = vrot.lane.b32.xlu0 %v3170_v56, %s9364_s8 }
 0x45e   :  { %v2968_v5 = vpop.permute.xlu1 %2967 }
 0x45f   :  { %3111 = vst.msk [vmem:[#allocation3 + $0x188] sm:$0xff] %vm3061_vm9, %v2968_v5  ;;  %v2974_v9 = vpop.permute.xlu0 %2973 }
 0x460   :  { %3340 = vrot.lane.b32.xlu1 %v3169_v63, %s9364_s8  ;;  %3114 = vst.msk [vmem:[#allocation3 + $0x1a0] sm:$0xff] %vm3061_vm9, %v2974_v9 }
 0x461   :  { %3346 = vrot.lane.b32.xlu0 %v3172_v2, %s9364_s8 }
 0x462   :  { %v2972_v14 = vpop.permute.xlu1 %2971 }
 0x463   :  { %3113 = vst.msk [vmem:[#allocation3 + $0x198] sm:$0xff] %vm3061_vm9, %v2972_v14  ;;  %v2978_v21 = vpop.permute.xlu0 %2977 }
 0x464   :  { %3344 = vrot.lane.b32.xlu1 %v3171_v6, %s9364_s8  ;;  %3116 = vst.msk [vmem:[#allocation3 + $0x1b0] sm:$0xff] %vm3061_vm9, %v2978_v21 }
 0x465   :  { %3350 = vrot.lane.b32.xlu0 %v3174_v11, %s9364_s8 }
 0x466   :  { %v2976_v31 = vpop.permute.xlu1 %2975 }
 0x467   :  { %3115 = vst.msk [vmem:[#allocation3 + $0x1a8] sm:$0xff] %vm3061_vm9, %v2976_v31  ;;  %v2982_v45 = vpop.permute.xlu0 %2981 }
 0x468   :  { %3348 = vrot.lane.b32.xlu1 %v3173_v15, %s9364_s8  ;;  %3118 = vst.msk [vmem:[#allocation3 + $0x1c0] sm:$0xff] %vm3061_vm9, %v2982_v45 }
 0x469   :  { %3354 = vrot.lane.b32.xlu0 %v3176_v22, %s9364_s8 }
 0x46a   :  { %v2980_v59 = vpop.permute.xlu1 %2979 }
 0x46b   :  { %3117 = vst.msk [vmem:[#allocation3 + $0x1b8] sm:$0xff] %vm3061_vm9, %v2980_v59  ;;  %v2986_v3 = vpop.permute.xlu0 %2985 }
 0x46c   :  { %3352 = vrot.lane.b32.xlu1 %v3175_v32, %s9364_s8  ;;  %3120 = vst.msk [vmem:[#allocation3 + $0x1d0] sm:$0xff] %vm3061_vm9, %v2986_v3 }
 0x46d   :  { %3358 = vrot.lane.b32.xlu0 %v3178_v48, %s9364_s8 }
 0x46e   :  { %v2984_v12 = vpop.permute.xlu1 %2983 }
 0x46f   :  { %3119 = vst.msk [vmem:[#allocation3 + $0x1c8] sm:$0xff] %vm3061_vm9, %v2984_v12  ;;  %v2990_v0 = vpop.permute.xlu0 %2989 }
 0x470   :  { %3356 = vrot.lane.b32.xlu1 %v3177_v60, %s9364_s8  ;;  %3122 = vst.msk [vmem:[#allocation3 + $0x1e0] sm:$0xff] %vm3061_vm9, %v2990_v0 }
 0x471   :  { %3362 = vrot.lane.b32.xlu0 %v3180_v4, %s9364_s8 }
 0x472   :  { %v2988_v17 = vpop.permute.xlu1 %2987 }
 0x473   :  { %3121 = vst.msk [vmem:[#allocation3 + $0x1d8] sm:$0xff] %vm3061_vm9, %v2988_v17  ;;  %v2994_v37 = vpop.permute.xlu0 %2993 }
 0x474   :  { %3360 = vrot.lane.b32.xlu1 %v3179_v25, %s9364_s8  ;;  %3124 = vst.msk [vmem:[#allocation3 + $0x1f0] sm:$0xff] %vm3061_vm9, %v2994_v37 }
 0x475   :  { %3366 = vrot.lane.b32.xlu0 %v3182_v13, %s9364_s8 }
 0x476   :  { %v2992_v7 = vpop.permute.xlu1 %2991 }
 0x477   :  { %3123 = vst.msk [vmem:[#allocation3 + $0x1e8] sm:$0xff] %vm3061_vm9, %v2992_v7  ;;  %v3255_v10 = vpop.permute.xlu0 %3254 }
 0x478   :  { %3364 = vrot.lane.b32.xlu1 %v3181_v53, %s9364_s8  ;;  %3447 = vst.msk [vmem:[#allocation3] sm:$0xff] %vm3446_vm11, %v3255_v10 }
 0x479   :  { %3370 = vrot.lane.b32.xlu0 %v3184_v61, %s9364_s8 }
 0x47a   :  { %v2996_v19 = vpop.permute.xlu1 %2995 }
 0x47b   :  { %3125 = vst.msk [vmem:[#allocation3 + $0x1f8] sm:$0xff] %vm3061_vm9, %v2996_v19  ;;  %v3259_v23 = vpop.permute.xlu0 %3258 }
 0x47c   :  { %3368 = vrot.lane.b32.xlu1 %v3183_v18, %s9364_s8  ;;  %3449 = vst.msk [vmem:[#allocation3 + $0x10] sm:$0xff] %vm3446_vm11, %v3259_v23 }
 0x47d   :  { %3374 = vrot.lane.b32.xlu0 %v3186_v16, %s9364_s8 }
 0x47e   :  { %v3257_v24 = vpop.permute.xlu1 %3256 }
 0x47f   :  { %3448 = vst.msk [vmem:[#allocation3 + $0x8] sm:$0xff] %vm3446_vm11, %v3257_v24  ;;  %v3263_v29 = vpop.permute.xlu0 %3262  ;;  %v3511_v28 = vld [vmem:[#allocation3] sm:$0xff] }
 0x480   :  { %3372 = vrot.lane.b32.xlu1 %v3185_v20, %s9364_s8  ;;  %3451 = vst.msk [vmem:[#allocation3 + $0x20] sm:$0xff] %vm3446_vm11, %v3263_v29  ;;  %8972 = vmatprep.mubr.msk.f32.mxu0 %vm3580_vm12, %v3511_v28 }
 0x481   :  { %4492 = vst.msk [vmem:[#allocation3] sm:$0xff] %vm85_vm0, %v4428_v26 }
 0x482   :  { %v3261_v30 = vpop.permute.xlu1 %3260 }
 0x483   :  { %3450 = vst.msk [vmem:[#allocation3 + $0x18] sm:$0xff] %vm3446_vm11, %v3261_v30  ;;  %v3267_v35 = vpop.permute.xlu0 %3266  ;;  %v3513_v34 = vld [vmem:[#allocation3 + $0x10] sm:$0xff] }
 0x484   :  { %3376 = vrot.lane.b32.xlu1 %v3187_v33, %s9364_s8  ;;  %3453 = vst.msk [vmem:[#allocation3 + $0x30] sm:$0xff] %vm3446_vm11, %v3267_v35 }
 0x486   :  { %v3265_v38 = vpop.permute.xlu1 %3264  ;;  %v3512_v36 = vld [vmem:[#allocation3 + $0x8] sm:$0xff] }
 0x487   :  { %3452 = vst.msk [vmem:[#allocation3 + $0x28] sm:$0xff] %vm3446_vm11, %v3265_v38  ;;  %8973 = vmatmul.mubr.msk.f32.vlgmr.msra.gmra.mrb[0].mxu0 %vm3580_vm12, %v3512_v36  ;;  %v3271_v41 = vpop.permute.xlu0 %3270  ;;  %v3515_v39 = vld [vmem:[#allocation3 + $0x20] sm:$0xff] }
 0x488   :  { %8975 = vmatprep.mubr.msk.f32.mxu0 %vm3580_vm12, %v3513_v34  ;;  %3455 = vst.msk [vmem:[#allocation3 + $0x40] sm:$0xff] %vm3446_vm11, %v3271_v41 }
 0x48a   :  { %v3269_v43 = vpop.permute.xlu1 %3268  ;;  %v3514_v42 = vld [vmem:[#allocation3 + $0x18] sm:$0xff] }
 0x48b   :  { %3454 = vst.msk [vmem:[#allocation3 + $0x38] sm:$0xff] %vm3446_vm11, %v3269_v43  ;;  %8976 = vmatmul.mubr.msk.f32.gmra.mrb[2].mxu0 %vm3580_vm12, %v3514_v42  ;;  %v3275_v46 = vpop.permute.xlu0 %3274  ;;  %v3517_v44 = vld [vmem:[#allocation3 + $0x30] sm:$0xff] }
 0x48c   :  { %8978 = vmatprep.mubr.msk.f32.mxu0 %vm3580_vm12, %v3515_v39  ;;  %3457 = vst.msk [vmem:[#allocation3 + $0x50] sm:$0xff] %vm3446_vm11, %v3275_v46 }
 0x48e   :  { %v3273_v49 = vpop.permute.xlu1 %3272  ;;  %v3516_v47 = vld [vmem:[#allocation3 + $0x28] sm:$0xff] }
 0x48f   :  { %3456 = vst.msk [vmem:[#allocation3 + $0x48] sm:$0xff] %vm3446_vm11, %v3273_v49  ;;  %8979 = vmatmul.mubr.msk.f32.gmra.mrb[4].mxu0 %vm3580_vm12, %v3516_v47  ;;  %v3279_v51 = vpop.permute.xlu0 %3278  ;;  %v3519_v40 = vld [vmem:[#allocation3 + $0x40] sm:$0xff] }
 0x490   :  { %8981 = vmatprep.mubr.msk.f32.mxu0 %vm3580_vm12, %v3517_v44  ;;  %3459 = vst.msk [vmem:[#allocation3 + $0x60] sm:$0xff] %vm3446_vm11, %v3279_v51 }
 0x492   :  { %v3277_v50 = vpop.permute.xlu1 %3276  ;;  %v3518_v54 = vld [vmem:[#allocation3 + $0x38] sm:$0xff] }
 0x493   :  { %3458 = vst.msk [vmem:[#allocation3 + $0x58] sm:$0xff] %vm3446_vm11, %v3277_v50  ;;  %8982 = vmatmul.mubr.msk.f32.gmra.mrb[6].mxu0 %vm3580_vm12, %v3518_v54  ;;  %v3283_v52 = vpop.permute.xlu0 %3282  ;;  %v3521_v57 = vld [vmem:[#allocation3 + $0x50] sm:$0xff] }
 0x494   :  { %8984 = vmatprep.mubr.msk.f32.mxu0 %vm3580_vm12, %v3519_v40  ;;  %3461 = vst.msk [vmem:[#allocation3 + $0x70] sm:$0xff] %vm3446_vm11, %v3283_v52 }
 0x496   :  { %v3281_v27 = vpop.permute.xlu1 %3280  ;;  %v3520_v55 = vld [vmem:[#allocation3 + $0x48] sm:$0xff] }
 0x497   :  { %3460 = vst.msk [vmem:[#allocation3 + $0x68] sm:$0xff] %vm3446_vm11, %v3281_v27  ;;  %8985 = vmatmul.mubr.msk.f32.gmra.mrb[8].mxu0 %vm3580_vm12, %v3520_v55  ;;  %v3287_v8 = vpop.permute.xlu0 %3286  ;;  %v3523_v58 = vld [vmem:[#allocation3 + $0x60] sm:$0xff] }
 0x498   :  { %8987 = vmatprep.mubr.msk.f32.mxu0 %vm3580_vm12, %v3521_v57  ;;  %3463 = vst.msk [vmem:[#allocation3 + $0x80] sm:$0xff] %vm3446_vm11, %v3287_v8 }
 0x49a   :  { %v3285_v62 = vpop.permute.xlu1 %3284  ;;  %v3522_v56 = vld [vmem:[#allocation3 + $0x58] sm:$0xff] }
 0x49b   :  { %3462 = vst.msk [vmem:[#allocation3 + $0x78] sm:$0xff] %vm3446_vm11, %v3285_v62  ;;  %8988 = vmatmul.mubr.msk.f32.gmra.mrb[10].mxu0 %vm3580_vm12, %v3522_v56  ;;  %v3291_v1 = vpop.permute.xlu0 %3290  ;;  %v3525_v63 = vld [vmem:[#allocation3 + $0x70] sm:$0xff] }
 0x49c   :  { %8990 = vmatprep.mubr.msk.f32.mxu0 %vm3580_vm12, %v3523_v58  ;;  %3465 = vst.msk [vmem:[#allocation3 + $0x90] sm:$0xff] %vm3446_vm11, %v3291_v1 }
 0x49e   :  { %v3289_v5 = vpop.permute.xlu1 %3288  ;;  %v3524_v2 = vld [vmem:[#allocation3 + $0x68] sm:$0xff] }
 0x49f   :  { %3464 = vst.msk [vmem:[#allocation3 + $0x88] sm:$0xff] %vm3446_vm11, %v3289_v5  ;;  %8991 = vmatmul.mubr.msk.f32.gmra.mrb[12].mxu0 %vm3580_vm12, %v3524_v2  ;;  %v3295_v9 = vpop.permute.xlu0 %3294  ;;  %v3527_v6 = vld [vmem:[#allocation3 + $0x80] sm:$0xff] }
 0x4a0   :  { %8993 = vmatprep.mubr.msk.f32.mxu0 %vm3580_vm12, %v3525_v63  ;;  %3467 = vst.msk [vmem:[#allocation3 + $0xa0] sm:$0xff] %vm3446_vm11, %v3295_v9 }
 0x4a2   :  { %v3293_v14 = vpop.permute.xlu1 %3292  ;;  %v3526_v11 = vld [vmem:[#allocation3 + $0x78] sm:$0xff] }
 0x4a3   :  { %3466 = vst.msk [vmem:[#allocation3 + $0x98] sm:$0xff] %vm3446_vm11, %v3293_v14  ;;  %8994 = vmatmul.mubr.msk.f32.gmra.mrb[14].mxu0 %vm3580_vm12, %v3526_v11  ;;  %v3299_v21 = vpop.permute.xlu0 %3298  ;;  %v3529_v15 = vld [vmem:[#allocation3 + $0x90] sm:$0xff] }
 0x4a4   :  { %8996 = vmatprep.mubr.msk.f32.mxu0 %vm3580_vm12, %v3527_v6  ;;  %3469 = vst.msk [vmem:[#allocation3 + $0xb0] sm:$0xff] %vm3446_vm11, %v3299_v21  ;;  %v3189_v6 = vld [vmem:[#allocation2 + $0x352] sm:$0xff]  ;;  %v3188_v14 = vld [vmem:[#allocation2 + $0x34a] sm:$0xff] }
 0x4a5   :  { %3380 = vrot.lane.b32.xlu1 %v3189_v6, %s9364_s8  ;;  %3378 = vrot.lane.b32.xlu0 %v3188_v14, %s9364_s8 }
 0x4a6   :  { %v3297_v31 = vpop.permute.xlu1 %3296  ;;  %v3528_v22 = vld [vmem:[#allocation3 + $0x88] sm:$0xff] }
 0x4a7   :  { %3468 = vst.msk [vmem:[#allocation3 + $0xa8] sm:$0xff] %vm3446_vm11, %v3297_v31  ;;  %8997 = vmatmul.mubr.msk.f32.gmra.mrb[16].mxu0 %vm3580_vm12, %v3528_v22  ;;  %v3303_v45 = vpop.permute.xlu0 %3302  ;;  %v3531_v32 = vld [vmem:[#allocation3 + $0xa0] sm:$0xff]  ;;  %v4557_v22 = vld [vmem:[#allocation2 + $0x9] sm:$0xff] }
 0x4a8   :  { %8999 = vmatprep.mubr.msk.f32.mxu0 %vm3580_vm12, %v3529_v15  ;;  %3471 = vst.msk [vmem:[#allocation3 + $0xc0] sm:$0xff] %vm3446_vm11, %v3303_v45 }
 0x4a9   :  { %4686 = vrot.lane.b32.xlu1 %v4557_v22, %s9358_s4 }
 0x4aa   :  { %v3301_v59 = vpop.permute.xlu1 %3300  ;;  %v3530_v48 = vld [vmem:[#allocation3 + $0x98] sm:$0xff] }
 0x4ab   :  { %3470 = vst.msk [vmem:[#allocation3 + $0xb8] sm:$0xff] %vm3446_vm11, %v3301_v59  ;;  %9000 = vmatmul.mubr.msk.f32.gmra.mrb[18].mxu0 %vm3580_vm12, %v3530_v48  ;;  %v3307_v3 = vpop.permute.xlu0 %3306  ;;  %v3533_v60 = vld [vmem:[#allocation3 + $0xb0] sm:$0xff] }
 0x4ac   :  { %9002 = vmatprep.mubr.msk.f32.mxu0 %vm3580_vm12, %v3531_v32  ;;  %3473 = vst.msk [vmem:[#allocation3 + $0xd0] sm:$0xff] %vm3446_vm11, %v3307_v3  ;;  %v4556_v32 = vld [vmem:[#allocation2 + $0x1] sm:$0xff] }
 0x4ad   :  { %4684 = vrot.lane.b32.xlu0 %v4556_v32, %s9358_s4 }
 0x4ae   :  { %v3305_v12 = vpop.permute.xlu1 %3304  ;;  %v3532_v4 = vld [vmem:[#allocation3 + $0xa8] sm:$0xff] }
 0x4af   :  { %3472 = vst.msk [vmem:[#allocation3 + $0xc8] sm:$0xff] %vm3446_vm11, %v3305_v12  ;;  %9003 = vmatmul.mubr.msk.f32.gmra.mrb[20].mxu0 %vm3580_vm12, %v3532_v4  ;;  %v3311_v0 = vpop.permute.xlu0 %3310  ;;  %v3535_v25 = vld [vmem:[#allocation3 + $0xc0] sm:$0xff] }
 0x4b0   :  { %9005 = vmatprep.mubr.msk.f32.mxu0 %vm3580_vm12, %v3533_v60  ;;  %3475 = vst.msk [vmem:[#allocation3 + $0xe0] sm:$0xff] %vm3446_vm11, %v3311_v0 }
 0x4b2   :  { %v3309_v17 = vpop.permute.xlu1 %3308  ;;  %v3534_v13 = vld [vmem:[#allocation3 + $0xb8] sm:$0xff] }
 0x4b3   :  { %3474 = vst.msk [vmem:[#allocation3 + $0xd8] sm:$0xff] %vm3446_vm11, %v3309_v17  ;;  %9006 = vmatmul.mubr.msk.f32.gmra.mrb[22].mxu0 %vm3580_vm12, %v3534_v13  ;;  %v3315_v37 = vpop.permute.xlu0 %3314  ;;  %v3537_v53 = vld [vmem:[#allocation3 + $0xd0] sm:$0xff] }
 0x4b4   :  { %9008 = vmatprep.mubr.msk.f32.mxu0 %vm3580_vm12, %v3535_v25  ;;  %3477 = vst.msk [vmem:[#allocation3 + $0xf0] sm:$0xff] %vm3446_vm11, %v3315_v37 }
 0x4b6   :  { %v3313_v7 = vpop.permute.xlu1 %3312  ;;  %v3536_v61 = vld [vmem:[#allocation3 + $0xc8] sm:$0xff] }
 0x4b7   :  { %3476 = vst.msk [vmem:[#allocation3 + $0xe8] sm:$0xff] %vm3446_vm11, %v3313_v7  ;;  %9009 = vmatmul.mubr.msk.f32.gmra.mrb[24].mxu0 %vm3580_vm12, %v3536_v61  ;;  %v3319_v10 = vpop.permute.xlu0 %3318  ;;  %v3539_v18 = vld [vmem:[#allocation3 + $0xe0] sm:$0xff] }
 0x4b8   :  { %9011 = vmatprep.mubr.msk.f32.mxu0 %vm3580_vm12, %v3537_v53  ;;  %3479 = vst.msk [vmem:[#allocation3 + $0x100] sm:$0xff] %vm3446_vm11, %v3319_v10 }
 0x4ba   :  { %v3317_v19 = vpop.permute.xlu1 %3316  ;;  %v3538_v16 = vld [vmem:[#allocation3 + $0xd8] sm:$0xff] }
 0x4bb   :  { %3478 = vst.msk [vmem:[#allocation3 + $0xf8] sm:$0xff] %vm3446_vm11, %v3317_v19  ;;  %9012 = vmatmul.mubr.msk.f32.gmra.mrb[26].mxu0 %vm3580_vm12, %v3538_v16  ;;  %v3323_v23 = vpop.permute.xlu0 %3322  ;;  %v3541_v20 = vld [vmem:[#allocation3 + $0xf0] sm:$0xff] }
 0x4bc   :  { %9014 = vmatprep.mubr.msk.f32.mxu0 %vm3580_vm12, %v3539_v18  ;;  %3481 = vst.msk [vmem:[#allocation3 + $0x110] sm:$0xff] %vm3446_vm11, %v3323_v23 }
 0x4be   :  { %v3321_v26 = vpop.permute.xlu1 %3320  ;;  %v3540_v24 = vld [vmem:[#allocation3 + $0xe8] sm:$0xff] }
 0x4bf   :  { %3480 = vst.msk [vmem:[#allocation3 + $0x108] sm:$0xff] %vm3446_vm11, %v3321_v26  ;;  %9015 = vmatmul.mubr.msk.f32.gmra.mrb[28].mxu0 %vm3580_vm12, %v3540_v24  ;;  %v3327_v29 = vpop.permute.xlu0 %3326  ;;  %v3543_v28 = vld [vmem:[#allocation3 + $0x100] sm:$0xff] }
 0x4c0   :  { %9017 = vmatprep.mubr.msk.f32.mxu0 %vm3580_vm12, %v3541_v20  ;;  %3483 = vst.msk [vmem:[#allocation3 + $0x120] sm:$0xff] %vm3446_vm11, %v3327_v29  ;;  %v11095_v29 = vld [vmem:[#allocation9] ss:$0 sm:$0xff] }
 0x4c2   :  { %v3325_v33 = vpop.permute.xlu1 %3324  ;;  %v3542_v30 = vld [vmem:[#allocation3 + $0xf8] sm:$0xff] }
 0x4c3   :  { %3482 = vst.msk [vmem:[#allocation3 + $0x118] sm:$0xff] %vm3446_vm11, %v3325_v33  ;;  %9018 = vmatmul.mubr.msk.f32.gmra.mrb[30].mxu0 %vm3580_vm12, %v3542_v30  ;;  %v3331_v35 = vpop.permute.xlu0 %3330  ;;  %v3545_v34 = vld [vmem:[#allocation3 + $0x110] sm:$0xff] }
 0x4c4   :  { %9020 = vmatprep.mubr.msk.f32.mxu0 %vm3580_vm12, %v3543_v28  ;;  %3485 = vst.msk [vmem:[#allocation3 + $0x130] sm:$0xff] %vm3446_vm11, %v3331_v35  ;;  %v4429_v28 = vld [vmem:[#allocation2 + $0x8] sm:$0xff] }
 0x4c5   :  { %4493 = vst.msk [vmem:[#allocation3 + $0x8] sm:$0xff] %vm85_vm0, %v4429_v28 }
 0x4c6   :  { %v3329_v38 = vpop.permute.xlu1 %3328  ;;  %v3544_v36 = vld [vmem:[#allocation3 + $0x108] sm:$0xff] }
 0x4c7   :  { %3484 = vst.msk [vmem:[#allocation3 + $0x128] sm:$0xff] %vm3446_vm11, %v3329_v38  ;;  %9021 = vmatmul.mubr.msk.f32.gmra.mrb[32].mxu0 %vm3580_vm12, %v3544_v36  ;;  %v3335_v41 = vpop.permute.xlu0 %3334  ;;  %v3547_v39 = vld [vmem:[#allocation3 + $0x120] sm:$0xff] }
 0x4c8   :  { %9023 = vmatprep.mubr.msk.f32.mxu0 %vm3580_vm12, %v3545_v34  ;;  %3487 = vst.msk [vmem:[#allocation3 + $0x140] sm:$0xff] %vm3446_vm11, %v3335_v41  ;;  %v11099_v34 = vld [vmem:[#allocation9 + $0x1] ss:$0 sm:$0xff] }
 0x4ca   :  { %v3333_v43 = vpop.permute.xlu1 %3332  ;;  %v3546_v42 = vld [vmem:[#allocation3 + $0x118] sm:$0xff] }
 0x4cb   :  { %3486 = vst.msk [vmem:[#allocation3 + $0x138] sm:$0xff] %vm3446_vm11, %v3333_v43  ;;  %9024 = vmatmul.mubr.msk.f32.gmra.mrb[34].mxu0 %vm3580_vm12, %v3546_v42  ;;  %v3339_v46 = vpop.permute.xlu0 %3338  ;;  %v3549_v44 = vld [vmem:[#allocation3 + $0x130] sm:$0xff] }
 0x4cc   :  { %9026 = vmatprep.mubr.msk.f32.mxu0 %vm3580_vm12, %v3547_v39  ;;  %3489 = vst.msk [vmem:[#allocation3 + $0x150] sm:$0xff] %vm3446_vm11, %v3339_v46 }
 0x4ce   :  { %v3337_v49 = vpop.permute.xlu1 %3336  ;;  %v3548_v47 = vld [vmem:[#allocation3 + $0x128] sm:$0xff] }
 0x4cf   :  { %3488 = vst.msk [vmem:[#allocation3 + $0x148] sm:$0xff] %vm3446_vm11, %v3337_v49  ;;  %9027 = vmatmul.mubr.msk.f32.gmra.mrb[36].mxu0 %vm3580_vm12, %v3548_v47  ;;  %v3343_v51 = vpop.permute.xlu0 %3342  ;;  %v3551_v40 = vld [vmem:[#allocation3 + $0x140] sm:$0xff] }
 0x4d0   :  { %9029 = vmatprep.mubr.msk.f32.mxu0 %vm3580_vm12, %v3549_v44  ;;  %3491 = vst.msk [vmem:[#allocation3 + $0x160] sm:$0xff] %vm3446_vm11, %v3343_v51 }
 0x4d2   :  { %v3341_v50 = vpop.permute.xlu1 %3340  ;;  %v3550_v54 = vld [vmem:[#allocation3 + $0x138] sm:$0xff] }
 0x4d3   :  { %3490 = vst.msk [vmem:[#allocation3 + $0x158] sm:$0xff] %vm3446_vm11, %v3341_v50  ;;  %9030 = vmatmul.mubr.msk.f32.gmra.mrb[38].mxu0 %vm3580_vm12, %v3550_v54  ;;  %v3347_v52 = vpop.permute.xlu0 %3346  ;;  %v3553_v57 = vld [vmem:[#allocation3 + $0x150] sm:$0xff] }
 0x4d4   :  { %9032 = vmatprep.mubr.msk.f32.mxu0 %vm3580_vm12, %v3551_v40  ;;  %3493 = vst.msk [vmem:[#allocation3 + $0x170] sm:$0xff] %vm3446_vm11, %v3347_v52 }
 0x4d6   :  { %v3345_v27 = vpop.permute.xlu1 %3344  ;;  %v3552_v55 = vld [vmem:[#allocation3 + $0x148] sm:$0xff] }
 0x4d7   :  { %3492 = vst.msk [vmem:[#allocation3 + $0x168] sm:$0xff] %vm3446_vm11, %v3345_v27  ;;  %9033 = vmatmul.mubr.msk.f32.gmra.mrb[40].mxu0 %vm3580_vm12, %v3552_v55  ;;  %v3351_v8 = vpop.permute.xlu0 %3350  ;;  %v3555_v58 = vld [vmem:[#allocation3 + $0x160] sm:$0xff] }
 0x4d8   :  { %9035 = vmatprep.mubr.msk.f32.mxu0 %vm3580_vm12, %v3553_v57  ;;  %3495 = vst.msk [vmem:[#allocation3 + $0x180] sm:$0xff] %vm3446_vm11, %v3351_v8 }
 0x4da   :  { %v3349_v62 = vpop.permute.xlu1 %3348  ;;  %v3554_v56 = vld [vmem:[#allocation3 + $0x158] sm:$0xff] }
 0x4db   :  { %3494 = vst.msk [vmem:[#allocation3 + $0x178] sm:$0xff] %vm3446_vm11, %v3349_v62  ;;  %9036 = vmatmul.mubr.msk.f32.gmra.mrb[42].mxu0 %vm3580_vm12, %v3554_v56  ;;  %v3355_v1 = vpop.permute.xlu0 %3354  ;;  %v3557_v63 = vld [vmem:[#allocation3 + $0x170] sm:$0xff] }
 0x4dc   :  { %9038 = vmatprep.mubr.msk.f32.mxu0 %vm3580_vm12, %v3555_v58  ;;  %3497 = vst.msk [vmem:[#allocation3 + $0x190] sm:$0xff] %vm3446_vm11, %v3355_v1 }
 0x4de   :  { %v3353_v5 = vpop.permute.xlu1 %3352  ;;  %v3556_v2 = vld [vmem:[#allocation3 + $0x168] sm:$0xff] }
 0x4df   :  { %3496 = vst.msk [vmem:[#allocation3 + $0x188] sm:$0xff] %vm3446_vm11, %v3353_v5  ;;  %9039 = vmatmul.mubr.msk.f32.gmra.mrb[44].mxu0 %vm3580_vm12, %v3556_v2  ;;  %v3359_v9 = vpop.permute.xlu0 %3358  ;;  %v3559_v11 = vld [vmem:[#allocation3 + $0x180] sm:$0xff] }
 0x4e0   :  { %9041 = vmatprep.mubr.msk.f32.mxu0 %vm3580_vm12, %v3557_v63  ;;  %3499 = vst.msk [vmem:[#allocation3 + $0x1a0] sm:$0xff] %vm3446_vm11, %v3359_v9 }
 0x4e2   :  { %v3357_v21 = vpop.permute.xlu1 %3356  ;;  %v3558_v15 = vld [vmem:[#allocation3 + $0x178] sm:$0xff] }
 0x4e3   :  { %3498 = vst.msk [vmem:[#allocation3 + $0x198] sm:$0xff] %vm3446_vm11, %v3357_v21  ;;  %9042 = vmatmul.mubr.msk.f32.gmra.mrb[46].mxu0 %vm3580_vm12, %v3558_v15  ;;  %v3363_v31 = vpop.permute.xlu0 %3362  ;;  %v3561_v45 = vld [vmem:[#allocation3 + $0x190] sm:$0xff] }
 0x4e4   :  { %9044 = vmatprep.mubr.msk.f32.mxu0 %vm3580_vm12, %v3559_v11  ;;  %3501 = vst.msk [vmem:[#allocation3 + $0x1b0] sm:$0xff] %vm3446_vm11, %v3363_v31 }
 0x4e6   :  { %v3361_v59 = vpop.permute.xlu1 %3360  ;;  %v3560_v48 = vld [vmem:[#allocation3 + $0x188] sm:$0xff] }
 0x4e7   :  { %3500 = vst.msk [vmem:[#allocation3 + $0x1a8] sm:$0xff] %vm3446_vm11, %v3361_v59  ;;  %9045 = vmatmul.mubr.msk.f32.gmra.mrb[48].mxu0 %vm3580_vm12, %v3560_v48  ;;  %v3367_v3 = vpop.permute.xlu0 %3366  ;;  %v3563_v60 = vld [vmem:[#allocation3 + $0x1a0] sm:$0xff] }
 0x4e8   :  { %9047 = vmatprep.mubr.msk.f32.mxu0 %vm3580_vm12, %v3561_v45  ;;  %3503 = vst.msk [vmem:[#allocation3 + $0x1c0] sm:$0xff] %vm3446_vm11, %v3367_v3 }
 0x4ea   :  { %v3365_v12 = vpop.permute.xlu1 %3364  ;;  %v3562_v4 = vld [vmem:[#allocation3 + $0x198] sm:$0xff] }
 0x4eb   :  { %3502 = vst.msk [vmem:[#allocation3 + $0x1b8] sm:$0xff] %vm3446_vm11, %v3365_v12  ;;  %9048 = vmatmul.mubr.msk.f32.gmra.mrb[50].mxu0 %vm3580_vm12, %v3562_v4  ;;  %v3371_v0 = vpop.permute.xlu0 %3370  ;;  %v3565_v25 = vld [vmem:[#allocation3 + $0x1b0] sm:$0xff] }
 0x4ec   :  { %9050 = vmatprep.mubr.msk.f32.mxu0 %vm3580_vm12, %v3563_v60  ;;  %3505 = vst.msk [vmem:[#allocation3 + $0x1d0] sm:$0xff] %vm3446_vm11, %v3371_v0 }
 0x4ee   :  { %v3369_v17 = vpop.permute.xlu1 %3368  ;;  %v3564_v13 = vld [vmem:[#allocation3 + $0x1a8] sm:$0xff] }
 0x4ef   :  { %3504 = vst.msk [vmem:[#allocation3 + $0x1c8] sm:$0xff] %vm3446_vm11, %v3369_v17  ;;  %9051 = vmatmul.mubr.msk.f32.gmra.mrb[52].mxu0 %vm3580_vm12, %v3564_v13  ;;  %v3375_v37 = vpop.permute.xlu0 %3374  ;;  %v3567_v53 = vld [vmem:[#allocation3 + $0x1c0] sm:$0xff] }
 0x4f0   :  { %9053 = vmatprep.mubr.msk.f32.mxu0 %vm3580_vm12, %v3565_v25  ;;  %3507 = vst.msk [vmem:[#allocation3 + $0x1e0] sm:$0xff] %vm3446_vm11, %v3375_v37 }
 0x4f2   :  { %v3373_v7 = vpop.permute.xlu1 %3372  ;;  %v3566_v61 = vld [vmem:[#allocation3 + $0x1b8] sm:$0xff] }
 0x4f3   :  { %3506 = vst.msk [vmem:[#allocation3 + $0x1d8] sm:$0xff] %vm3446_vm11, %v3373_v7  ;;  %9054 = vmatmul.mubr.msk.f32.gmra.mrb[54].mxu0 %vm3580_vm12, %v3566_v61  ;;  %v3569_v10 = vld [vmem:[#allocation3 + $0x1d0] sm:$0xff] }
 0x4f4   :  { %9056 = vmatprep.mubr.msk.f32.mxu0 %vm3580_vm12, %v3567_v53 }
 0x4f6   :  { %v3377_v18 = vpop.permute.xlu1 %3376  ;;  %v3568_v19 = vld [vmem:[#allocation3 + $0x1c8] sm:$0xff] }
 0x4f7   :  { %3508 = vst.msk [vmem:[#allocation3 + $0x1e8] sm:$0xff] %vm3446_vm11, %v3377_v18  ;;  %9057 = vmatmul.mubr.msk.f32.gmra.mrb[56].mxu0 %vm3580_vm12, %v3568_v19  ;;  %v3571_v16 = vld [vmem:[#allocation3 + $0x1e0] sm:$0xff] }
 0x4f8   :  { %9059 = vmatprep.mubr.msk.f32.mxu0 %vm3580_vm12, %v3569_v10 }
 0x4fa   :  { %v3570_v23 = vld [vmem:[#allocation3 + $0x1d8] sm:$0xff] }
 0x4fb   :  { %9060 = vmatmul.mubr.msk.f32.gmra.mrb[58].mxu0 %vm3580_vm12, %v3570_v23 }
 0x4fc   :  { %9062 = vmatprep.mubr.msk.f32.mxu0 %vm3580_vm12, %v3571_v16 }
 0x4fe   :  { %v3572_v20 = vld [vmem:[#allocation3 + $0x1e8] sm:$0xff] }
 0x4ff   :  { %9063 = vmatmul.mubr.msk.f32.gmra.mrb[60].mxu0 %vm3580_vm12, %v3572_v20 }
 0x517   :  { %v3381_v26 = vpop.permute.xlu1 %3380  ;;  %v3379_v24 = vpop.permute.xlu0 %3378 }
 0x518   :  { %3510 = vst.msk [vmem:[#allocation3 + $0x1f8] sm:$0xff] %vm3446_vm11, %v3381_v26  ;;  %3509 = vst.msk [vmem:[#allocation3 + $0x1f0] sm:$0xff] %vm3446_vm11, %v3379_v24 }
 0x51b   :  { %v4687_v30 = vpop.permute.xlu1 %4686 }
 0x51c   :  { %4877 = vst.msk [vmem:[#allocation3 + $0x8] sm:$0xff] %vm750_vm3, %v4687_v30 }
 0x51f   :  { %v4685_v33 = vpop.permute.xlu0 %4684  ;;  %v3573_v41 = vld [vmem:[#allocation3 + $0x1f0] sm:$0xff]  ;;  %v3574_v43 = vld [vmem:[#allocation3 + $0x1f8] sm:$0xff] }
 0x520   :  { %4876 = vst.msk [vmem:[#allocation3] sm:$0xff] %vm750_vm3, %v4685_v33  ;;  %9065 = vmatprep.mubr.msk.f32.mxu0 %vm3580_vm12, %v3573_v41 }
 0x521   :  { %9066 = vmatmul.mubr.msk.f32.gmra.mrb[62].mxu0 %vm3580_vm12, %v3574_v43 }
 0x55a   :  { %v8974_v35 = vpop.f32.mrb[0].mxu0 }
 0x55b   :  { %v4168_v38 = vmul.f32 %v8974_v35, %v11095_v29  ;;  %v3843_v36 = vpop.f32.mrb[1].mxu0 }
 0x55c   :  { %v4167_v39 = vmul.f32 %v11095_v29, %v3843_v36 }
 0x55d   :  { %v4237_v42 = vadd.f32 %v11099_v34, %v4168_v38 }
 0x55e   :  { %v4236_v46 = vadd.f32 %v11099_v34, %v4167_v39  ;;  %v8977_v44 = vpop.f32.mrb[2].mxu0 }
 0x55f   :  { %v4301_v49 = vmax.f32 %v4237_v42, 0.0  ;;  %v4170_v47 = vmul.f32 %v8977_v44, %v11095_v29  ;;  %v3853_v51 = vpop.f32.mrb[3].mxu0 }
 0x560   :  { %v4300_v40 = vmax.f32 %v4236_v46, 0.0  ;;  %v4169_v50 = vmul.f32 %v11095_v29, %v3853_v51 }
 0x561   :  { %4365 = vst.msk [vmem:[#allocation2 + $0x21] sm:$0xff] %vm85_vm0, %v4301_v49  ;;  %v4239_v54 = vadd.f32 %v11099_v34, %v4170_v47 }
 0x562   :  { %4364 = vst.msk [vmem:[#allocation2 + $0x19] sm:$0xff] %vm85_vm0, %v4300_v40  ;;  %v4238_v52 = vadd.f32 %v11099_v34, %v4169_v50  ;;  %v8980_v57 = vpop.f32.mrb[4].mxu0 }
 0x563   :  { %v4303_v27 = vmax.f32 %v4239_v54, 0.0  ;;  %v4172_v55 = vmul.f32 %v8980_v57, %v11095_v29  ;;  %v3863_v8 = vpop.f32.mrb[5].mxu0 }
 0x564   :  { %v4302_v58 = vmax.f32 %v4238_v52, 0.0  ;;  %v4171_v62 = vmul.f32 %v11095_v29, %v3863_v8 }
 0x565   :  { %4367 = vst.msk [vmem:[#allocation2 + $0x39] sm:$0xff] %vm85_vm0, %v4303_v27  ;;  %v4241_v56 = vadd.f32 %v11099_v34, %v4172_v55 }
 0x566   :  { %4366 = vst.msk [vmem:[#allocation2 + $0x31] sm:$0xff] %vm85_vm0, %v4302_v58  ;;  %v4240_v1 = vadd.f32 %v11099_v34, %v4171_v62  ;;  %v8983_v63 = vpop.f32.mrb[6].mxu0 }
 0x567   :  { %v4305_v5 = vmax.f32 %v4241_v56, 0.0  ;;  %v4174_v2 = vmul.f32 %v8983_v63, %v11095_v29  ;;  %v3873_v9 = vpop.f32.mrb[7].mxu0 }
 0x568   :  { %v4304_v6 = vmax.f32 %v4240_v1, 0.0  ;;  %v4173_v14 = vmul.f32 %v11095_v29, %v3873_v9  ;;  %v4559_v11 = vld [vmem:[#allocation2 + $0x21] sm:$0xff] }
 0x569   :  { %4369 = vst.msk [vmem:[#allocation2 + $0x51] sm:$0xff] %vm85_vm0, %v4305_v5  ;;  %v4243_v21 = vadd.f32 %v11099_v34, %v4174_v2  ;;  %4690 = vrot.lane.b32.xlu1 %v4559_v11, %s9358_s4  ;;  %v4558_v15 = vld [vmem:[#allocation2 + $0x19] sm:$0xff] }
 0x56a   :  { %v11125_v31 = vld [vmem:[#allocation2 + $0x20] sm:$0xff]  ;;  %v11127_v22 = vld [vmem:[#allocation2 + $0x18] sm:$0xff]  ;;  %4368 = vst.msk [vmem:[#allocation2 + $0x49] sm:$0xff] %vm85_vm0, %v4304_v6  ;;  %v4242_v45 = vadd.f32 %v11099_v34, %v4173_v14  ;;  %4688 = vrot.lane.b32.xlu0 %v4558_v15, %s9358_s4  ;;  %v8986_v32 = vpop.f32.mrb[8].mxu0 }
 0x56b   :  { %4495 = vst.msk [vmem:[#allocation3 + $0x18] sm:$0xff] %vm85_vm0, %v11125_v31  ;;  %4494 = vst.msk [vmem:[#allocation3 + $0x10] sm:$0xff] %vm85_vm0, %v11127_v22  ;;  %v4307_v59 = vmax.f32 %v4243_v21, 0.0  ;;  %v4176_v48 = vmul.f32 %v8986_v32, %v11095_v29  ;;  %v3883_v3 = vpop.f32.mrb[9].mxu0 }
 0x56c   :  { %v4306_v60 = vmax.f32 %v4242_v45, 0.0  ;;  %v4175_v12 = vmul.f32 %v11095_v29, %v3883_v3  ;;  %v4561_v4 = vld [vmem:[#allocation2 + $0x39] sm:$0xff] }
 0x56d   :  { %4371 = vst.msk [vmem:[#allocation2 + $0x69] sm:$0xff] %vm85_vm0, %v4307_v59  ;;  %v4245_v0 = vadd.f32 %v11099_v34, %v4176_v48  ;;  %4694 = vrot.lane.b32.xlu1 %v4561_v4, %s9358_s4  ;;  %v4560_v25 = vld [vmem:[#allocation2 + $0x31] sm:$0xff] }
 0x56e   :  { %v11141_v17 = vld [vmem:[#allocation2 + $0x38] sm:$0xff]  ;;  %v11143_v13 = vld [vmem:[#allocation2 + $0x30] sm:$0xff]  ;;  %4370 = vst.msk [vmem:[#allocation2 + $0x61] sm:$0xff] %vm85_vm0, %v4306_v60  ;;  %v4244_v37 = vadd.f32 %v11099_v34, %v4175_v12  ;;  %4692 = vrot.lane.b32.xlu0 %v4560_v25, %s9358_s4  ;;  %v8989_v53 = vpop.f32.mrb[10].mxu0 }
 0x56f   :  { %4497 = vst.msk [vmem:[#allocation3 + $0x28] sm:$0xff] %vm85_vm0, %v11141_v17  ;;  %4496 = vst.msk [vmem:[#allocation3 + $0x20] sm:$0xff] %vm85_vm0, %v11143_v13  ;;  %v4309_v7 = vmax.f32 %v4245_v0, 0.0  ;;  %v4178_v61 = vmul.f32 %v8989_v53, %v11095_v29  ;;  %v3893_v10 = vpop.f32.mrb[11].mxu0 }
 0x570   :  { %v4308_v18 = vmax.f32 %v4244_v37, 0.0  ;;  %v4177_v19 = vmul.f32 %v11095_v29, %v3893_v10  ;;  %v4563_v16 = vld [vmem:[#allocation2 + $0x51] sm:$0xff] }
 0x571   :  { %4373 = vst.msk [vmem:[#allocation2 + $0x81] sm:$0xff] %vm85_vm0, %v4309_v7  ;;  %v4247_v23 = vadd.f32 %v11099_v34, %v4178_v61  ;;  %4698 = vrot.lane.b32.xlu1 %v4563_v16, %s9358_s4  ;;  %v4562_v20 = vld [vmem:[#allocation2 + $0x49] sm:$0xff] }
 0x572   :  { %v11157_v26 = vld [vmem:[#allocation2 + $0x50] sm:$0xff]  ;;  %v11159_v24 = vld [vmem:[#allocation2 + $0x48] sm:$0xff]  ;;  %4372 = vst.msk [vmem:[#allocation2 + $0x79] sm:$0xff] %vm85_vm0, %v4308_v18  ;;  %v4246_v28 = vadd.f32 %v11099_v34, %v4177_v19  ;;  %4696 = vrot.lane.b32.xlu0 %v4562_v20, %s9358_s4  ;;  %v8992_v33 = vpop.f32.mrb[12].mxu0 }
 0x573   :  { %4499 = vst.msk [vmem:[#allocation3 + $0x38] sm:$0xff] %vm85_vm0, %v11157_v26  ;;  %4498 = vst.msk [vmem:[#allocation3 + $0x30] sm:$0xff] %vm85_vm0, %v11159_v24  ;;  %v4311_v30 = vmax.f32 %v4247_v23, 0.0  ;;  %v4180_v35 = vmul.f32 %v8992_v33, %v11095_v29  ;;  %v3903_v38 = vpop.f32.mrb[13].mxu0 }
 0x574   :  { %v4310_v36 = vmax.f32 %v4246_v28, 0.0  ;;  %v4179_v41 = vmul.f32 %v11095_v29, %v3903_v38  ;;  %v4565_v39 = vld [vmem:[#allocation2 + $0x69] sm:$0xff] }
 0x575   :  { %4375 = vst.msk [vmem:[#allocation2 + $0x99] sm:$0xff] %vm85_vm0, %v4311_v30  ;;  %v4249_v43 = vadd.f32 %v11099_v34, %v4180_v35  ;;  %4702 = vrot.lane.b32.xlu1 %v4565_v39, %s9358_s4  ;;  %v4564_v42 = vld [vmem:[#allocation2 + $0x61] sm:$0xff] }
 0x576   :  { %v11173_v46 = vld [vmem:[#allocation2 + $0x68] sm:$0xff]  ;;  %v11175_v44 = vld [vmem:[#allocation2 + $0x60] sm:$0xff]  ;;  %4374 = vst.msk [vmem:[#allocation2 + $0x91] sm:$0xff] %vm85_vm0, %v4310_v36  ;;  %v4248_v49 = vadd.f32 %v11099_v34, %v4179_v41  ;;  %4700 = vrot.lane.b32.xlu0 %v4564_v42, %s9358_s4  ;;  %v8995_v47 = vpop.f32.mrb[14].mxu0 }
 0x577   :  { %4501 = vst.msk [vmem:[#allocation3 + $0x48] sm:$0xff] %vm85_vm0, %v11173_v46  ;;  %4500 = vst.msk [vmem:[#allocation3 + $0x40] sm:$0xff] %vm85_vm0, %v11175_v44  ;;  %v4313_v51 = vmax.f32 %v4249_v43, 0.0  ;;  %v4182_v40 = vmul.f32 %v8995_v47, %v11095_v29  ;;  %v3913_v50 = vpop.f32.mrb[15].mxu0 }
 0x578   :  { %v4312_v54 = vmax.f32 %v4248_v49, 0.0  ;;  %v4181_v52 = vmul.f32 %v11095_v29, %v3913_v50  ;;  %v4567_v57 = vld [vmem:[#allocation2 + $0x81] sm:$0xff] }
 0x579   :  { %4377 = vst.msk [vmem:[#allocation2 + $0xb1] sm:$0xff] %vm85_vm0, %v4313_v51  ;;  %v4251_v27 = vadd.f32 %v11099_v34, %v4182_v40  ;;  %4706 = vrot.lane.b32.xlu1 %v4567_v57, %s9358_s4  ;;  %v4566_v55 = vld [vmem:[#allocation2 + $0x79] sm:$0xff] }
 0x57a   :  { %v11189_v8 = vld [vmem:[#allocation2 + $0x80] sm:$0xff]  ;;  %v11191_v58 = vld [vmem:[#allocation2 + $0x78] sm:$0xff]  ;;  %4376 = vst.msk [vmem:[#allocation2 + $0xa9] sm:$0xff] %vm85_vm0, %v4312_v54  ;;  %v4250_v62 = vadd.f32 %v11099_v34, %v4181_v52  ;;  %4704 = vrot.lane.b32.xlu0 %v4566_v55, %s9358_s4  ;;  %v8998_v56 = vpop.f32.mrb[16].mxu0 }
 0x57b   :  { %4503 = vst.msk [vmem:[#allocation3 + $0x58] sm:$0xff] %vm85_vm0, %v11189_v8  ;;  %4502 = vst.msk [vmem:[#allocation3 + $0x50] sm:$0xff] %vm85_vm0, %v11191_v58  ;;  %v4315_v1 = vmax.f32 %v4251_v27, 0.0  ;;  %v4184_v63 = vmul.f32 %v8998_v56, %v11095_v29  ;;  %v3923_v5 = vpop.f32.mrb[17].mxu0 }
 0x57c   :  { %v4314_v2 = vmax.f32 %v4250_v62, 0.0  ;;  %v4183_v9 = vmul.f32 %v11095_v29, %v3923_v5  ;;  %v4569_v6 = vld [vmem:[#allocation2 + $0x99] sm:$0xff] }
 0x57d   :  { %4379 = vst.msk [vmem:[#allocation2 + $0xc9] sm:$0xff] %vm85_vm0, %v4315_v1  ;;  %v4253_v14 = vadd.f32 %v11099_v34, %v4184_v63  ;;  %4710 = vrot.lane.b32.xlu1 %v4569_v6, %s9358_s4  ;;  %v4568_v11 = vld [vmem:[#allocation2 + $0x91] sm:$0xff] }
 0x57e   :  { %v11205_v21 = vld [vmem:[#allocation2 + $0x98] sm:$0xff]  ;;  %v11207_v15 = vld [vmem:[#allocation2 + $0x90] sm:$0xff]  ;;  %4378 = vst.msk [vmem:[#allocation2 + $0xc1] sm:$0xff] %vm85_vm0, %v4314_v2  ;;  %v4252_v45 = vadd.f32 %v11099_v34, %v4183_v9  ;;  %4708 = vrot.lane.b32.xlu0 %v4568_v11, %s9358_s4  ;;  %v9001_v32 = vpop.f32.mrb[18].mxu0 }
 0x57f   :  { %4505 = vst.msk [vmem:[#allocation3 + $0x68] sm:$0xff] %vm85_vm0, %v11205_v21  ;;  %4504 = vst.msk [vmem:[#allocation3 + $0x60] sm:$0xff] %vm85_vm0, %v11207_v15  ;;  %v4317_v59 = vmax.f32 %v4253_v14, 0.0  ;;  %v4186_v48 = vmul.f32 %v9001_v32, %v11095_v29  ;;  %v3933_v3 = vpop.f32.mrb[19].mxu0 }
 0x580   :  { %v4316_v60 = vmax.f32 %v4252_v45, 0.0  ;;  %v4185_v12 = vmul.f32 %v11095_v29, %v3933_v3  ;;  %v4571_v4 = vld [vmem:[#allocation2 + $0xb1] sm:$0xff] }
 0x581   :  { %4381 = vst.msk [vmem:[#allocation2 + $0xe1] sm:$0xff] %vm85_vm0, %v4317_v59  ;;  %v4255_v0 = vadd.f32 %v11099_v34, %v4186_v48  ;;  %4714 = vrot.lane.b32.xlu1 %v4571_v4, %s9358_s4  ;;  %v4570_v25 = vld [vmem:[#allocation2 + $0xa9] sm:$0xff] }
 0x582   :  { %v11221_v37 = vld [vmem:[#allocation2 + $0xb0] sm:$0xff]  ;;  %v11223_v53 = vld [vmem:[#allocation2 + $0xa8] sm:$0xff]  ;;  %4380 = vst.msk [vmem:[#allocation2 + $0xd9] sm:$0xff] %vm85_vm0, %v4316_v60  ;;  %v4254_v7 = vadd.f32 %v11099_v34, %v4185_v12  ;;  %4712 = vrot.lane.b32.xlu0 %v4570_v25, %s9358_s4  ;;  %v9004_v61 = vpop.f32.mrb[20].mxu0 }
 0x583   :  { %4507 = vst.msk [vmem:[#allocation3 + $0x78] sm:$0xff] %vm85_vm0, %v11221_v37  ;;  %4506 = vst.msk [vmem:[#allocation3 + $0x70] sm:$0xff] %vm85_vm0, %v11223_v53  ;;  %v4319_v10 = vmax.f32 %v4255_v0, 0.0  ;;  %v4188_v18 = vmul.f32 %v9004_v61, %v11095_v29  ;;  %v3943_v19 = vpop.f32.mrb[21].mxu0 }
 0x584   :  { %v4318_v16 = vmax.f32 %v4254_v7, 0.0  ;;  %v4187_v23 = vmul.f32 %v11095_v29, %v3943_v19  ;;  %v4573_v20 = vld [vmem:[#allocation2 + $0xc9] sm:$0xff] }
 0x585   :  { %4383 = vst.msk [vmem:[#allocation2 + $0xf9] sm:$0xff] %vm85_vm0, %v4319_v10  ;;  %v4257_v28 = vadd.f32 %v11099_v34, %v4188_v18  ;;  %4718 = vrot.lane.b32.xlu1 %v4573_v20, %s9358_s4  ;;  %v4572_v33 = vld [vmem:[#allocation2 + $0xc1] sm:$0xff] }
 0x586   :  { %v11237_v30 = vld [vmem:[#allocation2 + $0xc8] sm:$0xff]  ;;  %v11239_v35 = vld [vmem:[#allocation2 + $0xc0] sm:$0xff]  ;;  %4382 = vst.msk [vmem:[#allocation2 + $0xf1] sm:$0xff] %vm85_vm0, %v4318_v16  ;;  %v4256_v38 = vadd.f32 %v11099_v34, %v4187_v23  ;;  %4716 = vrot.lane.b32.xlu0 %v4572_v33, %s9358_s4  ;;  %v9007_v36 = vpop.f32.mrb[22].mxu0 }
 0x587   :  { %4509 = vst.msk [vmem:[#allocation3 + $0x88] sm:$0xff] %vm85_vm0, %v11237_v30  ;;  %4508 = vst.msk [vmem:[#allocation3 + $0x80] sm:$0xff] %vm85_vm0, %v11239_v35  ;;  %v4321_v41 = vmax.f32 %v4257_v28, 0.0  ;;  %v4190_v39 = vmul.f32 %v9007_v36, %v11095_v29  ;;  %v3953_v43 = vpop.f32.mrb[23].mxu0 }
 0x588   :  { %v4320_v42 = vmax.f32 %v4256_v38, 0.0  ;;  %v4189_v49 = vmul.f32 %v11095_v29, %v3953_v43  ;;  %v4575_v47 = vld [vmem:[#allocation2 + $0xe1] sm:$0xff]  ;;  %v4461_v43 = vld [vmem:[#allocation2 + $0x1b8] sm:$0xff] }
 0x589   :  { %4385 = vst.msk [vmem:[#allocation2 + $0x111] sm:$0xff] %vm85_vm0, %v4321_v41  ;;  %v4259_v51 = vadd.f32 %v11099_v34, %v4190_v39  ;;  %4722 = vrot.lane.b32.xlu1 %v4575_v47, %s9358_s4  ;;  %v4574_v40 = vld [vmem:[#allocation2 + $0xd9] sm:$0xff]  ;;  %4525 = vst.msk [vmem:[#allocation3 + $0x108] sm:$0xff] %vm85_vm0, %v4461_v43 }
 0x58a   :  { %v11253_v50 = vld [vmem:[#allocation2 + $0xe0] sm:$0xff]  ;;  %v11255_v54 = vld [vmem:[#allocation2 + $0xd8] sm:$0xff]  ;;  %4384 = vst.msk [vmem:[#allocation2 + $0x109] sm:$0xff] %vm85_vm0, %v4320_v42  ;;  %v4258_v52 = vadd.f32 %v11099_v34, %v4189_v49  ;;  %4720 = vrot.lane.b32.xlu0 %v4574_v40, %s9358_s4  ;;  %v9010_v57 = vpop.f32.mrb[24].mxu0 }
 0x58b   :  { %4511 = vst.msk [vmem:[#allocation3 + $0x98] sm:$0xff] %vm85_vm0, %v11253_v50  ;;  %4510 = vst.msk [vmem:[#allocation3 + $0x90] sm:$0xff] %vm85_vm0, %v11255_v54  ;;  %v4323_v27 = vmax.f32 %v4259_v51, 0.0  ;;  %v4192_v55 = vmul.f32 %v9010_v57, %v11095_v29  ;;  %v3963_v62 = vpop.f32.mrb[25].mxu0  ;;  %v4460_v57 = vld [vmem:[#allocation2 + $0x1b0] sm:$0xff]  ;;  %v4589_v43 = vld [vmem:[#allocation2 + $0x1b9] sm:$0xff] }
 0x58c   :  { %v4322_v56 = vmax.f32 %v4258_v52, 0.0  ;;  %v4191_v1 = vmul.f32 %v11095_v29, %v3963_v62  ;;  %v4577_v63 = vld [vmem:[#allocation2 + $0xf9] sm:$0xff]  ;;  %4524 = vst.msk [vmem:[#allocation3 + $0x100] sm:$0xff] %vm85_vm0, %v4460_v57 }
 0x58d   :  { %4387 = vst.msk [vmem:[#allocation2 + $0x129] sm:$0xff] %vm85_vm0, %v4323_v27  ;;  %v4261_v5 = vadd.f32 %v11099_v34, %v4192_v55  ;;  %4726 = vrot.lane.b32.xlu1 %v4577_v63, %s9358_s4  ;;  %v4576_v2 = vld [vmem:[#allocation2 + $0xf1] sm:$0xff] }
 0x58e   :  { %v11269_v9 = vld [vmem:[#allocation2 + $0xf8] sm:$0xff]  ;;  %v11271_v6 = vld [vmem:[#allocation2 + $0xf0] sm:$0xff]  ;;  %4386 = vst.msk [vmem:[#allocation2 + $0x121] sm:$0xff] %vm85_vm0, %v4322_v56  ;;  %v4260_v14 = vadd.f32 %v11099_v34, %v4191_v1  ;;  %4724 = vrot.lane.b32.xlu0 %v4576_v2, %s9358_s4  ;;  %v9013_v11 = vpop.f32.mrb[26].mxu0 }
 0x58f   :  { %4513 = vst.msk [vmem:[#allocation3 + $0xa8] sm:$0xff] %vm85_vm0, %v11269_v9  ;;  %4512 = vst.msk [vmem:[#allocation3 + $0xa0] sm:$0xff] %vm85_vm0, %v11271_v6  ;;  %v4325_v45 = vmax.f32 %v4261_v5, 0.0  ;;  %v4194_v32 = vmul.f32 %v9013_v11, %v11095_v29  ;;  %v3973_v59 = vpop.f32.mrb[27].mxu0 }
 0x590   :  { %v4324_v48 = vmax.f32 %v4260_v14, 0.0  ;;  %v4193_v3 = vmul.f32 %v11095_v29, %v3973_v59  ;;  %v4579_v60 = vld [vmem:[#allocation2 + $0x111] sm:$0xff] }
 0x591   :  { %4389 = vst.msk [vmem:[#allocation2 + $0x141] sm:$0xff] %vm85_vm0, %v4325_v45  ;;  %v4263_v12 = vadd.f32 %v11099_v34, %v4194_v32  ;;  %4730 = vrot.lane.b32.xlu1 %v4579_v60, %s9358_s4  ;;  %v4578_v4 = vld [vmem:[#allocation2 + $0x109] sm:$0xff] }
 0x592   :  { %v11285_v0 = vld [vmem:[#allocation2 + $0x110] sm:$0xff]  ;;  %v11287_v25 = vld [vmem:[#allocation2 + $0x108] sm:$0xff]  ;;  %4388 = vst.msk [vmem:[#allocation2 + $0x139] sm:$0xff] %vm85_vm0, %v4324_v48  ;;  %v4262_v7 = vadd.f32 %v11099_v34, %v4193_v3  ;;  %4728 = vrot.lane.b32.xlu0 %v4578_v4, %s9358_s4  ;;  %v9016_v61 = vpop.f32.mrb[28].mxu0 }
 0x593   :  { %4515 = vst.msk [vmem:[#allocation3 + $0xb8] sm:$0xff] %vm85_vm0, %v11285_v0  ;;  %4514 = vst.msk [vmem:[#allocation3 + $0xb0] sm:$0xff] %vm85_vm0, %v11287_v25  ;;  %v4327_v10 = vmax.f32 %v4263_v12, 0.0  ;;  %v4196_v18 = vmul.f32 %v9016_v61, %v11095_v29  ;;  %v3983_v19 = vpop.f32.mrb[29].mxu0 }
 0x594   :  { %v4326_v16 = vmax.f32 %v4262_v7, 0.0  ;;  %v4195_v23 = vmul.f32 %v11095_v29, %v3983_v19  ;;  %v4581_v20 = vld [vmem:[#allocation2 + $0x129] sm:$0xff] }
 0x595   :  { %4391 = vst.msk [vmem:[#allocation2 + $0x159] sm:$0xff] %vm85_vm0, %v4327_v10  ;;  %v4265_v28 = vadd.f32 %v11099_v34, %v4196_v18  ;;  %4734 = vrot.lane.b32.xlu1 %v4581_v20, %s9358_s4  ;;  %v4580_v33 = vld [vmem:[#allocation2 + $0x121] sm:$0xff] }
 0x596   :  { %v11301_v38 = vld [vmem:[#allocation2 + $0x128] sm:$0xff]  ;;  %v11303_v36 = vld [vmem:[#allocation2 + $0x120] sm:$0xff]  ;;  %4390 = vst.msk [vmem:[#allocation2 + $0x151] sm:$0xff] %vm85_vm0, %v4326_v16  ;;  %v4264_v41 = vadd.f32 %v11099_v34, %v4195_v23  ;;  %4732 = vrot.lane.b32.xlu0 %v4580_v33, %s9358_s4  ;;  %v9019_v39 = vpop.f32.mrb[30].mxu0 }
 0x597   :  { %4517 = vst.msk [vmem:[#allocation3 + $0xc8] sm:$0xff] %vm85_vm0, %v11301_v38  ;;  %4516 = vst.msk [vmem:[#allocation3 + $0xc0] sm:$0xff] %vm85_vm0, %v11303_v36  ;;  %v4329_v42 = vmax.f32 %v4265_v28, 0.0  ;;  %v4198_v49 = vmul.f32 %v9019_v39, %v11095_v29  ;;  %v3993_v47 = vpop.f32.mrb[31].mxu0 }
 0x598   :  { %v4328_v51 = vmax.f32 %v4264_v41, 0.0  ;;  %v4197_v40 = vmul.f32 %v11095_v29, %v3993_v47  ;;  %v4583_v52 = vld [vmem:[#allocation2 + $0x141] sm:$0xff] }
 0x599   :  { %4393 = vst.msk [vmem:[#allocation2 + $0x171] sm:$0xff] %vm85_vm0, %v4329_v42  ;;  %v4267_v27 = vadd.f32 %v11099_v34, %v4198_v49  ;;  %4738 = vrot.lane.b32.xlu1 %v4583_v52, %s9358_s4  ;;  %v4582_v55 = vld [vmem:[#allocation2 + $0x139] sm:$0xff] }
 0x59a   :  { %v11318_v62 = vld [vmem:[#allocation2 + $0x140] sm:$0xff]  ;;  %v11320_v56 = vld [vmem:[#allocation2 + $0x138] sm:$0xff]  ;;  %4392 = vst.msk [vmem:[#allocation2 + $0x169] sm:$0xff] %vm85_vm0, %v4328_v51  ;;  %v4266_v1 = vadd.f32 %v11099_v34, %v4197_v40  ;;  %4736 = vrot.lane.b32.xlu0 %v4582_v55, %s9358_s4  ;;  %v9022_v63 = vpop.f32.mrb[32].mxu0 }
 0x59b   :  { %4519 = vst.msk [vmem:[#allocation3 + $0xd8] sm:$0xff] %vm85_vm0, %v11318_v62  ;;  %4518 = vst.msk [vmem:[#allocation3 + $0xd0] sm:$0xff] %vm85_vm0, %v11320_v56  ;;  %v4331_v5 = vmax.f32 %v4267_v27, 0.0  ;;  %v4200_v2 = vmul.f32 %v9022_v63, %v11095_v29  ;;  %v4003_v14 = vpop.f32.mrb[33].mxu0  ;;  %v4588_v51 = vld [vmem:[#allocation2 + $0x1b1] sm:$0xff] }
 0x59c   :  { %v4330_v11 = vmax.f32 %v4266_v1, 0.0  ;;  %v4199_v45 = vmul.f32 %v11095_v29, %v4003_v14  ;;  %v4585_v32 = vld [vmem:[#allocation2 + $0x159] sm:$0xff] }
 0x59d   :  { %4395 = vst.msk [vmem:[#allocation2 + $0x189] sm:$0xff] %vm85_vm0, %v4331_v5  ;;  %v4269_v59 = vadd.f32 %v11099_v34, %v4200_v2  ;;  %4742 = vrot.lane.b32.xlu1 %v4585_v32, %s9358_s4  ;;  %v4584_v48 = vld [vmem:[#allocation2 + $0x151] sm:$0xff] }
 0x59e   :  { %v11335_v3 = vld [vmem:[#allocation2 + $0x158] sm:$0xff]  ;;  %v11337_v60 = vld [vmem:[#allocation2 + $0x150] sm:$0xff]  ;;  %4394 = vst.msk [vmem:[#allocation2 + $0x181] sm:$0xff] %vm85_vm0, %v4330_v11  ;;  %v4268_v12 = vadd.f32 %v11099_v34, %v4199_v45  ;;  %4740 = vrot.lane.b32.xlu0 %v4584_v48, %s9358_s4  ;;  %v9025_v4 = vpop.f32.mrb[34].mxu0 }
 0x59f   :  { %4521 = vst.msk [vmem:[#allocation3 + $0xe8] sm:$0xff] %vm85_vm0, %v11335_v3  ;;  %4520 = vst.msk [vmem:[#allocation3 + $0xe0] sm:$0xff] %vm85_vm0, %v11337_v60  ;;  %v4333_v7 = vmax.f32 %v4269_v59, 0.0  ;;  %v4202_v61 = vmul.f32 %v9025_v4, %v11095_v29  ;;  %v4013_v10 = vpop.f32.mrb[35].mxu0 }
 0x5a0   :  { %v4332_v18 = vmax.f32 %v4268_v12, 0.0  ;;  %v4201_v19 = vmul.f32 %v11095_v29, %v4013_v10  ;;  %v4587_v16 = vld [vmem:[#allocation2 + $0x171] sm:$0xff] }
 0x5a1   :  { %4397 = vst.msk [vmem:[#allocation2 + $0x1d1] sm:$0xff] %vm85_vm0, %v4333_v7  ;;  %v4271_v23 = vadd.f32 %v11099_v34, %v4202_v61  ;;  %4746 = vrot.lane.b32.xlu1 %v4587_v16, %s9358_s4  ;;  %v4586_v20 = vld [vmem:[#allocation2 + $0x169] sm:$0xff] }
 0x5a2   :  { %v11351_v28 = vld [vmem:[#allocation2 + $0x170] sm:$0xff]  ;;  %v11353_v33 = vld [vmem:[#allocation2 + $0x168] sm:$0xff]  ;;  %4396 = vst.msk [vmem:[#allocation2 + $0x1c9] sm:$0xff] %vm85_vm0, %v4332_v18  ;;  %v4270_v41 = vadd.f32 %v11099_v34, %v4201_v19  ;;  %4744 = vrot.lane.b32.xlu0 %v4586_v20, %s9358_s4  ;;  %v9028_v39 = vpop.f32.mrb[36].mxu0 }
 0x5a3   :  { %4523 = vst.msk [vmem:[#allocation3 + $0xf8] sm:$0xff] %vm85_vm0, %v11351_v28  ;;  %4522 = vst.msk [vmem:[#allocation3 + $0xf0] sm:$0xff] %vm85_vm0, %v11353_v33  ;;  %v4335_v42 = vmax.f32 %v4271_v23, 0.0  ;;  %v4204_v49 = vmul.f32 %v9028_v39, %v11095_v29  ;;  %v4023_v47 = vpop.f32.mrb[37].mxu0 }
 0x5a4   :  { %v4334_v40 = vmax.f32 %v4270_v41, 0.0  ;;  %v4203_v52 = vmul.f32 %v11095_v29, %v4023_v47 }
 0x5a5   :  { %4399 = vst.msk [vmem:[#allocation2 + $0x1e9] sm:$0xff] %vm85_vm0, %v4335_v42  ;;  %v4273_v57 = vadd.f32 %v11099_v34, %v4204_v49  ;;  %4750 = vrot.lane.b32.xlu1 %v4589_v43, %s9358_s4 }
 0x5a6   :  { %4398 = vst.msk [vmem:[#allocation2 + $0x1e1] sm:$0xff] %vm85_vm0, %v4334_v40  ;;  %v4272_v27 = vadd.f32 %v11099_v34, %v4203_v52  ;;  %4748 = vrot.lane.b32.xlu0 %v4588_v51, %s9358_s4  ;;  %v9031_v55 = vpop.f32.mrb[38].mxu0 }
 0x5a7   :  { %v4337_v1 = vmax.f32 %v4273_v57, 0.0  ;;  %v4206_v63 = vmul.f32 %v9031_v55, %v11095_v29  ;;  %v4033_v5 = vpop.f32.mrb[39].mxu0 }
 0x5a8   :  { %v4336_v2 = vmax.f32 %v4272_v27, 0.0  ;;  %v4205_v14 = vmul.f32 %v11095_v29, %v4033_v5  ;;  %v4591_v11 = vld [vmem:[#allocation2 + $0x1d1] sm:$0xff] }
 0x5a9   :  { %4401 = vst.msk [vmem:[#allocation2 + $0x201] sm:$0xff] %vm85_vm0, %v4337_v1  ;;  %v4275_v45 = vadd.f32 %v11099_v34, %v4206_v63  ;;  %4754 = vrot.lane.b32.xlu1 %v4591_v11, %s9358_s4  ;;  %v4590_v32 = vld [vmem:[#allocation2 + $0x1c9] sm:$0xff] }
 0x5aa   :  { %v11375_v59 = vld [vmem:[#allocation2 + $0x1d0] sm:$0xff]  ;;  %v11377_v48 = vld [vmem:[#allocation2 + $0x1c8] sm:$0xff]  ;;  %4400 = vst.msk [vmem:[#allocation2 + $0x1f9] sm:$0xff] %vm85_vm0, %v4336_v2  ;;  %v4274_v12 = vadd.f32 %v11099_v34, %v4205_v14  ;;  %4752 = vrot.lane.b32.xlu0 %v4590_v32, %s9358_s4  ;;  %v9034_v4 = vpop.f32.mrb[40].mxu0 }
 0x5ab   :  { %4527 = vst.msk [vmem:[#allocation3 + $0x118] sm:$0xff] %vm85_vm0, %v11375_v59  ;;  %4526 = vst.msk [vmem:[#allocation3 + $0x110] sm:$0xff] %vm85_vm0, %v11377_v48  ;;  %v4339_v7 = vmax.f32 %v4275_v45, 0.0  ;;  %v4208_v61 = vmul.f32 %v9034_v4, %v11095_v29  ;;  %v4043_v10 = vpop.f32.mrb[41].mxu0 }
 0x5ac   :  { %v4338_v18 = vmax.f32 %v4274_v12, 0.0  ;;  %v4207_v19 = vmul.f32 %v11095_v29, %v4043_v10  ;;  %v4593_v16 = vld [vmem:[#allocation2 + $0x1e9] sm:$0xff] }
 0x5ad   :  { %4403 = vst.msk [vmem:[#allocation2 + $0x219] sm:$0xff] %vm85_vm0, %v4339_v7  ;;  %v4277_v23 = vadd.f32 %v11099_v34, %v4208_v61  ;;  %4758 = vrot.lane.b32.xlu1 %v4593_v16, %s9358_s4  ;;  %v4592_v20 = vld [vmem:[#allocation2 + $0x1e1] sm:$0xff] }
 0x5ae   :  { %v11391_v41 = vld [vmem:[#allocation2 + $0x1e8] sm:$0xff]  ;;  %v11393_v39 = vld [vmem:[#allocation2 + $0x1e0] sm:$0xff]  ;;  %4402 = vst.msk [vmem:[#allocation2 + $0x211] sm:$0xff] %vm85_vm0, %v4338_v18  ;;  %v4276_v43 = vadd.f32 %v11099_v34, %v4207_v19  ;;  %4756 = vrot.lane.b32.xlu0 %v4592_v20, %s9358_s4  ;;  %v9037_v42 = vpop.f32.mrb[42].mxu0 }
 0x5af   :  { %4529 = vst.msk [vmem:[#allocation3 + $0x128] sm:$0xff] %vm85_vm0, %v11391_v41  ;;  %4528 = vst.msk [vmem:[#allocation3 + $0x120] sm:$0xff] %vm85_vm0, %v11393_v39  ;;  %v4341_v49 = vmax.f32 %v4277_v23, 0.0  ;;  %v4210_v47 = vmul.f32 %v9037_v42, %v11095_v29  ;;  %v4053_v51 = vpop.f32.mrb[43].mxu0 }
 0x5b0   :  { %v4340_v40 = vmax.f32 %v4276_v43, 0.0  ;;  %v4209_v52 = vmul.f32 %v11095_v29, %v4053_v51  ;;  %v4595_v57 = vld [vmem:[#allocation2 + $0x201] sm:$0xff] }
 0x5b1   :  { %4405 = vst.msk [vmem:[#allocation2 + $0x231] sm:$0xff] %vm85_vm0, %v4341_v49  ;;  %v4279_v27 = vadd.f32 %v11099_v34, %v4210_v47  ;;  %4762 = vrot.lane.b32.xlu1 %v4595_v57, %s9358_s4  ;;  %v4594_v55 = vld [vmem:[#allocation2 + $0x1f9] sm:$0xff] }
 0x5b2   :  { %v11407_v1 = vld [vmem:[#allocation2 + $0x200] sm:$0xff]  ;;  %v11409_v63 = vld [vmem:[#allocation2 + $0x1f8] sm:$0xff]  ;;  %4404 = vst.msk [vmem:[#allocation2 + $0x229] sm:$0xff] %vm85_vm0, %v4340_v40  ;;  %v4278_v5 = vadd.f32 %v11099_v34, %v4209_v52  ;;  %4760 = vrot.lane.b32.xlu0 %v4594_v55, %s9358_s4  ;;  %v9040_v2 = vpop.f32.mrb[44].mxu0 }
 0x5b3   :  { %4531 = vst.msk [vmem:[#allocation3 + $0x138] sm:$0xff] %vm85_vm0, %v11407_v1  ;;  %4530 = vst.msk [vmem:[#allocation3 + $0x130] sm:$0xff] %vm85_vm0, %v11409_v63  ;;  %v4343_v14 = vmax.f32 %v4279_v27, 0.0  ;;  %v4212_v11 = vmul.f32 %v9040_v2, %v11095_v29  ;;  %v4063_v45 = vpop.f32.mrb[45].mxu0 }
 0x5b4   :  { %v4342_v32 = vmax.f32 %v4278_v5, 0.0  ;;  %v4211_v12 = vmul.f32 %v11095_v29, %v4063_v45  ;;  %v4597_v4 = vld [vmem:[#allocation2 + $0x219] sm:$0xff] }
 0x5b5   :  { %4407 = vst.msk [vmem:[#allocation2 + $0x249] sm:$0xff] %vm85_vm0, %v4343_v14  ;;  %v4281_v7 = vadd.f32 %v11099_v34, %v4212_v11  ;;  %4766 = vrot.lane.b32.xlu1 %v4597_v4, %s9358_s4  ;;  %v4596_v61 = vld [vmem:[#allocation2 + $0x211] sm:$0xff] }
 0x5b6   :  { %v11423_v10 = vld [vmem:[#allocation2 + $0x218] sm:$0xff]  ;;  %v11425_v18 = vld [vmem:[#allocation2 + $0x210] sm:$0xff]  ;;  %4406 = vst.msk [vmem:[#allocation2 + $0x241] sm:$0xff] %vm85_vm0, %v4342_v32  ;;  %v4280_v19 = vadd.f32 %v11099_v34, %v4211_v12  ;;  %4764 = vrot.lane.b32.xlu0 %v4596_v61, %s9358_s4  ;;  %v9043_v16 = vpop.f32.mrb[46].mxu0 }
 0x5b7   :  { %4533 = vst.msk [vmem:[#allocation3 + $0x148] sm:$0xff] %vm85_vm0, %v11423_v10  ;;  %4532 = vst.msk [vmem:[#allocation3 + $0x140] sm:$0xff] %vm85_vm0, %v11425_v18  ;;  %v4345_v23 = vmax.f32 %v4281_v7, 0.0  ;;  %v4214_v20 = vmul.f32 %v9043_v16, %v11095_v29  ;;  %v4073_v43 = vpop.f32.mrb[47].mxu0 }
 0x5b8   :  { %v4344_v42 = vmax.f32 %v4280_v19, 0.0  ;;  %v4213_v49 = vmul.f32 %v11095_v29, %v4073_v43  ;;  %v4599_v47 = vld [vmem:[#allocation2 + $0x231] sm:$0xff] }
 0x5b9   :  { %4409 = vst.msk [vmem:[#allocation2 + $0x261] sm:$0xff] %vm85_vm0, %v4345_v23  ;;  %v4283_v51 = vadd.f32 %v11099_v34, %v4214_v20  ;;  %4770 = vrot.lane.b32.xlu1 %v4599_v47, %s9358_s4  ;;  %v4598_v40 = vld [vmem:[#allocation2 + $0x229] sm:$0xff] }
 0x5ba   :  { %v11439_v52 = vld [vmem:[#allocation2 + $0x230] sm:$0xff]  ;;  %v11441_v57 = vld [vmem:[#allocation2 + $0x228] sm:$0xff]  ;;  %4408 = vst.msk [vmem:[#allocation2 + $0x259] sm:$0xff] %vm85_vm0, %v4344_v42  ;;  %v4282_v27 = vadd.f32 %v11099_v34, %v4213_v49  ;;  %4768 = vrot.lane.b32.xlu0 %v4598_v40, %s9358_s4  ;;  %v9046_v55 = vpop.f32.mrb[48].mxu0 }
 0x5bb   :  { %4535 = vst.msk [vmem:[#allocation3 + $0x158] sm:$0xff] %vm85_vm0, %v11439_v52  ;;  %4534 = vst.msk [vmem:[#allocation3 + $0x150] sm:$0xff] %vm85_vm0, %v11441_v57  ;;  %v4347_v5 = vmax.f32 %v4283_v51, 0.0  ;;  %v4216_v2 = vmul.f32 %v9046_v55, %v11095_v29  ;;  %v4083_v14 = vpop.f32.mrb[49].mxu0 }
 0x5bc   :  { %v4346_v11 = vmax.f32 %v4282_v27, 0.0  ;;  %v4215_v45 = vmul.f32 %v11095_v29, %v4083_v14  ;;  %v4601_v32 = vld [vmem:[#allocation2 + $0x249] sm:$0xff] }
 0x5bd   :  { %4411 = vst.msk [vmem:[#allocation2 + $0x279] sm:$0xff] %vm85_vm0, %v4347_v5  ;;  %v4285_v12 = vadd.f32 %v11099_v34, %v4216_v2  ;;  %4774 = vrot.lane.b32.xlu1 %v4601_v32, %s9358_s4  ;;  %v4600_v4 = vld [vmem:[#allocation2 + $0x241] sm:$0xff] }
 0x5be   :  { %v11455_v7 = vld [vmem:[#allocation2 + $0x248] sm:$0xff]  ;;  %v11457_v61 = vld [vmem:[#allocation2 + $0x240] sm:$0xff]  ;;  %4410 = vst.msk [vmem:[#allocation2 + $0x271] sm:$0xff] %vm85_vm0, %v4346_v11  ;;  %v4284_v19 = vadd.f32 %v11099_v34, %v4215_v45  ;;  %4772 = vrot.lane.b32.xlu0 %v4600_v4, %s9358_s4  ;;  %v9049_v16 = vpop.f32.mrb[50].mxu0 }
 0x5bf   :  { %4537 = vst.msk [vmem:[#allocation3 + $0x168] sm:$0xff] %vm85_vm0, %v11455_v7  ;;  %4536 = vst.msk [vmem:[#allocation3 + $0x160] sm:$0xff] %vm85_vm0, %v11457_v61  ;;  %v4349_v23 = vmax.f32 %v4285_v12, 0.0  ;;  %v4218_v20 = vmul.f32 %v9049_v16, %v11095_v29  ;;  %v4093_v43 = vpop.f32.mrb[51].mxu0 }
 0x5c0   :  { %v4348_v42 = vmax.f32 %v4284_v19, 0.0  ;;  %v4217_v49 = vmul.f32 %v11095_v29, %v4093_v43  ;;  %v4603_v47 = vld [vmem:[#allocation2 + $0x261] sm:$0xff] }
 0x5c1   :  { %4413 = vst.msk [vmem:[#allocation2 + $0x291] sm:$0xff] %vm85_vm0, %v4349_v23  ;;  %v4287_v51 = vadd.f32 %v11099_v34, %v4218_v20  ;;  %4778 = vrot.lane.b32.xlu1 %v4603_v47, %s9358_s4  ;;  %v4602_v40 = vld [vmem:[#allocation2 + $0x259] sm:$0xff] }
 0x5c2   :  { %v11471_v27 = vld [vmem:[#allocation2 + $0x260] sm:$0xff]  ;;  %v11473_v55 = vld [vmem:[#allocation2 + $0x258] sm:$0xff]  ;;  %4412 = vst.msk [vmem:[#allocation2 + $0x289] sm:$0xff] %vm85_vm0, %v4348_v42  ;;  %v4286_v5 = vadd.f32 %v11099_v34, %v4217_v49  ;;  %4776 = vrot.lane.b32.xlu0 %v4602_v40, %s9358_s4  ;;  %v9052_v2 = vpop.f32.mrb[52].mxu0 }
 0x5c3   :  { %4539 = vst.msk [vmem:[#allocation3 + $0x178] sm:$0xff] %vm85_vm0, %v11471_v27  ;;  %4538 = vst.msk [vmem:[#allocation3 + $0x170] sm:$0xff] %vm85_vm0, %v11473_v55  ;;  %v4351_v14 = vmax.f32 %v4287_v51, 0.0  ;;  %v4220_v11 = vmul.f32 %v9052_v2, %v11095_v29  ;;  %v4103_v45 = vpop.f32.mrb[53].mxu0 }
 0x5c4   :  { %v4350_v32 = vmax.f32 %v4286_v5, 0.0  ;;  %v4219_v12 = vmul.f32 %v11095_v29, %v4103_v45  ;;  %v4605_v4 = vld [vmem:[#allocation2 + $0x279] sm:$0xff] }
 0x5c5   :  { %4415 = vst.msk [vmem:[#allocation2 + $0x2a9] sm:$0xff] %vm85_vm0, %v4351_v14  ;;  %v4289_v19 = vadd.f32 %v11099_v34, %v4220_v11  ;;  %4782 = vrot.lane.b32.xlu1 %v4605_v4, %s9358_s4  ;;  %v4604_v16 = vld [vmem:[#allocation2 + $0x271] sm:$0xff] }
 0x5c6   :  { %v11487_v23 = vld [vmem:[#allocation2 + $0x278] sm:$0xff]  ;;  %v11489_v20 = vld [vmem:[#allocation2 + $0x270] sm:$0xff]  ;;  %4414 = vst.msk [vmem:[#allocation2 + $0x2a1] sm:$0xff] %vm85_vm0, %v4350_v32  ;;  %v4288_v43 = vadd.f32 %v11099_v34, %v4219_v12  ;;  %4780 = vrot.lane.b32.xlu0 %v4604_v16, %s9358_s4  ;;  %v9055_v42 = vpop.f32.mrb[54].mxu0 }
 0x5c7   :  { %4541 = vst.msk [vmem:[#allocation3 + $0x188] sm:$0xff] %vm85_vm0, %v11487_v23  ;;  %4540 = vst.msk [vmem:[#allocation3 + $0x180] sm:$0xff] %vm85_vm0, %v11489_v20  ;;  %v4353_v49 = vmax.f32 %v4289_v19, 0.0  ;;  %v4222_v47 = vmul.f32 %v9055_v42, %v11095_v29  ;;  %v4113_v51 = vpop.f32.mrb[55].mxu0 }
 0x5c8   :  { %v4352_v40 = vmax.f32 %v4288_v43, 0.0  ;;  %v4221_v5 = vmul.f32 %v11095_v29, %v4113_v51  ;;  %v4607_v2 = vld [vmem:[#allocation2 + $0x291] sm:$0xff] }
 0x5c9   :  { %4417 = vst.msk [vmem:[#allocation2 + $0x2c1] sm:$0xff] %vm85_vm0, %v4353_v49  ;;  %v4291_v14 = vadd.f32 %v11099_v34, %v4222_v47  ;;  %4786 = vrot.lane.b32.xlu1 %v4607_v2, %s9358_s4  ;;  %v4606_v11 = vld [vmem:[#allocation2 + $0x289] sm:$0xff] }
 0x5ca   :  { %v11503_v45 = vld [vmem:[#allocation2 + $0x290] sm:$0xff]  ;;  %v11505_v32 = vld [vmem:[#allocation2 + $0x288] sm:$0xff]  ;;  %4416 = vst.msk [vmem:[#allocation2 + $0x2b9] sm:$0xff] %vm85_vm0, %v4352_v40  ;;  %v4290_v12 = vadd.f32 %v11099_v34, %v4221_v5  ;;  %4784 = vrot.lane.b32.xlu0 %v4606_v11, %s9358_s4  ;;  %v9058_v4 = vpop.f32.mrb[56].mxu0 }
 0x5cb   :  { %4543 = vst.msk [vmem:[#allocation3 + $0x198] sm:$0xff] %vm85_vm0, %v11503_v45  ;;  %4542 = vst.msk [vmem:[#allocation3 + $0x190] sm:$0xff] %vm85_vm0, %v11505_v32  ;;  %v4355_v19 = vmax.f32 %v4291_v14, 0.0  ;;  %v4224_v16 = vmul.f32 %v9058_v4, %v11095_v29  ;;  %v4123_v43 = vpop.f32.mrb[57].mxu0 }
 0x5cc   :  { %v4354_v42 = vmax.f32 %v4290_v12, 0.0  ;;  %v4223_v49 = vmul.f32 %v11095_v29, %v4123_v43  ;;  %v4609_v47 = vld [vmem:[#allocation2 + $0x2a9] sm:$0xff] }
 0x5cd   :  { %4419 = vst.msk [vmem:[#allocation2 + $0x2d9] sm:$0xff] %vm85_vm0, %v4355_v19  ;;  %v4293_v51 = vadd.f32 %v11099_v34, %v4224_v16  ;;  %4790 = vrot.lane.b32.xlu1 %v4609_v47, %s9358_s4  ;;  %v4608_v40 = vld [vmem:[#allocation2 + $0x2a1] sm:$0xff] }
 0x5ce   :  { %v11519_v5 = vld [vmem:[#allocation2 + $0x2a8] sm:$0xff]  ;;  %v11521_v2 = vld [vmem:[#allocation2 + $0x2a0] sm:$0xff]  ;;  %4418 = vst.msk [vmem:[#allocation2 + $0x2d1] sm:$0xff] %vm85_vm0, %v4354_v42  ;;  %v4292_v14 = vadd.f32 %v11099_v34, %v4223_v49  ;;  %4788 = vrot.lane.b32.xlu0 %v4608_v40, %s9358_s4  ;;  %v9061_v11 = vpop.f32.mrb[58].mxu0 }
 0x5cf   :  { %13105 = vst [vmem:[#allocation18_spill] sm:$0xff] %v11519_v5  ;;  %4545 = vst.msk [vmem:[#allocation3 + $0x1a8] sm:$0xff] %vm85_vm0, %v11519_v5  ;;  %v4357_v12 = vmax.f32 %v4293_v51, 0.0  ;;  %v4226_v4 = vmul.f32 %v9061_v11, %v11095_v29  ;;  %v4133_v19 = vpop.f32.mrb[59].mxu0  ;;  %v11540_v51 = vld [vmem:[#allocation9 + $0x1] ss:$0 sm:$0xff] }
 0x5d0   :  { %4544 = vst.msk [vmem:[#allocation3 + $0x1a0] sm:$0xff] %vm85_vm0, %v11521_v2  ;;  %v4356_v16 = vmax.f32 %v4292_v14, 0.0  ;;  %v4225_v43 = vmul.f32 %v11095_v29, %v4133_v19  ;;  %v4611_v47 = vld [vmem:[#allocation2 + $0x2c1] sm:$0xff] }
 0x5d1   :  { %4421 = vst.msk [vmem:[#allocation2 + $0x2f1] sm:$0xff] %vm85_vm0, %v4357_v12  ;;  %v4295_v42 = vadd.f32 %v11099_v34, %v4226_v4  ;;  %4794 = vrot.lane.b32.xlu1 %v4611_v47, %s9358_s4  ;;  %v4610_v49 = vld [vmem:[#allocation2 + $0x2b9] sm:$0xff]  ;;  %v11548_v11 = vld [vmem:[#allocation9] ss:$0 sm:$0xff] }
 0x5d2   :  { %v11535_v40 = vld [vmem:[#allocation2 + $0x2c0] sm:$0xff]  ;;  %v11537_v5 = vld [vmem:[#allocation2 + $0x2b8] sm:$0xff]  ;;  %4420 = vst.msk [vmem:[#allocation2 + $0x2e9] sm:$0xff] %vm85_vm0, %v4356_v16  ;;  %v4294_v14 = vadd.f32 %v11540_v51, %v4225_v43  ;;  %4792 = vrot.lane.b32.xlu0 %v4610_v49, %s9358_s4  ;;  %v9064_v29 = vpop.f32.mrb[60].mxu0 }
 0x5d3   :  { %13106 = vst [vmem:[#allocation20_spill] sm:$0xff] %v11535_v40  ;;  %13107 = vst [vmem:[#allocation19_spill] sm:$0xff] %v11537_v5  ;;  %v4359_v34 = vmax.f32 %v4295_v42, 0.0  ;;  %v4228_v12 = vmul.f32 %v11548_v11, %v9064_v29  ;;  %v4143_v4 = vpop.f32.mrb[61].mxu0 }
 0x5d4   :  { %4547 = vst.msk [vmem:[#allocation3 + $0x1b8] sm:$0xff] %vm85_vm0, %v11535_v40  ;;  %4546 = vst.msk [vmem:[#allocation3 + $0x1b0] sm:$0xff] %vm85_vm0, %v11537_v5  ;;  %v4358_v19 = vmax.f32 %v4294_v14, 0.0  ;;  %v4227_v16 = vmul.f32 %v11548_v11, %v4143_v4  ;;  %v4613_v47 = vld [vmem:[#allocation2 + $0x2d9] sm:$0xff] }
 0x5d5   :  { %4423 = vst.msk [vmem:[#allocation2 + $0x309] sm:$0xff] %vm85_vm0, %v4359_v34  ;;  %v4297_v43 = vadd.f32 %v11540_v51, %v4228_v12  ;;  %4798 = vrot.lane.b32.xlu1 %v4613_v47, %s9358_s4  ;;  %v4612_v49 = vld [vmem:[#allocation2 + $0x2d1] sm:$0xff] }
 0x5d6   :  { %v11555_v40 = vld [vmem:[#allocation2 + $0x2d8] sm:$0xff]  ;;  %v11557_v5 = vld [vmem:[#allocation2 + $0x2d0] sm:$0xff]  ;;  %4422 = vst.msk [vmem:[#allocation2 + $0x301] sm:$0xff] %vm85_vm0, %v4358_v19  ;;  %v4296_v42 = vadd.f32 %v11540_v51, %v4227_v16  ;;  %4796 = vrot.lane.b32.xlu0 %v4612_v49, %s9358_s4 }
 0x5d7   :  { %13108 = vst [vmem:[#allocation22_spill] sm:$0xff] %v11557_v5  ;;  %4549 = vst.msk [vmem:[#allocation3 + $0x1c8] sm:$0xff] %vm85_vm0, %v11555_v40  ;;  %v4361_v14 = vmax.f32 %v4297_v43, 0.0 }
 0x5d8   :  { %4548 = vst.msk [vmem:[#allocation3 + $0x1c0] sm:$0xff] %vm85_vm0, %v11557_v5  ;;  %v4360_v29 = vmax.f32 %v4296_v42, 0.0  ;;  %v4615_v34 = vld [vmem:[#allocation2 + $0x2f1] sm:$0xff] }
 0x5d9   :  { %4425 = vst.msk [vmem:[#allocation2 + $0x321] sm:$0xff] %vm85_vm0, %v4361_v14  ;;  %4802 = vrot.lane.b32.xlu1 %v4615_v34, %s9358_s4  ;;  %v4614_v12 = vld [vmem:[#allocation2 + $0x2e9] sm:$0xff] }
 0x5da   :  { %v11568_v4 = vld [vmem:[#allocation2 + $0x2f0] sm:$0xff]  ;;  %v11570_v19 = vld [vmem:[#allocation2 + $0x2e8] sm:$0xff]  ;;  %4424 = vst.msk [vmem:[#allocation2 + $0x319] sm:$0xff] %vm85_vm0, %v4360_v29  ;;  %4800 = vrot.lane.b32.xlu0 %v4614_v12, %s9358_s4 }
 0x5db   :  { %13109 = vst [vmem:[#allocation21_spill] sm:$0xff] %v11568_v4  ;;  %13110 = vst [vmem:[#allocation23_spill] sm:$0xff] %v11570_v19  ;;  %v4691_v16 = vpop.permute.xlu1 %4690 }
 0x5dc   :  { %4551 = vst.msk [vmem:[#allocation3 + $0x1d8] sm:$0xff] %vm85_vm0, %v11568_v4  ;;  %4550 = vst.msk [vmem:[#allocation3 + $0x1d0] sm:$0xff] %vm85_vm0, %v11570_v19  ;;  %v4689_v47 = vpop.permute.xlu0 %4688  ;;  %v4617_v43 = vld [vmem:[#allocation2 + $0x309] sm:$0xff] }
 0x5dd   :  { %4879 = vst.msk [vmem:[#allocation3 + $0x18] sm:$0xff] %vm750_vm3, %v4691_v16  ;;  %4878 = vst.msk [vmem:[#allocation3 + $0x10] sm:$0xff] %vm750_vm3, %v4689_v47  ;;  %4806 = vrot.lane.b32.xlu1 %v4617_v43, %s9358_s4  ;;  %v4616_v49 = vld [vmem:[#allocation2 + $0x301] sm:$0xff] }
 0x5de   :  { %v11581_v42 = vld [vmem:[#allocation2 + $0x308] sm:$0xff]  ;;  %v11583_v14 = vld [vmem:[#allocation2 + $0x300] sm:$0xff]  ;;  %4804 = vrot.lane.b32.xlu0 %v4616_v49, %s9358_s4 }
 0x5df   :  { %13111 = vst [vmem:[#allocation24_spill] sm:$0xff] %v11581_v42  ;;  %13112 = vst [vmem:[#allocation25_spill] sm:$0xff] %v11583_v14  ;;  %v4695_v29 = vpop.permute.xlu1 %4694  ;;  %v4941_v49 = vld [vmem:[#allocation2 + $0xa] sm:$0xff] }
 0x5e0   :  { %4553 = vst.msk [vmem:[#allocation3 + $0x1e8] sm:$0xff] %vm85_vm0, %v11581_v42  ;;  %4552 = vst.msk [vmem:[#allocation3 + $0x1e0] sm:$0xff] %vm85_vm0, %v11583_v14  ;;  %v4693_v34 = vpop.permute.xlu0 %4692  ;;  %v4619_v12 = vld [vmem:[#allocation2 + $0x321] sm:$0xff] }
 0x5e1   :  { %4881 = vst.msk [vmem:[#allocation3 + $0x28] sm:$0xff] %vm750_vm3, %v4695_v29  ;;  %4880 = vst.msk [vmem:[#allocation3 + $0x20] sm:$0xff] %vm750_vm3, %v4693_v34  ;;  %4810 = vrot.lane.b32.xlu1 %v4619_v12, %s9358_s4  ;;  %v4618_v16 = vld [vmem:[#allocation2 + $0x319] sm:$0xff]  ;;  %v4940_v14 = vld [vmem:[#allocation2 + $0x2] sm:$0xff] }
 0x5e2   :  { %v11593_v47 = vld [vmem:[#allocation2 + $0x320] sm:$0xff]  ;;  %v11595_v43 = vld [vmem:[#allocation2 + $0x318] sm:$0xff]  ;;  %4808 = vrot.lane.b32.xlu0 %v4618_v16, %s9358_s4 }
 0x5e3   :  { %13113 = vst [vmem:[#allocation26_spill] sm:$0xff] %v11593_v47  ;;  %13114 = vst [vmem:[#allocation27_spill] sm:$0xff] %v11595_v43  ;;  %v4699_v29 = vpop.permute.xlu1 %4698  ;;  %v4943_v42 = vld [vmem:[#allocation2 + $0x22] sm:$0xff] }
 0x5e4   :  { %4555 = vst.msk [vmem:[#allocation3 + $0x1f8] sm:$0xff] %vm85_vm0, %v11593_v47  ;;  %4554 = vst.msk [vmem:[#allocation3 + $0x1f0] sm:$0xff] %vm85_vm0, %v11595_v43  ;;  %v4697_v34 = vpop.permute.xlu0 %4696  ;;  %v4942_v43 = vld [vmem:[#allocation2 + $0x1a] sm:$0xff] }
 0x5e5   :  { %4883 = vst.msk [vmem:[#allocation3 + $0x38] sm:$0xff] %vm750_vm3, %v4699_v29  ;;  %4882 = vst.msk [vmem:[#allocation3 + $0x30] sm:$0xff] %vm750_vm3, %v4697_v34  ;;  %5070 = vrot.lane.b32.xlu1 %v4941_v49, %s9353_s6  ;;  %v4945_v47 = vld [vmem:[#allocation2 + $0x3a] sm:$0xff] }
 0x5e6   :  { %5068 = vrot.lane.b32.xlu0 %v4940_v14, %s9353_s6  ;;  %v4944_v14 = vld [vmem:[#allocation2 + $0x32] sm:$0xff] }
 0x5e7   :  { %v4703_v12 = vpop.permute.xlu1 %4702 }
 0x5e8   :  { %4885 = vst.msk [vmem:[#allocation3 + $0x48] sm:$0xff] %vm750_vm3, %v4703_v12  ;;  %v4701_v16 = vpop.permute.xlu0 %4700 }
 0x5e9   :  { %4884 = vst.msk [vmem:[#allocation3 + $0x40] sm:$0xff] %vm750_vm3, %v4701_v16  ;;  %5074 = vrot.lane.b32.xlu1 %v4943_v42, %s9353_s6  ;;  %v4947_v42 = vld [vmem:[#allocation2 + $0x52] sm:$0xff] }
 0x5ea   :  { %5072 = vrot.lane.b32.xlu0 %v4942_v43, %s9353_s6  ;;  %v4946_v43 = vld [vmem:[#allocation2 + $0x4a] sm:$0xff] }
 0x5eb   :  { %v4707_v29 = vpop.permute.xlu1 %4706 }
 0x5ec   :  { %4887 = vst.msk [vmem:[#allocation3 + $0x58] sm:$0xff] %vm750_vm3, %v4707_v29  ;;  %v4705_v34 = vpop.permute.xlu0 %4704 }
 0x5ed   :  { %4886 = vst.msk [vmem:[#allocation3 + $0x50] sm:$0xff] %vm750_vm3, %v4705_v34  ;;  %5078 = vrot.lane.b32.xlu1 %v4945_v47, %s9353_s6  ;;  %v4949_v47 = vld [vmem:[#allocation2 + $0x6a] sm:$0xff]  ;;  %v4948_v34 = vld [vmem:[#allocation2 + $0x62] sm:$0xff] }
 0x5ee   :  { %5076 = vrot.lane.b32.xlu0 %v4944_v14, %s9353_s6 }
 0x5ef   :  { %v4711_v49 = vpop.permute.xlu1 %4710 }
 0x5f0   :  { %4889 = vst.msk [vmem:[#allocation3 + $0x68] sm:$0xff] %vm750_vm3, %v4711_v49  ;;  %v4709_v12 = vpop.permute.xlu0 %4708 }
 0x5f1   :  { %4888 = vst.msk [vmem:[#allocation3 + $0x60] sm:$0xff] %vm750_vm3, %v4709_v12  ;;  %5082 = vrot.lane.b32.xlu1 %v4947_v42, %s9353_s6  ;;  %v4951_v12 = vld [vmem:[#allocation2 + $0x82] sm:$0xff]  ;;  %v4950_v42 = vld [vmem:[#allocation2 + $0x7a] sm:$0xff] }
 0x5f2   :  { %5080 = vrot.lane.b32.xlu0 %v4946_v43, %s9353_s6 }
 0x5f3   :  { %v4715_v16 = vpop.permute.xlu1 %4714 }
 0x5f4   :  { %4891 = vst.msk [vmem:[#allocation3 + $0x78] sm:$0xff] %vm750_vm3, %v4715_v16  ;;  %v4713_v29 = vpop.permute.xlu0 %4712 }
 0x5f5   :  { %4890 = vst.msk [vmem:[#allocation3 + $0x70] sm:$0xff] %vm750_vm3, %v4713_v29  ;;  %5086 = vrot.lane.b32.xlu1 %v4949_v47, %s9353_s6  ;;  %v4953_v29 = vld [vmem:[#allocation2 + $0x9a] sm:$0xff]  ;;  %v4952_v47 = vld [vmem:[#allocation2 + $0x92] sm:$0xff] }
 0x5f6   :  { %5084 = vrot.lane.b32.xlu0 %v4948_v34, %s9353_s6 }
 0x5f7   :  { %v4719_v14 = vpop.permute.xlu1 %4718 }
 0x5f8   :  { %4893 = vst.msk [vmem:[#allocation3 + $0x88] sm:$0xff] %vm750_vm3, %v4719_v14  ;;  %v4717_v49 = vpop.permute.xlu0 %4716 }
 0x5f9   :  { %4892 = vst.msk [vmem:[#allocation3 + $0x80] sm:$0xff] %vm750_vm3, %v4717_v49  ;;  %5090 = vrot.lane.b32.xlu1 %v4951_v12, %s9353_s6  ;;  %v4955_v49 = vld [vmem:[#allocation2 + $0xb2] sm:$0xff]  ;;  %v4954_v12 = vld [vmem:[#allocation2 + $0xaa] sm:$0xff] }
 0x5fa   :  { %5088 = vrot.lane.b32.xlu0 %v4950_v42, %s9353_s6 }
 0x5fb   :  { %v4723_v43 = vpop.permute.xlu1 %4722 }
 0x5fc   :  { %4895 = vst.msk [vmem:[#allocation3 + $0x98] sm:$0xff] %vm750_vm3, %v4723_v43  ;;  %v4721_v16 = vpop.permute.xlu0 %4720 }
 0x5fd   :  { %4894 = vst.msk [vmem:[#allocation3 + $0x90] sm:$0xff] %vm750_vm3, %v4721_v16  ;;  %5094 = vrot.lane.b32.xlu1 %v4953_v29, %s9353_s6  ;;  %v4957_v16 = vld [vmem:[#allocation2 + $0xca] sm:$0xff]  ;;  %v4956_v29 = vld [vmem:[#allocation2 + $0xc2] sm:$0xff] }
 0x5fe   :  { %5092 = vrot.lane.b32.xlu0 %v4952_v47, %s9353_s6 }
 0x5ff   :  { %v4727_v34 = vpop.permute.xlu1 %4726 }
 0x600   :  { %4897 = vst.msk [vmem:[#allocation3 + $0xa8] sm:$0xff] %vm750_vm3, %v4727_v34  ;;  %v4725_v14 = vpop.permute.xlu0 %4724 }
 0x601   :  { %4896 = vst.msk [vmem:[#allocation3 + $0xa0] sm:$0xff] %vm750_vm3, %v4725_v14  ;;  %5098 = vrot.lane.b32.xlu1 %v4955_v49, %s9353_s6  ;;  %v4959_v14 = vld [vmem:[#allocation2 + $0xe2] sm:$0xff]  ;;  %v4958_v49 = vld [vmem:[#allocation2 + $0xda] sm:$0xff] }
 0x602   :  { %5096 = vrot.lane.b32.xlu0 %v4954_v12, %s9353_s6 }
 0x603   :  { %v4731_v42 = vpop.permute.xlu1 %4730 }
 0x604   :  { %4899 = vst.msk [vmem:[#allocation3 + $0xb8] sm:$0xff] %vm750_vm3, %v4731_v42  ;;  %v4729_v43 = vpop.permute.xlu0 %4728 }
 0x605   :  { %4898 = vst.msk [vmem:[#allocation3 + $0xb0] sm:$0xff] %vm750_vm3, %v4729_v43  ;;  %5102 = vrot.lane.b32.xlu1 %v4957_v16, %s9353_s6  ;;  %v4961_v43 = vld [vmem:[#allocation2 + $0xfa] sm:$0xff]  ;;  %v4960_v16 = vld [vmem:[#allocation2 + $0xf2] sm:$0xff] }
 0x606   :  { %5100 = vrot.lane.b32.xlu0 %v4956_v29, %s9353_s6 }
 0x607   :  { %v4735_v47 = vpop.permute.xlu1 %4734 }
 0x608   :  { %4901 = vst.msk [vmem:[#allocation3 + $0xc8] sm:$0xff] %vm750_vm3, %v4735_v47  ;;  %v4733_v34 = vpop.permute.xlu0 %4732 }
 0x609   :  { %4900 = vst.msk [vmem:[#allocation3 + $0xc0] sm:$0xff] %vm750_vm3, %v4733_v34  ;;  %5106 = vrot.lane.b32.xlu1 %v4959_v14, %s9353_s6  ;;  %v4963_v34 = vld [vmem:[#allocation2 + $0x112] sm:$0xff]  ;;  %v4962_v14 = vld [vmem:[#allocation2 + $0x10a] sm:$0xff] }
 0x60a   :  { %5104 = vrot.lane.b32.xlu0 %v4958_v49, %s9353_s6 }
 0x60b   :  { %v4739_v12 = vpop.permute.xlu1 %4738 }
 0x60c   :  { %4903 = vst.msk [vmem:[#allocation3 + $0xd8] sm:$0xff] %vm750_vm3, %v4739_v12  ;;  %v4737_v42 = vpop.permute.xlu0 %4736 }
 0x60d   :  { %4902 = vst.msk [vmem:[#allocation3 + $0xd0] sm:$0xff] %vm750_vm3, %v4737_v42  ;;  %5110 = vrot.lane.b32.xlu1 %v4961_v43, %s9353_s6  ;;  %v4965_v42 = vld [vmem:[#allocation2 + $0x12a] sm:$0xff]  ;;  %v4964_v43 = vld [vmem:[#allocation2 + $0x122] sm:$0xff] }
 0x60e   :  { %5108 = vrot.lane.b32.xlu0 %v4960_v16, %s9353_s6 }
 0x60f   :  { %v4743_v29 = vpop.permute.xlu1 %4742 }
 0x610   :  { %4905 = vst.msk [vmem:[#allocation3 + $0xe8] sm:$0xff] %vm750_vm3, %v4743_v29  ;;  %v4741_v47 = vpop.permute.xlu0 %4740 }
 0x611   :  { %4904 = vst.msk [vmem:[#allocation3 + $0xe0] sm:$0xff] %vm750_vm3, %v4741_v47  ;;  %5114 = vrot.lane.b32.xlu1 %v4963_v34, %s9353_s6  ;;  %v4967_v47 = vld [vmem:[#allocation2 + $0x142] sm:$0xff]  ;;  %v4966_v34 = vld [vmem:[#allocation2 + $0x13a] sm:$0xff] }
 0x612   :  { %5112 = vrot.lane.b32.xlu0 %v4962_v14, %s9353_s6 }
 0x613   :  { %v4747_v49 = vpop.permute.xlu1 %4746 }
 0x614   :  { %4907 = vst.msk [vmem:[#allocation3 + $0xf8] sm:$0xff] %vm750_vm3, %v4747_v49  ;;  %v4745_v12 = vpop.permute.xlu0 %4744 }
 0x615   :  { %4906 = vst.msk [vmem:[#allocation3 + $0xf0] sm:$0xff] %vm750_vm3, %v4745_v12  ;;  %5118 = vrot.lane.b32.xlu1 %v4965_v42, %s9353_s6  ;;  %v4969_v12 = vld [vmem:[#allocation2 + $0x15a] sm:$0xff]  ;;  %v4968_v42 = vld [vmem:[#allocation2 + $0x152] sm:$0xff] }
 0x616   :  { %5116 = vrot.lane.b32.xlu0 %v4964_v43, %s9353_s6 }
 0x617   :  { %v4751_v16 = vpop.permute.xlu1 %4750 }
 0x618   :  { %4909 = vst.msk [vmem:[#allocation3 + $0x108] sm:$0xff] %vm750_vm3, %v4751_v16  ;;  %v4749_v29 = vpop.permute.xlu0 %4748 }
 0x619   :  { %4908 = vst.msk [vmem:[#allocation3 + $0x100] sm:$0xff] %vm750_vm3, %v4749_v29  ;;  %5122 = vrot.lane.b32.xlu1 %v4967_v47, %s9353_s6  ;;  %v4971_v29 = vld [vmem:[#allocation2 + $0x172] sm:$0xff]  ;;  %v4970_v47 = vld [vmem:[#allocation2 + $0x16a] sm:$0xff] }
 0x61a   :  { %5120 = vrot.lane.b32.xlu0 %v4966_v34, %s9353_s6  ;;  %v4973_v34 = vld [vmem:[#allocation2 + $0x1ba] sm:$0xff] }
 0x61b   :  { %v4755_v14 = vpop.permute.xlu1 %4754 }
 0x61c   :  { %4911 = vst.msk [vmem:[#allocation3 + $0x118] sm:$0xff] %vm750_vm3, %v4755_v14  ;;  %v4753_v49 = vpop.permute.xlu0 %4752 }
 0x61d   :  { %4910 = vst.msk [vmem:[#allocation3 + $0x110] sm:$0xff] %vm750_vm3, %v4753_v49  ;;  %5126 = vrot.lane.b32.xlu1 %v4969_v12, %s9353_s6  ;;  %v4972_v49 = vld [vmem:[#allocation2 + $0x1b2] sm:$0xff] }
 0x61e   :  { %5124 = vrot.lane.b32.xlu0 %v4968_v42, %s9353_s6 }
 0x61f   :  { %v4759_v43 = vpop.permute.xlu1 %4758 }
 0x620   :  { %4913 = vst.msk [vmem:[#allocation3 + $0x128] sm:$0xff] %vm750_vm3, %v4759_v43  ;;  %v4757_v16 = vpop.permute.xlu0 %4756 }
 0x621   :  { %4912 = vst.msk [vmem:[#allocation3 + $0x120] sm:$0xff] %vm750_vm3, %v4757_v16  ;;  %5130 = vrot.lane.b32.xlu1 %v4971_v29, %s9353_s6  ;;  %v4975_v16 = vld [vmem:[#allocation2 + $0x1d2] sm:$0xff]  ;;  %v4974_v29 = vld [vmem:[#allocation2 + $0x1ca] sm:$0xff] }
 0x622   :  { %5128 = vrot.lane.b32.xlu0 %v4970_v47, %s9353_s6 }
 0x623   :  { %v4763_v14 = vpop.permute.xlu1 %4762 }
 0x624   :  { %4915 = vst.msk [vmem:[#allocation3 + $0x138] sm:$0xff] %vm750_vm3, %v4763_v14  ;;  %v4761_v12 = vpop.permute.xlu0 %4760 }
 0x625   :  { %4914 = vst.msk [vmem:[#allocation3 + $0x130] sm:$0xff] %vm750_vm3, %v4761_v12  ;;  %5134 = vrot.lane.b32.xlu1 %v4973_v34, %s9353_s6  ;;  %v4977_v12 = vld [vmem:[#allocation2 + $0x1ea] sm:$0xff]  ;;  %v4976_v34 = vld [vmem:[#allocation2 + $0x1e2] sm:$0xff] }
 0x626   :  { %5132 = vrot.lane.b32.xlu0 %v4972_v49, %s9353_s6 }
 0x627   :  { %v4767_v42 = vpop.permute.xlu1 %4766 }
 0x628   :  { %4917 = vst.msk [vmem:[#allocation3 + $0x148] sm:$0xff] %vm750_vm3, %v4767_v42  ;;  %v4765_v43 = vpop.permute.xlu0 %4764 }
 0x629   :  { %4916 = vst.msk [vmem:[#allocation3 + $0x140] sm:$0xff] %vm750_vm3, %v4765_v43  ;;  %5138 = vrot.lane.b32.xlu1 %v4975_v16, %s9353_s6  ;;  %v4979_v43 = vld [vmem:[#allocation2 + $0x202] sm:$0xff]  ;;  %v4978_v16 = vld [vmem:[#allocation2 + $0x1fa] sm:$0xff] }
 0x62a   :  { %5136 = vrot.lane.b32.xlu0 %v4974_v29, %s9353_s6  ;;  %v9067_v29 = vpop.f32.mrb[62].mxu0 }
 0x62b   :  { %v4771_v47 = vpop.permute.xlu1 %4770 }
 0x62c   :  { %4919 = vst.msk [vmem:[#allocation3 + $0x158] sm:$0xff] %vm750_vm3, %v4771_v47  ;;  %v4769_v14 = vpop.permute.xlu0 %4768  ;;  %v4230_v47 = vmul.f32 %v11548_v11, %v9067_v29 }
 0x62d   :  { %4918 = vst.msk [vmem:[#allocation3 + $0x150] sm:$0xff] %vm750_vm3, %v4769_v14  ;;  %5142 = vrot.lane.b32.xlu1 %v4977_v12, %s9353_s6  ;;  %v4153_v14 = vpop.f32.mrb[63].mxu0 }
 0x62e   :  { %5140 = vrot.lane.b32.xlu0 %v4976_v34, %s9353_s6  ;;  %v4229_v19 = vmul.f32 %v11548_v11, %v4153_v14  ;;  %v4299_v4 = vadd.f32 %v11540_v51, %v4230_v47  ;;  %v4983_v14 = vld [vmem:[#allocation2 + $0x232] sm:$0xff]  ;;  %v4982_v47 = vld [vmem:[#allocation2 + $0x22a] sm:$0xff] }
 0x62f   :  { %v4775_v49 = vpop.permute.xlu1 %4774 }
 0x630   :  { %4921 = vst.msk [vmem:[#allocation3 + $0x168] sm:$0xff] %vm750_vm3, %v4775_v49  ;;  %v4773_v42 = vpop.permute.xlu0 %4772  ;;  %v4981_v49 = vld [vmem:[#allocation2 + $0x21a] sm:$0xff] }
 0x631   :  { %4920 = vst.msk [vmem:[#allocation3 + $0x160] sm:$0xff] %vm750_vm3, %v4773_v42  ;;  %5146 = vrot.lane.b32.xlu1 %v4979_v43, %s9353_s6  ;;  %v4980_v42 = vld [vmem:[#allocation2 + $0x212] sm:$0xff]  ;;  %v4298_v43 = vadd.f32 %v11540_v51, %v4229_v19  ;;  %v4985_v19 = vld [vmem:[#allocation2 + $0x24a] sm:$0xff] }
 0x632   :  { %5144 = vrot.lane.b32.xlu0 %v4978_v16, %s9353_s6  ;;  %v4363_v16 = vmax.f32 %v4299_v4, 0.0 }
 0x633   :  { %v4779_v12 = vpop.permute.xlu1 %4778  ;;  %v4362_v5 = vmax.f32 %v4298_v43, 0.0 }
 0x634   :  { %4923 = vst.msk [vmem:[#allocation3 + $0x178] sm:$0xff] %vm750_vm3, %v4779_v12  ;;  %v4777_v34 = vpop.permute.xlu0 %4776  ;;  %v4984_v12 = vld [vmem:[#allocation2 + $0x242] sm:$0xff] }
 0x635   :  { %4922 = vst.msk [vmem:[#allocation3 + $0x170] sm:$0xff] %vm750_vm3, %v4777_v34  ;;  %5150 = vrot.lane.b32.xlu1 %v4981_v49, %s9353_s6 }
 0x636   :  { %5148 = vrot.lane.b32.xlu0 %v4980_v42, %s9353_s6  ;;  %4427 = vst.msk [vmem:[#allocation2 + $0x339] sm:$0xff] %vm85_vm0, %v4363_v16  ;;  %4426 = vst.msk [vmem:[#allocation2 + $0x331] sm:$0xff] %vm85_vm0, %v4362_v5  ;;  %v4987_v42 = vld [vmem:[#allocation2 + $0x262] sm:$0xff]  ;;  %v4986_v5 = vld [vmem:[#allocation2 + $0x25a] sm:$0xff] }
 0x637   :  { %v4783_v29 = vpop.permute.xlu1 %4782 }
 0x638   :  { %4925 = vst.msk [vmem:[#allocation3 + $0x188] sm:$0xff] %vm750_vm3, %v4783_v29  ;;  %v4781_v11 = vpop.permute.xlu0 %4780  ;;  %v4989_v29 = vld [vmem:[#allocation2 + $0x27a] sm:$0xff] }
 0x639   :  { %4924 = vst.msk [vmem:[#allocation3 + $0x180] sm:$0xff] %vm750_vm3, %v4781_v11  ;;  %5154 = vrot.lane.b32.xlu1 %v4983_v14, %s9353_s6  ;;  %v4988_v11 = vld [vmem:[#allocation2 + $0x272] sm:$0xff] }
 0x63a   :  { %5152 = vrot.lane.b32.xlu0 %v4982_v47, %s9353_s6 }
 0x63b   :  { %v4787_v51 = vpop.permute.xlu1 %4786 }
 0x63c   :  { %4927 = vst.msk [vmem:[#allocation3 + $0x198] sm:$0xff] %vm750_vm3, %v4787_v51  ;;  %v4785_v4 = vpop.permute.xlu0 %4784  ;;  %v4991_v51 = vld [vmem:[#allocation2 + $0x292] sm:$0xff] }
 0x63d   :  { %4926 = vst.msk [vmem:[#allocation3 + $0x190] sm:$0xff] %vm750_vm3, %v4785_v4  ;;  %5158 = vrot.lane.b32.xlu1 %v4985_v19, %s9353_s6  ;;  %v4990_v4 = vld [vmem:[#allocation2 + $0x28a] sm:$0xff] }
 0x63e   :  { %5156 = vrot.lane.b32.xlu0 %v4984_v12, %s9353_s6 }
 0x63f   :  { %v4791_v34 = vpop.permute.xlu1 %4790 }
 0x640   :  { %4929 = vst.msk [vmem:[#allocation3 + $0x1a8] sm:$0xff] %vm750_vm3, %v4791_v34  ;;  %v4789_v49 = vpop.permute.xlu0 %4788  ;;  %v4993_v34 = vld [vmem:[#allocation2 + $0x2aa] sm:$0xff] }
 0x641   :  { %4928 = vst.msk [vmem:[#allocation3 + $0x1a0] sm:$0xff] %vm750_vm3, %v4789_v49  ;;  %5162 = vrot.lane.b32.xlu1 %v4987_v42, %s9353_s6  ;;  %v4992_v49 = vld [vmem:[#allocation2 + $0x2a2] sm:$0xff] }
 0x642   :  { %5160 = vrot.lane.b32.xlu0 %v4986_v5, %s9353_s6 }
 0x643   :  { %v4795_v43 = vpop.permute.xlu1 %4794 }
 0x644   :  { %4931 = vst.msk [vmem:[#allocation3 + $0x1b8] sm:$0xff] %vm750_vm3, %v4795_v43  ;;  %v4793_v16 = vpop.permute.xlu0 %4792  ;;  %v4995_v43 = vld [vmem:[#allocation2 + $0x2c2] sm:$0xff] }
 0x645   :  { %4930 = vst.msk [vmem:[#allocation3 + $0x1b0] sm:$0xff] %vm750_vm3, %v4793_v16  ;;  %5166 = vrot.lane.b32.xlu1 %v4989_v29, %s9353_s6  ;;  %v4994_v16 = vld [vmem:[#allocation2 + $0x2ba] sm:$0xff] }
 0x646   :  { %5164 = vrot.lane.b32.xlu0 %v4988_v11, %s9353_s6 }
 0x647   :  { %v4799_v14 = vpop.permute.xlu1 %4798 }
 0x648   :  { %4933 = vst.msk [vmem:[#allocation3 + $0x1c8] sm:$0xff] %vm750_vm3, %v4799_v14  ;;  %v4797_v47 = vpop.permute.xlu0 %4796  ;;  %v4997_v14 = vld [vmem:[#allocation2 + $0x2da] sm:$0xff] }
 0x649   :  { %4932 = vst.msk [vmem:[#allocation3 + $0x1c0] sm:$0xff] %vm750_vm3, %v4797_v47  ;;  %5170 = vrot.lane.b32.xlu1 %v4991_v51, %s9353_s6  ;;  %v4996_v47 = vld [vmem:[#allocation2 + $0x2d2] sm:$0xff] }
 0x64a   :  { %5168 = vrot.lane.b32.xlu0 %v4990_v4, %s9353_s6 }
 0x64b   :  { %v4803_v19 = vpop.permute.xlu1 %4802 }
 0x64c   :  { %4935 = vst.msk [vmem:[#allocation3 + $0x1d8] sm:$0xff] %vm750_vm3, %v4803_v19  ;;  %v4801_v12 = vpop.permute.xlu0 %4800  ;;  %v4999_v19 = vld [vmem:[#allocation2 + $0x2f2] sm:$0xff] }
 0x64d   :  { %4934 = vst.msk [vmem:[#allocation3 + $0x1d0] sm:$0xff] %vm750_vm3, %v4801_v12  ;;  %5174 = vrot.lane.b32.xlu1 %v4993_v34, %s9353_s6  ;;  %v4998_v12 = vld [vmem:[#allocation2 + $0x2ea] sm:$0xff] }
 0x64e   :  { %5172 = vrot.lane.b32.xlu0 %v4992_v49, %s9353_s6 }
 0x64f   :  { %v4807_v42 = vpop.permute.xlu1 %4806 }
 0x650   :  { %4937 = vst.msk [vmem:[#allocation3 + $0x1e8] sm:$0xff] %vm750_vm3, %v4807_v42  ;;  %v4805_v5 = vpop.permute.xlu0 %4804  ;;  %v5001_v42 = vld [vmem:[#allocation2 + $0x30a] sm:$0xff] }
 0x651   :  { %4936 = vst.msk [vmem:[#allocation3 + $0x1e0] sm:$0xff] %vm750_vm3, %v4805_v5  ;;  %5178 = vrot.lane.b32.xlu1 %v4995_v43, %s9353_s6  ;;  %v5000_v5 = vld [vmem:[#allocation2 + $0x302] sm:$0xff] }
 0x652   :  { %5176 = vrot.lane.b32.xlu0 %v4994_v16, %s9353_s6 }
 0x653   :  { %v4811_v29 = vpop.permute.xlu1 %4810 }
 0x654   :  { %4939 = vst.msk [vmem:[#allocation3 + $0x1f8] sm:$0xff] %vm750_vm3, %v4811_v29  ;;  %v4809_v11 = vpop.permute.xlu0 %4808  ;;  %v5003_v29 = vld [vmem:[#allocation2 + $0x322] sm:$0xff] }
 0x655   :  { %4938 = vst.msk [vmem:[#allocation3 + $0x1f0] sm:$0xff] %vm750_vm3, %v4809_v11  ;;  %5182 = vrot.lane.b32.xlu1 %v4997_v14, %s9353_s6  ;;  %v5002_v11 = vld [vmem:[#allocation2 + $0x31a] sm:$0xff] }
 0x656   :  { %5180 = vrot.lane.b32.xlu0 %v4996_v47, %s9353_s6 }
 0x657   :  { %v5071_v51 = vpop.permute.xlu1 %5070 }
 0x658   :  { %5261 = vst.msk [vmem:[#allocation3 + $0x8] sm:$0xff] %vm1135_vm4, %v5071_v51  ;;  %v5069_v4 = vpop.permute.xlu0 %5068 }
 0x659   :  { %5260 = vst.msk [vmem:[#allocation3] sm:$0xff] %vm1135_vm4, %v5069_v4  ;;  %5186 = vrot.lane.b32.xlu1 %v4999_v19, %s9353_s6 }
 0x65a   :  { %5184 = vrot.lane.b32.xlu0 %v4998_v12, %s9353_s6 }
 0x65b   :  { %v5075_v34 = vpop.permute.xlu1 %5074 }
 0x65c   :  { %5263 = vst.msk [vmem:[#allocation3 + $0x18] sm:$0xff] %vm1135_vm4, %v5075_v34  ;;  %v5073_v49 = vpop.permute.xlu0 %5072 }
 0x65d   :  { %5262 = vst.msk [vmem:[#allocation3 + $0x10] sm:$0xff] %vm1135_vm4, %v5073_v49  ;;  %5190 = vrot.lane.b32.xlu1 %v5001_v42, %s9353_s6 }
 0x65e   :  { %5188 = vrot.lane.b32.xlu0 %v5000_v5, %s9353_s6 }
 0x65f   :  { %v5079_v43 = vpop.permute.xlu1 %5078 }
 0x660   :  { %5265 = vst.msk [vmem:[#allocation3 + $0x28] sm:$0xff] %vm1135_vm4, %v5079_v43  ;;  %v5077_v16 = vpop.permute.xlu0 %5076 }
 0x661   :  { %5264 = vst.msk [vmem:[#allocation3 + $0x20] sm:$0xff] %vm1135_vm4, %v5077_v16  ;;  %5194 = vrot.lane.b32.xlu1 %v5003_v29, %s9353_s6 }
 0x662   :  { %5192 = vrot.lane.b32.xlu0 %v5002_v11, %s9353_s6 }
 0x663   :  { %v5083_v14 = vpop.permute.xlu1 %5082 }
 0x664   :  { %5267 = vst.msk [vmem:[#allocation3 + $0x38] sm:$0xff] %vm1135_vm4, %v5083_v14  ;;  %v5081_v47 = vpop.permute.xlu0 %5080 }
 0x665   :  { %5266 = vst.msk [vmem:[#allocation3 + $0x30] sm:$0xff] %vm1135_vm4, %v5081_v47  ;;  %5454 = vrot.lane.b32.xlu1 %v11125_v31, %s9359_s28  ;;  %v13119_v47 = vld [vmem:[#allocation21_spill] sm:$0xff] }
 0x666   :  { %5452 = vrot.lane.b32.xlu0 %v11127_v22, %s9359_s28 }
 0x667   :  { %v5087_v51 = vpop.permute.xlu1 %5086 }
 0x668   :  { %5269 = vst.msk [vmem:[#allocation3 + $0x48] sm:$0xff] %vm1135_vm4, %v5087_v51  ;;  %v5085_v4 = vpop.permute.xlu0 %5084  ;;  %v13120_v51 = vld [vmem:[#allocation23_spill] sm:$0xff] }
 0x669   :  { %5268 = vst.msk [vmem:[#allocation3 + $0x40] sm:$0xff] %vm1135_vm4, %v5085_v4  ;;  %5458 = vrot.lane.b32.xlu1 %v11141_v17, %s9359_s28 }
 0x66a   :  { %5456 = vrot.lane.b32.xlu0 %v11143_v13, %s9359_s28 }
 0x66b   :  { %v5091_v19 = vpop.permute.xlu1 %5090 }
 0x66c   :  { %5271 = vst.msk [vmem:[#allocation3 + $0x58] sm:$0xff] %vm1135_vm4, %v5091_v19  ;;  %v5089_v12 = vpop.permute.xlu0 %5088 }
 0x66d   :  { %5270 = vst.msk [vmem:[#allocation3 + $0x50] sm:$0xff] %vm1135_vm4, %v5089_v12  ;;  %5462 = vrot.lane.b32.xlu1 %v11157_v26, %s9359_s28  ;;  %v13122_v12 = vld [vmem:[#allocation25_spill] sm:$0xff] }
 0x66e   :  { %5460 = vrot.lane.b32.xlu0 %v11159_v24, %s9359_s28 }
 0x66f   :  { %v5095_v31 = vpop.permute.xlu1 %5094 }
 0x670   :  { %5273 = vst.msk [vmem:[#allocation3 + $0x68] sm:$0xff] %vm1135_vm4, %v5095_v31  ;;  %v5093_v22 = vpop.permute.xlu0 %5092 }
 0x671   :  { %5272 = vst.msk [vmem:[#allocation3 + $0x60] sm:$0xff] %vm1135_vm4, %v5093_v22  ;;  %5466 = vrot.lane.b32.xlu1 %v11173_v46, %s9359_s28 }
 0x672   :  { %5464 = vrot.lane.b32.xlu0 %v11175_v44, %s9359_s28 }
 0x673   :  { %v5099_v17 = vpop.permute.xlu1 %5098 }
 0x674   :  { %5275 = vst.msk [vmem:[#allocation3 + $0x78] sm:$0xff] %vm1135_vm4, %v5099_v17  ;;  %v5097_v13 = vpop.permute.xlu0 %5096  ;;  %v13123_v17 = vld [vmem:[#allocation26_spill] sm:$0xff] }
 0x675   :  { %5274 = vst.msk [vmem:[#allocation3 + $0x70] sm:$0xff] %vm1135_vm4, %v5097_v13  ;;  %5470 = vrot.lane.b32.xlu1 %v11189_v8, %s9359_s28  ;;  %v13124_v13 = vld [vmem:[#allocation27_spill] sm:$0xff] }
 0x676   :  { %5468 = vrot.lane.b32.xlu0 %v11191_v58, %s9359_s28 }
 0x677   :  { %v5103_v26 = vpop.permute.xlu1 %5102 }
 0x678   :  { %5277 = vst.msk [vmem:[#allocation3 + $0x88] sm:$0xff] %vm1135_vm4, %v5103_v26  ;;  %v5101_v24 = vpop.permute.xlu0 %5100 }
 0x679   :  { %5276 = vst.msk [vmem:[#allocation3 + $0x80] sm:$0xff] %vm1135_vm4, %v5101_v24  ;;  %5474 = vrot.lane.b32.xlu1 %v11205_v21, %s9359_s28 }
 0x67a   :  { %5472 = vrot.lane.b32.xlu0 %v11207_v15, %s9359_s28 }
 0x67b   :  { %v5107_v46 = vpop.permute.xlu1 %5106 }
 0x67c   :  { %5279 = vst.msk [vmem:[#allocation3 + $0x98] sm:$0xff] %vm1135_vm4, %v5107_v46  ;;  %v5105_v44 = vpop.permute.xlu0 %5104  ;;  %v5387_v46 = vld [vmem:[#allocation2 + $0x338] sm:$0xff] }
 0x67d   :  { %5278 = vst.msk [vmem:[#allocation3 + $0x90] sm:$0xff] %vm1135_vm4, %v5105_v44  ;;  %5478 = vrot.lane.b32.xlu1 %v11221_v37, %s9359_s28  ;;  %v5386_v44 = vld [vmem:[#allocation2 + $0x330] sm:$0xff] }
 0x67e   :  { %5476 = vrot.lane.b32.xlu0 %v11223_v53, %s9359_s28 }
 0x67f   :  { %v5111_v8 = vpop.permute.xlu1 %5110 }
 0x680   :  { %5281 = vst.msk [vmem:[#allocation3 + $0xa8] sm:$0xff] %vm1135_vm4, %v5111_v8  ;;  %v5109_v58 = vpop.permute.xlu0 %5108 }
 0x681   :  { %5280 = vst.msk [vmem:[#allocation3 + $0xa0] sm:$0xff] %vm1135_vm4, %v5109_v58  ;;  %5482 = vrot.lane.b32.xlu1 %v11237_v30, %s9359_s28 }
 0x682   :  { %5480 = vrot.lane.b32.xlu0 %v11239_v35, %s9359_s28 }
 0x683   :  { %v5115_v21 = vpop.permute.xlu1 %5114 }
 0x684   :  { %5283 = vst.msk [vmem:[#allocation3 + $0xb8] sm:$0xff] %vm1135_vm4, %v5115_v21  ;;  %v5113_v15 = vpop.permute.xlu0 %5112  ;;  %v5709_v21 = vld [vmem:[#allocation2 + $0x21] sm:$0xff] }
 0x685   :  { %5282 = vst.msk [vmem:[#allocation3 + $0xb0] sm:$0xff] %vm1135_vm4, %v5113_v15  ;;  %5486 = vrot.lane.b32.xlu1 %v11253_v50, %s9359_s28  ;;  %v5708_v15 = vld [vmem:[#allocation2 + $0x19] sm:$0xff] }
 0x686   :  { %5484 = vrot.lane.b32.xlu0 %v11255_v54, %s9359_s28 }
 0x687   :  { %v5119_v37 = vpop.permute.xlu1 %5118 }
 0x688   :  { %5285 = vst.msk [vmem:[#allocation3 + $0xc8] sm:$0xff] %vm1135_vm4, %v5119_v37  ;;  %v5117_v53 = vpop.permute.xlu0 %5116 }
 0x689   :  { %5284 = vst.msk [vmem:[#allocation3 + $0xc0] sm:$0xff] %vm1135_vm4, %v5117_v53  ;;  %5490 = vrot.lane.b32.xlu1 %v11269_v9, %s9359_s28 }
 0x68a   :  { %5488 = vrot.lane.b32.xlu0 %v11271_v6, %s9359_s28 }
 0x68b   :  { %v5123_v30 = vpop.permute.xlu1 %5122 }
 0x68c   :  { %5287 = vst.msk [vmem:[#allocation3 + $0xd8] sm:$0xff] %vm1135_vm4, %v5123_v30  ;;  %v5121_v35 = vpop.permute.xlu0 %5120  ;;  %v11929_v30 = vld [vmem:[#allocation2 + $0x39] sm:$0xff] }
 0x68d   :  { %5286 = vst.msk [vmem:[#allocation3 + $0xd0] sm:$0xff] %vm1135_vm4, %v5121_v35  ;;  %5494 = vrot.lane.b32.xlu1 %v11285_v0, %s9359_s28  ;;  %v11934_v35 = vld [vmem:[#allocation2 + $0x31] sm:$0xff] }
 0x68e   :  { %5492 = vrot.lane.b32.xlu0 %v11287_v25, %s9359_s28 }
 0x68f   :  { %v5127_v50 = vpop.permute.xlu1 %5126 }
 0x690   :  { %5289 = vst.msk [vmem:[#allocation3 + $0xe8] sm:$0xff] %vm1135_vm4, %v5127_v50  ;;  %v5125_v54 = vpop.permute.xlu0 %5124 }
 0x691   :  { %5288 = vst.msk [vmem:[#allocation3 + $0xe0] sm:$0xff] %vm1135_vm4, %v5125_v54  ;;  %5498 = vrot.lane.b32.xlu1 %v11301_v38, %s9359_s28 }
 0x692   :  { %5496 = vrot.lane.b32.xlu0 %v11303_v36, %s9359_s28 }
 0x693   :  { %v5131_v9 = vpop.permute.xlu1 %5130 }
 0x694   :  { %5291 = vst.msk [vmem:[#allocation3 + $0xf8] sm:$0xff] %vm1135_vm4, %v5131_v9  ;;  %v5129_v6 = vpop.permute.xlu0 %5128  ;;  %v11939_v9 = vld [vmem:[#allocation2 + $0x51] sm:$0xff] }
 0x695   :  { %5290 = vst.msk [vmem:[#allocation3 + $0xf0] sm:$0xff] %vm1135_vm4, %v5129_v6  ;;  %5502 = vrot.lane.b32.xlu1 %v11318_v62, %s9359_s28  ;;  %v11944_v6 = vld [vmem:[#allocation2 + $0x49] sm:$0xff] }
 0x696   :  { %5500 = vrot.lane.b32.xlu0 %v11320_v56, %s9359_s28 }
 0x697   :  { %v5135_v0 = vpop.permute.xlu1 %5134 }
 0x698   :  { %5293 = vst.msk [vmem:[#allocation3 + $0x108] sm:$0xff] %vm1135_vm4, %v5135_v0  ;;  %v5133_v25 = vpop.permute.xlu0 %5132 }
 0x699   :  { %5292 = vst.msk [vmem:[#allocation3 + $0x100] sm:$0xff] %vm1135_vm4, %v5133_v25  ;;  %5506 = vrot.lane.b32.xlu1 %v11335_v3, %s9359_s28  ;;  %v5355_v3 = vld [vmem:[#allocation2 + $0x188] sm:$0xff] }
 0x69a   :  { %5504 = vrot.lane.b32.xlu0 %v11337_v60, %s9359_s28  ;;  %v5354_v60 = vld [vmem:[#allocation2 + $0x180] sm:$0xff] }
 0x69b   :  { %v5139_v38 = vpop.permute.xlu1 %5138 }
 0x69c   :  { %5295 = vst.msk [vmem:[#allocation3 + $0x118] sm:$0xff] %vm1135_vm4, %v5139_v38  ;;  %v5137_v36 = vpop.permute.xlu0 %5136  ;;  %v11949_v38 = vld [vmem:[#allocation2 + $0x69] sm:$0xff] }
 0x69d   :  { %5294 = vst.msk [vmem:[#allocation3 + $0x110] sm:$0xff] %vm1135_vm4, %v5137_v36  ;;  %5510 = vrot.lane.b32.xlu1 %v11351_v28, %s9359_s28  ;;  %v11954_v36 = vld [vmem:[#allocation2 + $0x61] sm:$0xff] }
 0x69e   :  { %5508 = vrot.lane.b32.xlu0 %v11353_v33, %s9359_s28 }
 0x69f   :  { %v5143_v62 = vpop.permute.xlu1 %5142 }
 0x6a0   :  { %5297 = vst.msk [vmem:[#allocation3 + $0x128] sm:$0xff] %vm1135_vm4, %v5143_v62  ;;  %v5141_v56 = vpop.permute.xlu0 %5140 }
 0x6a1   :  { %5296 = vst.msk [vmem:[#allocation3 + $0x120] sm:$0xff] %vm1135_vm4, %v5141_v56  ;;  %5514 = vrot.lane.b32.xlu1 %v5355_v3, %s9359_s28  ;;  %v11959_v3 = vld [vmem:[#allocation2 + $0x81] sm:$0xff] }
 0x6a2   :  { %5512 = vrot.lane.b32.xlu0 %v5354_v60, %s9359_s28  ;;  %v11964_v60 = vld [vmem:[#allocation2 + $0x79] sm:$0xff] }
 0x6a3   :  { %v5147_v34 = vpop.permute.xlu1 %5146 }
 0x6a4   :  { %5299 = vst.msk [vmem:[#allocation3 + $0x138] sm:$0xff] %vm1135_vm4, %v5147_v34  ;;  %v5145_v49 = vpop.permute.xlu0 %5144 }
 0x6a5   :  { %5298 = vst.msk [vmem:[#allocation3 + $0x130] sm:$0xff] %vm1135_vm4, %v5145_v49  ;;  %5518 = vrot.lane.b32.xlu1 %v11375_v59, %s9359_s28 }
 0x6a6   :  { %5516 = vrot.lane.b32.xlu0 %v11377_v48, %s9359_s28 }
 0x6a7   :  { %v5151_v28 = vpop.permute.xlu1 %5150 }
 0x6a8   :  { %5301 = vst.msk [vmem:[#allocation3 + $0x148] sm:$0xff] %vm1135_vm4, %v5151_v28  ;;  %v5149_v33 = vpop.permute.xlu0 %5148  ;;  %v5719_v28 = vld [vmem:[#allocation2 + $0x99] sm:$0xff] }
 0x6a9   :  { %5300 = vst.msk [vmem:[#allocation3 + $0x140] sm:$0xff] %vm1135_vm4, %v5149_v33  ;;  %5522 = vrot.lane.b32.xlu1 %v11391_v41, %s9359_s28  ;;  %v11971_v33 = vld [vmem:[#allocation2 + $0x91] sm:$0xff] }
 0x6aa   :  { %5520 = vrot.lane.b32.xlu0 %v11393_v39, %s9359_s28 }
 0x6ab   :  { %v5155_v42 = vpop.permute.xlu1 %5154 }
 0x6ac   :  { %5303 = vst.msk [vmem:[#allocation3 + $0x158] sm:$0xff] %vm1135_vm4, %v5155_v42  ;;  %v5153_v5 = vpop.permute.xlu0 %5152 }
 0x6ad   :  { %5302 = vst.msk [vmem:[#allocation3 + $0x150] sm:$0xff] %vm1135_vm4, %v5153_v5  ;;  %5526 = vrot.lane.b32.xlu1 %v11407_v1, %s9359_s28 }
 0x6ae   :  { %5524 = vrot.lane.b32.xlu0 %v11409_v63, %s9359_s28 }
 0x6af   :  { %v5159_v59 = vpop.permute.xlu1 %5158 }
 0x6b0   :  { %5305 = vst.msk [vmem:[#allocation3 + $0x168] sm:$0xff] %vm1135_vm4, %v5159_v59  ;;  %v5157_v48 = vpop.permute.xlu0 %5156  ;;  %v5721_v59 = vld [vmem:[#allocation2 + $0xb1] sm:$0xff] }
 0x6b1   :  { %5304 = vst.msk [vmem:[#allocation3 + $0x160] sm:$0xff] %vm1135_vm4, %v5157_v48  ;;  %5530 = vrot.lane.b32.xlu1 %v11423_v10, %s9359_s28  ;;  %v5720_v48 = vld [vmem:[#allocation2 + $0xa9] sm:$0xff] }
 0x6b2   :  { %5528 = vrot.lane.b32.xlu0 %v11425_v18, %s9359_s28 }
 0x6b3   :  { %v5163_v41 = vpop.permute.xlu1 %5162 }
 0x6b4   :  { %5307 = vst.msk [vmem:[#allocation3 + $0x178] sm:$0xff] %vm1135_vm4, %v5163_v41  ;;  %v5161_v39 = vpop.permute.xlu0 %5160 }
 0x6b5   :  { %5306 = vst.msk [vmem:[#allocation3 + $0x170] sm:$0xff] %vm1135_vm4, %v5161_v39  ;;  %5534 = vrot.lane.b32.xlu1 %v11439_v52, %s9359_s28 }
 0x6b6   :  { %5532 = vrot.lane.b32.xlu0 %v11441_v57, %s9359_s28 }
 0x6b7   :  { %v5167_v1 = vpop.permute.xlu1 %5166 }
 0x6b8   :  { %5309 = vst.msk [vmem:[#allocation3 + $0x188] sm:$0xff] %vm1135_vm4, %v5167_v1  ;;  %v5165_v63 = vpop.permute.xlu0 %5164  ;;  %v5723_v1 = vld [vmem:[#allocation2 + $0xc9] sm:$0xff] }
 0x6b9   :  { %5308 = vst.msk [vmem:[#allocation3 + $0x180] sm:$0xff] %vm1135_vm4, %v5165_v63  ;;  %5538 = vrot.lane.b32.xlu1 %v11455_v7, %s9359_s28  ;;  %v5722_v63 = vld [vmem:[#allocation2 + $0xc1] sm:$0xff] }
 0x6ba   :  { %5536 = vrot.lane.b32.xlu0 %v11457_v61, %s9359_s28 }
 0x6bb   :  { %v5171_v10 = vpop.permute.xlu1 %5170 }
 0x6bc   :  { %5311 = vst.msk [vmem:[#allocation3 + $0x198] sm:$0xff] %vm1135_vm4, %v5171_v10  ;;  %v5169_v18 = vpop.permute.xlu0 %5168 }
 0x6bd   :  { %5310 = vst.msk [vmem:[#allocation3 + $0x190] sm:$0xff] %vm1135_vm4, %v5169_v18  ;;  %5542 = vrot.lane.b32.xlu1 %v11471_v27, %s9359_s28 }
 0x6be   :  { %5540 = vrot.lane.b32.xlu0 %v11473_v55, %s9359_s28 }
 0x6bf   :  { %v5175_v52 = vpop.permute.xlu1 %5174 }
 0x6c0   :  { %5313 = vst.msk [vmem:[#allocation3 + $0x1a8] sm:$0xff] %vm1135_vm4, %v5175_v52  ;;  %v5173_v57 = vpop.permute.xlu0 %5172  ;;  %v5725_v52 = vld [vmem:[#allocation2 + $0xe1] sm:$0xff] }
 0x6c1   :  { %5312 = vst.msk [vmem:[#allocation3 + $0x1a0] sm:$0xff] %vm1135_vm4, %v5173_v57  ;;  %5546 = vrot.lane.b32.xlu1 %v11487_v23, %s9359_s28  ;;  %v13115_v23 = vld [vmem:[#allocation18_spill] sm:$0xff] }
 0x6c2   :  { %5544 = vrot.lane.b32.xlu0 %v11489_v20, %s9359_s28  ;;  %v5724_v57 = vld [vmem:[#allocation2 + $0xd9] sm:$0xff] }
 0x6c3   :  { %v5179_v7 = vpop.permute.xlu1 %5178 }
 0x6c4   :  { %5315 = vst.msk [vmem:[#allocation3 + $0x1b8] sm:$0xff] %vm1135_vm4, %v5179_v7  ;;  %v5177_v61 = vpop.permute.xlu0 %5176 }
 0x6c5   :  { %5314 = vst.msk [vmem:[#allocation3 + $0x1b0] sm:$0xff] %vm1135_vm4, %v5177_v61  ;;  %5550 = vrot.lane.b32.xlu1 %v11503_v45, %s9359_s28  ;;  %v13116_v45 = vld [vmem:[#allocation20_spill] sm:$0xff] }
 0x6c6   :  { %5548 = vrot.lane.b32.xlu0 %v11505_v32, %s9359_s28  ;;  %v13117_v32 = vld [vmem:[#allocation19_spill] sm:$0xff] }
 0x6c7   :  { %v5183_v27 = vpop.permute.xlu1 %5182 }
 0x6c8   :  { %5317 = vst.msk [vmem:[#allocation3 + $0x1c8] sm:$0xff] %vm1135_vm4, %v5183_v27  ;;  %v5181_v55 = vpop.permute.xlu0 %5180  ;;  %v5727_v27 = vld [vmem:[#allocation2 + $0xf9] sm:$0xff] }
 0x6c9   :  { %5316 = vst.msk [vmem:[#allocation3 + $0x1c0] sm:$0xff] %vm1135_vm4, %v5181_v55  ;;  %5554 = vrot.lane.b32.xlu1 %v13115_v23, %s9359_s28  ;;  %v5726_v55 = vld [vmem:[#allocation2 + $0xf1] sm:$0xff] }
 0x6ca   :  { %5552 = vrot.lane.b32.xlu0 %v11521_v2, %s9359_s28  ;;  %v13118_v2 = vld [vmem:[#allocation22_spill] sm:$0xff] }
 0x6cb   :  { %v5187_v20 = vpop.permute.xlu1 %5186 }
 0x6cc   :  { %5319 = vst.msk [vmem:[#allocation3 + $0x1d8] sm:$0xff] %vm1135_vm4, %v5187_v20  ;;  %v5185_v43 = vpop.permute.xlu0 %5184 }
 0x6cd   :  { %5318 = vst.msk [vmem:[#allocation3 + $0x1d0] sm:$0xff] %vm1135_vm4, %v5185_v43  ;;  %5558 = vrot.lane.b32.xlu1 %v13116_v45, %s9359_s28  ;;  %v5729_v43 = vld [vmem:[#allocation2 + $0x111] sm:$0xff]  ;;  %v5728_v45 = vld [vmem:[#allocation2 + $0x109] sm:$0xff] }
 0x6ce   :  { %5556 = vrot.lane.b32.xlu0 %v13117_v32, %s9359_s28 }
 0x6cf   :  { %v5191_v16 = vpop.permute.xlu1 %5190 }
 0x6d0   :  { %5321 = vst.msk [vmem:[#allocation3 + $0x1e8] sm:$0xff] %vm1135_vm4, %v5191_v16  ;;  %v5189_v29 = vpop.permute.xlu0 %5188 }
 0x6d1   :  { %5320 = vst.msk [vmem:[#allocation3 + $0x1e0] sm:$0xff] %vm1135_vm4, %v5189_v29  ;;  %5562 = vrot.lane.b32.xlu1 %v11555_v40, %s9359_s28  ;;  %v13121_v40 = vld [vmem:[#allocation24_spill] sm:$0xff] }
 0x6d2   :  { %5560 = vrot.lane.b32.xlu0 %v13118_v2, %s9359_s28  ;;  %v5731_v29 = vld [vmem:[#allocation2 + $0x129] sm:$0xff]  ;;  %v5730_v2 = vld [vmem:[#allocation2 + $0x121] sm:$0xff] }
 0x6d3   :  { %v5195_v11 = vpop.permute.xlu1 %5194 }
 0x6d4   :  { %5323 = vst.msk [vmem:[#allocation3 + $0x1f8] sm:$0xff] %vm1135_vm4, %v5195_v11  ;;  %v5193_v14 = vpop.permute.xlu0 %5192 }
 0x6d5   :  { %5322 = vst.msk [vmem:[#allocation3 + $0x1f0] sm:$0xff] %vm1135_vm4, %v5193_v14  ;;  %5566 = vrot.lane.b32.xlu1 %v13119_v47, %s9359_s28  ;;  %v5733_v47 = vld [vmem:[#allocation2 + $0x141] sm:$0xff] }
 0x6d6   :  { %5564 = vrot.lane.b32.xlu0 %v13120_v51, %s9359_s28  ;;  %v5732_v51 = vld [vmem:[#allocation2 + $0x139] sm:$0xff] }
 0x6d7   :  { %v5455_v4 = vpop.permute.xlu1 %5454 }
 0x6d8   :  { %5645 = vst.msk [vmem:[#allocation3 + $0x8] sm:$0xff] %vm1520_vm5, %v5455_v4  ;;  %v5453_v19 = vpop.permute.xlu0 %5452 }
 0x6d9   :  { %5644 = vst.msk [vmem:[#allocation3] sm:$0xff] %vm1520_vm5, %v5453_v19  ;;  %5570 = vrot.lane.b32.xlu1 %v13121_v40, %s9359_s28  ;;  %v5735_v40 = vld [vmem:[#allocation2 + $0x159] sm:$0xff] }
 0x6da   :  { %5568 = vrot.lane.b32.xlu0 %v13122_v12, %s9359_s28  ;;  %v5734_v12 = vld [vmem:[#allocation2 + $0x151] sm:$0xff] }
 0x6db   :  { %v5459_v31 = vpop.permute.xlu1 %5458 }
 0x6dc   :  { %5647 = vst.msk [vmem:[#allocation3 + $0x18] sm:$0xff] %vm1520_vm5, %v5459_v31  ;;  %v5457_v22 = vpop.permute.xlu0 %5456 }
 0x6dd   :  { %5646 = vst.msk [vmem:[#allocation3 + $0x10] sm:$0xff] %vm1520_vm5, %v5457_v22  ;;  %5574 = vrot.lane.b32.xlu1 %v13123_v17, %s9359_s28  ;;  %v5737_v17 = vld [vmem:[#allocation2 + $0x171] sm:$0xff] }
 0x6de   :  { %5572 = vrot.lane.b32.xlu0 %v13124_v13, %s9359_s28  ;;  %v5736_v13 = vld [vmem:[#allocation2 + $0x169] sm:$0xff] }
 0x6df   :  { %v5463_v26 = vpop.permute.xlu1 %5462 }
 0x6e0   :  { %5649 = vst.msk [vmem:[#allocation3 + $0x28] sm:$0xff] %vm1520_vm5, %v5463_v26  ;;  %v5461_v24 = vpop.permute.xlu0 %5460 }
 0x6e1   :  { %5648 = vst.msk [vmem:[#allocation3 + $0x20] sm:$0xff] %vm1520_vm5, %v5461_v24  ;;  %5578 = vrot.lane.b32.xlu1 %v5387_v46, %s9359_s28  ;;  %v5739_v46 = vld [vmem:[#allocation2 + $0x189] sm:$0xff] }
 0x6e2   :  { %5576 = vrot.lane.b32.xlu0 %v5386_v44, %s9359_s28  ;;  %v5738_v44 = vld [vmem:[#allocation2 + $0x181] sm:$0xff] }
 0x6e3   :  { %v5467_v8 = vpop.permute.xlu1 %5466 }
 0x6e4   :  { %5651 = vst.msk [vmem:[#allocation3 + $0x38] sm:$0xff] %vm1520_vm5, %v5467_v8  ;;  %v5465_v58 = vpop.permute.xlu0 %5464 }
 0x6e5   :  { %5650 = vst.msk [vmem:[#allocation3 + $0x30] sm:$0xff] %vm1520_vm5, %v5465_v58  ;;  %5838 = vrot.lane.b32.xlu1 %v5709_v21, %s9360_s29  ;;  %v5741_v21 = vld [vmem:[#allocation2 + $0x1d1] sm:$0xff] }
 0x6e6   :  { %5836 = vrot.lane.b32.xlu0 %v5708_v15, %s9360_s29  ;;  %v5740_v15 = vld [vmem:[#allocation2 + $0x1c9] sm:$0xff] }
 0x6e7   :  { %v5471_v37 = vpop.permute.xlu1 %5470 }
 0x6e8   :  { %5653 = vst.msk [vmem:[#allocation3 + $0x48] sm:$0xff] %vm1520_vm5, %v5471_v37  ;;  %v5469_v53 = vpop.permute.xlu0 %5468 }
 0x6e9   :  { %5652 = vst.msk [vmem:[#allocation3 + $0x40] sm:$0xff] %vm1520_vm5, %v5469_v53  ;;  %5842 = vrot.lane.b32.xlu1 %v11929_v30, %s9360_s29 }
 0x6ea   :  { %5840 = vrot.lane.b32.xlu0 %v11934_v35, %s9360_s29 }
 0x6eb   :  { %v5475_v50 = vpop.permute.xlu1 %5474 }
 0x6ec   :  { %5655 = vst.msk [vmem:[#allocation3 + $0x58] sm:$0xff] %vm1520_vm5, %v5475_v50  ;;  %v5473_v54 = vpop.permute.xlu0 %5472  ;;  %v5743_v50 = vld [vmem:[#allocation2 + $0x1e9] sm:$0xff] }
 0x6ed   :  { %5654 = vst.msk [vmem:[#allocation3 + $0x50] sm:$0xff] %vm1520_vm5, %v5473_v54  ;;  %5846 = vrot.lane.b32.xlu1 %v11939_v9, %s9360_s29  ;;  %v5742_v54 = vld [vmem:[#allocation2 + $0x1e1] sm:$0xff] }
 0x6ee   :  { %5844 = vrot.lane.b32.xlu0 %v11944_v6, %s9360_s29 }
 0x6ef   :  { %v5479_v0 = vpop.permute.xlu1 %5478 }
 0x6f0   :  { %5657 = vst.msk [vmem:[#allocation3 + $0x68] sm:$0xff] %vm1520_vm5, %v5479_v0  ;;  %v5477_v25 = vpop.permute.xlu0 %5476 }
 0x6f1   :  { %5656 = vst.msk [vmem:[#allocation3 + $0x60] sm:$0xff] %vm1520_vm5, %v5477_v25  ;;  %5850 = vrot.lane.b32.xlu1 %v11949_v38, %s9360_s29 }
 0x6f2   :  { %5848 = vrot.lane.b32.xlu0 %v11954_v36, %s9360_s29 }
 0x6f3   :  { %v5483_v62 = vpop.permute.xlu1 %5482 }
 0x6f4   :  { %5659 = vst.msk [vmem:[#allocation3 + $0x78] sm:$0xff] %vm1520_vm5, %v5483_v62  ;;  %v5481_v56 = vpop.permute.xlu0 %5480  ;;  %v5745_v62 = vld [vmem:[#allocation2 + $0x201] sm:$0xff] }
 0x6f5   :  { %5658 = vst.msk [vmem:[#allocation3 + $0x70] sm:$0xff] %vm1520_vm5, %v5481_v56  ;;  %5854 = vrot.lane.b32.xlu1 %v11959_v3, %s9360_s29  ;;  %v5744_v56 = vld [vmem:[#allocation2 + $0x1f9] sm:$0xff] }
 0x6f6   :  { %5852 = vrot.lane.b32.xlu0 %v11964_v60, %s9360_s29 }
 0x6f7   :  { %v5487_v34 = vpop.permute.xlu1 %5486 }
 0x6f8   :  { %5661 = vst.msk [vmem:[#allocation3 + $0x88] sm:$0xff] %vm1520_vm5, %v5487_v34  ;;  %v5485_v49 = vpop.permute.xlu0 %5484 }
 0x6f9   :  { %5660 = vst.msk [vmem:[#allocation3 + $0x80] sm:$0xff] %vm1520_vm5, %v5485_v49  ;;  %5858 = vrot.lane.b32.xlu1 %v5719_v28, %s9360_s29  ;;  %v5747_v28 = vld [vmem:[#allocation2 + $0x219] sm:$0xff] }
 0x6fa   :  { %5856 = vrot.lane.b32.xlu0 %v11971_v33, %s9360_s29 }
 0x6fb   :  { %v5491_v42 = vpop.permute.xlu1 %5490 }
 0x6fc   :  { %5663 = vst.msk [vmem:[#allocation3 + $0x98] sm:$0xff] %vm1520_vm5, %v5491_v42  ;;  %v5489_v5 = vpop.permute.xlu0 %5488  ;;  %v5746_v42 = vld [vmem:[#allocation2 + $0x211] sm:$0xff] }
 0x6fd   :  { %5662 = vst.msk [vmem:[#allocation3 + $0x90] sm:$0xff] %vm1520_vm5, %v5489_v5  ;;  %5862 = vrot.lane.b32.xlu1 %v5721_v59, %s9360_s29 }
 0x6fe   :  { %5860 = vrot.lane.b32.xlu0 %v5720_v48, %s9360_s29  ;;  %v5749_v48 = vld [vmem:[#allocation2 + $0x231] sm:$0xff] }
 0x6ff   :  { %v5495_v41 = vpop.permute.xlu1 %5494 }
 0x700   :  { %5665 = vst.msk [vmem:[#allocation3 + $0xa8] sm:$0xff] %vm1520_vm5, %v5495_v41  ;;  %v5493_v39 = vpop.permute.xlu0 %5492  ;;  %v5748_v41 = vld [vmem:[#allocation2 + $0x229] sm:$0xff] }
 0x701   :  { %5664 = vst.msk [vmem:[#allocation3 + $0xa0] sm:$0xff] %vm1520_vm5, %v5493_v39  ;;  %5866 = vrot.lane.b32.xlu1 %v5723_v1, %s9360_s29 }
 0x702   :  { %5864 = vrot.lane.b32.xlu0 %v5722_v63, %s9360_s29  ;;  %v5751_v63 = vld [vmem:[#allocation2 + $0x249] sm:$0xff] }
 0x703   :  { %v5499_v10 = vpop.permute.xlu1 %5498 }
 0x704   :  { %5667 = vst.msk [vmem:[#allocation3 + $0xb8] sm:$0xff] %vm1520_vm5, %v5499_v10  ;;  %v5497_v18 = vpop.permute.xlu0 %5496  ;;  %v5750_v10 = vld [vmem:[#allocation2 + $0x241] sm:$0xff] }
 0x705   :  { %5666 = vst.msk [vmem:[#allocation3 + $0xb0] sm:$0xff] %vm1520_vm5, %v5497_v18  ;;  %5870 = vrot.lane.b32.xlu1 %v5725_v52, %s9360_s29 }
 0x706   :  { %5868 = vrot.lane.b32.xlu0 %v5724_v57, %s9360_s29  ;;  %v5753_v57 = vld [vmem:[#allocation2 + $0x261] sm:$0xff] }
 0x707   :  { %v5503_v7 = vpop.permute.xlu1 %5502 }
 0x708   :  { %5669 = vst.msk [vmem:[#allocation3 + $0xc8] sm:$0xff] %vm1520_vm5, %v5503_v7  ;;  %v5501_v61 = vpop.permute.xlu0 %5500  ;;  %v5752_v7 = vld [vmem:[#allocation2 + $0x259] sm:$0xff] }
 0x709   :  { %5668 = vst.msk [vmem:[#allocation3 + $0xc0] sm:$0xff] %vm1520_vm5, %v5501_v61  ;;  %5874 = vrot.lane.b32.xlu1 %v5727_v27, %s9360_s29 }
 0x70a   :  { %5872 = vrot.lane.b32.xlu0 %v5726_v55, %s9360_s29  ;;  %v5755_v55 = vld [vmem:[#allocation2 + $0x279] sm:$0xff] }
 0x70b   :  { %v5507_v23 = vpop.permute.xlu1 %5506 }
 0x70c   :  { %5671 = vst.msk [vmem:[#allocation3 + $0xd8] sm:$0xff] %vm1520_vm5, %v5507_v23  ;;  %v5505_v20 = vpop.permute.xlu0 %5504  ;;  %v5754_v23 = vld [vmem:[#allocation2 + $0x271] sm:$0xff] }
 0x70d   :  { %5670 = vst.msk [vmem:[#allocation3 + $0xd0] sm:$0xff] %vm1520_vm5, %v5505_v20  ;;  %5878 = vrot.lane.b32.xlu1 %v5729_v43, %s9360_s29 }
 0x70e   :  { %5876 = vrot.lane.b32.xlu0 %v5728_v45, %s9360_s29  ;;  %v5757_v45 = vld [vmem:[#allocation2 + $0x291] sm:$0xff] }
 0x70f   :  { %v5511_v32 = vpop.permute.xlu1 %5510 }
 0x710   :  { %5673 = vst.msk [vmem:[#allocation3 + $0xe8] sm:$0xff] %vm1520_vm5, %v5511_v32  ;;  %v5509_v16 = vpop.permute.xlu0 %5508  ;;  %v5756_v32 = vld [vmem:[#allocation2 + $0x289] sm:$0xff] }
 0x711   :  { %5672 = vst.msk [vmem:[#allocation3 + $0xe0] sm:$0xff] %vm1520_vm5, %v5509_v16  ;;  %5882 = vrot.lane.b32.xlu1 %v5731_v29, %s9360_s29 }
 0x712   :  { %5880 = vrot.lane.b32.xlu0 %v5730_v2, %s9360_s29  ;;  %v5759_v2 = vld [vmem:[#allocation2 + $0x2a9] sm:$0xff] }
 0x713   :  { %v5515_v11 = vpop.permute.xlu1 %5514 }
 0x714   :  { %5675 = vst.msk [vmem:[#allocation3 + $0xf8] sm:$0xff] %vm1520_vm5, %v5515_v11  ;;  %v5513_v14 = vpop.permute.xlu0 %5512  ;;  %v5758_v11 = vld [vmem:[#allocation2 + $0x2a1] sm:$0xff] }
 0x715   :  { %5674 = vst.msk [vmem:[#allocation3 + $0xf0] sm:$0xff] %vm1520_vm5, %v5513_v14  ;;  %5886 = vrot.lane.b32.xlu1 %v5733_v47, %s9360_s29 }
 0x716   :  { %5884 = vrot.lane.b32.xlu0 %v5732_v51, %s9360_s29  ;;  %v5761_v51 = vld [vmem:[#allocation2 + $0x2c1] sm:$0xff] }
 0x717   :  { %v5519_v4 = vpop.permute.xlu1 %5518 }
 0x718   :  { %5677 = vst.msk [vmem:[#allocation3 + $0x108] sm:$0xff] %vm1520_vm5, %v5519_v4  ;;  %v5517_v19 = vpop.permute.xlu0 %5516  ;;  %v5760_v4 = vld [vmem:[#allocation2 + $0x2b9] sm:$0xff] }
 0x719   :  { %5676 = vst.msk [vmem:[#allocation3 + $0x100] sm:$0xff] %vm1520_vm5, %v5517_v19  ;;  %5890 = vrot.lane.b32.xlu1 %v5735_v40, %s9360_s29 }
 0x71a   :  { %5888 = vrot.lane.b32.xlu0 %v5734_v12, %s9360_s29  ;;  %v5763_v12 = vld [vmem:[#allocation2 + $0x2d9] sm:$0xff] }
 0x71b   :  { %v5523_v31 = vpop.permute.xlu1 %5522 }
 0x71c   :  { %5679 = vst.msk [vmem:[#allocation3 + $0x118] sm:$0xff] %vm1520_vm5, %v5523_v31  ;;  %v5521_v22 = vpop.permute.xlu0 %5520  ;;  %v5762_v31 = vld [vmem:[#allocation2 + $0x2d1] sm:$0xff] }
 0x71d   :  { %5678 = vst.msk [vmem:[#allocation3 + $0x110] sm:$0xff] %vm1520_vm5, %v5521_v22  ;;  %5894 = vrot.lane.b32.xlu1 %v5737_v17, %s9360_s29 }
 0x71e   :  { %5892 = vrot.lane.b32.xlu0 %v5736_v13, %s9360_s29  ;;  %v5765_v13 = vld [vmem:[#allocation2 + $0x2f1] sm:$0xff] }
 0x71f   :  { %v5527_v26 = vpop.permute.xlu1 %5526 }
 0x720   :  { %5681 = vst.msk [vmem:[#allocation3 + $0x128] sm:$0xff] %vm1520_vm5, %v5527_v26  ;;  %v5525_v24 = vpop.permute.xlu0 %5524  ;;  %v5764_v26 = vld [vmem:[#allocation2 + $0x2e9] sm:$0xff] }
 0x721   :  { %5680 = vst.msk [vmem:[#allocation3 + $0x120] sm:$0xff] %vm1520_vm5, %v5525_v24  ;;  %5898 = vrot.lane.b32.xlu1 %v5739_v46, %s9360_s29 }
 0x722   :  { %5896 = vrot.lane.b32.xlu0 %v5738_v44, %s9360_s29  ;;  %v5767_v44 = vld [vmem:[#allocation2 + $0x309] sm:$0xff] }
 0x723   :  { %v5531_v8 = vpop.permute.xlu1 %5530 }
 0x724   :  { %5683 = vst.msk [vmem:[#allocation3 + $0x138] sm:$0xff] %vm1520_vm5, %v5531_v8  ;;  %v5529_v58 = vpop.permute.xlu0 %5528  ;;  %v5766_v8 = vld [vmem:[#allocation2 + $0x301] sm:$0xff] }
 0x725   :  { %5682 = vst.msk [vmem:[#allocation3 + $0x130] sm:$0xff] %vm1520_vm5, %v5529_v58  ;;  %5902 = vrot.lane.b32.xlu1 %v5741_v21, %s9360_s29 }
 0x726   :  { %5900 = vrot.lane.b32.xlu0 %v5740_v15, %s9360_s29  ;;  %v5769_v15 = vld [vmem:[#allocation2 + $0x321] sm:$0xff] }
 0x727   :  { %v5535_v37 = vpop.permute.xlu1 %5534 }
 0x728   :  { %5685 = vst.msk [vmem:[#allocation3 + $0x148] sm:$0xff] %vm1520_vm5, %v5535_v37  ;;  %v5533_v53 = vpop.permute.xlu0 %5532  ;;  %v5768_v37 = vld [vmem:[#allocation2 + $0x319] sm:$0xff] }
 0x729   :  { %5684 = vst.msk [vmem:[#allocation3 + $0x140] sm:$0xff] %vm1520_vm5, %v5533_v53  ;;  %5906 = vrot.lane.b32.xlu1 %v5743_v50, %s9360_s29 }
 0x72a   :  { %5904 = vrot.lane.b32.xlu0 %v5742_v54, %s9360_s29  ;;  %v5771_v54 = vld [vmem:[#allocation2 + $0x339] sm:$0xff] }
 0x72b   :  { %v5539_v0 = vpop.permute.xlu1 %5538 }
 0x72c   :  { %5687 = vst.msk [vmem:[#allocation3 + $0x158] sm:$0xff] %vm1520_vm5, %v5539_v0  ;;  %v5537_v25 = vpop.permute.xlu0 %5536  ;;  %v5770_v0 = vld [vmem:[#allocation2 + $0x331] sm:$0xff] }
 0x72d   :  { %5686 = vst.msk [vmem:[#allocation3 + $0x150] sm:$0xff] %vm1520_vm5, %v5537_v25  ;;  %5910 = vrot.lane.b32.xlu1 %v5745_v62, %s9360_s29 }
 0x72e   :  { %5908 = vrot.lane.b32.xlu0 %v5744_v56, %s9360_s29  ;;  %v6093_v56 = vld [vmem:[#allocation2 + $0x22] sm:$0xff] }
 0x72f   :  { %v5543_v34 = vpop.permute.xlu1 %5542 }
 0x730   :  { %5689 = vst.msk [vmem:[#allocation3 + $0x168] sm:$0xff] %vm1520_vm5, %v5543_v34  ;;  %v5541_v49 = vpop.permute.xlu0 %5540  ;;  %v6092_v34 = vld [vmem:[#allocation2 + $0x1a] sm:$0xff] }
 0x731   :  { %5688 = vst.msk [vmem:[#allocation3 + $0x160] sm:$0xff] %vm1520_vm5, %v5541_v49  ;;  %5914 = vrot.lane.b32.xlu1 %v5747_v28, %s9360_s29 }
 0x732   :  { %5912 = vrot.lane.b32.xlu0 %v5746_v42, %s9360_s29  ;;  %v12084_v42 = vld [vmem:[#allocation2 + $0x3a] sm:$0xff] }
 0x733   :  { %v5547_v5 = vpop.permute.xlu1 %5546 }
 0x734   :  { %5691 = vst.msk [vmem:[#allocation3 + $0x178] sm:$0xff] %vm1520_vm5, %v5547_v5  ;;  %v5545_v59 = vpop.permute.xlu0 %5544  ;;  %v12089_v5 = vld [vmem:[#allocation2 + $0x32] sm:$0xff] }
 0x735   :  { %5690 = vst.msk [vmem:[#allocation3 + $0x170] sm:$0xff] %vm1520_vm5, %v5545_v59  ;;  %5918 = vrot.lane.b32.xlu1 %v5749_v48, %s9360_s29 }
 0x736   :  { %5916 = vrot.lane.b32.xlu0 %v5748_v41, %s9360_s29  ;;  %v12094_v41 = vld [vmem:[#allocation2 + $0x52] sm:$0xff] }
 0x737   :  { %v5551_v39 = vpop.permute.xlu1 %5550 }
 0x738   :  { %5693 = vst.msk [vmem:[#allocation3 + $0x188] sm:$0xff] %vm1520_vm5, %v5551_v39  ;;  %v5549_v1 = vpop.permute.xlu0 %5548  ;;  %v12099_v39 = vld [vmem:[#allocation2 + $0x4a] sm:$0xff] }
 0x739   :  { %5692 = vst.msk [vmem:[#allocation3 + $0x180] sm:$0xff] %vm1520_vm5, %v5549_v1  ;;  %5922 = vrot.lane.b32.xlu1 %v5751_v63, %s9360_s29 }
 0x73a   :  { %5920 = vrot.lane.b32.xlu0 %v5750_v10, %s9360_s29  ;;  %v12104_v10 = vld [vmem:[#allocation2 + $0x6a] sm:$0xff] }
 0x73b   :  { %v5555_v18 = vpop.permute.xlu1 %5554 }
 0x73c   :  { %5695 = vst.msk [vmem:[#allocation3 + $0x198] sm:$0xff] %vm1520_vm5, %v5555_v18  ;;  %v5553_v52 = vpop.permute.xlu0 %5552  ;;  %v12109_v18 = vld [vmem:[#allocation2 + $0x62] sm:$0xff] }
 0x73d   :  { %5694 = vst.msk [vmem:[#allocation3 + $0x190] sm:$0xff] %vm1520_vm5, %v5553_v52  ;;  %5926 = vrot.lane.b32.xlu1 %v5753_v57, %s9360_s29 }
 0x73e   :  { %5924 = vrot.lane.b32.xlu0 %v5752_v7, %s9360_s29  ;;  %v12114_v7 = vld [vmem:[#allocation2 + $0x82] sm:$0xff] }
 0x73f   :  { %v5559_v61 = vpop.permute.xlu1 %5558 }
 0x740   :  { %5697 = vst.msk [vmem:[#allocation3 + $0x1a8] sm:$0xff] %vm1520_vm5, %v5559_v61  ;;  %v5557_v27 = vpop.permute.xlu0 %5556  ;;  %v12119_v61 = vld [vmem:[#allocation2 + $0x7a] sm:$0xff] }
 0x741   :  { %5696 = vst.msk [vmem:[#allocation3 + $0x1a0] sm:$0xff] %vm1520_vm5, %v5557_v27  ;;  %5930 = vrot.lane.b32.xlu1 %v5755_v55, %s9360_s29 }
 0x742   :  { %5928 = vrot.lane.b32.xlu0 %v5754_v23, %s9360_s29  ;;  %v12124_v23 = vld [vmem:[#allocation2 + $0x9a] sm:$0xff] }
 0x743   :  { %v5563_v20 = vpop.permute.xlu1 %5562 }
 0x744   :  { %5699 = vst.msk [vmem:[#allocation3 + $0x1b8] sm:$0xff] %vm1520_vm5, %v5563_v20  ;;  %v5561_v43 = vpop.permute.xlu0 %5560  ;;  %v12129_v20 = vld [vmem:[#allocation2 + $0x92] sm:$0xff] }
 0x745   :  { %5698 = vst.msk [vmem:[#allocation3 + $0x1b0] sm:$0xff] %vm1520_vm5, %v5561_v43  ;;  %5934 = vrot.lane.b32.xlu1 %v5757_v45, %s9360_s29 }
 0x746   :  { %5932 = vrot.lane.b32.xlu0 %v5756_v32, %s9360_s29  ;;  %v12134_v32 = vld [vmem:[#allocation2 + $0xb2] sm:$0xff] }
 0x747   :  { %v5567_v16 = vpop.permute.xlu1 %5566 }
 0x748   :  { %5701 = vst.msk [vmem:[#allocation3 + $0x1c8] sm:$0xff] %vm1520_vm5, %v5567_v16  ;;  %v5565_v29 = vpop.permute.xlu0 %5564  ;;  %v12139_v16 = vld [vmem:[#allocation2 + $0xaa] sm:$0xff] }
 0x749   :  { %5700 = vst.msk [vmem:[#allocation3 + $0x1c0] sm:$0xff] %vm1520_vm5, %v5565_v29  ;;  %5938 = vrot.lane.b32.xlu1 %v5759_v2, %s9360_s29 }
 0x74a   :  { %5936 = vrot.lane.b32.xlu0 %v5758_v11, %s9360_s29  ;;  %v12144_v11 = vld [vmem:[#allocation2 + $0xca] sm:$0xff] }
 0x74b   :  { %v5571_v14 = vpop.permute.xlu1 %5570 }
 0x74c   :  { %5703 = vst.msk [vmem:[#allocation3 + $0x1d8] sm:$0xff] %vm1520_vm5, %v5571_v14  ;;  %v5569_v47 = vpop.permute.xlu0 %5568  ;;  %v12149_v14 = vld [vmem:[#allocation2 + $0xc2] sm:$0xff] }
 0x74d   :  { %5702 = vst.msk [vmem:[#allocation3 + $0x1d0] sm:$0xff] %vm1520_vm5, %v5569_v47  ;;  %5942 = vrot.lane.b32.xlu1 %v5761_v51, %s9360_s29 }
 0x74e   :  { %5940 = vrot.lane.b32.xlu0 %v5760_v4, %s9360_s29  ;;  %v12154_v4 = vld [vmem:[#allocation2 + $0xe2] sm:$0xff] }
 0x74f   :  { %v5575_v19 = vpop.permute.xlu1 %5574 }
 0x750   :  { %5705 = vst.msk [vmem:[#allocation3 + $0x1e8] sm:$0xff] %vm1520_vm5, %v5575_v19  ;;  %v5573_v40 = vpop.permute.xlu0 %5572  ;;  %v12159_v19 = vld [vmem:[#allocation2 + $0xda] sm:$0xff] }
 0x751   :  { %5704 = vst.msk [vmem:[#allocation3 + $0x1e0] sm:$0xff] %vm1520_vm5, %v5573_v40  ;;  %5946 = vrot.lane.b32.xlu1 %v5763_v12, %s9360_s29 }
 0x752   :  { %5944 = vrot.lane.b32.xlu0 %v5762_v31, %s9360_s29  ;;  %v12164_v31 = vld [vmem:[#allocation2 + $0xfa] sm:$0xff] }
 0x753   :  { %v5579_v22 = vpop.permute.xlu1 %5578 }
 0x754   :  { %5707 = vst.msk [vmem:[#allocation3 + $0x1f8] sm:$0xff] %vm1520_vm5, %v5579_v22  ;;  %v5577_v17 = vpop.permute.xlu0 %5576  ;;  %v12169_v22 = vld [vmem:[#allocation2 + $0xf2] sm:$0xff] }
 0x755   :  { %5706 = vst.msk [vmem:[#allocation3 + $0x1f0] sm:$0xff] %vm1520_vm5, %v5577_v17  ;;  %5950 = vrot.lane.b32.xlu1 %v5765_v13, %s9360_s29 }
 0x756   :  { %5948 = vrot.lane.b32.xlu0 %v5764_v26, %s9360_s29  ;;  %v12174_v26 = vld [vmem:[#allocation2 + $0x112] sm:$0xff] }
 0x757   :  { %v5839_v24 = vpop.permute.xlu1 %5838 }
 0x758   :  { %6029 = vst.msk [vmem:[#allocation3 + $0x8] sm:$0xff] %vm1905_vm6, %v5839_v24  ;;  %v5837_v46 = vpop.permute.xlu0 %5836  ;;  %v12179_v24 = vld [vmem:[#allocation2 + $0x10a] sm:$0xff] }
 0x759   :  { %6028 = vst.msk [vmem:[#allocation3] sm:$0xff] %vm1905_vm6, %v5837_v46  ;;  %5954 = vrot.lane.b32.xlu1 %v5767_v44, %s9360_s29 }
 0x75a   :  { %5952 = vrot.lane.b32.xlu0 %v5766_v8, %s9360_s29  ;;  %v12184_v8 = vld [vmem:[#allocation2 + $0x12a] sm:$0xff] }
 0x75b   :  { %v5843_v58 = vpop.permute.xlu1 %5842 }
 0x75c   :  { %6031 = vst.msk [vmem:[#allocation3 + $0x18] sm:$0xff] %vm1905_vm6, %v5843_v58  ;;  %v5841_v21 = vpop.permute.xlu0 %5840  ;;  %v12189_v58 = vld [vmem:[#allocation2 + $0x122] sm:$0xff] }
 0x75d   :  { %6030 = vst.msk [vmem:[#allocation3 + $0x10] sm:$0xff] %vm1905_vm6, %v5841_v21  ;;  %5958 = vrot.lane.b32.xlu1 %v5769_v15, %s9360_s29 }
 0x75e   :  { %5956 = vrot.lane.b32.xlu0 %v5768_v37, %s9360_s29  ;;  %v12194_v37 = vld [vmem:[#allocation2 + $0x142] sm:$0xff] }
 0x75f   :  { %v5847_v53 = vpop.permute.xlu1 %5846 }
 0x760   :  { %6033 = vst.msk [vmem:[#allocation3 + $0x28] sm:$0xff] %vm1905_vm6, %v5847_v53  ;;  %v5845_v50 = vpop.permute.xlu0 %5844  ;;  %v12199_v53 = vld [vmem:[#allocation2 + $0x13a] sm:$0xff] }
 0x761   :  { %6032 = vst.msk [vmem:[#allocation3 + $0x20] sm:$0xff] %vm1905_vm6, %v5845_v50  ;;  %5962 = vrot.lane.b32.xlu1 %v5771_v54, %s9360_s29 }
 0x762   :  { %5960 = vrot.lane.b32.xlu0 %v5770_v0, %s9360_s29  ;;  %v12204_v0 = vld [vmem:[#allocation2 + $0x15a] sm:$0xff] }
 0x763   :  { %v5851_v25 = vpop.permute.xlu1 %5850 }
 0x764   :  { %6035 = vst.msk [vmem:[#allocation3 + $0x38] sm:$0xff] %vm1905_vm6, %v5851_v25  ;;  %v5849_v62 = vpop.permute.xlu0 %5848  ;;  %v12209_v25 = vld [vmem:[#allocation2 + $0x152] sm:$0xff] }
 0x765   :  { %6034 = vst.msk [vmem:[#allocation3 + $0x30] sm:$0xff] %vm1905_vm6, %v5849_v62  ;;  %6222 = vrot.lane.b32.xlu1 %v6093_v56, %s9361_s3 }
 0x766   :  { %6220 = vrot.lane.b32.xlu0 %v6092_v34, %s9361_s3  ;;  %v12214_v34 = vld [vmem:[#allocation2 + $0x172] sm:$0xff] }
 0x767   :  { %v5855_v49 = vpop.permute.xlu1 %5854 }
 0x768   :  { %6037 = vst.msk [vmem:[#allocation3 + $0x48] sm:$0xff] %vm1905_vm6, %v5855_v49  ;;  %v5853_v28 = vpop.permute.xlu0 %5852  ;;  %v12219_v49 = vld [vmem:[#allocation2 + $0x16a] sm:$0xff] }
 0x769   :  { %6036 = vst.msk [vmem:[#allocation3 + $0x40] sm:$0xff] %vm1905_vm6, %v5853_v28  ;;  %6226 = vrot.lane.b32.xlu1 %v12084_v42, %s9361_s3 }
 0x76a   :  { %6224 = vrot.lane.b32.xlu0 %v12089_v5, %s9361_s3 }
 0x76b   :  { %v5859_v59 = vpop.permute.xlu1 %5858 }
 0x76c   :  { %6039 = vst.msk [vmem:[#allocation3 + $0x58] sm:$0xff] %vm1905_vm6, %v5859_v59  ;;  %v5857_v48 = vpop.permute.xlu0 %5856 }
 0x76d   :  { %6038 = vst.msk [vmem:[#allocation3 + $0x50] sm:$0xff] %vm1905_vm6, %v5857_v48  ;;  %6230 = vrot.lane.b32.xlu1 %v12094_v41, %s9361_s3  ;;  %v12224_v48 = vld [vmem:[#allocation2 + $0x18a] sm:$0xff] }
 0x76e   :  { %6228 = vrot.lane.b32.xlu0 %v12099_v39, %s9361_s3 }
 0x76f   :  { %v5863_v1 = vpop.permute.xlu1 %5862 }
 0x770   :  { %6041 = vst.msk [vmem:[#allocation3 + $0x68] sm:$0xff] %vm1905_vm6, %v5863_v1  ;;  %v5861_v63 = vpop.permute.xlu0 %5860  ;;  %v12229_v1 = vld [vmem:[#allocation2 + $0x182] sm:$0xff] }
 0x771   :  { %6040 = vst.msk [vmem:[#allocation3 + $0x60] sm:$0xff] %vm1905_vm6, %v5861_v63  ;;  %6234 = vrot.lane.b32.xlu1 %v12104_v10, %s9361_s3 }
 0x772   :  { %6232 = vrot.lane.b32.xlu0 %v12109_v18, %s9361_s3 }
 0x773   :  { %v5867_v52 = vpop.permute.xlu1 %5866 }
 0x774   :  { %6043 = vst.msk [vmem:[#allocation3 + $0x78] sm:$0xff] %vm1905_vm6, %v5867_v52  ;;  %v5865_v57 = vpop.permute.xlu0 %5864 }
 0x775   :  { %6042 = vst.msk [vmem:[#allocation3 + $0x70] sm:$0xff] %vm1905_vm6, %v5865_v57  ;;  %6238 = vrot.lane.b32.xlu1 %v12114_v7, %s9361_s3  ;;  %v6125_v57 = vld [vmem:[#allocation2 + $0x1d2] sm:$0xff] }
 0x776   :  { %6236 = vrot.lane.b32.xlu0 %v12119_v61, %s9361_s3 }
 0x777   :  { %v5871_v27 = vpop.permute.xlu1 %5870 }
 0x778   :  { %6045 = vst.msk [vmem:[#allocation3 + $0x88] sm:$0xff] %vm1905_vm6, %v5871_v27  ;;  %v5869_v55 = vpop.permute.xlu0 %5868  ;;  %v6124_v27 = vld [vmem:[#allocation2 + $0x1ca] sm:$0xff] }
 0x779   :  { %6044 = vst.msk [vmem:[#allocation3 + $0x80] sm:$0xff] %vm1905_vm6, %v5869_v55  ;;  %6242 = vrot.lane.b32.xlu1 %v12124_v23, %s9361_s3 }
 0x77a   :  { %6240 = vrot.lane.b32.xlu0 %v12129_v20, %s9361_s3 }
 0x77b   :  { %v5875_v43 = vpop.permute.xlu1 %5874 }
 0x77c   :  { %6047 = vst.msk [vmem:[#allocation3 + $0x98] sm:$0xff] %vm1905_vm6, %v5875_v43  ;;  %v5873_v45 = vpop.permute.xlu0 %5872 }
 0x77d   :  { %6046 = vst.msk [vmem:[#allocation3 + $0x90] sm:$0xff] %vm1905_vm6, %v5873_v45  ;;  %6246 = vrot.lane.b32.xlu1 %v12134_v32, %s9361_s3  ;;  %v12238_v45 = vld [vmem:[#allocation2 + $0x1ea] sm:$0xff] }
 0x77e   :  { %6244 = vrot.lane.b32.xlu0 %v12139_v16, %s9361_s3 }
 0x77f   :  { %v5879_v29 = vpop.permute.xlu1 %5878 }
 0x780   :  { %6049 = vst.msk [vmem:[#allocation3 + $0xa8] sm:$0xff] %vm1905_vm6, %v5879_v29  ;;  %v5877_v2 = vpop.permute.xlu0 %5876  ;;  %v12243_v29 = vld [vmem:[#allocation2 + $0x1e2] sm:$0xff] }
 0x781   :  { %6048 = vst.msk [vmem:[#allocation3 + $0xa0] sm:$0xff] %vm1905_vm6, %v5877_v2  ;;  %6250 = vrot.lane.b32.xlu1 %v12144_v11, %s9361_s3 }
 0x782   :  { %6248 = vrot.lane.b32.xlu0 %v12149_v14, %s9361_s3 }
 0x783   :  { %v5883_v47 = vpop.permute.xlu1 %5882 }
 0x784   :  { %6051 = vst.msk [vmem:[#allocation3 + $0xb8] sm:$0xff] %vm1905_vm6, %v5883_v47  ;;  %v5881_v51 = vpop.permute.xlu0 %5880 }
 0x785   :  { %6050 = vst.msk [vmem:[#allocation3 + $0xb0] sm:$0xff] %vm1905_vm6, %v5881_v51  ;;  %6254 = vrot.lane.b32.xlu1 %v12154_v4, %s9361_s3  ;;  %v6129_v51 = vld [vmem:[#allocation2 + $0x202] sm:$0xff] }
 0x786   :  { %6252 = vrot.lane.b32.xlu0 %v12159_v19, %s9361_s3 }
 0x787   :  { %v5887_v40 = vpop.permute.xlu1 %5886 }
 0x788   :  { %6053 = vst.msk [vmem:[#allocation3 + $0xc8] sm:$0xff] %vm1905_vm6, %v5887_v40  ;;  %v5885_v12 = vpop.permute.xlu0 %5884  ;;  %v12250_v40 = vld [vmem:[#allocation2 + $0x1fa] sm:$0xff] }
 0x789   :  { %6052 = vst.msk [vmem:[#allocation3 + $0xc0] sm:$0xff] %vm1905_vm6, %v5885_v12  ;;  %6258 = vrot.lane.b32.xlu1 %v12164_v31, %s9361_s3 }
 0x78a   :  { %6256 = vrot.lane.b32.xlu0 %v12169_v22, %s9361_s3 }
 0x78b   :  { %v5891_v17 = vpop.permute.xlu1 %5890 }
 0x78c   :  { %6055 = vst.msk [vmem:[#allocation3 + $0xd8] sm:$0xff] %vm1905_vm6, %v5891_v17  ;;  %v5889_v13 = vpop.permute.xlu0 %5888 }
 0x78d   :  { %6054 = vst.msk [vmem:[#allocation3 + $0xd0] sm:$0xff] %vm1905_vm6, %v5889_v13  ;;  %6262 = vrot.lane.b32.xlu1 %v12174_v26, %s9361_s3  ;;  %v6131_v13 = vld [vmem:[#allocation2 + $0x21a] sm:$0xff] }
 0x78e   :  { %6260 = vrot.lane.b32.xlu0 %v12179_v24, %s9361_s3 }
 0x78f   :  { %v5895_v46 = vpop.permute.xlu1 %5894 }
 0x790   :  { %6057 = vst.msk [vmem:[#allocation3 + $0xe8] sm:$0xff] %vm1905_vm6, %v5895_v46  ;;  %v5893_v44 = vpop.permute.xlu0 %5892  ;;  %v6130_v46 = vld [vmem:[#allocation2 + $0x212] sm:$0xff] }
 0x791   :  { %6056 = vst.msk [vmem:[#allocation3 + $0xe0] sm:$0xff] %vm1905_vm6, %v5893_v44  ;;  %6266 = vrot.lane.b32.xlu1 %v12184_v8, %s9361_s3 }
 0x792   :  { %6264 = vrot.lane.b32.xlu0 %v12189_v58, %s9361_s3 }
 0x793   :  { %v5899_v21 = vpop.permute.xlu1 %5898 }
 0x794   :  { %6059 = vst.msk [vmem:[#allocation3 + $0xf8] sm:$0xff] %vm1905_vm6, %v5899_v21  ;;  %v5897_v15 = vpop.permute.xlu0 %5896 }
 0x795   :  { %6058 = vst.msk [vmem:[#allocation3 + $0xf0] sm:$0xff] %vm1905_vm6, %v5897_v15  ;;  %6270 = vrot.lane.b32.xlu1 %v12194_v37, %s9361_s3  ;;  %v6133_v15 = vld [vmem:[#allocation2 + $0x232] sm:$0xff] }
 0x796   :  { %6268 = vrot.lane.b32.xlu0 %v12199_v53, %s9361_s3 }
 0x797   :  { %v5903_v50 = vpop.permute.xlu1 %5902 }
 0x798   :  { %6061 = vst.msk [vmem:[#allocation3 + $0x108] sm:$0xff] %vm1905_vm6, %v5903_v50  ;;  %v5901_v54 = vpop.permute.xlu0 %5900  ;;  %v6132_v50 = vld [vmem:[#allocation2 + $0x22a] sm:$0xff] }
 0x799   :  { %6060 = vst.msk [vmem:[#allocation3 + $0x100] sm:$0xff] %vm1905_vm6, %v5901_v54  ;;  %6274 = vrot.lane.b32.xlu1 %v12204_v0, %s9361_s3 }
 0x79a   :  { %6272 = vrot.lane.b32.xlu0 %v12209_v25, %s9361_s3 }
 0x79b   :  { %v5907_v62 = vpop.permute.xlu1 %5906 }
 0x79c   :  { %6063 = vst.msk [vmem:[#allocation3 + $0x118] sm:$0xff] %vm1905_vm6, %v5907_v62  ;;  %v5905_v56 = vpop.permute.xlu0 %5904 }
 0x79d   :  { %6062 = vst.msk [vmem:[#allocation3 + $0x110] sm:$0xff] %vm1905_vm6, %v5905_v56  ;;  %6278 = vrot.lane.b32.xlu1 %v12214_v34, %s9361_s3  ;;  %v6135_v56 = vld [vmem:[#allocation2 + $0x24a] sm:$0xff] }
 0x79e   :  { %6276 = vrot.lane.b32.xlu0 %v12219_v49, %s9361_s3 }
 0x79f   :  { %v5911_v28 = vpop.permute.xlu1 %5910 }
 0x7a0   :  { %6065 = vst.msk [vmem:[#allocation3 + $0x128] sm:$0xff] %vm1905_vm6, %v5911_v28  ;;  %v5909_v59 = vpop.permute.xlu0 %5908  ;;  %v6134_v28 = vld [vmem:[#allocation2 + $0x242] sm:$0xff] }
 0x7a1   :  { %6064 = vst.msk [vmem:[#allocation3 + $0x120] sm:$0xff] %vm1905_vm6, %v5909_v59  ;;  %6282 = vrot.lane.b32.xlu1 %v12224_v48, %s9361_s3 }
 0x7a2   :  { %6280 = vrot.lane.b32.xlu0 %v12229_v1, %s9361_s3 }
 0x7a3   :  { %v5915_v63 = vpop.permute.xlu1 %5914 }
 0x7a4   :  { %6067 = vst.msk [vmem:[#allocation3 + $0x138] sm:$0xff] %vm1905_vm6, %v5915_v63  ;;  %v5913_v52 = vpop.permute.xlu0 %5912 }
 0x7a5   :  { %6066 = vst.msk [vmem:[#allocation3 + $0x130] sm:$0xff] %vm1905_vm6, %v5913_v52  ;;  %6286 = vrot.lane.b32.xlu1 %v6125_v57, %s9361_s3  ;;  %v6137_v52 = vld [vmem:[#allocation2 + $0x262] sm:$0xff]  ;;  %v6136_v57 = vld [vmem:[#allocation2 + $0x25a] sm:$0xff] }
 0x7a6   :  { %6284 = vrot.lane.b32.xlu0 %v6124_v27, %s9361_s3 }
 0x7a7   :  { %v5919_v55 = vpop.permute.xlu1 %5918 }
 0x7a8   :  { %6069 = vst.msk [vmem:[#allocation3 + $0x148] sm:$0xff] %vm1905_vm6, %v5919_v55  ;;  %v5917_v43 = vpop.permute.xlu0 %5916 }
 0x7a9   :  { %6068 = vst.msk [vmem:[#allocation3 + $0x140] sm:$0xff] %vm1905_vm6, %v5917_v43  ;;  %6290 = vrot.lane.b32.xlu1 %v12238_v45, %s9361_s3  ;;  %v6139_v43 = vld [vmem:[#allocation2 + $0x27a] sm:$0xff] }
 0x7aa   :  { %6288 = vrot.lane.b32.xlu0 %v12243_v29, %s9361_s3 }
 0x7ab   :  { %v5923_v2 = vpop.permute.xlu1 %5922 }
 0x7ac   :  { %6071 = vst.msk [vmem:[#allocation3 + $0x158] sm:$0xff] %vm1905_vm6, %v5923_v2  ;;  %v5921_v47 = vpop.permute.xlu0 %5920  ;;  %v6138_v2 = vld [vmem:[#allocation2 + $0x272] sm:$0xff] }
 0x7ad   :  { %6070 = vst.msk [vmem:[#allocation3 + $0x150] sm:$0xff] %vm1905_vm6, %v5921_v47  ;;  %6294 = vrot.lane.b32.xlu1 %v6129_v51, %s9361_s3  ;;  %v7692_v47 = vld [vmem:[#allocation10] sm:$0xff]  ;;  %v7693_v51 = vld [vmem:[#allocation10 + $0x8] sm:$0xff] }
 0x7ae   :  { %6292 = vrot.lane.b32.xlu0 %v12250_v40, %s9361_s3 }
 0x7af   :  { %v5927_v12 = vpop.permute.xlu1 %5926 }
 0x7b0   :  { %6073 = vst.msk [vmem:[#allocation3 + $0x168] sm:$0xff] %vm1905_vm6, %v5927_v12  ;;  %v5925_v17 = vpop.permute.xlu0 %5924 }
 0x7b1   :  { %6072 = vst.msk [vmem:[#allocation3 + $0x160] sm:$0xff] %vm1905_vm6, %v5925_v17  ;;  %6298 = vrot.lane.b32.xlu1 %v6131_v13, %s9361_s3  ;;  %v9182_v17 = vpack.c.bf16 %v7693_v51, %v7692_v47 }
 0x7b2   :  { %6296 = vrot.lane.b32.xlu0 %v6130_v46, %s9361_s3  ;;  %v6476_v46 = vld [vmem:[#allocation2 + $0x30] sm:$0xff] }
 0x7b3   :  { %v5931_v44 = vpop.permute.xlu1 %5930  ;;  %9183 = vmatprep.subr.bf16.mxu1 %v9182_v17 }
 0x7b4   :  { %6075 = vst.msk [vmem:[#allocation3 + $0x178] sm:$0xff] %vm1905_vm6, %v5931_v44  ;;  %v5929_v21 = vpop.permute.xlu0 %5928  ;;  %v6140_v44 = vld [vmem:[#allocation2 + $0x28a] sm:$0xff]  ;;  %9185 = vmatpush3.bf16.msra.mxu1 %v9182_v17 }
 0x7b5   :  { %6074 = vst.msk [vmem:[#allocation3 + $0x170] sm:$0xff] %vm1905_vm6, %v5929_v21  ;;  %6302 = vrot.lane.b32.xlu1 %v6133_v15, %s9361_s3  ;;  %v7694_v21 = vld [vmem:[#allocation10 + $0x10] sm:$0xff]  ;;  %v7695_v15 = vld [vmem:[#allocation10 + $0x18] sm:$0xff] }
 0x7b6   :  { %6300 = vrot.lane.b32.xlu0 %v6132_v50, %s9361_s3 }
 0x7b7   :  { %v5935_v54 = vpop.permute.xlu1 %5934 }
 0x7b8   :  { %6077 = vst.msk [vmem:[#allocation3 + $0x188] sm:$0xff] %vm1905_vm6, %v5935_v54  ;;  %v5933_v62 = vpop.permute.xlu0 %5932  ;;  %v9186_v54 = vpack.c.bf16 %v7695_v15, %v7694_v21 }
 0x7b9   :  { %6076 = vst.msk [vmem:[#allocation3 + $0x180] sm:$0xff] %vm1905_vm6, %v5933_v62  ;;  %6306 = vrot.lane.b32.xlu1 %v6135_v56, %s9361_s3  ;;  %v6477_v56 = vld [vmem:[#allocation2 + $0x38] sm:$0xff] }
 0x7ba   :  { %6304 = vrot.lane.b32.xlu0 %v6134_v28, %s9361_s3  ;;  %9187 = vmatprep.subr.bf16.mxu1 %v9186_v54  ;;  %v7696_v28 = vld [vmem:[#allocation10 + $0x20] sm:$0xf] }
 0x7bb   :  { %v5939_v59 = vpop.permute.xlu1 %5938  ;;  %9189 = vmatpush3.bf16.msra.mxu1 %v9186_v54 }
 0x7bc   :  { %6079 = vst.msk [vmem:[#allocation3 + $0x198] sm:$0xff] %vm1905_vm6, %v5939_v59  ;;  %v5937_v63 = vpop.permute.xlu0 %5936  ;;  %9076 = vmatprep.subr.msk.mxu1 %vm3773_vm10, %v7696_v28 }
 0x7bd   :  { %6078 = vst.msk [vmem:[#allocation3 + $0x190] sm:$0xff] %vm1905_vm6, %v5937_v63  ;;  %6310 = vrot.lane.b32.xlu1 %v6137_v52, %s9361_s3 }
 0x7be   :  { %6308 = vrot.lane.b32.xlu0 %v6136_v57, %s9361_s3  ;;  %v6478_v57 = vld [vmem:[#allocation2 + $0x48] sm:$0xff] }
 0x7bf   :  { %v5943_v27 = vpop.permute.xlu1 %5942  ;;  %9077 = vmatpush3.msk.msra.mxu1 %vm3773_vm10, %v7696_v28 }
 0x7c0   :  { %6081 = vst.msk [vmem:[#allocation3 + $0x1a8] sm:$0xff] %vm1905_vm6, %v5943_v27  ;;  %v5941_v55 = vpop.permute.xlu0 %5940 }
 0x7c1   :  { %6080 = vst.msk [vmem:[#allocation3 + $0x1a0] sm:$0xff] %vm1905_vm6, %v5941_v55  ;;  %6314 = vrot.lane.b32.xlu1 %v6139_v43, %s9361_s3 }
 0x7c2   :  { %6312 = vrot.lane.b32.xlu0 %v6138_v2, %s9361_s3 }
 0x7c3   :  { %v5947_v12 = vpop.permute.xlu1 %5946 }
 0x7c4   :  { %6083 = vst.msk [vmem:[#allocation3 + $0x1b8] sm:$0xff] %vm1905_vm6, %v5947_v12  ;;  %v5945_v13 = vpop.permute.xlu0 %5944 }
 0x7c5   :  { %6082 = vst.msk [vmem:[#allocation3 + $0x1b0] sm:$0xff] %vm1905_vm6, %v5945_v13  ;;  %6604 = vrot.lane.b32.xlu1 %v6476_v46, %s9362_s21 }
 0x7c6   :  { %6316 = vrot.lane.b32.xlu0 %v6140_v44, %s9361_s3 }
 0x7c7   :  { %v5951_v50 = vpop.permute.xlu1 %5950 }
 0x7c8   :  { %6085 = vst.msk [vmem:[#allocation3 + $0x1c8] sm:$0xff] %vm1905_vm6, %v5951_v50  ;;  %v5949_v62 = vpop.permute.xlu0 %5948 }
 0x7c9   :  { %6084 = vst.msk [vmem:[#allocation3 + $0x1c0] sm:$0xff] %vm1905_vm6, %v5949_v62  ;;  %6988 = vrot.lane.b32.xlu1 %v11934_v35, %s9363_s7 }
 0x7ca   :  { %6606 = vrot.lane.b32.xlu0 %v6477_v56, %s9362_s21 }
 0x7cb   :  { %v5955_v59 = vpop.permute.xlu1 %5954 }
 0x7cc   :  { %6087 = vst.msk [vmem:[#allocation3 + $0x1d8] sm:$0xff] %vm1905_vm6, %v5955_v59  ;;  %v5953_v63 = vpop.permute.xlu0 %5952 }
 0x7cd   :  { %6086 = vst.msk [vmem:[#allocation3 + $0x1d0] sm:$0xff] %vm1905_vm6, %v5953_v63  ;;  %7372 = vrot.lane.b32.xlu1 %v12089_v5, %s9364_s8  ;;  %v6487_v63 = vld [vmem:[#allocation2 + $0xb0] sm:$0xff] }
 0x7ce   :  { %6990 = vrot.lane.b32.xlu0 %v11929_v30, %s9363_s7  ;;  %v6479_v30 = vld [vmem:[#allocation2 + $0x50] sm:$0xff] }
 0x7cf   :  { %v5959_v35 = vpop.permute.xlu1 %5958 }
 0x7d0   :  { %6089 = vst.msk [vmem:[#allocation3 + $0x1e8] sm:$0xff] %vm1905_vm6, %v5959_v35  ;;  %v5957_v52 = vpop.permute.xlu0 %5956 }
 0x7d1   :  { %6088 = vst.msk [vmem:[#allocation3 + $0x1e0] sm:$0xff] %vm1905_vm6, %v5957_v52  ;;  %6608 = vrot.lane.b32.xlu1 %v6478_v57, %s9362_s21 }
 0x7d2   :  { %7374 = vrot.lane.b32.xlu0 %v12084_v42, %s9364_s8 }
 0x7d3   :  { %v5963_v27 = vpop.permute.xlu1 %5962 }
 0x7d4   :  { %6091 = vst.msk [vmem:[#allocation3 + $0x1f8] sm:$0xff] %vm1905_vm6, %v5963_v27  ;;  %v5961_v5 = vpop.permute.xlu0 %5960 }
 0x7d5   :  { %6090 = vst.msk [vmem:[#allocation3 + $0x1f0] sm:$0xff] %vm1905_vm6, %v5961_v5  ;;  %6992 = vrot.lane.b32.xlu1 %v11944_v6, %s9363_s7  ;;  %v6480_v6 = vld [vmem:[#allocation2 + $0x60] sm:$0xff] }
 0x7d6   :  { %6610 = vrot.lane.b32.xlu0 %v6479_v30, %s9362_s21  ;;  %v6488_v5 = vld [vmem:[#allocation2 + $0xc0] sm:$0xff] }
 0x7d7   :  { %v6223_v55 = vpop.permute.xlu1 %6222 }
 0x7d8   :  { %6413 = vst.msk [vmem:[#allocation3 + $0x8] sm:$0xff] %vm2290_vm7, %v6223_v55  ;;  %v6221_v43 = vpop.permute.xlu0 %6220 }
 0x7d9   :  { %6412 = vst.msk [vmem:[#allocation3] sm:$0xff] %vm2290_vm7, %v6221_v43  ;;  %7376 = vrot.lane.b32.xlu1 %v12099_v39, %s9364_s8  ;;  %v6489_v43 = vld [vmem:[#allocation2 + $0xc8] sm:$0xff] }
 0x7da   :  { %6994 = vrot.lane.b32.xlu0 %v11939_v9, %s9363_s7  ;;  %v6481_v9 = vld [vmem:[#allocation2 + $0x68] sm:$0xff] }
 0x7db   :  { %v6227_v42 = vpop.permute.xlu1 %6226 }
 0x7dc   :  { %6415 = vst.msk [vmem:[#allocation3 + $0x18] sm:$0xff] %vm2290_vm7, %v6227_v42  ;;  %v6225_v2 = vpop.permute.xlu0 %6224 }
 0x7dd   :  { %6414 = vst.msk [vmem:[#allocation3 + $0x10] sm:$0xff] %vm2290_vm7, %v6225_v2  ;;  %6612 = vrot.lane.b32.xlu1 %v6480_v6, %s9362_s21 }
 0x7de   :  { %7378 = vrot.lane.b32.xlu0 %v12094_v41, %s9364_s8 }
 0x7df   :  { %v6231_v47 = vpop.permute.xlu1 %6230 }
 0x7e0   :  { %6417 = vst.msk [vmem:[#allocation3 + $0x28] sm:$0xff] %vm2290_vm7, %v6231_v47  ;;  %v6229_v51 = vpop.permute.xlu0 %6228 }
 0x7e1   :  { %6416 = vst.msk [vmem:[#allocation3 + $0x20] sm:$0xff] %vm2290_vm7, %v6229_v51  ;;  %6996 = vrot.lane.b32.xlu1 %v11954_v36, %s9363_s7  ;;  %v6482_v36 = vld [vmem:[#allocation2 + $0x78] sm:$0xff] }
 0x7e2   :  { %6614 = vrot.lane.b32.xlu0 %v6481_v9, %s9362_s21  ;;  %v6490_v51 = vld [vmem:[#allocation2 + $0xd8] sm:$0xff] }
 0x7e3   :  { %v6235_v39 = vpop.permute.xlu1 %6234 }
 0x7e4   :  { %6419 = vst.msk [vmem:[#allocation3 + $0x38] sm:$0xff] %vm2290_vm7, %v6235_v39  ;;  %v6233_v12 = vpop.permute.xlu0 %6232 }
 0x7e5   :  { %6418 = vst.msk [vmem:[#allocation3 + $0x30] sm:$0xff] %vm2290_vm7, %v6233_v12  ;;  %7380 = vrot.lane.b32.xlu1 %v12109_v18, %s9364_s8  ;;  %v6491_v12 = vld [vmem:[#allocation2 + $0xe0] sm:$0xff] }
 0x7e6   :  { %6998 = vrot.lane.b32.xlu0 %v11949_v38, %s9363_s7  ;;  %v6483_v38 = vld [vmem:[#allocation2 + $0x80] sm:$0xff] }
 0x7e7   :  { %v6239_v41 = vpop.permute.xlu1 %6238 }
 0x7e8   :  { %6421 = vst.msk [vmem:[#allocation3 + $0x48] sm:$0xff] %vm2290_vm7, %v6239_v41  ;;  %v6237_v17 = vpop.permute.xlu0 %6236 }
 0x7e9   :  { %6420 = vst.msk [vmem:[#allocation3 + $0x40] sm:$0xff] %vm2290_vm7, %v6237_v17  ;;  %6616 = vrot.lane.b32.xlu1 %v6482_v36, %s9362_s21 }
 0x7ea   :  { %7382 = vrot.lane.b32.xlu0 %v12104_v10, %s9364_s8 }
 0x7eb   :  { %v6243_v13 = vpop.permute.xlu1 %6242 }
 0x7ec   :  { %6423 = vst.msk [vmem:[#allocation3 + $0x58] sm:$0xff] %vm2290_vm7, %v6243_v13  ;;  %v6241_v46 = vpop.permute.xlu0 %6240 }
 0x7ed   :  { %6422 = vst.msk [vmem:[#allocation3 + $0x50] sm:$0xff] %vm2290_vm7, %v6241_v46  ;;  %7000 = vrot.lane.b32.xlu1 %v11964_v60, %s9363_s7  ;;  %v6484_v60 = vld [vmem:[#allocation2 + $0x90] sm:$0xff] }
 0x7ee   :  { %6618 = vrot.lane.b32.xlu0 %v6483_v38, %s9362_s21  ;;  %v6492_v46 = vld [vmem:[#allocation2 + $0xf0] sm:$0xff] }
 0x7ef   :  { %v6247_v18 = vpop.permute.xlu1 %6246 }
 0x7f0   :  { %6425 = vst.msk [vmem:[#allocation3 + $0x68] sm:$0xff] %vm2290_vm7, %v6247_v18  ;;  %v6245_v44 = vpop.permute.xlu0 %6244 }
 0x7f1   :  { %6424 = vst.msk [vmem:[#allocation3 + $0x60] sm:$0xff] %vm2290_vm7, %v6245_v44  ;;  %7384 = vrot.lane.b32.xlu1 %v12119_v61, %s9364_s8  ;;  %v6493_v44 = vld [vmem:[#allocation2 + $0xf8] sm:$0xff] }
 0x7f2   :  { %7002 = vrot.lane.b32.xlu0 %v11959_v3, %s9363_s7  ;;  %v6485_v3 = vld [vmem:[#allocation2 + $0x98] sm:$0xff] }
 0x7f3   :  { %v6251_v10 = vpop.permute.xlu1 %6250 }
 0x7f4   :  { %6427 = vst.msk [vmem:[#allocation3 + $0x78] sm:$0xff] %vm2290_vm7, %v6251_v10  ;;  %v6249_v21 = vpop.permute.xlu0 %6248 }
 0x7f5   :  { %6426 = vst.msk [vmem:[#allocation3 + $0x70] sm:$0xff] %vm2290_vm7, %v6249_v21  ;;  %6620 = vrot.lane.b32.xlu1 %v6484_v60, %s9362_s21 }
 0x7f6   :  { %7386 = vrot.lane.b32.xlu0 %v12114_v7, %s9364_s8  ;;  %v6869_v7 = vld [vmem:[#allocation2 + $0x99] sm:$0xff] }
 0x7f7   :  { %v6255_v15 = vpop.permute.xlu1 %6254 }
 0x7f8   :  { %6429 = vst.msk [vmem:[#allocation3 + $0x88] sm:$0xff] %vm2290_vm7, %v6255_v15  ;;  %v6253_v50 = vpop.permute.xlu0 %6252 }
 0x7f9   :  { %6428 = vst.msk [vmem:[#allocation3 + $0x80] sm:$0xff] %vm2290_vm7, %v6253_v50  ;;  %7004 = vrot.lane.b32.xlu1 %v11971_v33, %s9363_s7  ;;  %v6486_v33 = vld [vmem:[#allocation2 + $0xa8] sm:$0xff] }
 0x7fa   :  { %6622 = vrot.lane.b32.xlu0 %v6485_v3, %s9362_s21  ;;  %v6494_v50 = vld [vmem:[#allocation2 + $0x108] sm:$0xff] }
 0x7fb   :  { %v6259_v61 = vpop.permute.xlu1 %6258 }
 0x7fc   :  { %6431 = vst.msk [vmem:[#allocation3 + $0x98] sm:$0xff] %vm2290_vm7, %v6259_v61  ;;  %v6257_v54 = vpop.permute.xlu0 %6256 }
 0x7fd   :  { %6430 = vst.msk [vmem:[#allocation3 + $0x90] sm:$0xff] %vm2290_vm7, %v6257_v54  ;;  %7388 = vrot.lane.b32.xlu1 %v12129_v20, %s9364_s8  ;;  %v6870_v20 = vld [vmem:[#allocation2 + $0xa9] sm:$0xff] }
 0x7fe   :  { %7006 = vrot.lane.b32.xlu0 %v6869_v7, %s9363_s7  ;;  %v6495_v54 = vld [vmem:[#allocation2 + $0x110] sm:$0xff] }
 0x7ff   :  { %v6263_v62 = vpop.permute.xlu1 %6262 }
 0x800   :  { %6433 = vst.msk [vmem:[#allocation3 + $0xa8] sm:$0xff] %vm2290_vm7, %v6263_v62  ;;  %v6261_v56 = vpop.permute.xlu0 %6260 }
 0x801   :  { %6432 = vst.msk [vmem:[#allocation3 + $0xa0] sm:$0xff] %vm2290_vm7, %v6261_v56  ;;  %6624 = vrot.lane.b32.xlu1 %v6486_v33, %s9362_s21 }
 0x802   :  { %7390 = vrot.lane.b32.xlu0 %v12124_v23, %s9364_s8  ;;  %v6871_v23 = vld [vmem:[#allocation2 + $0xb1] sm:$0xff] }
 0x803   :  { %v6267_v28 = vpop.permute.xlu1 %6266 }
 0x804   :  { %6435 = vst.msk [vmem:[#allocation3 + $0xb8] sm:$0xff] %vm2290_vm7, %v6267_v28  ;;  %v6265_v59 = vpop.permute.xlu0 %6264  ;;  %v6496_v28 = vld [vmem:[#allocation2 + $0x120] sm:$0xff] }
 0x805   :  { %6434 = vst.msk [vmem:[#allocation3 + $0xb0] sm:$0xff] %vm2290_vm7, %v6265_v59  ;;  %7008 = vrot.lane.b32.xlu1 %v6870_v20, %s9363_s7 }
 0x806   :  { %6626 = vrot.lane.b32.xlu0 %v6487_v63, %s9362_s21  ;;  %v6497_v63 = vld [vmem:[#allocation2 + $0x128] sm:$0xff] }
 0x807   :  { %v6271_v35 = vpop.permute.xlu1 %6270 }
 0x808   :  { %6437 = vst.msk [vmem:[#allocation3 + $0xc8] sm:$0xff] %vm2290_vm7, %v6271_v35  ;;  %v6269_v52 = vpop.permute.xlu0 %6268 }
 0x809   :  { %6436 = vst.msk [vmem:[#allocation3 + $0xc0] sm:$0xff] %vm2290_vm7, %v6269_v52  ;;  %7392 = vrot.lane.b32.xlu1 %v12139_v16, %s9364_s8  ;;  %v6872_v16 = vld [vmem:[#allocation2 + $0xc1] sm:$0xff] }
 0x80a   :  { %7010 = vrot.lane.b32.xlu0 %v6871_v23, %s9363_s7 }
 0x80b   :  { %v6275_v57 = vpop.permute.xlu1 %6274 }
 0x80c   :  { %6439 = vst.msk [vmem:[#allocation3 + $0xd8] sm:$0xff] %vm2290_vm7, %v6275_v57  ;;  %v6273_v27 = vpop.permute.xlu0 %6272 }
 0x80d   :  { %6438 = vst.msk [vmem:[#allocation3 + $0xd0] sm:$0xff] %vm2290_vm7, %v6273_v27  ;;  %6628 = vrot.lane.b32.xlu1 %v6488_v5, %s9362_s21  ;;  %v6498_v5 = vld [vmem:[#allocation2 + $0x138] sm:$0xff] }
 0x80e   :  { %7394 = vrot.lane.b32.xlu0 %v12134_v32, %s9364_s8  ;;  %v6873_v32 = vld [vmem:[#allocation2 + $0xc9] sm:$0xff] }
 0x80f   :  { %v6279_v30 = vpop.permute.xlu1 %6278 }
 0x810   :  { %6441 = vst.msk [vmem:[#allocation3 + $0xe8] sm:$0xff] %vm2290_vm7, %v6279_v30  ;;  %v6277_v55 = vpop.permute.xlu0 %6276 }
 0x811   :  { %6440 = vst.msk [vmem:[#allocation3 + $0xe0] sm:$0xff] %vm2290_vm7, %v6277_v55  ;;  %7012 = vrot.lane.b32.xlu1 %v6872_v16, %s9363_s7  ;;  %v6882_v55 = vld [vmem:[#allocation2 + $0x139] sm:$0xff] }
 0x812   :  { %6630 = vrot.lane.b32.xlu0 %v6489_v43, %s9362_s21  ;;  %v6499_v43 = vld [vmem:[#allocation2 + $0x140] sm:$0xff] }
 0x813   :  { %v6283_v42 = vpop.permute.xlu1 %6282 }
 0x814   :  { %6443 = vst.msk [vmem:[#allocation3 + $0xf8] sm:$0xff] %vm2290_vm7, %v6283_v42  ;;  %v6281_v2 = vpop.permute.xlu0 %6280 }
 0x815   :  { %6442 = vst.msk [vmem:[#allocation3 + $0xf0] sm:$0xff] %vm2290_vm7, %v6281_v2  ;;  %7396 = vrot.lane.b32.xlu1 %v12149_v14, %s9364_s8  ;;  %v6874_v14 = vld [vmem:[#allocation2 + $0xd9] sm:$0xff] }
 0x816   :  { %7014 = vrot.lane.b32.xlu0 %v6873_v32, %s9363_s7 }
 0x817   :  { %v6287_v6 = vpop.permute.xlu1 %6286 }
 0x818   :  { %6445 = vst.msk [vmem:[#allocation3 + $0x108] sm:$0xff] %vm2290_vm7, %v6287_v6  ;;  %v6285_v47 = vpop.permute.xlu0 %6284 }
 0x819   :  { %6444 = vst.msk [vmem:[#allocation3 + $0x100] sm:$0xff] %vm2290_vm7, %v6285_v47  ;;  %6632 = vrot.lane.b32.xlu1 %v6490_v51, %s9362_s21  ;;  %v6500_v51 = vld [vmem:[#allocation2 + $0x150] sm:$0xff] }
 0x81a   :  { %7398 = vrot.lane.b32.xlu0 %v12144_v11, %s9364_s8  ;;  %v6875_v11 = vld [vmem:[#allocation2 + $0xe1] sm:$0xff] }
 0x81b   :  { %v6291_v9 = vpop.permute.xlu1 %6290 }
 0x81c   :  { %6447 = vst.msk [vmem:[#allocation3 + $0x118] sm:$0xff] %vm2290_vm7, %v6291_v9  ;;  %v6289_v39 = vpop.permute.xlu0 %6288 }
 0x81d   :  { %6446 = vst.msk [vmem:[#allocation3 + $0x110] sm:$0xff] %vm2290_vm7, %v6289_v39  ;;  %7016 = vrot.lane.b32.xlu1 %v6874_v14, %s9363_s7  ;;  %v6884_v39 = vld [vmem:[#allocation2 + $0x151] sm:$0xff] }
 0x81e   :  { %6634 = vrot.lane.b32.xlu0 %v6491_v12, %s9362_s21  ;;  %v6501_v12 = vld [vmem:[#allocation2 + $0x158] sm:$0xff] }
 0x81f   :  { %v6295_v41 = vpop.permute.xlu1 %6294 }
 0x820   :  { %6449 = vst.msk [vmem:[#allocation3 + $0x128] sm:$0xff] %vm2290_vm7, %v6295_v41  ;;  %v6293_v17 = vpop.permute.xlu0 %6292 }
 0x821   :  { %6448 = vst.msk [vmem:[#allocation3 + $0x120] sm:$0xff] %vm2290_vm7, %v6293_v17  ;;  %7400 = vrot.lane.b32.xlu1 %v12159_v19, %s9364_s8  ;;  %v6876_v19 = vld [vmem:[#allocation2 + $0xf1] sm:$0xff] }
 0x822   :  { %7018 = vrot.lane.b32.xlu0 %v6875_v11, %s9363_s7 }
 0x823   :  { %v6299_v36 = vpop.permute.xlu1 %6298 }
 0x824   :  { %6451 = vst.msk [vmem:[#allocation3 + $0x138] sm:$0xff] %vm2290_vm7, %v6299_v36  ;;  %v6297_v13 = vpop.permute.xlu0 %6296 }
 0x825   :  { %6450 = vst.msk [vmem:[#allocation3 + $0x130] sm:$0xff] %vm2290_vm7, %v6297_v13  ;;  %6636 = vrot.lane.b32.xlu1 %v6492_v46, %s9362_s21  ;;  %v6502_v46 = vld [vmem:[#allocation2 + $0x168] sm:$0xff] }
 0x826   :  { %7402 = vrot.lane.b32.xlu0 %v12154_v4, %s9364_s8  ;;  %v6877_v4 = vld [vmem:[#allocation2 + $0xf9] sm:$0xff] }
 0x827   :  { %v6303_v38 = vpop.permute.xlu1 %6302 }
 0x828   :  { %6453 = vst.msk [vmem:[#allocation3 + $0x148] sm:$0xff] %vm2290_vm7, %v6303_v38  ;;  %v6301_v18 = vpop.permute.xlu0 %6300 }
 0x829   :  { %6452 = vst.msk [vmem:[#allocation3 + $0x140] sm:$0xff] %vm2290_vm7, %v6301_v18  ;;  %7020 = vrot.lane.b32.xlu1 %v6876_v19, %s9363_s7  ;;  %v6886_v18 = vld [vmem:[#allocation2 + $0x169] sm:$0xff] }
 0x82a   :  { %6638 = vrot.lane.b32.xlu0 %v6493_v44, %s9362_s21  ;;  %v6503_v44 = vld [vmem:[#allocation2 + $0x170] sm:$0xff] }
 0x82b   :  { %v6307_v10 = vpop.permute.xlu1 %6306 }
 0x82c   :  { %6455 = vst.msk [vmem:[#allocation3 + $0x158] sm:$0xff] %vm2290_vm7, %v6307_v10  ;;  %v6305_v21 = vpop.permute.xlu0 %6304 }
 0x82d   :  { %6454 = vst.msk [vmem:[#allocation3 + $0x150] sm:$0xff] %vm2290_vm7, %v6305_v21  ;;  %7404 = vrot.lane.b32.xlu1 %v12169_v22, %s9364_s8  ;;  %v6878_v22 = vld [vmem:[#allocation2 + $0x109] sm:$0xff] }
 0x82e   :  { %7022 = vrot.lane.b32.xlu0 %v6877_v4, %s9363_s7 }
 0x82f   :  { %v6311_v60 = vpop.permute.xlu1 %6310 }
 0x830   :  { %6457 = vst.msk [vmem:[#allocation3 + $0x168] sm:$0xff] %vm2290_vm7, %v6311_v60  ;;  %v6309_v15 = vpop.permute.xlu0 %6308 }
 0x831   :  { %6456 = vst.msk [vmem:[#allocation3 + $0x160] sm:$0xff] %vm2290_vm7, %v6309_v15  ;;  %6640 = vrot.lane.b32.xlu1 %v6494_v50, %s9362_s21  ;;  %v6504_v50 = vld [vmem:[#allocation2 + $0x180] sm:$0xff] }
 0x832   :  { %7406 = vrot.lane.b32.xlu0 %v12164_v31, %s9364_s8  ;;  %v6879_v31 = vld [vmem:[#allocation2 + $0x111] sm:$0xff] }
 0x833   :  { %v6315_v3 = vpop.permute.xlu1 %6314 }
 0x834   :  { %6459 = vst.msk [vmem:[#allocation3 + $0x178] sm:$0xff] %vm2290_vm7, %v6315_v3  ;;  %v6313_v61 = vpop.permute.xlu0 %6312 }
 0x835   :  { %6458 = vst.msk [vmem:[#allocation3 + $0x170] sm:$0xff] %vm2290_vm7, %v6313_v61  ;;  %7024 = vrot.lane.b32.xlu1 %v6878_v22, %s9363_s7  ;;  %v6888_v61 = vld [vmem:[#allocation2 + $0x181] sm:$0xff] }
 0x836   :  { %6642 = vrot.lane.b32.xlu0 %v6495_v54, %s9362_s21  ;;  %v6505_v54 = vld [vmem:[#allocation2 + $0x188] sm:$0xff] }
 0x837   :  { %v6605_v7 = vpop.permute.xlu1 %6604 }
 0x838   :  { %6796 = vst.msk [vmem:[#allocation3] sm:$0xff] %vm2676_vm8, %v6605_v7  ;;  %v6317_v62 = vpop.permute.xlu0 %6316 }
 0x839   :  { %6460 = vst.msk [vmem:[#allocation3 + $0x180] sm:$0xff] %vm2290_vm7, %v6317_v62  ;;  %7408 = vrot.lane.b32.xlu1 %v12179_v24, %s9364_s8  ;;  %v6880_v24 = vld [vmem:[#allocation2 + $0x121] sm:$0xff] }
 0x83a   :  { %7026 = vrot.lane.b32.xlu0 %v6879_v31, %s9363_s7  ;;  %v6506_v31 = vld [vmem:[#allocation2 + $0x198] sm:$0xff] }
 0x83b   :  { %v6989_v56 = vpop.permute.xlu1 %6988 }
 0x83c   :  { %7180 = vst.msk [vmem:[#allocation3] sm:$0xff] %vm3061_vm9, %v6989_v56  ;;  %v6607_v33 = vpop.permute.xlu0 %6606 }
 0x83d   :  { %6797 = vst.msk [vmem:[#allocation3 + $0x8] sm:$0xff] %vm2676_vm8, %v6607_v33  ;;  %6644 = vrot.lane.b32.xlu1 %v6496_v28, %s9362_s21 }
 0x83e   :  { %7410 = vrot.lane.b32.xlu0 %v12174_v26, %s9364_s8  ;;  %v6881_v26 = vld [vmem:[#allocation2 + $0x129] sm:$0xff] }
 0x83f   :  { %v7373_v59 = vpop.permute.xlu1 %7372 }
 0x840   :  { %7564 = vst.msk [vmem:[#allocation3] sm:$0xff] %vm3446_vm11, %v7373_v59  ;;  %v6991_v20 = vpop.permute.xlu0 %6990  ;;  %v6890_v59 = vld [vmem:[#allocation2 + $0x199] sm:$0xff] }
 0x841   :  { %7181 = vst.msk [vmem:[#allocation3 + $0x8] sm:$0xff] %vm3061_vm9, %v6991_v20  ;;  %7028 = vrot.lane.b32.xlu1 %v6880_v24, %s9363_s7  ;;  %v6507_v20 = vld [vmem:[#allocation2 + $0x1a0] sm:$0xff] }
 0x842   :  { %6646 = vrot.lane.b32.xlu0 %v6497_v63, %s9362_s21 }
 0x843   :  { %v6609_v35 = vpop.permute.xlu1 %6608 }
 0x844   :  { %6798 = vst.msk [vmem:[#allocation3 + $0x10] sm:$0xff] %vm2676_vm8, %v6609_v35  ;;  %v7375_v52 = vpop.permute.xlu0 %7374  ;;  %v7274_v35 = vld [vmem:[#allocation2 + $0x19a] sm:$0xff] }
 0x845   :  { %7565 = vst.msk [vmem:[#allocation3 + $0x8] sm:$0xff] %vm3446_vm11, %v7375_v52  ;;  %7412 = vrot.lane.b32.xlu1 %v12189_v58, %s9364_s8 }
 0x846   :  { %7030 = vrot.lane.b32.xlu0 %v6881_v26, %s9363_s7  ;;  %v6891_v26 = vld [vmem:[#allocation2 + $0x1a1] sm:$0xff] }
 0x847   :  { %v6993_v23 = vpop.permute.xlu1 %6992  ;;  %v7628_v57 = vld [vmem:[#allocation3] sm:$0xff] }
 0x848   :  { %7182 = vst.msk [vmem:[#allocation3 + $0x10] sm:$0xff] %vm3061_vm9, %v6993_v23  ;;  %9078 = vmatprep.mubr.msk.f32.mxu1 %vm3580_vm12, %v7628_v57  ;;  %v6611_v27 = vpop.permute.xlu0 %6610 }
 0x849   :  { %6799 = vst.msk [vmem:[#allocation3 + $0x18] sm:$0xff] %vm2676_vm8, %v6611_v27  ;;  %6648 = vrot.lane.b32.xlu1 %v6498_v5, %s9362_s21  ;;  %v7275_v27 = vld [vmem:[#allocation2 + $0x1a2] sm:$0xff] }
 0x84a   :  { %7414 = vrot.lane.b32.xlu0 %v12184_v8, %s9364_s8  ;;  %v6883_v8 = vld [vmem:[#allocation2 + $0x141] sm:$0xff] }
 0x84b   :  { %v7377_v30 = vpop.permute.xlu1 %7376 }
 0x84c   :  { %7566 = vst.msk [vmem:[#allocation3 + $0x10] sm:$0xff] %vm3446_vm11, %v7377_v30  ;;  %v6995_v58 = vpop.permute.xlu0 %6994  ;;  %v7629_v16 = vld [vmem:[#allocation3 + $0x8] sm:$0xff]  ;;  %v6508_v30 = vld [vmem:[#allocation2 + $0x1e0] sm:$0xff] }
 0x84d   :  { %7183 = vst.msk [vmem:[#allocation3 + $0x18] sm:$0xff] %vm3061_vm9, %v6995_v58  ;;  %7032 = vrot.lane.b32.xlu1 %v6882_v55, %s9363_s7  ;;  %9079 = vmatmul.mubr.msk.f32.vlgmr.msra.gmra.mrb[0].mxu1 %vm3580_vm12, %v7629_v16  ;;  %v6892_v16 = vld [vmem:[#allocation2 + $0x1e1] sm:$0xff] }
 0x84e   :  { %6650 = vrot.lane.b32.xlu0 %v6499_v43, %s9362_s21 }
 0x84f   :  { %v6613_v42 = vpop.permute.xlu1 %6612 }
 0x850   :  { %6800 = vst.msk [vmem:[#allocation3 + $0x20] sm:$0xff] %vm2676_vm8, %v6613_v42  ;;  %v7379_v2 = vpop.permute.xlu0 %7378  ;;  %v6509_v42 = vld [vmem:[#allocation2 + $0x1e8] sm:$0xff] }
 0x851   :  { %7567 = vst.msk [vmem:[#allocation3 + $0x18] sm:$0xff] %vm3446_vm11, %v7379_v2  ;;  %7416 = vrot.lane.b32.xlu1 %v12199_v53, %s9364_s8 }
 0x852   :  { %7034 = vrot.lane.b32.xlu0 %v6883_v8, %s9363_s7 }
 0x853   :  { %v6997_v32 = vpop.permute.xlu1 %6996  ;;  %v7630_v6 = vld [vmem:[#allocation3 + $0x10] sm:$0xff] }
 0x854   :  { %7184 = vst.msk [vmem:[#allocation3 + $0x20] sm:$0xff] %vm3061_vm9, %v6997_v32  ;;  %9081 = vmatprep.mubr.msk.f32.mxu1 %vm3580_vm12, %v7630_v6  ;;  %v6615_v47 = vpop.permute.xlu0 %6614  ;;  %v6893_v32 = vld [vmem:[#allocation2 + $0x1e9] sm:$0xff] }
 0x855   :  { %6801 = vst.msk [vmem:[#allocation3 + $0x28] sm:$0xff] %vm2676_vm8, %v6615_v47  ;;  %6652 = vrot.lane.b32.xlu1 %v6500_v51, %s9362_s21 }
 0x856   :  { %7418 = vrot.lane.b32.xlu0 %v12194_v37, %s9364_s8  ;;  %v6885_v37 = vld [vmem:[#allocation2 + $0x159] sm:$0xff] }
 0x857   :  { %v7381_v9 = vpop.permute.xlu1 %7380 }
 0x858   :  { %7568 = vst.msk [vmem:[#allocation3 + $0x20] sm:$0xff] %vm3446_vm11, %v7381_v9  ;;  %v6999_v53 = vpop.permute.xlu0 %6998  ;;  %v7631_v14 = vld [vmem:[#allocation3 + $0x18] sm:$0xff] }
 0x859   :  { %7185 = vst.msk [vmem:[#allocation3 + $0x28] sm:$0xff] %vm3061_vm9, %v6999_v53  ;;  %7036 = vrot.lane.b32.xlu1 %v6884_v39, %s9363_s7  ;;  %9082 = vmatmul.mubr.msk.f32.gmra.mrb[2].mxu1 %vm3580_vm12, %v7631_v14  ;;  %v6510_v9 = vld [vmem:[#allocation2 + $0x1f8] sm:$0xff] }
 0x85a   :  { %6654 = vrot.lane.b32.xlu0 %v6501_v12, %s9362_s21  ;;  %v6894_v39 = vld [vmem:[#allocation2 + $0x1f9] sm:$0xff] }
 0x85b   :  { %v6617_v41 = vpop.permute.xlu1 %6616  ;;  %v6511_v12 = vld [vmem:[#allocation2 + $0x200] sm:$0xff] }
 0x85c   :  { %6802 = vst.msk [vmem:[#allocation3 + $0x30] sm:$0xff] %vm2676_vm8, %v6617_v41  ;;  %v7383_v17 = vpop.permute.xlu0 %7382 }
 0x85d   :  { %7569 = vst.msk [vmem:[#allocation3 + $0x28] sm:$0xff] %vm3446_vm11, %v7383_v17  ;;  %7420 = vrot.lane.b32.xlu1 %v12209_v25, %s9364_s8 }
 0x85e   :  { %7038 = vrot.lane.b32.xlu0 %v6885_v37, %s9363_s7 }
 0x85f   :  { %v7001_v11 = vpop.permute.xlu1 %7000  ;;  %v7632_v36 = vld [vmem:[#allocation3 + $0x20] sm:$0xff] }
 0x860   :  { %7186 = vst.msk [vmem:[#allocation3 + $0x30] sm:$0xff] %vm3061_vm9, %v7001_v11  ;;  %9084 = vmatprep.mubr.msk.f32.mxu1 %vm3580_vm12, %v7632_v36  ;;  %v6619_v13 = vpop.permute.xlu0 %6618 }
 0x861   :  { %6803 = vst.msk [vmem:[#allocation3 + $0x38] sm:$0xff] %vm2676_vm8, %v6619_v13  ;;  %6656 = vrot.lane.b32.xlu1 %v6502_v46, %s9362_s21  ;;  %v6512_v13 = vld [vmem:[#allocation2 + $0x210] sm:$0xff]  ;;  %v7279_v46 = vld [vmem:[#allocation2 + $0x202] sm:$0xff] }
 0x862   :  { %7422 = vrot.lane.b32.xlu0 %v12204_v0, %s9364_s8  ;;  %v6887_v0 = vld [vmem:[#allocation2 + $0x171] sm:$0xff] }
 0x863   :  { %v7385_v38 = vpop.permute.xlu1 %7384 }
 0x864   :  { %7570 = vst.msk [vmem:[#allocation3 + $0x30] sm:$0xff] %vm3446_vm11, %v7385_v38  ;;  %v7003_v25 = vpop.permute.xlu0 %7002  ;;  %v7633_v19 = vld [vmem:[#allocation3 + $0x28] sm:$0xff] }
 0x865   :  { %7187 = vst.msk [vmem:[#allocation3 + $0x38] sm:$0xff] %vm3061_vm9, %v7003_v25  ;;  %7040 = vrot.lane.b32.xlu1 %v6886_v18, %s9363_s7  ;;  %9085 = vmatmul.mubr.msk.f32.gmra.mrb[4].mxu1 %vm3580_vm12, %v7633_v19  ;;  %v6896_v25 = vld [vmem:[#allocation2 + $0x211] sm:$0xff] }
 0x866   :  { %6658 = vrot.lane.b32.xlu0 %v6503_v44, %s9362_s21  ;;  %v6513_v19 = vld [vmem:[#allocation2 + $0x218] sm:$0xff] }
 0x867   :  { %v6621_v10 = vpop.permute.xlu1 %6620 }
 0x868   :  { %6804 = vst.msk [vmem:[#allocation3 + $0x40] sm:$0xff] %vm2676_vm8, %v6621_v10  ;;  %v7387_v21 = vpop.permute.xlu0 %7386 }
 0x869   :  { %7571 = vst.msk [vmem:[#allocation3 + $0x38] sm:$0xff] %vm3446_vm11, %v7387_v21  ;;  %7424 = vrot.lane.b32.xlu1 %v12219_v49, %s9364_s8  ;;  %v7280_v21 = vld [vmem:[#allocation2 + $0x212] sm:$0xff] }
 0x86a   :  { %7042 = vrot.lane.b32.xlu0 %v6887_v0, %s9363_s7  ;;  %v6897_v0 = vld [vmem:[#allocation2 + $0x219] sm:$0xff] }
 0x86b   :  { %v7005_v4 = vpop.permute.xlu1 %7004  ;;  %v7634_v60 = vld [vmem:[#allocation3 + $0x30] sm:$0xff] }
 0x86c   :  { %7188 = vst.msk [vmem:[#allocation3 + $0x40] sm:$0xff] %vm3061_vm9, %v7005_v4  ;;  %9087 = vmatprep.mubr.msk.f32.mxu1 %vm3580_vm12, %v7634_v60  ;;  %v6623_v15 = vpop.permute.xlu0 %6622 }
 0x86d   :  { %6805 = vst.msk [vmem:[#allocation3 + $0x48] sm:$0xff] %vm2676_vm8, %v6623_v15  ;;  %6660 = vrot.lane.b32.xlu1 %v6504_v50, %s9362_s21  ;;  %v6514_v50 = vld [vmem:[#allocation2 + $0x228] sm:$0xff] }
 0x86e   :  { %7426 = vrot.lane.b32.xlu0 %v12214_v34, %s9364_s8  ;;  %v6889_v34 = vld [vmem:[#allocation2 + $0x189] sm:$0xff] }
 0x86f   :  { %v7389_v3 = vpop.permute.xlu1 %7388 }
 0x870   :  { %7572 = vst.msk [vmem:[#allocation3 + $0x40] sm:$0xff] %vm3446_vm11, %v7389_v3  ;;  %v7007_v49 = vpop.permute.xlu0 %7006  ;;  %v7635_v22 = vld [vmem:[#allocation3 + $0x38] sm:$0xff] }
 0x871   :  { %7189 = vst.msk [vmem:[#allocation3 + $0x48] sm:$0xff] %vm3061_vm9, %v7007_v49  ;;  %7044 = vrot.lane.b32.xlu1 %v6888_v61, %s9363_s7  ;;  %9088 = vmatmul.mubr.msk.f32.gmra.mrb[6].mxu1 %vm3580_vm12, %v7635_v22  ;;  %v7281_v3 = vld [vmem:[#allocation2 + $0x21a] sm:$0xff]  ;;  %v6898_v22 = vld [vmem:[#allocation2 + $0x229] sm:$0xff] }
 0x872   :  { %6662 = vrot.lane.b32.xlu0 %v6505_v54, %s9362_s21 }
 0x873   :  { %v6625_v7 = vpop.permute.xlu1 %6624 }
 0x874   :  { %6806 = vst.msk [vmem:[#allocation3 + $0x50] sm:$0xff] %vm2676_vm8, %v6625_v7  ;;  %v7391_v62 = vpop.permute.xlu0 %7390  ;;  %v6515_v7 = vld [vmem:[#allocation2 + $0x230] sm:$0xff] }
 0x875   :  { %7573 = vst.msk [vmem:[#allocation3 + $0x48] sm:$0xff] %vm3446_vm11, %v7391_v62  ;;  %7428 = vrot.lane.b32.xlu1 %v12229_v1, %s9364_s8 }
 0x876   :  { %7046 = vrot.lane.b32.xlu0 %v6889_v34, %s9363_s7 }
 0x877   :  { %v7009_v56 = vpop.permute.xlu1 %7008  ;;  %v7636_v33 = vld [vmem:[#allocation3 + $0x40] sm:$0xff] }
 0x878   :  { %7190 = vst.msk [vmem:[#allocation3 + $0x50] sm:$0xff] %vm3061_vm9, %v7009_v56  ;;  %9090 = vmatprep.mubr.msk.f32.mxu1 %vm3580_vm12, %v7636_v33  ;;  %v6627_v28 = vpop.permute.xlu0 %6626  ;;  %v6899_v56 = vld [vmem:[#allocation2 + $0x231] sm:$0xff] }
 0x879   :  { %6807 = vst.msk [vmem:[#allocation3 + $0x58] sm:$0xff] %vm2676_vm8, %v6627_v28  ;;  %6664 = vrot.lane.b32.xlu1 %v6506_v31, %s9362_s21  ;;  %v7282_v31 = vld [vmem:[#allocation2 + $0x22a] sm:$0xff] }
 0x87a   :  { %7430 = vrot.lane.b32.xlu0 %v12224_v48, %s9364_s8 }
 0x87b   :  { %v7393_v1 = vpop.permute.xlu1 %7392 }
 0x87c   :  { %7574 = vst.msk [vmem:[#allocation3 + $0x50] sm:$0xff] %vm3446_vm11, %v7393_v1  ;;  %v7011_v24 = vpop.permute.xlu0 %7010  ;;  %v7637_v63 = vld [vmem:[#allocation3 + $0x48] sm:$0xff]  ;;  %v6516_v1 = vld [vmem:[#allocation2 + $0x240] sm:$0xff] }
 0x87d   :  { %7191 = vst.msk [vmem:[#allocation3 + $0x58] sm:$0xff] %vm3061_vm9, %v7011_v24  ;;  %7048 = vrot.lane.b32.xlu1 %v6890_v59, %s9363_s7  ;;  %9091 = vmatmul.mubr.msk.f32.gmra.mrb[8].mxu1 %vm3580_vm12, %v7637_v63 }
 0x87e   :  { %6666 = vrot.lane.b32.xlu0 %v6507_v20, %s9362_s21  ;;  %v7283_v20 = vld [vmem:[#allocation2 + $0x232] sm:$0xff] }
 0x87f   :  { %v6629_v52 = vpop.permute.xlu1 %6628 }
 0x880   :  { %6808 = vst.msk [vmem:[#allocation3 + $0x60] sm:$0xff] %vm2676_vm8, %v6629_v52  ;;  %v7395_v48 = vpop.permute.xlu0 %7394 }
 0x881   :  { %7575 = vst.msk [vmem:[#allocation3 + $0x58] sm:$0xff] %vm3446_vm11, %v7395_v48  ;;  %7432 = vrot.lane.b32.xlu1 %v7274_v35, %s9364_s8  ;;  %v6900_v35 = vld [vmem:[#allocation2 + $0x241] sm:$0xff] }
 0x882   :  { %7050 = vrot.lane.b32.xlu0 %v6891_v26, %s9363_s7  ;;  %v6517_v26 = vld [vmem:[#allocation2 + $0x248] sm:$0xff] }
 0x883   :  { %v7013_v23 = vpop.permute.xlu1 %7012  ;;  %v7638_v57 = vld [vmem:[#allocation3 + $0x50] sm:$0xff] }
 0x884   :  { %7192 = vst.msk [vmem:[#allocation3 + $0x60] sm:$0xff] %vm3061_vm9, %v7013_v23  ;;  %9093 = vmatprep.mubr.msk.f32.mxu1 %vm3580_vm12, %v7638_v57  ;;  %v6631_v5 = vpop.permute.xlu0 %6630  ;;  %v7284_v57 = vld [vmem:[#allocation2 + $0x242] sm:$0xff] }
 0x885   :  { %6809 = vst.msk [vmem:[#allocation3 + $0x68] sm:$0xff] %vm2676_vm8, %v6631_v5  ;;  %6668 = vrot.lane.b32.xlu1 %v6508_v30, %s9362_s21 }
 0x886   :  { %7434 = vrot.lane.b32.xlu0 %v7275_v27, %s9364_s8  ;;  %v6901_v27 = vld [vmem:[#allocation2 + $0x249] sm:$0xff] }
 0x887   :  { %v7397_v58 = vpop.permute.xlu1 %7396 }
 0x888   :  { %7576 = vst.msk [vmem:[#allocation3 + $0x60] sm:$0xff] %vm3446_vm11, %v7397_v58  ;;  %v7015_v55 = vpop.permute.xlu0 %7014  ;;  %v7639_v43 = vld [vmem:[#allocation3 + $0x58] sm:$0xff] }
 0x889   :  { %7193 = vst.msk [vmem:[#allocation3 + $0x68] sm:$0xff] %vm3061_vm9, %v7015_v55  ;;  %7052 = vrot.lane.b32.xlu1 %v6892_v16, %s9363_s7  ;;  %9094 = vmatmul.mubr.msk.f32.gmra.mrb[10].mxu1 %vm3580_vm12, %v7639_v43  ;;  %v6518_v55 = vld [vmem:[#allocation2 + $0x258] sm:$0xff]  ;;  %v7285_v16 = vld [vmem:[#allocation2 + $0x24a] sm:$0xff] }
 0x88a   :  { %6670 = vrot.lane.b32.xlu0 %v6509_v42, %s9362_s21 }
 0x88b   :  { %v6633_v2 = vpop.permute.xlu1 %6632 }
 0x88c   :  { %6810 = vst.msk [vmem:[#allocation3 + $0x70] sm:$0xff] %vm2676_vm8, %v6633_v2  ;;  %v7399_v8 = vpop.permute.xlu0 %7398  ;;  %v6902_v2 = vld [vmem:[#allocation2 + $0x259] sm:$0xff] }
 0x88d   :  { %7577 = vst.msk [vmem:[#allocation3 + $0x68] sm:$0xff] %vm3446_vm11, %v7399_v8  ;;  %7436 = vrot.lane.b32.xlu1 %v12243_v29, %s9364_s8 }
 0x88e   :  { %7054 = vrot.lane.b32.xlu0 %v6893_v32, %s9363_s7  ;;  %v6519_v32 = vld [vmem:[#allocation2 + $0x260] sm:$0xff] }
 0x88f   :  { %v7017_v6 = vpop.permute.xlu1 %7016  ;;  %v7640_v47 = vld [vmem:[#allocation3 + $0x60] sm:$0xff] }
 0x890   :  { %7194 = vst.msk [vmem:[#allocation3 + $0x70] sm:$0xff] %vm3061_vm9, %v7017_v6  ;;  %9096 = vmatprep.mubr.msk.f32.mxu1 %vm3580_vm12, %v7640_v47  ;;  %v6635_v51 = vpop.permute.xlu0 %6634 }
 0x891   :  { %6811 = vst.msk [vmem:[#allocation3 + $0x78] sm:$0xff] %vm2676_vm8, %v6635_v51  ;;  %6672 = vrot.lane.b32.xlu1 %v6510_v9, %s9362_s21  ;;  %v7286_v51 = vld [vmem:[#allocation2 + $0x25a] sm:$0xff] }
 0x892   :  { %7438 = vrot.lane.b32.xlu0 %v12238_v45, %s9364_s8  ;;  %v6895_v45 = vld [vmem:[#allocation2 + $0x201] sm:$0xff] }
 0x893   :  { %v7401_v53 = vpop.permute.xlu1 %7400  ;;  %v6903_v9 = vld [vmem:[#allocation2 + $0x261] sm:$0xff] }
 0x894   :  { %7578 = vst.msk [vmem:[#allocation3 + $0x70] sm:$0xff] %vm3446_vm11, %v7401_v53  ;;  %v7019_v29 = vpop.permute.xlu0 %7018  ;;  %v7641_v14 = vld [vmem:[#allocation3 + $0x68] sm:$0xff] }
 0x895   :  { %7195 = vst.msk [vmem:[#allocation3 + $0x78] sm:$0xff] %vm3061_vm9, %v7019_v29  ;;  %7056 = vrot.lane.b32.xlu1 %v6894_v39, %s9363_s7  ;;  %9097 = vmatmul.mubr.msk.f32.gmra.mrb[12].mxu1 %vm3580_vm12, %v7641_v14  ;;  %v6520_v14 = vld [vmem:[#allocation2 + $0x270] sm:$0xff] }
 0x896   :  { %6674 = vrot.lane.b32.xlu0 %v6511_v12, %s9362_s21  ;;  %v7287_v12 = vld [vmem:[#allocation2 + $0x262] sm:$0xff] }
 0x897   :  { %v6637_v41 = vpop.permute.xlu1 %6636 }
 0x898   :  { %6812 = vst.msk [vmem:[#allocation3 + $0x80] sm:$0xff] %vm2676_vm8, %v6637_v41  ;;  %v7403_v17 = vpop.permute.xlu0 %7402 }
 0x899   :  { %7579 = vst.msk [vmem:[#allocation3 + $0x78] sm:$0xff] %vm3446_vm11, %v7403_v17  ;;  %7440 = vrot.lane.b32.xlu1 %v12250_v40, %s9364_s8 }
 0x89a   :  { %7058 = vrot.lane.b32.xlu0 %v6895_v45, %s9363_s7  ;;  %v6904_v45 = vld [vmem:[#allocation2 + $0x271] sm:$0xff] }
 0x89b   :  { %v7021_v37 = vpop.permute.xlu1 %7020  ;;  %v7642_v11 = vld [vmem:[#allocation3 + $0x70] sm:$0xff] }
 0x89c   :  { %7196 = vst.msk [vmem:[#allocation3 + $0x80] sm:$0xff] %vm3061_vm9, %v7021_v37  ;;  %9099 = vmatprep.mubr.msk.f32.mxu1 %vm3580_vm12, %v7642_v11  ;;  %v6639_v36 = vpop.permute.xlu0 %6638  ;;  %v6521_v11 = vld [vmem:[#allocation2 + $0x278] sm:$0xff] }
 0x89d   :  { %6813 = vst.msk [vmem:[#allocation3 + $0x88] sm:$0xff] %vm2676_vm8, %v6639_v36  ;;  %6676 = vrot.lane.b32.xlu1 %v6512_v13, %s9362_s21 }
 0x89e   :  { %7442 = vrot.lane.b32.xlu0 %v7279_v46, %s9364_s8  ;;  %v7288_v46 = vld [vmem:[#allocation2 + $0x272] sm:$0xff] }
 0x89f   :  { %v7405_v38 = vpop.permute.xlu1 %7404 }
 0x8a0   :  { %7580 = vst.msk [vmem:[#allocation3 + $0x80] sm:$0xff] %vm3446_vm11, %v7405_v38  ;;  %v7023_v40 = vpop.permute.xlu0 %7022  ;;  %v7643_v18 = vld [vmem:[#allocation3 + $0x78] sm:$0xff] }
 0x8a1   :  { %7197 = vst.msk [vmem:[#allocation3 + $0x88] sm:$0xff] %vm3061_vm9, %v7023_v40  ;;  %7060 = vrot.lane.b32.xlu1 %v6896_v25, %s9363_s7  ;;  %9100 = vmatmul.mubr.msk.f32.gmra.mrb[14].mxu1 %vm3580_vm12, %v7643_v18  ;;  %v6905_v38 = vld [vmem:[#allocation2 + $0x279] sm:$0xff] }
 0x8a2   :  { %6678 = vrot.lane.b32.xlu0 %v6513_v19, %s9362_s21  ;;  %v6522_v19 = vld [vmem:[#allocation2 + $0x288] sm:$0xff] }
 0x8a3   :  { %v6641_v44 = vpop.permute.xlu1 %6640 }
 0x8a4   :  { %6814 = vst.msk [vmem:[#allocation3 + $0x90] sm:$0xff] %vm2676_vm8, %v6641_v44  ;;  %v7407_v10 = vpop.permute.xlu0 %7406  ;;  %v7289_v44 = vld [vmem:[#allocation2 + $0x27a] sm:$0xff] }
 0x8a5   :  { %7581 = vst.msk [vmem:[#allocation3 + $0x88] sm:$0xff] %vm3446_vm11, %v7407_v10  ;;  %7444 = vrot.lane.b32.xlu1 %v7280_v21, %s9364_s8 }
 0x8a6   :  { %7062 = vrot.lane.b32.xlu0 %v6897_v0, %s9363_s7  ;;  %v6906_v0 = vld [vmem:[#allocation2 + $0x289] sm:$0xff] }
 0x8a7   :  { %v7025_v4 = vpop.permute.xlu1 %7024  ;;  %v7644_v60 = vld [vmem:[#allocation3 + $0x80] sm:$0xff] }
 0x8a8   :  { %7198 = vst.msk [vmem:[#allocation3 + $0x90] sm:$0xff] %vm3061_vm9, %v7025_v4  ;;  %9102 = vmatprep.mubr.msk.f32.mxu1 %vm3580_vm12, %v7644_v60  ;;  %v6643_v15 = vpop.permute.xlu0 %6642  ;;  %v6523_v60 = vld [vmem:[#allocation2 + $0x290] sm:$0xff] }
 0x8a9   :  { %6815 = vst.msk [vmem:[#allocation3 + $0x98] sm:$0xff] %vm2676_vm8, %v6643_v15  ;;  %6680 = vrot.lane.b32.xlu1 %v6514_v50, %s9362_s21 }
 0x8aa   :  { %7446 = vrot.lane.b32.xlu0 %v7281_v3, %s9364_s8  ;;  %v7290_v3 = vld [vmem:[#allocation2 + $0x28a] sm:$0xff] }
 0x8ab   :  { %v7409_v49 = vpop.permute.xlu1 %7408 }
 0x8ac   :  { %7582 = vst.msk [vmem:[#allocation3 + $0x90] sm:$0xff] %vm3446_vm11, %v7409_v49  ;;  %v7027_v61 = vpop.permute.xlu0 %7026  ;;  %v7645_v54 = vld [vmem:[#allocation3 + $0x88] sm:$0xff]  ;;  %v6907_v49 = vld [vmem:[#allocation2 + $0x291] sm:$0xff] }
 0x8ad   :  { %7199 = vst.msk [vmem:[#allocation3 + $0x98] sm:$0xff] %vm3061_vm9, %v7027_v61  ;;  %7064 = vrot.lane.b32.xlu1 %v6898_v22, %s9363_s7  ;;  %9103 = vmatmul.mubr.msk.f32.gmra.mrb[16].mxu1 %vm3580_vm12, %v7645_v54 }
 0x8ae   :  { %6682 = vrot.lane.b32.xlu0 %v6515_v7, %s9362_s21  ;;  %v6141_v7 = vld [vmem:[#allocation2 + $0x292] sm:$0xff] }
 0x8af   :  { %v6645_v62 = vpop.permute.xlu1 %6644 }
 0x8b0   :  { %6816 = vst.msk [vmem:[#allocation3 + $0xa0] sm:$0xff] %vm2676_vm8, %v6645_v62  ;;  %v7411_v34 = vpop.permute.xlu0 %7410 }
 0x8b1   :  { %7583 = vst.msk [vmem:[#allocation3 + $0x98] sm:$0xff] %vm3446_vm11, %v7411_v34  ;;  %7448 = vrot.lane.b32.xlu1 %v7282_v31, %s9364_s8  ;;  %v6525_v31 = vld [vmem:[#allocation2 + $0x2a8] sm:$0xff] }
 0x8b2   :  { %7066 = vrot.lane.b32.xlu0 %v6899_v56, %s9363_s7 }
 0x8b3   :  { %v7029_v33 = vpop.permute.xlu1 %7028  ;;  %v7646_v28 = vld [vmem:[#allocation3 + $0x90] sm:$0xff] }
 0x8b4   :  { %7200 = vst.msk [vmem:[#allocation3 + $0xa0] sm:$0xff] %vm3061_vm9, %v7029_v33  ;;  %9105 = vmatprep.mubr.msk.f32.mxu1 %vm3580_vm12, %v7646_v28  ;;  %v6647_v59 = vpop.permute.xlu0 %6646  ;;  %v6524_v33 = vld [vmem:[#allocation2 + $0x2a0] sm:$0xff] }
 0x8b5   :  { %6817 = vst.msk [vmem:[#allocation3 + $0xa8] sm:$0xff] %vm2676_vm8, %v6647_v59  ;;  %6684 = vrot.lane.b32.xlu1 %v6516_v1, %s9362_s21  ;;  %v6909_v1 = vld [vmem:[#allocation2 + $0x2a9] sm:$0xff] }
 0x8b6   :  { %7450 = vrot.lane.b32.xlu0 %v7283_v20, %s9364_s8  ;;  %v6908_v20 = vld [vmem:[#allocation2 + $0x2a1] sm:$0xff] }
 0x8b7   :  { %v7413_v24 = vpop.permute.xlu1 %7412 }
 0x8b8   :  { %7584 = vst.msk [vmem:[#allocation3 + $0xa0] sm:$0xff] %vm3446_vm11, %v7413_v24  ;;  %v7031_v63 = vpop.permute.xlu0 %7030  ;;  %v7647_v52 = vld [vmem:[#allocation3 + $0x98] sm:$0xff] }
 0x8b9   :  { %7201 = vst.msk [vmem:[#allocation3 + $0xa8] sm:$0xff] %vm3061_vm9, %v7031_v63  ;;  %7068 = vrot.lane.b32.xlu1 %v6900_v35, %s9363_s7  ;;  %9106 = vmatmul.mubr.msk.f32.gmra.mrb[18].mxu1 %vm3580_vm12, %v7647_v52  ;;  %v6142_v52 = vld [vmem:[#allocation2 + $0x2a2] sm:$0xff] }
 0x8ba   :  { %6686 = vrot.lane.b32.xlu0 %v6517_v26, %s9362_s21 }
 0x8bb   :  { %v6649_v48 = vpop.permute.xlu1 %6648 }
 0x8bc   :  { %6818 = vst.msk [vmem:[#allocation3 + $0xb0] sm:$0xff] %vm2676_vm8, %v6649_v48  ;;  %v7415_v23 = vpop.permute.xlu0 %7414 }
 0x8bd   :  { %7585 = vst.msk [vmem:[#allocation3 + $0xa8] sm:$0xff] %vm3446_vm11, %v7415_v23  ;;  %7452 = vrot.lane.b32.xlu1 %v7284_v57, %s9364_s8  ;;  %v6143_v23 = vld [vmem:[#allocation2 + $0x2aa] sm:$0xff] }
 0x8be   :  { %7070 = vrot.lane.b32.xlu0 %v6901_v27, %s9363_s7 }
 0x8bf   :  { %v7033_v5 = vpop.permute.xlu1 %7032  ;;  %v7648_v30 = vld [vmem:[#allocation3 + $0xa0] sm:$0xff] }
 0x8c0   :  { %7202 = vst.msk [vmem:[#allocation3 + $0xb0] sm:$0xff] %vm3061_vm9, %v7033_v5  ;;  %9108 = vmatprep.mubr.msk.f32.mxu1 %vm3580_vm12, %v7648_v30  ;;  %v6651_v58 = vpop.permute.xlu0 %6650  ;;  %v6527_v30 = vld [vmem:[#allocation2 + $0x2c0] sm:$0xff] }
 0x8c1   :  { %6819 = vst.msk [vmem:[#allocation3 + $0xb8] sm:$0xff] %vm2676_vm8, %v6651_v58  ;;  %6688 = vrot.lane.b32.xlu1 %v6518_v55, %s9362_s21  ;;  %v6526_v58 = vld [vmem:[#allocation2 + $0x2b8] sm:$0xff] }
 0x8c2   :  { %7454 = vrot.lane.b32.xlu0 %v7285_v16, %s9364_s8 }
 0x8c3   :  { %v7417_v43 = vpop.permute.xlu1 %7416 }
 0x8c4   :  { %7586 = vst.msk [vmem:[#allocation3 + $0xb0] sm:$0xff] %vm3446_vm11, %v7417_v43  ;;  %v7035_v42 = vpop.permute.xlu0 %7034  ;;  %v7649_v8 = vld [vmem:[#allocation3 + $0xa8] sm:$0xff] }
 0x8c5   :  { %7203 = vst.msk [vmem:[#allocation3 + $0xb8] sm:$0xff] %vm3061_vm9, %v7035_v42  ;;  %7072 = vrot.lane.b32.xlu1 %v6902_v2, %s9363_s7  ;;  %9109 = vmatmul.mubr.msk.f32.gmra.mrb[20].mxu1 %vm3580_vm12, %v7649_v8  ;;  %v6911_v42 = vld [vmem:[#allocation2 + $0x2c1] sm:$0xff]  ;;  %v6910_v2 = vld [vmem:[#allocation2 + $0x2b9] sm:$0xff] }
 0x8c6   :  { %6690 = vrot.lane.b32.xlu0 %v6519_v32, %s9362_s21 }
 0x8c7   :  { %v6653_v6 = vpop.permute.xlu1 %6652 }
 0x8c8   :  { %6820 = vst.msk [vmem:[#allocation3 + $0xc0] sm:$0xff] %vm2676_vm8, %v6653_v6  ;;  %v7419_v47 = vpop.permute.xlu0 %7418  ;;  %v6144_v6 = vld [vmem:[#allocation2 + $0x2ba] sm:$0xff] }
 0x8c9   :  { %7587 = vst.msk [vmem:[#allocation3 + $0xb8] sm:$0xff] %vm3446_vm11, %v7419_v47  ;;  %7456 = vrot.lane.b32.xlu1 %v7286_v51, %s9364_s8 }
 0x8ca   :  { %7074 = vrot.lane.b32.xlu0 %v6903_v9, %s9363_s7 }
 0x8cb   :  { %v7037_v53 = vpop.permute.xlu1 %7036  ;;  %v7650_v29 = vld [vmem:[#allocation3 + $0xb0] sm:$0xff] }
 0x8cc   :  { %7204 = vst.msk [vmem:[#allocation3 + $0xc0] sm:$0xff] %vm3061_vm9, %v7037_v53  ;;  %9111 = vmatprep.mubr.msk.f32.mxu1 %vm3580_vm12, %v7650_v29  ;;  %v6655_v39 = vpop.permute.xlu0 %6654  ;;  %v6145_v53 = vld [vmem:[#allocation2 + $0x2c2] sm:$0xff] }
 0x8cd   :  { %6821 = vst.msk [vmem:[#allocation3 + $0xc8] sm:$0xff] %vm2676_vm8, %v6655_v39  ;;  %6692 = vrot.lane.b32.xlu1 %v6520_v14, %s9362_s21 }
 0x8ce   :  { %7458 = vrot.lane.b32.xlu0 %v7287_v12, %s9364_s8  ;;  %v6529_v12 = vld [vmem:[#allocation2 + $0x2d8] sm:$0xff] }
 0x8cf   :  { %v7421_v41 = vpop.permute.xlu1 %7420 }
 0x8d0   :  { %7588 = vst.msk [vmem:[#allocation3 + $0xc0] sm:$0xff] %vm3446_vm11, %v7421_v41  ;;  %v7039_v17 = vpop.permute.xlu0 %7038  ;;  %v7651_v37 = vld [vmem:[#allocation3 + $0xb8] sm:$0xff]  ;;  %v6528_v41 = vld [vmem:[#allocation2 + $0x2d0] sm:$0xff] }
 0x8d1   :  { %7205 = vst.msk [vmem:[#allocation3 + $0xc8] sm:$0xff] %vm3061_vm9, %v7039_v17  ;;  %7076 = vrot.lane.b32.xlu1 %v6904_v45, %s9363_s7  ;;  %9112 = vmatmul.mubr.msk.f32.gmra.mrb[22].mxu1 %vm3580_vm12, %v7651_v37  ;;  %v6913_v37 = vld [vmem:[#allocation2 + $0x2d9] sm:$0xff] }
 0x8d2   :  { %6694 = vrot.lane.b32.xlu0 %v6521_v11, %s9362_s21 }
 0x8d3   :  { %v6657_v36 = vpop.permute.xlu1 %6656 }
 0x8d4   :  { %6822 = vst.msk [vmem:[#allocation3 + $0xd0] sm:$0xff] %vm2676_vm8, %v6657_v36  ;;  %v7423_v13 = vpop.permute.xlu0 %7422  ;;  %v6912_v36 = vld [vmem:[#allocation2 + $0x2d1] sm:$0xff] }
 0x8d5   :  { %7589 = vst.msk [vmem:[#allocation3 + $0xc8] sm:$0xff] %vm3446_vm11, %v7423_v13  ;;  %7460 = vrot.lane.b32.xlu1 %v7288_v46, %s9364_s8 }
 0x8d6   :  { %7078 = vrot.lane.b32.xlu0 %v6905_v38, %s9363_s7  ;;  %v6146_v38 = vld [vmem:[#allocation2 + $0x2d2] sm:$0xff] }
 0x8d7   :  { %v7041_v40 = vpop.permute.xlu1 %7040  ;;  %v7652_v25 = vld [vmem:[#allocation3 + $0xc0] sm:$0xff] }
 0x8d8   :  { %7206 = vst.msk [vmem:[#allocation3 + $0xd0] sm:$0xff] %vm3061_vm9, %v7041_v40  ;;  %9114 = vmatprep.mubr.msk.f32.mxu1 %vm3580_vm12, %v7652_v25  ;;  %v6659_v18 = vpop.permute.xlu0 %6658 }
 0x8d9   :  { %6823 = vst.msk [vmem:[#allocation3 + $0xd8] sm:$0xff] %vm2676_vm8, %v6659_v18  ;;  %6696 = vrot.lane.b32.xlu1 %v6522_v19, %s9362_s21  ;;  %v6147_v19 = vld [vmem:[#allocation2 + $0x2da] sm:$0xff] }
 0x8da   :  { %7462 = vrot.lane.b32.xlu0 %v7289_v44, %s9364_s8 }
 0x8db   :  { %v7425_v10 = vpop.permute.xlu1 %7424 }
 0x8dc   :  { %7590 = vst.msk [vmem:[#allocation3 + $0xd0] sm:$0xff] %vm3446_vm11, %v7425_v10  ;;  %v7043_v21 = vpop.permute.xlu0 %7042  ;;  %v7653_v4 = vld [vmem:[#allocation3 + $0xc8] sm:$0xff] }
 0x8dd   :  { %7207 = vst.msk [vmem:[#allocation3 + $0xd8] sm:$0xff] %vm3061_vm9, %v7043_v21  ;;  %7080 = vrot.lane.b32.xlu1 %v6906_v0, %s9363_s7  ;;  %9115 = vmatmul.mubr.msk.f32.gmra.mrb[24].mxu1 %vm3580_vm12, %v7653_v4  ;;  %v6531_v21 = vld [vmem:[#allocation2 + $0x2f0] sm:$0xff]  ;;  %v6530_v4 = vld [vmem:[#allocation2 + $0x2e8] sm:$0xff] }
 0x8de   :  { %6698 = vrot.lane.b32.xlu0 %v6523_v60, %s9362_s21 }
 0x8df   :  { %v6661_v15 = vpop.permute.xlu1 %6660 }
 0x8e0   :  { %6824 = vst.msk [vmem:[#allocation3 + $0xe0] sm:$0xff] %vm2676_vm8, %v6661_v15  ;;  %v7427_v50 = vpop.permute.xlu0 %7426 }
 0x8e1   :  { %7591 = vst.msk [vmem:[#allocation3 + $0xd8] sm:$0xff] %vm3446_vm11, %v7427_v50  ;;  %7464 = vrot.lane.b32.xlu1 %v7290_v3, %s9364_s8  ;;  %v6915_v50 = vld [vmem:[#allocation2 + $0x2f1] sm:$0xff]  ;;  %v6914_v3 = vld [vmem:[#allocation2 + $0x2e9] sm:$0xff] }
 0x8e2   :  { %7082 = vrot.lane.b32.xlu0 %v6907_v49, %s9363_s7  ;;  %v12702_v49 = vld [vmem:[#allocation12] ss:$0 sm:$0xff] }
 0x8e3   :  { %v7045_v61 = vpop.permute.xlu1 %7044  ;;  %v7654_v22 = vld [vmem:[#allocation3 + $0xd0] sm:$0xff] }
 0x8e4   :  { %7208 = vst.msk [vmem:[#allocation3 + $0xe0] sm:$0xff] %vm3061_vm9, %v7045_v61  ;;  %9117 = vmatprep.mubr.msk.f32.mxu1 %vm3580_vm12, %v7654_v22  ;;  %v6663_v54 = vpop.permute.xlu0 %6662 }
 0x8e5   :  { %6825 = vst.msk [vmem:[#allocation3 + $0xe8] sm:$0xff] %vm2676_vm8, %v6663_v54  ;;  %6318 = vrot.lane.b32.xlu1 %v6141_v7, %s9361_s3 }
 0x8e6   :  { %7466 = vrot.lane.b32.xlu0 %v6141_v7, %s9364_s8  ;;  %v12705_v7 = vld [vmem:[#allocation12 + $0x1] ss:$0 sm:$0xff] }
 0x8e7   :  { %v7429_v62 = vpop.permute.xlu1 %7428 }
 0x8e8   :  { %7592 = vst.msk [vmem:[#allocation3 + $0xe0] sm:$0xff] %vm3446_vm11, %v7429_v62  ;;  %v7047_v34 = vpop.permute.xlu0 %7046  ;;  %v7655_v56 = vld [vmem:[#allocation3 + $0xd8] sm:$0xff] }
 0x8e9   :  { %7209 = vst.msk [vmem:[#allocation3 + $0xe8] sm:$0xff] %vm3061_vm9, %v7047_v34  ;;  %6702 = vrot.lane.b32.xlu1 %v6525_v31, %s9362_s21  ;;  %9118 = vmatmul.mubr.msk.f32.gmra.mrb[26].mxu1 %vm3580_vm12, %v7655_v56  ;;  %v6148_v34 = vld [vmem:[#allocation2 + $0x2ea] sm:$0xff] }
 0x8ea   :  { %6700 = vrot.lane.b32.xlu0 %v6524_v33, %s9362_s21  ;;  %v8416_v33 = vld [vmem:[#allocation4 + $0x8] sm:$0xff] }
 0x8eb   :  { %v6665_v28 = vpop.permute.xlu1 %6664 }
 0x8ec   :  { %6826 = vst.msk [vmem:[#allocation3 + $0xf0] sm:$0xff] %vm2676_vm8, %v6665_v28  ;;  %v7431_v59 = vpop.permute.xlu0 %7430 }
 0x8ed   :  { %7593 = vst.msk [vmem:[#allocation3 + $0xe8] sm:$0xff] %vm3446_vm11, %v7431_v59  ;;  %7086 = vrot.lane.b32.xlu1 %v6909_v1, %s9363_s7  ;;  %v8415_v1 = vld [vmem:[#allocation4] sm:$0xff] }
 0x8ee   :  { %7084 = vrot.lane.b32.xlu0 %v6908_v20, %s9363_s7 }
 0x8ef   :  { %v7049_v24 = vpop.permute.xlu1 %7048  ;;  %v7656_v63 = vld [vmem:[#allocation3 + $0xe0] sm:$0xff] }
 0x8f0   :  { %7210 = vst.msk [vmem:[#allocation3 + $0xf0] sm:$0xff] %vm3061_vm9, %v7049_v24  ;;  %9120 = vmatprep.mubr.msk.f32.mxu1 %vm3580_vm12, %v7656_v63  ;;  %v6667_v35 = vpop.permute.xlu0 %6666 }
 0x8f1   :  { %6827 = vst.msk [vmem:[#allocation3 + $0xf8] sm:$0xff] %vm2676_vm8, %v6667_v35  ;;  %6320 = vrot.lane.b32.xlu1 %v6142_v52, %s9361_s3  ;;  %v6149_v35 = vld [vmem:[#allocation2 + $0x2f2] sm:$0xff] }
 0x8f2   :  { %7468 = vrot.lane.b32.xlu0 %v6142_v52, %s9364_s8 }
 0x8f3   :  { %v7433_v26 = vpop.permute.xlu1 %7432 }
 0x8f4   :  { %7594 = vst.msk [vmem:[#allocation3 + $0xf0] sm:$0xff] %vm3446_vm11, %v7433_v26  ;;  %v7051_v48 = vpop.permute.xlu0 %7050  ;;  %v7657_v57 = vld [vmem:[#allocation3 + $0xe8] sm:$0xff] }
 0x8f5   :  { %7211 = vst.msk [vmem:[#allocation3 + $0xf8] sm:$0xff] %vm3061_vm9, %v7051_v48  ;;  %6322 = vrot.lane.b32.xlu1 %v6143_v23, %s9361_s3  ;;  %9121 = vmatmul.mubr.msk.f32.gmra.mrb[28].mxu1 %vm3580_vm12, %v7657_v57 }
 0x8f6   :  { %7470 = vrot.lane.b32.xlu0 %v6143_v23, %s9364_s8 }
 0x8f7   :  { %v6669_v27 = vpop.permute.xlu1 %6668 }
 0x8f8   :  { %6828 = vst.msk [vmem:[#allocation3 + $0x100] sm:$0xff] %vm2676_vm8, %v6669_v27  ;;  %v7435_v5 = vpop.permute.xlu0 %7434 }
 0x8f9   :  { %7595 = vst.msk [vmem:[#allocation3 + $0xf8] sm:$0xff] %vm3446_vm11, %v7435_v5  ;;  %6706 = vrot.lane.b32.xlu1 %v6527_v30, %s9362_s21  ;;  %v6533_v30 = vld [vmem:[#allocation2 + $0x308] sm:$0xff] }
 0x8fa   :  { %6704 = vrot.lane.b32.xlu0 %v6526_v58, %s9362_s21  ;;  %v6532_v58 = vld [vmem:[#allocation2 + $0x300] sm:$0xff] }
 0x8fb   :  { %v7053_v55 = vpop.permute.xlu1 %7052  ;;  %v7658_v16 = vld [vmem:[#allocation3 + $0xf0] sm:$0xff] }
 0x8fc   :  { %7212 = vst.msk [vmem:[#allocation3 + $0x100] sm:$0xff] %vm3061_vm9, %v7053_v55  ;;  %v6671_v43 = vpop.permute.xlu0 %6670  ;;  %9123 = vmatprep.mubr.msk.f32.mxu1 %vm3580_vm12, %v7658_v16 }
 0x8fd   :  { %6829 = vst.msk [vmem:[#allocation3 + $0x108] sm:$0xff] %vm2676_vm8, %v6671_v43  ;;  %7090 = vrot.lane.b32.xlu1 %v6911_v42, %s9363_s7 }
 0x8fe   :  { %7088 = vrot.lane.b32.xlu0 %v6910_v2, %s9363_s7  ;;  %v6917_v2 = vld [vmem:[#allocation2 + $0x309] sm:$0xff] }
 0x8ff   :  { %v7437_v8 = vpop.permute.xlu1 %7436 }
 0x900   :  { %7596 = vst.msk [vmem:[#allocation3 + $0x100] sm:$0xff] %vm3446_vm11, %v7437_v8  ;;  %v7055_v32 = vpop.permute.xlu0 %7054  ;;  %v7659_v47 = vld [vmem:[#allocation3 + $0xf8] sm:$0xff] }
 0x901   :  { %7213 = vst.msk [vmem:[#allocation3 + $0x108] sm:$0xff] %vm3061_vm9, %v7055_v32  ;;  %6324 = vrot.lane.b32.xlu1 %v6144_v6, %s9361_s3  ;;  %9124 = vmatmul.mubr.msk.f32.gmra.mrb[30].mxu1 %vm3580_vm12, %v7659_v47  ;;  %v8418_v47 = vld [vmem:[#allocation4 + $0x18] sm:$0xff] }
 0x902   :  { %7472 = vrot.lane.b32.xlu0 %v6144_v6, %s9364_s8  ;;  %v6916_v6 = vld [vmem:[#allocation2 + $0x301] sm:$0xff] }
 0x903   :  { %v6673_v51 = vpop.permute.xlu1 %6672 }
 0x904   :  { %6830 = vst.msk [vmem:[#allocation3 + $0x110] sm:$0xff] %vm2676_vm8, %v6673_v51  ;;  %v7439_v9 = vpop.permute.xlu0 %7438 }
 0x905   :  { %7597 = vst.msk [vmem:[#allocation3 + $0x108] sm:$0xff] %vm3446_vm11, %v7439_v9  ;;  %6326 = vrot.lane.b32.xlu1 %v6145_v53, %s9361_s3 }
 0x906   :  { %7474 = vrot.lane.b32.xlu0 %v6145_v53, %s9364_s8  ;;  %v8417_v53 = vld [vmem:[#allocation4 + $0x10] sm:$0xff] }
 0x907   :  { %v7057_v29 = vpop.permute.xlu1 %7056  ;;  %v7660_v39 = vld [vmem:[#allocation3 + $0x100] sm:$0xff] }
 0x908   :  { %7214 = vst.msk [vmem:[#allocation3 + $0x110] sm:$0xff] %vm3061_vm9, %v7057_v29  ;;  %9126 = vmatprep.mubr.msk.f32.mxu1 %vm3580_vm12, %v7660_v39  ;;  %v6675_v14 = vpop.permute.xlu0 %6674 }
 0x909   :  { %6831 = vst.msk [vmem:[#allocation3 + $0x118] sm:$0xff] %vm2676_vm8, %v6675_v14  ;;  %6710 = vrot.lane.b32.xlu1 %v6529_v12, %s9362_s21  ;;  %v6150_v12 = vld [vmem:[#allocation2 + $0x302] sm:$0xff] }
 0x90a   :  { %6708 = vrot.lane.b32.xlu0 %v6528_v41, %s9362_s21 }
 0x90b   :  { %v7441_v17 = vpop.permute.xlu1 %7440 }
 0x90c   :  { %7598 = vst.msk [vmem:[#allocation3 + $0x110] sm:$0xff] %vm3446_vm11, %v7441_v17  ;;  %v7059_v45 = vpop.permute.xlu0 %7058  ;;  %v7661_v11 = vld [vmem:[#allocation3 + $0x108] sm:$0xff] }
 0x90d   :  { %7215 = vst.msk [vmem:[#allocation3 + $0x118] sm:$0xff] %vm3061_vm9, %v7059_v45  ;;  %7094 = vrot.lane.b32.xlu1 %v6913_v37, %s9363_s7  ;;  %9127 = vmatmul.mubr.msk.f32.gmra.mrb[32].mxu1 %vm3580_vm12, %v7661_v11 }
 0x90e   :  { %7092 = vrot.lane.b32.xlu0 %v6912_v36, %s9363_s7 }
 0x90f   :  { %v6677_v13 = vpop.permute.xlu1 %6676 }
 0x910   :  { %6832 = vst.msk [vmem:[#allocation3 + $0x120] sm:$0xff] %vm2676_vm8, %v6677_v13  ;;  %v7443_v46 = vpop.permute.xlu0 %7442 }
 0x911   :  { %7599 = vst.msk [vmem:[#allocation3 + $0x118] sm:$0xff] %vm3446_vm11, %v7443_v46  ;;  %6328 = vrot.lane.b32.xlu1 %v6146_v38, %s9361_s3  ;;  %v6151_v46 = vld [vmem:[#allocation2 + $0x30a] sm:$0xff] }
 0x912   :  { %7476 = vrot.lane.b32.xlu0 %v6146_v38, %s9364_s8 }
 0x913   :  { %v7061_v40 = vpop.permute.xlu1 %7060  ;;  %v7662_v25 = vld [vmem:[#allocation3 + $0x110] sm:$0xff] }
 0x914   :  { %7216 = vst.msk [vmem:[#allocation3 + $0x120] sm:$0xff] %vm3061_vm9, %v7061_v40  ;;  %9129 = vmatprep.mubr.msk.f32.mxu1 %vm3580_vm12, %v7662_v25  ;;  %v6679_v18 = vpop.permute.xlu0 %6678 }
 0x915   :  { %6833 = vst.msk [vmem:[#allocation3 + $0x128] sm:$0xff] %vm2676_vm8, %v6679_v18  ;;  %6330 = vrot.lane.b32.xlu1 %v6147_v19, %s9361_s3 }
 0x916   :  { %7478 = vrot.lane.b32.xlu0 %v6147_v19, %s9364_s8  ;;  %v6535_v19 = vld [vmem:[#allocation2 + $0x320] sm:$0xff] }
 0x917   :  { %v7445_v44 = vpop.permute.xlu1 %7444 }
 0x918   :  { %7600 = vst.msk [vmem:[#allocation3 + $0x120] sm:$0xff] %vm3446_vm11, %v7445_v44  ;;  %v7063_v10 = vpop.permute.xlu0 %7062  ;;  %v7663_v0 = vld [vmem:[#allocation3 + $0x118] sm:$0xff] }
 0x919   :  { %7217 = vst.msk [vmem:[#allocation3 + $0x128] sm:$0xff] %vm3061_vm9, %v7063_v10  ;;  %6714 = vrot.lane.b32.xlu1 %v6531_v21, %s9362_s21  ;;  %9130 = vmatmul.mubr.msk.f32.gmra.mrb[34].mxu1 %vm3580_vm12, %v7663_v0  ;;  %v6534_v21 = vld [vmem:[#allocation2 + $0x318] sm:$0xff]  ;;  %v8420_v0 = vld [vmem:[#allocation4 + $0x28] sm:$0xff] }
 0x91a   :  { %6712 = vrot.lane.b32.xlu0 %v6530_v4, %s9362_s21 }
 0x91b   :  { %v6681_v60 = vpop.permute.xlu1 %6680 }
 0x91c   :  { %6834 = vst.msk [vmem:[#allocation3 + $0x130] sm:$0xff] %vm2676_vm8, %v6681_v60  ;;  %v7447_v15 = vpop.permute.xlu0 %7446 }
 0x91d   :  { %7601 = vst.msk [vmem:[#allocation3 + $0x128] sm:$0xff] %vm3446_vm11, %v7447_v15  ;;  %7098 = vrot.lane.b32.xlu1 %v6915_v50, %s9363_s7  ;;  %v8419_v15 = vld [vmem:[#allocation4 + $0x20] sm:$0xff] }
 0x91e   :  { %7096 = vrot.lane.b32.xlu0 %v6914_v3, %s9363_s7 }
 0x91f   :  { %v7065_v61 = vpop.permute.xlu1 %7064  ;;  %v7664_v22 = vld [vmem:[#allocation3 + $0x120] sm:$0xff] }
 0x920   :  { %7218 = vst.msk [vmem:[#allocation3 + $0x130] sm:$0xff] %vm3061_vm9, %v7065_v61  ;;  %v9080_v54 = vpop.f32.mrb[0].mxu1  ;;  %9132 = vmatprep.mubr.msk.f32.mxu1 %vm3580_vm12, %v7664_v22  ;;  %v6683_v62 = vpop.permute.xlu0 %6682  ;;  %v6919_v22 = vld [vmem:[#allocation2 + $0x321] sm:$0xff] }
 0x921   :  { %v8283_v31 = vmul.f32 %v9080_v54, %v12702_v49  ;;  %6835 = vst.msk [vmem:[#allocation3 + $0x138] sm:$0xff] %vm2676_vm8, %v6683_v62  ;;  %6332 = vrot.lane.b32.xlu1 %v6148_v34, %s9361_s3  ;;  %v7958_v56 = vpop.f32.mrb[1].mxu1 }
 0x922   :  { %v8282_v28 = vmul.f32 %v12702_v49, %v7958_v56  ;;  %7480 = vrot.lane.b32.xlu0 %v6148_v34, %s9364_s8  ;;  %v6918_v34 = vld [vmem:[#allocation2 + $0x319] sm:$0xff] }
 0x923   :  { %v8352_v59 = vadd.f32 %v12705_v7, %v8283_v31  ;;  %v7449_v20 = vpop.permute.xlu1 %7448 }
 0x924   :  { %v8351_v24 = vadd.f32 %v12705_v7, %v8282_v28  ;;  %7602 = vst.msk [vmem:[#allocation3 + $0x130] sm:$0xff] %vm3446_vm11, %v7449_v20  ;;  %v7067_v63 = vpop.permute.xlu0 %7066  ;;  %v7665_v52 = vld [vmem:[#allocation3 + $0x128] sm:$0xff] }
 0x925   :  { %v8480_v26 = vadd.f32 %v8416_v33, %v8352_v59  ;;  %7219 = vst.msk [vmem:[#allocation3 + $0x138] sm:$0xff] %vm3061_vm9, %v7067_v63  ;;  %6334 = vrot.lane.b32.xlu1 %v6149_v35, %s9361_s3  ;;  %9133 = vmatmul.mubr.msk.f32.gmra.mrb[36].mxu1 %vm3580_vm12, %v7665_v52  ;;  %v6153_v52 = vld [vmem:[#allocation2 + $0x322] sm:$0xff] }
 0x926   :  { %v8479_v48 = vadd.f32 %v8415_v1, %v8351_v24  ;;  %7482 = vrot.lane.b32.xlu0 %v6149_v35, %s9364_s8  ;;  %v6152_v1 = vld [vmem:[#allocation2 + $0x31a] sm:$0xff] }
 0x927   :  { %v8544_v23 = vmax.f32 %v8480_v26, 0.0  ;;  %v6685_v57 = vpop.permute.xlu1 %6684 }
 0x928   :  { %v8543_v27 = vmax.f32 %v8479_v48, 0.0  ;;  %6836 = vst.msk [vmem:[#allocation3 + $0x140] sm:$0xff] %vm2676_vm8, %v6685_v57  ;;  %v7451_v5 = vpop.permute.xlu0 %7450 }
 0x929   :  { %8608 = vst.msk [vmem:[#allocation13 + $0x8] sm:$0xff] %vm85_vm0, %v8544_v23  ;;  %6718 = vrot.lane.b32.xlu1 %v6533_v30, %s9362_s21  ;;  %v8422_v23 = vld [vmem:[#allocation4 + $0x38] sm:$0xff] }
 0x92a   :  { %7603 = vst.msk [vmem:[#allocation3 + $0x138] sm:$0xff] %vm3446_vm11, %v7451_v5  ;;  %6716 = vrot.lane.b32.xlu0 %v6532_v58, %s9362_s21  ;;  %v8421_v5 = vld [vmem:[#allocation4 + $0x30] sm:$0xff] }
 0x92b   :  { %8607 = vst.msk [vmem:[#allocation13] sm:$0xff] %vm85_vm0, %v8543_v27  ;;  %v7069_v55 = vpop.permute.xlu1 %7068  ;;  %v7666_v16 = vld [vmem:[#allocation3 + $0x130] sm:$0xff] }
 0x92c   :  { %7220 = vst.msk [vmem:[#allocation3 + $0x140] sm:$0xff] %vm3061_vm9, %v7069_v55  ;;  %v9083_v43 = vpop.f32.mrb[2].mxu1  ;;  %9135 = vmatprep.mubr.msk.f32.mxu1 %vm3580_vm12, %v7666_v16  ;;  %v6687_v42 = vpop.permute.xlu0 %6686  ;;  %v6537_v16 = vld [vmem:[#allocation2 + $0x338] sm:$0xff] }
 0x92d   :  { %v8285_v8 = vmul.f32 %v9083_v43, %v12702_v49  ;;  %6837 = vst.msk [vmem:[#allocation3 + $0x148] sm:$0xff] %vm2676_vm8, %v6687_v42  ;;  %7102 = vrot.lane.b32.xlu1 %v6917_v2, %s9363_s7  ;;  %v7968_v32 = vpop.f32.mrb[3].mxu1  ;;  %v6536_v2 = vld [vmem:[#allocation2 + $0x330] sm:$0xff] }
 0x92e   :  { %v8284_v51 = vmul.f32 %v12702_v49, %v7968_v32  ;;  %7100 = vrot.lane.b32.xlu0 %v6916_v6, %s9363_s7 }
 0x92f   :  { %v8354_v9 = vadd.f32 %v12705_v7, %v8285_v8  ;;  %v7453_v29 = vpop.permute.xlu1 %7452 }
 0x930   :  { %v8353_v39 = vadd.f32 %v12705_v7, %v8284_v51  ;;  %7604 = vst.msk [vmem:[#allocation3 + $0x140] sm:$0xff] %vm3446_vm11, %v7453_v29  ;;  %v7071_v14 = vpop.permute.xlu0 %7070 }
 0x931   :  { %v7667_v41 = vld [vmem:[#allocation3 + $0x138] sm:$0xff]  ;;  %v8482_v17 = vadd.f32 %v8418_v47, %v8354_v9  ;;  %7221 = vst.msk [vmem:[#allocation3 + $0x148] sm:$0xff] %vm3061_vm9, %v7071_v14  ;;  %6336 = vrot.lane.b32.xlu1 %v6150_v12, %s9361_s3 }
 0x932   :  { %9136 = vmatmul.mubr.msk.f32.gmra.mrb[38].mxu1 %vm3580_vm12, %v7667_v41  ;;  %v8481_v45 = vadd.f32 %v8417_v53, %v8353_v39  ;;  %7484 = vrot.lane.b32.xlu0 %v6150_v12, %s9364_s8  ;;  %v6921_v9 = vld [vmem:[#allocation2 + $0x339] sm:$0xff]  ;;  %v6920_v53 = vld [vmem:[#allocation2 + $0x331] sm:$0xff] }
 0x933   :  { %v8546_v37 = vmax.f32 %v8482_v17, 0.0  ;;  %v6689_v11 = vpop.permute.xlu1 %6688  ;;  %v6154_v41 = vld [vmem:[#allocation2 + $0x332] sm:$0xff] }
 0x934   :  { %v8545_v36 = vmax.f32 %v8481_v45, 0.0  ;;  %6838 = vst.msk [vmem:[#allocation3 + $0x150] sm:$0xff] %vm2676_vm8, %v6689_v11  ;;  %v7455_v13 = vpop.permute.xlu0 %7454 }
 0x935   :  { %8610 = vst.msk [vmem:[#allocation13 + $0x18] sm:$0xff] %vm85_vm0, %v8546_v37  ;;  %6338 = vrot.lane.b32.xlu1 %v6151_v46, %s9361_s3  ;;  %v8424_v37 = vld [vmem:[#allocation4 + $0x48] sm:$0xff] }
 0x936   :  { %7605 = vst.msk [vmem:[#allocation3 + $0x148] sm:$0xff] %vm3446_vm11, %v7455_v13  ;;  %7486 = vrot.lane.b32.xlu0 %v6151_v46, %s9364_s8  ;;  %v8423_v13 = vld [vmem:[#allocation4 + $0x40] sm:$0xff] }
 0x937   :  { %8609 = vst.msk [vmem:[#allocation13 + $0x10] sm:$0xff] %vm85_vm0, %v8545_v36  ;;  %v7073_v38 = vpop.permute.xlu1 %7072  ;;  %v7668_v40 = vld [vmem:[#allocation3 + $0x140] sm:$0xff] }
 0x938   :  { %7222 = vst.msk [vmem:[#allocation3 + $0x150] sm:$0xff] %vm3061_vm9, %v7073_v38  ;;  %v9086_v25 = vpop.f32.mrb[4].mxu1  ;;  %9138 = vmatprep.mubr.msk.f32.mxu1 %vm3580_vm12, %v7668_v40  ;;  %v6691_v18 = vpop.permute.xlu0 %6690 }
 0x939   :  { %v8287_v44 = vmul.f32 %v9086_v25, %v12702_v49  ;;  %6839 = vst.msk [vmem:[#allocation3 + $0x158] sm:$0xff] %vm2676_vm8, %v6691_v18  ;;  %6722 = vrot.lane.b32.xlu1 %v6535_v19, %s9362_s21  ;;  %v7978_v10 = vpop.f32.mrb[5].mxu1  ;;  %v6155_v25 = vld [vmem:[#allocation2 + $0x33a] sm:$0xff] }
 0x93a   :  { %v8286_v4 = vmul.f32 %v12702_v49, %v7978_v10  ;;  %6720 = vrot.lane.b32.xlu0 %v6534_v21, %s9362_s21  ;;  %v6539_v10 = vld [vmem:[#allocation2 + $0x350] sm:$0xff] }
 0x93b   :  { %v8356_v60 = vadd.f32 %v12705_v7, %v8287_v44  ;;  %v7457_v50 = vpop.permute.xlu1 %7456 }
 0x93c   :  { %v8355_v3 = vadd.f32 %v12705_v7, %v8286_v4  ;;  %7606 = vst.msk [vmem:[#allocation3 + $0x150] sm:$0xff] %vm3446_vm11, %v7457_v50  ;;  %v7075_v61 = vpop.permute.xlu0 %7074  ;;  %v6538_v4 = vld [vmem:[#allocation2 + $0x348] sm:$0xff]  ;;  %v6923_v50 = vld [vmem:[#allocation2 + $0x351] sm:$0xff] }
 0x93d   :  { %v7669_v54 = vld [vmem:[#allocation3 + $0x148] sm:$0xff]  ;;  %v8484_v62 = vadd.f32 %v8420_v0, %v8356_v60  ;;  %7223 = vst.msk [vmem:[#allocation3 + $0x158] sm:$0xff] %vm3061_vm9, %v7075_v61  ;;  %7106 = vrot.lane.b32.xlu1 %v6919_v22, %s9363_s7 }
 0x93e   :  { %9139 = vmatmul.mubr.msk.f32.gmra.mrb[40].mxu1 %vm3580_vm12, %v7669_v54  ;;  %v8483_v31 = vadd.f32 %v8419_v15, %v8355_v3  ;;  %7104 = vrot.lane.b32.xlu0 %v6918_v34, %s9363_s7  ;;  %v6922_v22 = vld [vmem:[#allocation2 + $0x349] sm:$0xff] }
 0x93f   :  { %v8548_v56 = vmax.f32 %v8484_v62, 0.0  ;;  %v6693_v33 = vpop.permute.xlu1 %6692 }
 0x940   :  { %v8547_v28 = vmax.f32 %v8483_v31, 0.0  ;;  %6840 = vst.msk [vmem:[#allocation3 + $0x160] sm:$0xff] %vm2676_vm8, %v6693_v33  ;;  %v7459_v59 = vpop.permute.xlu0 %7458 }
 0x941   :  { %8612 = vst.msk [vmem:[#allocation13 + $0x28] sm:$0xff] %vm85_vm0, %v8548_v56  ;;  %6340 = vrot.lane.b32.xlu1 %v6152_v1, %s9361_s3  ;;  %v8426_v56 = vld [vmem:[#allocation4 + $0x58] sm:$0xff] }
 0x942   :  { %7607 = vst.msk [vmem:[#allocation3 + $0x158] sm:$0xff] %vm3446_vm11, %v7459_v59  ;;  %7488 = vrot.lane.b32.xlu0 %v6152_v1, %s9364_s8  ;;  %v8425_v1 = vld [vmem:[#allocation4 + $0x50] sm:$0xff] }
 0x943   :  { %8611 = vst.msk [vmem:[#allocation13 + $0x20] sm:$0xff] %vm85_vm0, %v8547_v28  ;;  %v7077_v20 = vpop.permute.xlu1 %7076  ;;  %v7670_v24 = vld [vmem:[#allocation3 + $0x150] sm:$0xff] }
 0x944   :  { %7224 = vst.msk [vmem:[#allocation3 + $0x160] sm:$0xff] %vm3061_vm9, %v7077_v20  ;;  %v9089_v63 = vpop.f32.mrb[6].mxu1  ;;  %9141 = vmatprep.mubr.msk.f32.mxu1 %vm3580_vm12, %v7670_v24  ;;  %v6695_v35 = vpop.permute.xlu0 %6694  ;;  %v7307_v28 = vld [vmem:[#allocation2 + $0x352] sm:$0xff]  ;;  %v7306_v24 = vld [vmem:[#allocation2 + $0x34a] sm:$0xff] }
 0x945   :  { %v8289_v26 = vmul.f32 %v9089_v63, %v12702_v49  ;;  %6841 = vst.msk [vmem:[#allocation3 + $0x168] sm:$0xff] %vm2676_vm8, %v6695_v35  ;;  %6342 = vrot.lane.b32.xlu1 %v6153_v52, %s9361_s3  ;;  %v7988_v48 = vpop.f32.mrb[7].mxu1 }
 0x946   :  { %v8288_v57 = vmul.f32 %v12702_v49, %v7988_v48  ;;  %7490 = vrot.lane.b32.xlu0 %v6153_v52, %s9364_s8 }
 0x947   :  { %v8358_v27 = vadd.f32 %v12705_v7, %v8289_v26  ;;  %v7461_v30 = vpop.permute.xlu1 %7460 }
 0x948   :  { %v8357_v58 = vadd.f32 %v12705_v7, %v8288_v57  ;;  %7608 = vst.msk [vmem:[#allocation3 + $0x160] sm:$0xff] %vm3446_vm11, %v7461_v30  ;;  %v7079_v55 = vpop.permute.xlu0 %7078 }
 0x949   :  { %v7671_v43 = vld [vmem:[#allocation3 + $0x158] sm:$0xff]  ;;  %v8486_v42 = vadd.f32 %v8422_v23, %v8358_v27  ;;  %7225 = vst.msk [vmem:[#allocation3 + $0x168] sm:$0xff] %vm3061_vm9, %v7079_v55  ;;  %6726 = vrot.lane.b32.xlu1 %v6537_v16, %s9362_s21 }
 0x94a   :  { %9142 = vmatmul.mubr.msk.f32.gmra.mrb[42].mxu1 %vm3580_vm12, %v7671_v43  ;;  %v8485_v8 = vadd.f32 %v8421_v5, %v8357_v58  ;;  %6724 = vrot.lane.b32.xlu0 %v6536_v2, %s9362_s21 }
 0x94b   :  { %v8550_v32 = vmax.f32 %v8486_v42, 0.0  ;;  %v6697_v6 = vpop.permute.xlu1 %6696  ;;  %v8428_v42 = vld [vmem:[#allocation4 + $0x68] sm:$0xff] }
 0x94c   :  { %v8549_v47 = vmax.f32 %v8485_v8, 0.0  ;;  %6842 = vst.msk [vmem:[#allocation3 + $0x170] sm:$0xff] %vm2676_vm8, %v6697_v6  ;;  %v7463_v51 = vpop.permute.xlu0 %7462 }
 0x94d   :  { %8614 = vst.msk [vmem:[#allocation13 + $0x38] sm:$0xff] %vm85_vm0, %v8550_v32  ;;  %7110 = vrot.lane.b32.xlu1 %v6921_v9, %s9363_s7  ;;  %v8427_v32 = vld [vmem:[#allocation4 + $0x60] sm:$0xff] }
 0x94e   :  { %7609 = vst.msk [vmem:[#allocation3 + $0x168] sm:$0xff] %vm3446_vm11, %v7463_v51  ;;  %7108 = vrot.lane.b32.xlu0 %v6920_v53, %s9363_s7 }
 0x94f   :  { %8613 = vst.msk [vmem:[#allocation13 + $0x30] sm:$0xff] %vm85_vm0, %v8549_v47  ;;  %v7081_v29 = vpop.permute.xlu1 %7080  ;;  %v7672_v39 = vld [vmem:[#allocation3 + $0x160] sm:$0xff] }
 0x950   :  { %7226 = vst.msk [vmem:[#allocation3 + $0x170] sm:$0xff] %vm3061_vm9, %v7081_v29  ;;  %v9092_v14 = vpop.f32.mrb[8].mxu1  ;;  %9144 = vmatprep.mubr.msk.f32.mxu1 %vm3580_vm12, %v7672_v39  ;;  %v6699_v12 = vpop.permute.xlu0 %6698 }
 0x951   :  { %v8291_v17 = vmul.f32 %v9092_v14, %v12702_v49  ;;  %6843 = vst.msk [vmem:[#allocation3 + $0x178] sm:$0xff] %vm2676_vm8, %v6699_v12  ;;  %6344 = vrot.lane.b32.xlu1 %v6154_v41, %s9361_s3  ;;  %v7998_v45 = vpop.f32.mrb[9].mxu1 }
 0x952   :  { %v8290_v11 = vmul.f32 %v12702_v49, %v7998_v45  ;;  %7492 = vrot.lane.b32.xlu0 %v6154_v41, %s9364_s8 }
 0x953   :  { %v8360_v36 = vadd.f32 %v12705_v7, %v8291_v17  ;;  %v7465_v46 = vpop.permute.xlu1 %7464 }
 0x954   :  { %v8359_v38 = vadd.f32 %v12705_v7, %v8290_v11  ;;  %7610 = vst.msk [vmem:[#allocation3 + $0x170] sm:$0xff] %vm3446_vm11, %v7465_v46  ;;  %v7083_v40 = vpop.permute.xlu0 %7082  ;;  %v8430_v46 = vld [vmem:[#allocation4 + $0x78] sm:$0xff] }
 0x955   :  { %v7673_v18 = vld [vmem:[#allocation3 + $0x168] sm:$0xff]  ;;  %v8488_v19 = vadd.f32 %v8424_v37, %v8360_v36  ;;  %7227 = vst.msk [vmem:[#allocation3 + $0x178] sm:$0xff] %vm3061_vm9, %v7083_v40  ;;  %6346 = vrot.lane.b32.xlu1 %v6155_v25, %s9361_s3 }
 0x956   :  { %9145 = vmatmul.mubr.msk.f32.gmra.mrb[44].mxu1 %vm3580_vm12, %v7673_v18  ;;  %v8487_v44 = vadd.f32 %v8423_v13, %v8359_v38  ;;  %7494 = vrot.lane.b32.xlu0 %v6155_v25, %s9364_s8  ;;  %v8429_v25 = vld [vmem:[#allocation4 + $0x70] sm:$0xff] }
 0x957   :  { %v8552_v21 = vmax.f32 %v8488_v19, 0.0  ;;  %v6319_v0 = vpop.permute.xlu1 %6318 }
 0x958   :  { %v8551_v60 = vmax.f32 %v8487_v44, 0.0  ;;  %6461 = vst.msk [vmem:[#allocation3 + $0x188] sm:$0xff] %vm2290_vm7, %v6319_v0  ;;  %v7467_v15 = vpop.permute.xlu0 %7466 }
 0x959   :  { %8616 = vst.msk [vmem:[#allocation13 + $0x48] sm:$0xff] %vm85_vm0, %v8552_v21  ;;  %6730 = vrot.lane.b32.xlu1 %v6539_v10, %s9362_s21 }
 0x95a   :  { %7611 = vst.msk [vmem:[#allocation3 + $0x178] sm:$0xff] %vm3446_vm11, %v7467_v15  ;;  %6728 = vrot.lane.b32.xlu0 %v6538_v4, %s9362_s21 }
 0x95b   :  { %8615 = vst.msk [vmem:[#allocation13 + $0x40] sm:$0xff] %vm85_vm0, %v8551_v60  ;;  %v6703_v3 = vpop.permute.xlu1 %6702  ;;  %v7674_v61 = vld [vmem:[#allocation3 + $0x170] sm:$0xff] }
 0x95c   :  { %6845 = vst.msk [vmem:[#allocation3 + $0x188] sm:$0xff] %vm2676_vm8, %v6703_v3  ;;  %v9095_v54 = vpop.f32.mrb[10].mxu1  ;;  %9147 = vmatprep.mubr.msk.f32.mxu1 %vm3580_vm12, %v7674_v61  ;;  %v6701_v62 = vpop.permute.xlu0 %6700 }
 0x95d   :  { %v8293_v34 = vmul.f32 %v9095_v54, %v12702_v49  ;;  %6844 = vst.msk [vmem:[#allocation3 + $0x180] sm:$0xff] %vm2676_vm8, %v6701_v62  ;;  %v8008_v31 = vpop.f32.mrb[11].mxu1  ;;  %7114 = vrot.lane.b32.xlu1 %v6923_v50, %s9363_s7 }
 0x95e   :  { %v8292_v33 = vmul.f32 %v12702_v49, %v8008_v31  ;;  %7112 = vrot.lane.b32.xlu0 %v6922_v22, %s9363_s7  ;;  %v8432_v31 = vld [vmem:[#allocation4 + $0x88] sm:$0xff] }
 0x95f   :  { %v8362_v59 = vadd.f32 %v12705_v7, %v8293_v34  ;;  %v7087_v20 = vpop.permute.xlu1 %7086 }
 0x960   :  { %v8361_v63 = vadd.f32 %v12705_v7, %v8292_v33  ;;  %7229 = vst.msk [vmem:[#allocation3 + $0x188] sm:$0xff] %vm3061_vm9, %v7087_v20  ;;  %v7085_v35 = vpop.permute.xlu0 %7084 }
 0x961   :  { %v7675_v52 = vld [vmem:[#allocation3 + $0x178] sm:$0xff]  ;;  %v8490_v26 = vadd.f32 %v8426_v56, %v8362_v59  ;;  %7228 = vst.msk [vmem:[#allocation3 + $0x180] sm:$0xff] %vm3061_vm9, %v7085_v35  ;;  %7498 = vrot.lane.b32.xlu1 %v7307_v28, %s9364_s8  ;;  %v8431_v28 = vld [vmem:[#allocation4 + $0x80] sm:$0xff] }
 0x962   :  { %9148 = vmatmul.mubr.msk.f32.gmra.mrb[46].mxu1 %vm3580_vm12, %v7675_v52  ;;  %v8489_v48 = vadd.f32 %v8425_v1, %v8361_v63  ;;  %7496 = vrot.lane.b32.xlu0 %v7306_v24, %s9364_s8 }
 0x963   :  { %v8554_v23 = vmax.f32 %v8490_v26, 0.0  ;;  %v6321_v57 = vpop.permute.xlu1 %6320 }
 0x964   :  { %v8553_v27 = vmax.f32 %v8489_v48, 0.0  ;;  %6462 = vst.msk [vmem:[#allocation3 + $0x190] sm:$0xff] %vm2290_vm7, %v6321_v57  ;;  %v7469_v5 = vpop.permute.xlu0 %7468 }
 0x965   :  { %8618 = vst.msk [vmem:[#allocation13 + $0x58] sm:$0xff] %vm85_vm0, %v8554_v23 }
 0x966   :  { %7612 = vst.msk [vmem:[#allocation3 + $0x180] sm:$0xff] %vm3446_vm11, %v7469_v5 }
 0x967   :  { %8617 = vst.msk [vmem:[#allocation13 + $0x50] sm:$0xff] %vm85_vm0, %v8553_v27  ;;  %v6323_v30 = vpop.permute.xlu1 %6322 }
 0x968   :  { %6463 = vst.msk [vmem:[#allocation3 + $0x198] sm:$0xff] %vm2290_vm7, %v6323_v30  ;;  %v9098_v58 = vpop.f32.mrb[12].mxu1  ;;  %v7471_v55 = vpop.permute.xlu0 %7470 }
 0x969   :  { %v8295_v16 = vmul.f32 %v9098_v58, %v12702_v49  ;;  %7613 = vst.msk [vmem:[#allocation3 + $0x188] sm:$0xff] %vm3446_vm11, %v7471_v55  ;;  %v8018_v43 = vpop.f32.mrb[13].mxu1  ;;  %v8434_v55 = vld [vmem:[#allocation4 + $0x98] sm:$0xff] }
 0x96a   :  { %v8294_v2 = vmul.f32 %v12702_v49, %v8018_v43 }
 0x96b   :  { %v8364_v8 = vadd.f32 %v12705_v7, %v8295_v16  ;;  %v6707_v6 = vpop.permute.xlu1 %6706 }
 0x96c   :  { %v8363_v47 = vadd.f32 %v12705_v7, %v8294_v2  ;;  %6847 = vst.msk [vmem:[#allocation3 + $0x198] sm:$0xff] %vm2676_vm8, %v6707_v6  ;;  %v6705_v51 = vpop.permute.xlu0 %6704 }
 0x96d   :  { %v7676_v9 = vld [vmem:[#allocation3 + $0x180] sm:$0xff]  ;;  %v8492_v53 = vadd.f32 %v8428_v42, %v8364_v8  ;;  %6846 = vst.msk [vmem:[#allocation3 + $0x190] sm:$0xff] %vm2676_vm8, %v6705_v51  ;;  %v8433_v42 = vld [vmem:[#allocation4 + $0x90] sm:$0xff] }
 0x96e   :  { %9150 = vmatprep.mubr.msk.f32.mxu1 %vm3580_vm12, %v7676_v9  ;;  %v8491_v29 = vadd.f32 %v8427_v32, %v8363_v47 }
 0x96f   :  { %v8556_v39 = vmax.f32 %v8492_v53, 0.0  ;;  %v7091_v14 = vpop.permute.xlu1 %7090 }
 0x970   :  { %v8555_v12 = vmax.f32 %v8491_v29, 0.0  ;;  %7231 = vst.msk [vmem:[#allocation3 + $0x198] sm:$0xff] %vm3061_vm9, %v7091_v14  ;;  %v7089_v41 = vpop.permute.xlu0 %7088  ;;  %v7677_v17 = vld [vmem:[#allocation3 + $0x188] sm:$0xff] }
 0x971   :  { %8620 = vst.msk [vmem:[#allocation13 + $0x68] sm:$0xff] %vm85_vm0, %v8556_v39  ;;  %9151 = vmatmul.mubr.msk.f32.gmra.mrb[48].mxu1 %vm3580_vm12, %v7677_v17 }
 0x972   :  { %7230 = vst.msk [vmem:[#allocation3 + $0x190] sm:$0xff] %vm3061_vm9, %v7089_v41 }
 0x973   :  { %8619 = vst.msk [vmem:[#allocation13 + $0x60] sm:$0xff] %vm85_vm0, %v8555_v12  ;;  %v6325_v45 = vpop.permute.xlu1 %6324 }
 0x974   :  { %6464 = vst.msk [vmem:[#allocation3 + $0x1a0] sm:$0xff] %vm2290_vm7, %v6325_v45  ;;  %v9101_v37 = vpop.f32.mrb[14].mxu1  ;;  %v7473_v11 = vpop.permute.xlu0 %7472 }
 0x975   :  { %v8297_v36 = vmul.f32 %v9101_v37, %v12702_v49  ;;  %7614 = vst.msk [vmem:[#allocation3 + $0x190] sm:$0xff] %vm3446_vm11, %v7473_v11  ;;  %v8028_v13 = vpop.f32.mrb[15].mxu1  ;;  %v8436_v37 = vld [vmem:[#allocation4 + $0xa8] sm:$0xff] }
 0x976   :  { %v8296_v38 = vmul.f32 %v12702_v49, %v8028_v13  ;;  %v8435_v13 = vld [vmem:[#allocation4 + $0xa0] sm:$0xff] }
 0x977   :  { %v8366_v40 = vadd.f32 %v12705_v7, %v8297_v36  ;;  %v6327_v18 = vpop.permute.xlu1 %6326 }
 0x978   :  { %v8365_v19 = vadd.f32 %v12705_v7, %v8296_v38  ;;  %6465 = vst.msk [vmem:[#allocation3 + $0x1a8] sm:$0xff] %vm2290_vm7, %v6327_v18  ;;  %v7475_v44 = vpop.permute.xlu0 %7474 }
 0x979   :  { %v8494_v10 = vadd.f32 %v8430_v46, %v8366_v40  ;;  %7615 = vst.msk [vmem:[#allocation3 + $0x198] sm:$0xff] %vm3446_vm11, %v7475_v44 }
 0x97a   :  { %v8493_v21 = vadd.f32 %v8429_v25, %v8365_v19 }
 0x97b   :  { %v8558_v0 = vmax.f32 %v8494_v10, 0.0  ;;  %v6711_v4 = vpop.permute.xlu1 %6710 }
 0x97c   :  { %v8557_v60 = vmax.f32 %v8493_v21, 0.0  ;;  %6849 = vst.msk [vmem:[#allocation3 + $0x1a8] sm:$0xff] %vm2676_vm8, %v6711_v4  ;;  %v6709_v15 = vpop.permute.xlu0 %6708  ;;  %v7678_v50 = vld [vmem:[#allocation3 + $0x190] sm:$0xff] }
 0x97d   :  { %8622 = vst.msk [vmem:[#allocation13 + $0x78] sm:$0xff] %vm85_vm0, %v8558_v0  ;;  %9153 = vmatprep.mubr.msk.f32.mxu1 %vm3580_vm12, %v7678_v50 }
 0x97e   :  { %6848 = vst.msk [vmem:[#allocation3 + $0x1a0] sm:$0xff] %vm2676_vm8, %v6709_v15 }
 0x97f   :  { %8621 = vst.msk [vmem:[#allocation13 + $0x70] sm:$0xff] %vm85_vm0, %v8557_v60  ;;  %v7095_v3 = vpop.permute.xlu1 %7094 }
 0x980   :  { %7233 = vst.msk [vmem:[#allocation3 + $0x1a8] sm:$0xff] %vm3061_vm9, %v7095_v3  ;;  %v9104_v61 = vpop.f32.mrb[16].mxu1  ;;  %v7093_v22 = vpop.permute.xlu0 %7092  ;;  %v7679_v54 = vld [vmem:[#allocation3 + $0x198] sm:$0xff] }
 0x981   :  { %v8299_v62 = vmul.f32 %v9104_v61, %v12702_v49  ;;  %7232 = vst.msk [vmem:[#allocation3 + $0x1a0] sm:$0xff] %vm3061_vm9, %v7093_v22  ;;  %v8038_v34 = vpop.f32.mrb[17].mxu1  ;;  %9154 = vmatmul.mubr.msk.f32.gmra.mrb[50].mxu1 %vm3580_vm12, %v7679_v54  ;;  %v8438_v22 = vld [vmem:[#allocation4 + $0xb8] sm:$0xff] }
 0x982   :  { %v8298_v56 = vmul.f32 %v12702_v49, %v8038_v34  ;;  %v8437_v34 = vld [vmem:[#allocation4 + $0xb0] sm:$0xff] }
 0x983   :  { %v8368_v33 = vadd.f32 %v12705_v7, %v8299_v62  ;;  %v6329_v59 = vpop.permute.xlu1 %6328 }
 0x984   :  { %v8367_v1 = vadd.f32 %v12705_v7, %v8298_v56  ;;  %6466 = vst.msk [vmem:[#allocation3 + $0x1b0] sm:$0xff] %vm2290_vm7, %v6329_v59  ;;  %v7477_v20 = vpop.permute.xlu0 %7476 }
 0x985   :  { %v8496_v24 = vadd.f32 %v8432_v31, %v8368_v33  ;;  %7616 = vst.msk [vmem:[#allocation3 + $0x1a0] sm:$0xff] %vm3446_vm11, %v7477_v20 }
 0x986   :  { %v8495_v63 = vadd.f32 %v8431_v28, %v8367_v1 }
 0x987   :  { %v8560_v35 = vmax.f32 %v8496_v24, 0.0  ;;  %v6331_v52 = vpop.permute.xlu1 %6330 }
 0x988   :  { %v8559_v26 = vmax.f32 %v8495_v63, 0.0  ;;  %6467 = vst.msk [vmem:[#allocation3 + $0x1b8] sm:$0xff] %vm2290_vm7, %v6331_v52  ;;  %v7479_v48 = vpop.permute.xlu0 %7478 }
 0x989   :  { %8624 = vst.msk [vmem:[#allocation13 + $0x88] sm:$0xff] %vm85_vm0, %v8560_v35 }
 0x98a   :  { %7617 = vst.msk [vmem:[#allocation3 + $0x1a8] sm:$0xff] %vm3446_vm11, %v7479_v48 }
 0x98b   :  { %8623 = vst.msk [vmem:[#allocation13 + $0x80] sm:$0xff] %vm85_vm0, %v8559_v26  ;;  %v6715_v23 = vpop.permute.xlu1 %6714 }
 0x98c   :  { %6851 = vst.msk [vmem:[#allocation3 + $0x1b8] sm:$0xff] %vm2676_vm8, %v6715_v23  ;;  %v9107_v57 = vpop.f32.mrb[18].mxu1  ;;  %v6713_v27 = vpop.permute.xlu0 %6712  ;;  %v7680_v5 = vld [vmem:[#allocation3 + $0x1a0] sm:$0xff] }
 0x98d   :  { %v8301_v30 = vmul.f32 %v9107_v57, %v12702_v49  ;;  %6850 = vst.msk [vmem:[#allocation3 + $0x1b0] sm:$0xff] %vm2676_vm8, %v6713_v27  ;;  %v8048_v58 = vpop.f32.mrb[19].mxu1  ;;  %9156 = vmatprep.mubr.msk.f32.mxu1 %vm3580_vm12, %v7680_v5  ;;  %v8440_v5 = vld [vmem:[#allocation4 + $0xc8] sm:$0xff] }
 0x98e   :  { %v8300_v16 = vmul.f32 %v12702_v49, %v8048_v58 }
 0x98f   :  { %v8370_v43 = vadd.f32 %v12705_v7, %v8301_v30  ;;  %v7099_v2 = vpop.permute.xlu1 %7098 }
 0x990   :  { %v8369_v8 = vadd.f32 %v12705_v7, %v8300_v16  ;;  %7235 = vst.msk [vmem:[#allocation3 + $0x1b8] sm:$0xff] %vm3061_vm9, %v7099_v2  ;;  %v7097_v32 = vpop.permute.xlu0 %7096 }
 0x991   :  { %v7681_v6 = vld [vmem:[#allocation3 + $0x1a8] sm:$0xff]  ;;  %v8498_v47 = vadd.f32 %v8434_v55, %v8370_v43  ;;  %7234 = vst.msk [vmem:[#allocation3 + $0x1b0] sm:$0xff] %vm3061_vm9, %v7097_v32  ;;  %v8439_v55 = vld [vmem:[#allocation4 + $0xc0] sm:$0xff] }
 0x992   :  { %9157 = vmatmul.mubr.msk.f32.gmra.mrb[52].mxu1 %vm3580_vm12, %v7681_v6  ;;  %v8497_v51 = vadd.f32 %v8433_v42, %v8369_v8 }
 0x993   :  { %v8562_v9 = vmax.f32 %v8498_v47, 0.0  ;;  %v6333_v53 = vpop.permute.xlu1 %6332 }
 0x994   :  { %v8561_v29 = vmax.f32 %v8497_v51, 0.0  ;;  %6468 = vst.msk [vmem:[#allocation3 + $0x1c0] sm:$0xff] %vm2290_vm7, %v6333_v53  ;;  %v7481_v39 = vpop.permute.xlu0 %7480 }
 0x995   :  { %8626 = vst.msk [vmem:[#allocation13 + $0x98] sm:$0xff] %vm85_vm0, %v8562_v9 }
 0x996   :  { %7618 = vst.msk [vmem:[#allocation3 + $0x1b0] sm:$0xff] %vm3446_vm11, %v7481_v39 }
 0x997   :  { %8625 = vst.msk [vmem:[#allocation13 + $0x90] sm:$0xff] %vm85_vm0, %v8561_v29  ;;  %v6335_v14 = vpop.permute.xlu1 %6334 }
 0x998   :  { %6469 = vst.msk [vmem:[#allocation3 + $0x1c8] sm:$0xff] %vm2290_vm7, %v6335_v14  ;;  %v9110_v12 = vpop.f32.mrb[20].mxu1  ;;  %v7483_v41 = vpop.permute.xlu0 %7482 }
 0x999   :  { %v8303_v17 = vmul.f32 %v9110_v12, %v12702_v49  ;;  %7619 = vst.msk [vmem:[#allocation3 + $0x1b8] sm:$0xff] %vm3446_vm11, %v7483_v41  ;;  %v8058_v45 = vpop.f32.mrb[21].mxu1  ;;  %v8442_v41 = vld [vmem:[#allocation4 + $0xd8] sm:$0xff] }
 0x99a   :  { %v8302_v11 = vmul.f32 %v12702_v49, %v8058_v45 }
 0x99b   :  { %v8372_v36 = vadd.f32 %v12705_v7, %v8303_v17  ;;  %v6719_v46 = vpop.permute.xlu1 %6718 }
 0x99c   :  { %v8371_v38 = vadd.f32 %v12705_v7, %v8302_v11  ;;  %6853 = vst.msk [vmem:[#allocation3 + $0x1c8] sm:$0xff] %vm2676_vm8, %v6719_v46  ;;  %v6717_v40 = vpop.permute.xlu0 %6716 }
 0x99d   :  { %v7682_v25 = vld [vmem:[#allocation3 + $0x1b0] sm:$0xff]  ;;  %v8500_v18 = vadd.f32 %v8436_v37, %v8372_v36  ;;  %6852 = vst.msk [vmem:[#allocation3 + $0x1c0] sm:$0xff] %vm2676_vm8, %v6717_v40 }
 0x99e   :  { %9159 = vmatprep.mubr.msk.f32.mxu1 %vm3580_vm12, %v7682_v25  ;;  %v8499_v19 = vadd.f32 %v8435_v13, %v8371_v38  ;;  %v8441_v37 = vld [vmem:[#allocation4 + $0xd0] sm:$0xff] }
 0x99f   :  { %v8564_v44 = vmax.f32 %v8500_v18, 0.0  ;;  %v7103_v10 = vpop.permute.xlu1 %7102 }
 0x9a0   :  { %v8563_v21 = vmax.f32 %v8499_v19, 0.0  ;;  %7237 = vst.msk [vmem:[#allocation3 + $0x1c8] sm:$0xff] %vm3061_vm9, %v7103_v10  ;;  %v7101_v0 = vpop.permute.xlu0 %7100  ;;  %v7683_v4 = vld [vmem:[#allocation3 + $0x1b8] sm:$0xff] }
 0x9a1   :  { %8628 = vst.msk [vmem:[#allocation13 + $0xa8] sm:$0xff] %vm85_vm0, %v8564_v44  ;;  %9160 = vmatmul.mubr.msk.f32.gmra.mrb[54].mxu1 %vm3580_vm12, %v7683_v4 }
 0x9a2   :  { %7236 = vst.msk [vmem:[#allocation3 + $0x1c0] sm:$0xff] %vm3061_vm9, %v7101_v0 }
 0x9a3   :  { %8627 = vst.msk [vmem:[#allocation13 + $0xa0] sm:$0xff] %vm85_vm0, %v8563_v21  ;;  %v6337_v60 = vpop.permute.xlu1 %6336 }
 0x9a4   :  { %6470 = vst.msk [vmem:[#allocation3 + $0x1d0] sm:$0xff] %vm2290_vm7, %v6337_v60  ;;  %v9113_v15 = vpop.f32.mrb[22].mxu1  ;;  %v7485_v50 = vpop.permute.xlu0 %7484 }
 0x9a5   :  { %v8305_v3 = vmul.f32 %v9113_v15, %v12702_v49  ;;  %7620 = vst.msk [vmem:[#allocation3 + $0x1c0] sm:$0xff] %vm3446_vm11, %v7485_v50  ;;  %v8068_v61 = vpop.f32.mrb[23].mxu1  ;;  %v8444_v15 = vld [vmem:[#allocation4 + $0xe8] sm:$0xff] }
 0x9a6   :  { %v8304_v54 = vmul.f32 %v12702_v49, %v8068_v61  ;;  %v8443_v61 = vld [vmem:[#allocation4 + $0xe0] sm:$0xff] }
 0x9a7   :  { %v8374_v62 = vadd.f32 %v12705_v7, %v8305_v3  ;;  %v6339_v31 = vpop.permute.xlu1 %6338 }
 0x9a8   :  { %v8373_v56 = vadd.f32 %v12705_v7, %v8304_v54  ;;  %6471 = vst.msk [vmem:[#allocation3 + $0x1d8] sm:$0xff] %vm2290_vm7, %v6339_v31  ;;  %v7487_v33 = vpop.permute.xlu0 %7486 }
 0x9a9   :  { %v8502_v28 = vadd.f32 %v8438_v22, %v8374_v62  ;;  %7621 = vst.msk [vmem:[#allocation3 + $0x1c8] sm:$0xff] %vm3446_vm11, %v7487_v33 }
 0x9aa   :  { %v8501_v59 = vadd.f32 %v8437_v34, %v8373_v56 }
 0x9ab   :  { %v8566_v1 = vmax.f32 %v8502_v28, 0.0  ;;  %v6723_v20 = vpop.permute.xlu1 %6722 }
 0x9ac   :  { %v8565_v24 = vmax.f32 %v8501_v59, 0.0  ;;  %6855 = vst.msk [vmem:[#allocation3 + $0x1d8] sm:$0xff] %vm2676_vm8, %v6723_v20  ;;  %v6721_v63 = vpop.permute.xlu0 %6720  ;;  %v7684_v35 = vld [vmem:[#allocation3 + $0x1c0] sm:$0xff] }
 0x9ad   :  { %8630 = vst.msk [vmem:[#allocation13 + $0xb8] sm:$0xff] %vm85_vm0, %v8566_v1  ;;  %9162 = vmatprep.mubr.msk.f32.mxu1 %vm3580_vm12, %v7684_v35 }
 0x9ae   :  { %6854 = vst.msk [vmem:[#allocation3 + $0x1d0] sm:$0xff] %vm2676_vm8, %v6721_v63 }
 0x9af   :  { %8629 = vst.msk [vmem:[#allocation13 + $0xb0] sm:$0xff] %vm85_vm0, %v8565_v24  ;;  %v7107_v52 = vpop.permute.xlu1 %7106 }
 0x9b0   :  { %7239 = vst.msk [vmem:[#allocation3 + $0x1d8] sm:$0xff] %vm3061_vm9, %v7107_v52  ;;  %v9116_v26 = vpop.f32.mrb[24].mxu1  ;;  %v7105_v48 = vpop.permute.xlu0 %7104  ;;  %v7685_v23 = vld [vmem:[#allocation3 + $0x1c8] sm:$0xff] }
 0x9b1   :  { %v8307_v57 = vmul.f32 %v9116_v26, %v12702_v49  ;;  %7238 = vst.msk [vmem:[#allocation3 + $0x1d0] sm:$0xff] %vm3061_vm9, %v7105_v48  ;;  %v8078_v27 = vpop.f32.mrb[25].mxu1  ;;  %9163 = vmatmul.mubr.msk.f32.gmra.mrb[56].mxu1 %vm3580_vm12, %v7685_v23  ;;  %v8446_v48 = vld [vmem:[#allocation4 + $0xf8] sm:$0xff]  ;;  %v12949_v23 = vld [vmem:[#allocation12] ss:$0 sm:$0xff] }
 0x9b2   :  { %v8306_v30 = vmul.f32 %v12702_v49, %v8078_v27 }
 0x9b3   :  { %v8376_v58 = vadd.f32 %v12705_v7, %v8307_v57  ;;  %v6341_v16 = vpop.permute.xlu1 %6340 }
 0x9b4   :  { %v8375_v43 = vadd.f32 %v12705_v7, %v8306_v30  ;;  %6472 = vst.msk [vmem:[#allocation3 + $0x1e0] sm:$0xff] %vm2290_vm7, %v6341_v16  ;;  %v7489_v42 = vpop.permute.xlu0 %7488 }
 0x9b5   :  { %v8504_v2 = vadd.f32 %v8440_v5, %v8376_v58  ;;  %7622 = vst.msk [vmem:[#allocation3 + $0x1d0] sm:$0xff] %vm3446_vm11, %v7489_v42  ;;  %v8445_v5 = vld [vmem:[#allocation4 + $0xf0] sm:$0xff] }
 0x9b6   :  { %v8503_v8 = vadd.f32 %v8439_v55, %v8375_v43 }
 0x9b7   :  { %v8568_v32 = vmax.f32 %v8504_v2, 0.0  ;;  %v6343_v6 = vpop.permute.xlu1 %6342 }
 0x9b8   :  { %v8567_v47 = vmax.f32 %v8503_v8, 0.0  ;;  %6473 = vst.msk [vmem:[#allocation3 + $0x1e8] sm:$0xff] %vm2290_vm7, %v6343_v6  ;;  %v7491_v51 = vpop.permute.xlu0 %7490  ;;  %v8448_v6 = vld [vmem:[#allocation4 + $0x108] sm:$0xff] }
 0x9b9   :  { %8632 = vst.msk [vmem:[#allocation13 + $0xc8] sm:$0xff] %vm85_vm0, %v8568_v32 }
 0x9ba   :  { %7623 = vst.msk [vmem:[#allocation3 + $0x1d8] sm:$0xff] %vm3446_vm11, %v7491_v51 }
 0x9bb   :  { %8631 = vst.msk [vmem:[#allocation13 + $0xc0] sm:$0xff] %vm85_vm0, %v8567_v47  ;;  %v6727_v9 = vpop.permute.xlu1 %6726  ;;  %v12960_v47 = vld [vmem:[#allocation12 + $0x1] ss:$0 sm:$0xff] }
 0x9bc   :  { %6857 = vst.msk [vmem:[#allocation3 + $0x1e8] sm:$0xff] %vm2676_vm8, %v6727_v9  ;;  %v9119_v53 = vpop.f32.mrb[26].mxu1  ;;  %v6725_v29 = vpop.permute.xlu0 %6724  ;;  %v7686_v39 = vld [vmem:[#allocation3 + $0x1d0] sm:$0xff]  ;;  %v8447_v9 = vld [vmem:[#allocation4 + $0x100] sm:$0xff] }
 0x9bd   :  { %v8309_v14 = vmul.f32 %v9119_v53, %v12702_v49  ;;  %6856 = vst.msk [vmem:[#allocation3 + $0x1e0] sm:$0xff] %vm2676_vm8, %v6725_v29  ;;  %v8088_v12 = vpop.f32.mrb[27].mxu1  ;;  %9165 = vmatprep.mubr.msk.f32.mxu1 %vm3580_vm12, %v7686_v39 }
 0x9be   :  { %v8308_v17 = vmul.f32 %v12702_v49, %v8088_v12 }
 0x9bf   :  { %v8378_v45 = vadd.f32 %v12705_v7, %v8309_v14  ;;  %v7111_v11 = vpop.permute.xlu1 %7110 }
 0x9c0   :  { %v8377_v36 = vadd.f32 %v12705_v7, %v8308_v17  ;;  %7241 = vst.msk [vmem:[#allocation3 + $0x1e8] sm:$0xff] %vm3061_vm9, %v7111_v11  ;;  %v7109_v13 = vpop.permute.xlu0 %7108 }
 0x9c1   :  { %v7687_v46 = vld [vmem:[#allocation3 + $0x1d8] sm:$0xff]  ;;  %v8506_v38 = vadd.f32 %v8442_v41, %v8378_v45  ;;  %7240 = vst.msk [vmem:[#allocation3 + $0x1e0] sm:$0xff] %vm3061_vm9, %v7109_v13  ;;  %v8449_v13 = vld [vmem:[#allocation4 + $0x110] sm:$0xff] }
 0x9c2   :  { %9166 = vmatmul.mubr.msk.f32.gmra.mrb[58].mxu1 %vm3580_vm12, %v7687_v46  ;;  %v8505_v40 = vadd.f32 %v8441_v37, %v8377_v36  ;;  %v8450_v37 = vld [vmem:[#allocation4 + $0x118] sm:$0xff] }
 0x9c3   :  { %v8570_v25 = vmax.f32 %v8506_v38, 0.0  ;;  %v6345_v18 = vpop.permute.xlu1 %6344 }
 0x9c4   :  { %v8569_v19 = vmax.f32 %v8505_v40, 0.0  ;;  %6474 = vst.msk [vmem:[#allocation3 + $0x1f0] sm:$0xff] %vm2290_vm7, %v6345_v18  ;;  %v7493_v44 = vpop.permute.xlu0 %7492 }
 0x9c5   :  { %8634 = vst.msk [vmem:[#allocation13 + $0xd8] sm:$0xff] %vm85_vm0, %v8570_v25 }
 0x9c6   :  { %7624 = vst.msk [vmem:[#allocation3 + $0x1e0] sm:$0xff] %vm3446_vm11, %v7493_v44 }
 0x9c7   :  { %8633 = vst.msk [vmem:[#allocation13 + $0xd0] sm:$0xff] %vm85_vm0, %v8569_v19  ;;  %v6347_v10 = vpop.permute.xlu1 %6346 }
 0x9c8   :  { %6475 = vst.msk [vmem:[#allocation3 + $0x1f8] sm:$0xff] %vm2290_vm7, %v6347_v10  ;;  %v9122_v21 = vpop.f32.mrb[28].mxu1  ;;  %v7495_v0 = vpop.permute.xlu0 %7494 }
 0x9c9   :  { %v8311_v4 = vmul.f32 %v9122_v21, %v12702_v49  ;;  %7625 = vst.msk [vmem:[#allocation3 + $0x1e8] sm:$0xff] %vm3446_vm11, %v7495_v0  ;;  %v8098_v60 = vpop.f32.mrb[29].mxu1  ;;  %v8452_v21 = vld [vmem:[#allocation4 + $0x128] sm:$0xff] }
 0x9ca   :  { %v8310_v50 = vmul.f32 %v12702_v49, %v8098_v60  ;;  %v8451_v60 = vld [vmem:[#allocation4 + $0x120] sm:$0xff] }
 0x9cb   :  { %v8380_v3 = vadd.f32 %v12705_v7, %v8311_v4  ;;  %v6731_v22 = vpop.permute.xlu1 %6730 }
 0x9cc   :  { %v8379_v54 = vadd.f32 %v12705_v7, %v8310_v50  ;;  %v6729_v62 = vpop.permute.xlu0 %6728  ;;  %6859 = vst.msk [vmem:[#allocation3 + $0x1f8] sm:$0xff] %vm2676_vm8, %v6731_v22 }
 0x9cd   :  { %v7688_v34 = vld [vmem:[#allocation3 + $0x1e0] sm:$0xff]  ;;  %v8508_v31 = vadd.f32 %v8444_v15, %v8380_v3  ;;  %6858 = vst.msk [vmem:[#allocation3 + $0x1f0] sm:$0xff] %vm2676_vm8, %v6729_v62 }
 0x9ce   :  { %9168 = vmatprep.mubr.msk.f32.mxu1 %vm3580_vm12, %v7688_v34  ;;  %v8507_v56 = vadd.f32 %v8443_v61, %v8379_v54 }
 0x9cf   :  { %v8572_v33 = vmax.f32 %v8508_v31, 0.0  ;;  %v7115_v28 = vpop.permute.xlu1 %7114  ;;  %v8454_v31 = vld [vmem:[#allocation4 + $0x138] sm:$0xff] }
 0x9d0   :  { %v8571_v59 = vmax.f32 %v8507_v56, 0.0  ;;  %v7113_v1 = vpop.permute.xlu0 %7112  ;;  %7243 = vst.msk [vmem:[#allocation3 + $0x1f8] sm:$0xff] %vm3061_vm9, %v7115_v28  ;;  %v7689_v20 = vld [vmem:[#allocation3 + $0x1e8] sm:$0xff]  ;;  %v8453_v28 = vld [vmem:[#allocation4 + $0x130] sm:$0xff] }
 0x9d1   :  { %8636 = vst.msk [vmem:[#allocation13 + $0xe8] sm:$0xff] %vm85_vm0, %v8572_v33  ;;  %9169 = vmatmul.mubr.msk.f32.gmra.mrb[60].mxu1 %vm3580_vm12, %v7689_v20 }
 0x9d2   :  { %7242 = vst.msk [vmem:[#allocation3 + $0x1f0] sm:$0xff] %vm3061_vm9, %v7113_v1 }
 0x9d3   :  { %8635 = vst.msk [vmem:[#allocation13 + $0xe0] sm:$0xff] %vm85_vm0, %v8571_v59  ;;  %v7499_v24 = vpop.permute.xlu1 %7498 }
 0x9d4   :  { %v9125_v63 = vpop.f32.mrb[30].mxu1  ;;  %v7497_v35 = vpop.permute.xlu0 %7496  ;;  %7627 = vst.msk [vmem:[#allocation3 + $0x1f8] sm:$0xff] %vm3446_vm11, %v7499_v24 }
 0x9d5   :  { %v8313_v52 = vmul.f32 %v9125_v63, %v12702_v49  ;;  %7626 = vst.msk [vmem:[#allocation3 + $0x1f0] sm:$0xff] %vm3446_vm11, %v7497_v35  ;;  %v8108_v26 = vpop.f32.mrb[31].mxu1 }
 0x9d6   :  { %v8312_v57 = vmul.f32 %v12949_v23, %v8108_v26 }
 0x9d7   :  { %v8382_v27 = vadd.f32 %v12705_v7, %v8313_v52 }
 0x9d8   :  { %v8381_v30 = vadd.f32 %v12705_v7, %v8312_v57 }
 0x9d9   :  { %v8510_v58 = vadd.f32 %v8446_v48, %v8382_v27  ;;  %v8456_v48 = vld [vmem:[#allocation4 + $0x148] sm:$0xff] }
 0x9da   :  { %v8509_v55 = vadd.f32 %v8445_v5, %v8381_v30  ;;  %v8455_v5 = vld [vmem:[#allocation4 + $0x140] sm:$0xff] }
 0x9db   :  { %v8574_v16 = vmax.f32 %v8510_v58, 0.0  ;;  %v7691_v43 = vld [vmem:[#allocation3 + $0x1f8] sm:$0xff] }
 0x9dc   :  { %v8573_v42 = vmax.f32 %v8509_v55, 0.0  ;;  %v7690_v2 = vld [vmem:[#allocation3 + $0x1f0] sm:$0xff] }
 0x9dd   :  { %8638 = vst.msk [vmem:[#allocation13 + $0xf8] sm:$0xff] %vm85_vm0, %v8574_v16  ;;  %9171 = vmatprep.mubr.msk.f32.mxu1 %vm3580_vm12, %v7690_v2 }
 0x9de   :  { %8637 = vst.msk [vmem:[#allocation13 + $0xf0] sm:$0xff] %vm85_vm0, %v8573_v42  ;;  %9172 = vmatmul.mubr.msk.f32.gmra.mrb[62].mxu1 %vm3580_vm12, %v7691_v43 }
 0x9e0   :  { %v9128_v49 = vpop.f32.mrb[32].mxu1 }
 0x9e1   :  { %v8315_v8 = vmul.f32 %v12949_v23, %v9128_v49  ;;  %v8118_v32 = vpop.f32.mrb[33].mxu1 }
 0x9e2   :  { %v8314_v7 = vmul.f32 %v12949_v23, %v8118_v32 }
 0x9e3   :  { %v8384_v51 = vadd.f32 %v12960_v47, %v8315_v8  ;;  %v8458_v8 = vld [vmem:[#allocation4 + $0x158] sm:$0xff] }
 0x9e4   :  { %v8383_v53 = vadd.f32 %v12960_v47, %v8314_v7  ;;  %v8457_v7 = vld [vmem:[#allocation4 + $0x150] sm:$0xff] }
 0x9e5   :  { %v8512_v29 = vadd.f32 %v8448_v6, %v8384_v51 }
 0x9e6   :  { %v8511_v39 = vadd.f32 %v8447_v9, %v8383_v53 }
 0x9e7   :  { %v8576_v14 = vmax.f32 %v8512_v29, 0.0 }
 0x9e8   :  { %v8575_v12 = vmax.f32 %v8511_v39, 0.0 }
 0x9e9   :  { %8640 = vst.msk [vmem:[#allocation13 + $0x108] sm:$0xff] %vm85_vm0, %v8576_v14 }
 0x9ea   :  { %8639 = vst.msk [vmem:[#allocation13 + $0x100] sm:$0xff] %vm85_vm0, %v8575_v12 }
 0x9ec   :  { %v9131_v41 = vpop.f32.mrb[34].mxu1 }
 0x9ed   :  { %v8317_v17 = vmul.f32 %v12949_v23, %v9131_v41  ;;  %v8128_v45 = vpop.f32.mrb[35].mxu1 }
 0x9ee   :  { %v8316_v11 = vmul.f32 %v12949_v23, %v8128_v45 }
 0x9ef   :  { %v8386_v36 = vadd.f32 %v12960_v47, %v8317_v17  ;;  %v8460_v17 = vld [vmem:[#allocation4 + $0x168] sm:$0xff] }
 0x9f0   :  { %v8385_v46 = vadd.f32 %v12960_v47, %v8316_v11  ;;  %v8459_v11 = vld [vmem:[#allocation4 + $0x160] sm:$0xff] }
 0x9f1   :  { %v8514_v38 = vadd.f32 %v8450_v37, %v8386_v36 }
 0x9f2   :  { %v8513_v40 = vadd.f32 %v8449_v13, %v8385_v46 }
 0x9f3   :  { %v8578_v25 = vmax.f32 %v8514_v38, 0.0 }
 0x9f4   :  { %v8577_v18 = vmax.f32 %v8513_v40, 0.0 }
 0x9f5   :  { %8642 = vst.msk [vmem:[#allocation13 + $0x118] sm:$0xff] %vm85_vm0, %v8578_v25 }
 0x9f6   :  { %8641 = vst.msk [vmem:[#allocation13 + $0x110] sm:$0xff] %vm85_vm0, %v8577_v18 }
 0x9f8   :  { %v9134_v19 = vpop.f32.mrb[36].mxu1 }
 0x9f9   :  { %v8319_v44 = vmul.f32 %v12949_v23, %v9134_v19  ;;  %v8138_v10 = vpop.f32.mrb[37].mxu1 }
 0x9fa   :  { %v8318_v0 = vmul.f32 %v12949_v23, %v8138_v10 }
 0x9fb   :  { %v8388_v4 = vadd.f32 %v12960_v47, %v8319_v44  ;;  %v8462_v44 = vld [vmem:[#allocation4 + $0x178] sm:$0xff] }
 0x9fc   :  { %v8387_v15 = vadd.f32 %v12960_v47, %v8318_v0  ;;  %v8461_v0 = vld [vmem:[#allocation4 + $0x170] sm:$0xff] }
 0x9fd   :  { %v8516_v50 = vadd.f32 %v8452_v21, %v8388_v4 }
 0x9fe   :  { %v8515_v3 = vadd.f32 %v8451_v60, %v8387_v15 }
 0x9ff   :  { %v8580_v61 = vmax.f32 %v8516_v50, 0.0 }
 0xa00   :  { %v8579_v22 = vmax.f32 %v8515_v3, 0.0 }
 0xa01   :  { %8644 = vst.msk [vmem:[#allocation13 + $0x128] sm:$0xff] %vm85_vm0, %v8580_v61 }
 0xa02   :  { %8643 = vst.msk [vmem:[#allocation13 + $0x120] sm:$0xff] %vm85_vm0, %v8579_v22 }
 0xa05   :  { %v9137_v54 = vpop.f32.mrb[38].mxu1 }
 0xa06   :  { %v8321_v62 = vmul.f32 %v12949_v23, %v9137_v54  ;;  %v8148_v34 = vpop.f32.mrb[39].mxu1 }
 0xa07   :  { %v8320_v56 = vmul.f32 %v12949_v23, %v8148_v34 }
 0xa08   :  { %v8390_v33 = vadd.f32 %v12960_v47, %v8321_v62  ;;  %v8464_v62 = vld [vmem:[#allocation4 + $0x188] sm:$0xff] }
 0xa09   :  { %v8389_v59 = vadd.f32 %v12960_v47, %v8320_v56  ;;  %v8463_v56 = vld [vmem:[#allocation4 + $0x180] sm:$0xff] }
 0xa0a   :  { %v8518_v1 = vadd.f32 %v8454_v31, %v8390_v33 }
 0xa0b   :  { %v8517_v20 = vadd.f32 %v8453_v28, %v8389_v59 }
 0xa0c   :  { %v8582_v24 = vmax.f32 %v8518_v1, 0.0 }
 0xa0d   :  { %v8581_v63 = vmax.f32 %v8517_v20, 0.0 }
 0xa0e   :  { %8646 = vst.msk [vmem:[#allocation13 + $0x138] sm:$0xff] %vm85_vm0, %v8582_v24 }
 0xa0f   :  { %8645 = vst.msk [vmem:[#allocation13 + $0x130] sm:$0xff] %vm85_vm0, %v8581_v63 }
 0xa11   :  { %v9140_v35 = vpop.f32.mrb[40].mxu1 }
 0xa12   :  { %v8323_v52 = vmul.f32 %v12949_v23, %v9140_v35  ;;  %v8158_v26 = vpop.f32.mrb[41].mxu1 }
 0xa13   :  { %v8322_v57 = vmul.f32 %v12949_v23, %v8158_v26 }
 0xa14   :  { %v8392_v27 = vadd.f32 %v12960_v47, %v8323_v52  ;;  %v8466_v52 = vld [vmem:[#allocation4 + $0x198] sm:$0xff] }
 0xa15   :  { %v8391_v30 = vadd.f32 %v12960_v47, %v8322_v57  ;;  %v8465_v57 = vld [vmem:[#allocation4 + $0x190] sm:$0xff] }
 0xa16   :  { %v8520_v58 = vadd.f32 %v8456_v48, %v8392_v27 }
 0xa17   :  { %v8519_v55 = vadd.f32 %v8455_v5, %v8391_v30 }
 0xa18   :  { %v8584_v16 = vmax.f32 %v8520_v58, 0.0 }
 0xa19   :  { %v8583_v43 = vmax.f32 %v8519_v55, 0.0 }
 0xa1a   :  { %8648 = vst.msk [vmem:[#allocation13 + $0x148] sm:$0xff] %vm85_vm0, %v8584_v16 }
 0xa1b   :  { %8647 = vst.msk [vmem:[#allocation13 + $0x140] sm:$0xff] %vm85_vm0, %v8583_v43 }
 0xa1d   :  { %v9143_v42 = vpop.f32.mrb[42].mxu1 }
 0xa1e   :  { %v8325_v2 = vmul.f32 %v12949_v23, %v9143_v42  ;;  %v8168_v49 = vpop.f32.mrb[43].mxu1 }
 0xa1f   :  { %v8324_v32 = vmul.f32 %v12949_v23, %v8168_v49 }
 0xa20   :  { %v8394_v6 = vadd.f32 %v12960_v47, %v8325_v2  ;;  %v8468_v2 = vld [vmem:[#allocation4 + $0x1a8] sm:$0xff] }
 0xa21   :  { %v8393_v51 = vadd.f32 %v12960_v47, %v8324_v32  ;;  %v8467_v32 = vld [vmem:[#allocation4 + $0x1a0] sm:$0xff] }
 0xa22   :  { %v8522_v9 = vadd.f32 %v8458_v8, %v8394_v6 }
 0xa23   :  { %v8521_v53 = vadd.f32 %v8457_v7, %v8393_v51 }
 0xa24   :  { %v8586_v29 = vmax.f32 %v8522_v9, 0.0 }
 0xa25   :  { %v8585_v39 = vmax.f32 %v8521_v53, 0.0 }
 0xa26   :  { %8650 = vst.msk [vmem:[#allocation13 + $0x158] sm:$0xff] %vm85_vm0, %v8586_v29 }
 0xa27   :  { %8649 = vst.msk [vmem:[#allocation13 + $0x150] sm:$0xff] %vm85_vm0, %v8585_v39 }
 0xa29   :  { %v9146_v14 = vpop.f32.mrb[44].mxu1 }
 0xa2a   :  { %v8327_v12 = vmul.f32 %v12949_v23, %v9146_v14  ;;  %v8178_v41 = vpop.f32.mrb[45].mxu1 }
 0xa2b   :  { %v8326_v45 = vmul.f32 %v12949_v23, %v8178_v41 }
 0xa2c   :  { %v8396_v37 = vadd.f32 %v12960_v47, %v8327_v12  ;;  %v8470_v12 = vld [vmem:[#allocation4 + $0x1b8] sm:$0xff] }
 0xa2d   :  { %v8395_v36 = vadd.f32 %v12960_v47, %v8326_v45  ;;  %v8469_v45 = vld [vmem:[#allocation4 + $0x1b0] sm:$0xff] }
 0xa2e   :  { %v8524_v13 = vadd.f32 %v8460_v17, %v8396_v37 }
 0xa2f   :  { %v8523_v46 = vadd.f32 %v8459_v11, %v8395_v36 }
 0xa30   :  { %v8588_v38 = vmax.f32 %v8524_v13, 0.0 }
 0xa31   :  { %v8587_v40 = vmax.f32 %v8523_v46, 0.0 }
 0xa32   :  { %8652 = vst.msk [vmem:[#allocation13 + $0x168] sm:$0xff] %vm85_vm0, %v8588_v38 }
 0xa33   :  { %8651 = vst.msk [vmem:[#allocation13 + $0x160] sm:$0xff] %vm85_vm0, %v8587_v40 }
 0xa35   :  { %v9149_v25 = vpop.f32.mrb[46].mxu1 }
 0xa36   :  { %v8329_v18 = vmul.f32 %v12949_v23, %v9149_v25  ;;  %v8188_v19 = vpop.f32.mrb[47].mxu1 }
 0xa37   :  { %v8328_v10 = vmul.f32 %v12949_v23, %v8188_v19 }
 0xa38   :  { %v8398_v21 = vadd.f32 %v12960_v47, %v8329_v18  ;;  %v8472_v18 = vld [vmem:[#allocation4 + $0x1c8] sm:$0xff] }
 0xa39   :  { %v8397_v4 = vadd.f32 %v12960_v47, %v8328_v10  ;;  %v8471_v10 = vld [vmem:[#allocation4 + $0x1c0] sm:$0xff] }
 0xa3a   :  { %v8526_v60 = vadd.f32 %v8462_v44, %v8398_v21 }
 0xa3b   :  { %v8525_v15 = vadd.f32 %v8461_v0, %v8397_v4 }
 0xa3c   :  { %v8590_v50 = vmax.f32 %v8526_v60, 0.0 }
 0xa3d   :  { %v8589_v3 = vmax.f32 %v8525_v15, 0.0 }
 0xa3e   :  { %8654 = vst.msk [vmem:[#allocation13 + $0x178] sm:$0xff] %vm85_vm0, %v8590_v50 }
 0xa3f   :  { %8653 = vst.msk [vmem:[#allocation13 + $0x170] sm:$0xff] %vm85_vm0, %v8589_v3 }
 0xa44   :  { %v9152_v61 = vpop.f32.mrb[48].mxu1 }
 0xa45   :  { %v8331_v22 = vmul.f32 %v12949_v23, %v9152_v61  ;;  %v8198_v54 = vpop.f32.mrb[49].mxu1 }
 0xa46   :  { %v8330_v34 = vmul.f32 %v12949_v23, %v8198_v54 }
 0xa47   :  { %v8400_v31 = vadd.f32 %v12960_v47, %v8331_v22  ;;  %v8474_v22 = vld [vmem:[#allocation4 + $0x1d8] sm:$0xff] }
 0xa48   :  { %v8399_v33 = vadd.f32 %v12960_v47, %v8330_v34  ;;  %v8473_v34 = vld [vmem:[#allocation4 + $0x1d0] sm:$0xff] }
 0xa49   :  { %v8528_v28 = vadd.f32 %v8464_v62, %v8400_v31 }
 0xa4a   :  { %v8527_v59 = vadd.f32 %v8463_v56, %v8399_v33 }
 0xa4b   :  { %v8592_v1 = vmax.f32 %v8528_v28, 0.0 }
 0xa4c   :  { %v8591_v20 = vmax.f32 %v8527_v59, 0.0 }
 0xa4d   :  { %8656 = vst.msk [vmem:[#allocation13 + $0x188] sm:$0xff] %vm85_vm0, %v8592_v1 }
 0xa4e   :  { %8655 = vst.msk [vmem:[#allocation13 + $0x180] sm:$0xff] %vm85_vm0, %v8591_v20 }
 0xa54   :  { %v9155_v24 = vpop.f32.mrb[50].mxu1 }
 0xa55   :  { %v8333_v63 = vmul.f32 %v12949_v23, %v9155_v24  ;;  %v8208_v35 = vpop.f32.mrb[51].mxu1 }
 0xa56   :  { %v8332_v26 = vmul.f32 %v12949_v23, %v8208_v35 }
 0xa57   :  { %v8402_v48 = vadd.f32 %v12960_v47, %v8333_v63  ;;  %v8476_v63 = vld [vmem:[#allocation4 + $0x1e8] sm:$0xff] }
 0xa58   :  { %v8401_v27 = vadd.f32 %v12960_v47, %v8332_v26  ;;  %v8475_v26 = vld [vmem:[#allocation4 + $0x1e0] sm:$0xff] }
 0xa59   :  { %v8530_v5 = vadd.f32 %v8466_v52, %v8402_v48 }
 0xa5a   :  { %v8529_v30 = vadd.f32 %v8465_v57, %v8401_v27 }
 0xa5b   :  { %v8594_v58 = vmax.f32 %v8530_v5, 0.0 }
 0xa5c   :  { %v8593_v55 = vmax.f32 %v8529_v30, 0.0 }
 0xa5d   :  { %8658 = vst.msk [vmem:[#allocation13 + $0x198] sm:$0xff] %vm85_vm0, %v8594_v58 }
 0xa5e   :  { %8657 = vst.msk [vmem:[#allocation13 + $0x190] sm:$0xff] %vm85_vm0, %v8593_v55 }
 0xa65   :  { %v9158_v16 = vpop.f32.mrb[52].mxu1 }
 0xa66   :  { %v8335_v43 = vmul.f32 %v12949_v23, %v9158_v16  ;;  %v8218_v42 = vpop.f32.mrb[53].mxu1 }
 0xa67   :  { %v8334_v49 = vmul.f32 %v12949_v23, %v8218_v42 }
 0xa68   :  { %v8404_v8 = vadd.f32 %v12960_v47, %v8335_v43  ;;  %v8478_v43 = vld [vmem:[#allocation4 + $0x1f8] sm:$0xff] }
 0xa69   :  { %v8403_v6 = vadd.f32 %v12960_v47, %v8334_v49  ;;  %v8477_v49 = vld [vmem:[#allocation4 + $0x1f0] sm:$0xff] }
 0xa6a   :  { %v8532_v7 = vadd.f32 %v8468_v2, %v8404_v8 }
 0xa6b   :  { %v8531_v51 = vadd.f32 %v8467_v32, %v8403_v6 }
 0xa6c   :  { %v8596_v9 = vmax.f32 %v8532_v7, 0.0 }
 0xa6d   :  { %v8595_v53 = vmax.f32 %v8531_v51, 0.0 }
 0xa6e   :  { %8660 = vst.msk [vmem:[#allocation13 + $0x1a8] sm:$0xff] %vm85_vm0, %v8596_v9 }
 0xa6f   :  { %8659 = vst.msk [vmem:[#allocation13 + $0x1a0] sm:$0xff] %vm85_vm0, %v8595_v53 }
 0xa74   :  { %v9161_v29 = vpop.f32.mrb[54].mxu1 }
 0xa75   :  { %v8337_v39 = vmul.f32 %v12949_v23, %v9161_v29  ;;  %v8228_v14 = vpop.f32.mrb[55].mxu1 }
 0xa76   :  { %v8336_v41 = vmul.f32 %v12949_v23, %v8228_v14 }
 0xa77   :  { %v8406_v17 = vadd.f32 %v12960_v47, %v8337_v39 }
 0xa78   :  { %v8405_v37 = vadd.f32 %v12960_v47, %v8336_v41 }
 0xa79   :  { %v8534_v11 = vadd.f32 %v8470_v12, %v8406_v17 }
 0xa7a   :  { %v8533_v36 = vadd.f32 %v8469_v45, %v8405_v37 }
 0xa7b   :  { %v8598_v13 = vmax.f32 %v8534_v11, 0.0 }
 0xa7c   :  { %v8597_v46 = vmax.f32 %v8533_v36, 0.0 }
 0xa7d   :  { %8662 = vst.msk [vmem:[#allocation13 + $0x1b8] sm:$0xff] %vm85_vm0, %v8598_v13 }
 0xa7e   :  { %8661 = vst.msk [vmem:[#allocation13 + $0x1b0] sm:$0xff] %vm85_vm0, %v8597_v46 }
 0xa84   :  { %v9164_v38 = vpop.f32.mrb[56].mxu1 }
 0xa85   :  { %v8339_v40 = vmul.f32 %v12949_v23, %v9164_v38  ;;  %v8238_v25 = vpop.f32.mrb[57].mxu1 }
 0xa86   :  { %v8338_v19 = vmul.f32 %v12949_v23, %v8238_v25 }
 0xa87   :  { %v8408_v44 = vadd.f32 %v12960_v47, %v8339_v40 }
 0xa88   :  { %v8407_v21 = vadd.f32 %v12960_v47, %v8338_v19 }
 0xa89   :  { %v8536_v0 = vadd.f32 %v8472_v18, %v8408_v44 }
 0xa8a   :  { %v8535_v4 = vadd.f32 %v8471_v10, %v8407_v21 }
 0xa8b   :  { %v8600_v60 = vmax.f32 %v8536_v0, 0.0 }
 0xa8c   :  { %v8599_v15 = vmax.f32 %v8535_v4, 0.0 }
 0xa8d   :  { %8664 = vst.msk [vmem:[#allocation13 + $0x1c8] sm:$0xff] %vm85_vm0, %v8600_v60 }
 0xa8e   :  { %8663 = vst.msk [vmem:[#allocation13 + $0x1c0] sm:$0xff] %vm85_vm0, %v8599_v15 }
 0xa95   :  { %v9167_v50 = vpop.f32.mrb[58].mxu1 }
 0xa96   :  { %v8341_v3 = vmul.f32 %v12949_v23, %v9167_v50  ;;  %v8248_v61 = vpop.f32.mrb[59].mxu1 }
 0xa97   :  { %v8340_v54 = vmul.f32 %v12949_v23, %v8248_v61 }
 0xa98   :  { %v8410_v62 = vadd.f32 %v12960_v47, %v8341_v3 }
 0xa99   :  { %v8409_v31 = vadd.f32 %v12960_v47, %v8340_v54 }
 0xa9a   :  { %v8538_v56 = vadd.f32 %v8474_v22, %v8410_v62 }
 0xa9b   :  { %v8537_v33 = vadd.f32 %v8473_v34, %v8409_v31 }
 0xa9c   :  { %v8602_v28 = vmax.f32 %v8538_v56, 0.0 }
 0xa9d   :  { %v8601_v59 = vmax.f32 %v8537_v33, 0.0 }
 0xa9e   :  { %8666 = vst.msk [vmem:[#allocation13 + $0x1d8] sm:$0xff] %vm85_vm0, %v8602_v28 }
 0xa9f   :  { %8665 = vst.msk [vmem:[#allocation13 + $0x1d0] sm:$0xff] %vm85_vm0, %v8601_v59 }
 0xaa4   :  { %v9170_v1 = vpop.f32.mrb[60].mxu1 }
 0xaa5   :  { %v8343_v20 = vmul.f32 %v12949_v23, %v9170_v1  ;;  %v8258_v24 = vpop.f32.mrb[61].mxu1 }
 0xaa6   :  { %v8342_v35 = vmul.f32 %v12949_v23, %v8258_v24 }
 0xaa7   :  { %v8412_v52 = vadd.f32 %v12960_v47, %v8343_v20 }
 0xaa8   :  { %v8411_v48 = vadd.f32 %v12960_v47, %v8342_v35 }
 0xaa9   :  { %v8540_v57 = vadd.f32 %v8476_v63, %v8412_v52 }
 0xaaa   :  { %v8539_v27 = vadd.f32 %v8475_v26, %v8411_v48 }
 0xaab   :  { %v8604_v5 = vmax.f32 %v8540_v57, 0.0 }
 0xaac   :  { %v8603_v30 = vmax.f32 %v8539_v27, 0.0 }
 0xaad   :  { %8668 = vst.msk [vmem:[#allocation13 + $0x1e8] sm:$0xff] %vm85_vm0, %v8604_v5 }
 0xaae   :  { %8667 = vst.msk [vmem:[#allocation13 + $0x1e0] sm:$0xff] %vm85_vm0, %v8603_v30 }
 0xab1   :  { %v9173_v58 = vpop.f32.mrb[62].mxu1 }
 0xab2   :  { %v8345_v55 = vmul.f32 %v12949_v23, %v9173_v58  ;;  %v8268_v16 = vpop.f32.mrb[63].mxu1 }
 0xab3   :  { %v8344_v42 = vmul.f32 %v12949_v23, %v8268_v16 }
 0xab4   :  { %v8414_v2 = vadd.f32 %v12960_v47, %v8345_v55 }
 0xab5   :  { %v8413_v8 = vadd.f32 %v12960_v47, %v8344_v42 }
 0xab6   :  { %v8542_v32 = vadd.f32 %v8478_v43, %v8414_v2 }
 0xab7   :  { %v8541_v6 = vadd.f32 %v8477_v49, %v8413_v8 }
 0xab8   :  { %v8606_v7 = vmax.f32 %v8542_v32, 0.0 }
 0xab9   :  { %v8605_v51 = vmax.f32 %v8541_v6, 0.0 }
 0xaba   :  { %8670 = vst.msk [vmem:[#allocation13 + $0x1f8] sm:$0xff] %vm85_vm0, %v8606_v7 }
 0xabb   :  { %8669 = vst.msk [vmem:[#allocation13 + $0x1f0] sm:$0xff] %vm85_vm0, %v8605_v51 }
 0xabc   :  { %9331 = shalt.err (!%p9328_p2)
}
 0xabd   :  { %s9332_s14 = scalar_lea.hbm %s13076_s5, 8192 }
 0xabe   :  { %p9333_p3 = scmp.ne.s32.totalorder %s13076_s5, %s9332_s14  ;;  %p9336_p4 = scmp.lt.u32.totalorder %s9332_s14, %s13076_s5 }
 0xac0   :  { %p9338_p5 = pnand %p9336_p4, %p9333_p3 }
 0xac2   :  { %9341 = shalt.err (!%p9338_p5)
}
 0xac3   :  { %8682 = dma.vmem_to_hbm [thread:$0]  %s8677_s10, 8192, %s13076_s5, [#allocation6], %s9352_s30, %s9352_s30, %s9353_s6  }
 0xac4   :  { %9348 = dma.done.wait [#allocation6], 8192  }
 0xac5   :  { %9349 = vsyncadd [#allocation6], 4294959104 }
 0xac6   :  { %8686 = vsyncpa [#allocation5], 1 }
 0xac7   :  { %8687 = vsyncpa [#allocation8], 1 }
 0xac8   :  { %8688 = vsyncpa [#allocation11], 1 }
 0xac9   :  { %8689 = vsyncpa [#allocation6], 1 }

</bundles_post_ra>
